<compile_context>
chip_gen: v7x
topology: tpu7x:2x2x1
jax: 0.10.0
libtpu: 0.0.40
codegen_flags: <defaults>
</compile_context>

<pallas_src>
import jax
import jax.numpy as jnp
import numpy as np
from jax.experimental import pallas as pl
from jax.experimental.pallas import tpu as pltpu

IN_DIM = 3072
HID_DIM = 2048
OUT_DIM = 10
EPS = 1e-5


def _classifier_kernel(x_ref, w2_ref, gamma_ref, beta_ref, w3t_ref, o_ref):
    # fc2 tile: (B, 3072) bf16 @ (3072, tn) bf16 -> f32 accumulate on the MXU.
    # fc2 bias is omitted: training-mode BatchNorm subtracts the batch mean,
    # which cancels a per-feature constant bias exactly.
    h = jnp.dot(x_ref[...], w2_ref[...], preferred_element_type=jnp.float32)

    # BatchNorm1d (training mode): per-feature batch mean / biased variance,
    # affine fused into one scale/shift, then ReLU.
    mean = jnp.mean(h, axis=0, keepdims=True)
    var = jnp.mean((h - mean) * (h - mean), axis=0, keepdims=True)
    scale = gamma_ref[...] * jax.lax.rsqrt(var + EPS)
    shift = beta_ref[...] - mean * scale
    a = jnp.maximum(h * scale + shift, 0.0).astype(jnp.bfloat16)

    # fc3 partial for this hidden tile: contract (B, tn) with (10, tn) along
    # tn (W3 is pre-transposed), bf16 x bf16 -> f32.
    o_ref[...] = jax.lax.dot_general(
        a, w3t_ref[...],
        dimension_numbers=(((1,), (1,)), ((), ())),
        preferred_element_type=jnp.float32)


def _make_call(B, n_tiles, tn, semantics):
    return pl.pallas_call(
        _classifier_kernel,
        out_shape=jax.ShapeDtypeStruct((n_tiles, B, OUT_DIM), jnp.float32),
        grid=(n_tiles,),
        in_specs=[
            pl.BlockSpec((B, IN_DIM), lambda j: (0, 0)),            # x (resident)
            pl.BlockSpec((None, IN_DIM, tn), lambda j: (j, 0, 0)),  # W2 tile (contiguous 6 MiB)
            pl.BlockSpec((1, tn), lambda j: (0, j)),                # gamma tile (4 KiB)
            pl.BlockSpec((1, tn), lambda j: (0, j)),                # beta tile  (4 KiB)
            pl.BlockSpec((OUT_DIM, tn), lambda j: (0, j)),          # W3^T tile (bf16, lane-dense)
        ],
        out_specs=pl.BlockSpec((None, B, OUT_DIM), lambda j: (j, 0, 0)),
        compiler_params=pltpu.CompilerParams(
            dimension_semantics=(semantics,),
            vmem_limit_bytes=32 * 1024 * 1024,
        ),
    )


_CORE_SPLIT_OK = None  # None = untried, True / False after first attempt


def classifier_forward(x, w2, b2, gamma, beta, w3, b3, *, tn=1024):
    """Forward pass of Classifier (training-mode BN).  Weight layouts:
       w2: (3072, 2048), w3: (2048, 10)  (i.e. already transposed vs PyTorch)."""
    global _CORE_SPLIT_OK
    B = x.shape[0]
    assert x.shape == (B, IN_DIM)
    assert HID_DIM % tn == 0 and tn % 128 == 0
    n_tiles = HID_DIM // tn

    del b2  # cancelled exactly by training-mode BatchNorm mean subtraction

    # bf16 cast of the big operands; f32 accumulation happens inside the kernel.
    x_bf16 = x.astype(jnp.bfloat16)
    # Tile-major, contiguous W2 tiles: (n_tiles, IN_DIM, tn).
    w2_tiled = (w2.astype(jnp.bfloat16)
                  .reshape(IN_DIM, n_tiles, tn)
                  .transpose(1, 0, 2))
    gamma_2d = gamma.reshape(1, HID_DIM).astype(jnp.float32)
    beta_2d = beta.reshape(1, HID_DIM).astype(jnp.float32)
    w3t_bf16 = jnp.transpose(w3).astype(jnp.bfloat16)       # (10, 2048), one 40 KiB slab

    args = (x_bf16, w2_tiled, gamma_2d, beta_2d, w3t_bf16)

    partials = None
    if _CORE_SPLIT_OK is not False:
        try:
            # v7x: shard the two W2 tiles across the two TensorCores (each
            # output block is written by exactly one grid step, so this is
            # race-free).  Falls back below if unsupported on this chip.
            partials = jax.block_until_ready(
                _make_call(B, n_tiles, tn, pltpu.CORE_PARALLEL)(*args))
            _CORE_SPLIT_OK = True
        except Exception:
            _CORE_SPLIT_OK = False
    if partials is None:
        partials = _make_call(B, n_tiles, tn, "parallel")(*args)

    out = partials.sum(axis=0) + b3.reshape(1, OUT_DIM)
    return out.astype(x.dtype)


def _reference_forward(x, w2, b2, gamma, beta, w3, b3):
    # Reference with matching bf16 matmul inputs (f32 accumulation).
    h = jnp.dot(x.astype(jnp.bfloat16), w2.astype(jnp.bfloat16),
                preferred_element_type=jnp.float32) + b2
    mean = jnp.mean(h, axis=0, keepdims=True)
    var = jnp.mean((h - mean) ** 2, axis=0, keepdims=True)
    h = (h - mean) * jax.lax.rsqrt(var + EPS)
    h = jnp.maximum(h * gamma + beta, 0.0)
    return jnp.dot(h.astype(jnp.bfloat16), w3.astype(jnp.bfloat16),
                   preferred_element_type=jnp.float32) + b3


if __name__ == "__main__":
    key = jax.random.PRNGKey(0)
    kx, kw2, kb2, kg, kbt, kw3, kb3 = jax.random.split(key, 7)

    B = 8
    x = jax.random.normal(kx, (B, IN_DIM), dtype=jnp.float32)

    # Deterministic synthetic parameters (shapes from Classifier.__init__).
    w2 = jax.random.normal(kw2, (IN_DIM, HID_DIM), dtype=jnp.float32) * 0.02
    b2 = jax.random.normal(kb2, (HID_DIM,), dtype=jnp.float32) * 0.02
    gamma = 1.0 + 0.1 * jax.random.normal(kg, (HID_DIM,), dtype=jnp.float32)
    beta = 0.1 * jax.random.normal(kbt, (HID_DIM,), dtype=jnp.float32)
    w3 = jax.random.normal(kw3, (HID_DIM, OUT_DIM), dtype=jnp.float32) * 0.02
    b3 = jax.random.normal(kb3, (OUT_DIM,), dtype=jnp.float32) * 0.02

    out = classifier_forward(x, w2, b2, gamma, beta, w3, b3)
    out = jax.block_until_ready(out)

    ref = _reference_forward(x, w2, b2, gamma, beta, w3, b3)
    np.testing.assert_allclose(np.asarray(out), np.asarray(ref),
                               rtol=2e-3, atol=2e-3)
    print("KERNEL_OK")
</pallas_src>

<mosaic_0001>
module attributes {stable_mosaic.version = 11 : i64} {
  func.func @_classifier_kernel(%arg0: i32, %arg1: memref<8x3072xbf16, #tpu.memory_space<vmem>>, %arg2: memref<1x3072x1024xbf16, #tpu.memory_space<vmem>>, %arg3: memref<1x1024xf32, #tpu.memory_space<vmem>>, %arg4: memref<1x1024xf32, #tpu.memory_space<vmem>>, %arg5: memref<10x1024xbf16, #tpu.memory_space<vmem>>, %arg6: memref<1x8x10xf32, #tpu.memory_space<vmem>>) attributes {dimension_semantics = [#tpu.dimension_semantics<core_parallel>], iteration_bounds = array<i64: 2>, scalar_prefetch = 0 : i64, scratch_operands = 0 : i64, tpu.core_type = #tpu.core_type<tc>, window_params = [{pipeline_mode = #tpu.pipeline_mode<synchronous>, transform_indices = @transform_0, window_bounds = array<i64: 8, 3072>}, {transform_indices = @transform_1, window_bounds = array<i64: 1, 3072, 1024>}, {transform_indices = @transform_2, window_bounds = array<i64: 1, 1024>}, {transform_indices = @transform_3, window_bounds = array<i64: 1, 1024>}, {transform_indices = @transform_4, window_bounds = array<i64: 10, 1024>}, {transform_indices = @transform_5, window_bounds = array<i64: 1, 8, 10>}]} {
    %c0 = arith.constant 0 : index
    %c0_0 = arith.constant 0 : index
    %0 = vector.load %arg1[%c0, %c0_0] : memref<8x3072xbf16, #tpu.memory_space<vmem>>, vector<8x3072xbf16>
    %c0_1 = arith.constant 0 : index
    %c0_2 = arith.constant 0 : index
    %c0_3 = arith.constant 0 : index
    %1 = vector.load %arg2[%c0_1, %c0_2, %c0_3] : memref<1x3072x1024xbf16, #tpu.memory_space<vmem>>, vector<1x3072x1024xbf16>
    %2 = vector.shape_cast %1 : vector<1x3072x1024xbf16> to vector<3072x1024xbf16>
    %cst = arith.constant dense<0.000000e+00> : vector<8x1024xf32>
    %3 = tpu.matmul %0, %2, %cst {dimension_numbers = #tpu.dot_dimension_numbers<[1], [0], [0], [1], [0, 0, 1, 1], [], []>} : vector<8x3072xbf16>, vector<3072x1024xbf16>, vector<8x1024xf32> -> vector<8x1024xf32>
    %cst_4 = arith.constant dense<0.000000e+00> : vector<1024xf32>
    %4 = vector.multi_reduction <add>, %3, %cst_4 [0] : vector<8x1024xf32> to vector<1024xf32>
    %5 = vector.shape_cast %4 : vector<1024xf32> to vector<1x1024xf32>
    %cst_5 = arith.constant 8.000000e+00 : f32
    %6 = vector.broadcast %cst_5 : f32 to vector<1x1024xf32>
    %7 = arith.divf %5, %6 : vector<1x1024xf32>
    %8 = vector.broadcast %7 : vector<1x1024xf32> to vector<8x1024xf32>
    %9 = arith.subf %3, %8 : vector<8x1024xf32>
    %10 = vector.broadcast %7 : vector<1x1024xf32> to vector<8x1024xf32>
    %11 = arith.subf %3, %10 : vector<8x1024xf32>
    %12 = arith.mulf %9, %11 : vector<8x1024xf32>
    %cst_6 = arith.constant dense<0.000000e+00> : vector<1024xf32>
    %13 = vector.multi_reduction <add>, %12, %cst_6 [0] : vector<8x1024xf32> to vector<1024xf32>
    %14 = vector.shape_cast %13 : vector<1024xf32> to vector<1x1024xf32>
    %cst_7 = arith.constant 8.000000e+00 : f32
    %15 = vector.broadcast %cst_7 : f32 to vector<1x1024xf32>
    %16 = arith.divf %14, %15 : vector<1x1024xf32>
    %c0_8 = arith.constant 0 : index
    %c0_9 = arith.constant 0 : index
    %17 = vector.load %arg3[%c0_8, %c0_9] : memref<1x1024xf32, #tpu.memory_space<vmem>>, vector<1x1024xf32>
    %cst_10 = arith.constant 9.99999974E-6 : f32
    %18 = vector.broadcast %cst_10 : f32 to vector<1x1024xf32>
    %19 = arith.addf %16, %18 : vector<1x1024xf32>
    %20 = math.rsqrt %19 : vector<1x1024xf32>
    %21 = arith.mulf %17, %20 : vector<1x1024xf32>
    %c0_11 = arith.constant 0 : index
    %c0_12 = arith.constant 0 : index
    %22 = vector.load %arg4[%c0_11, %c0_12] : memref<1x1024xf32, #tpu.memory_space<vmem>>, vector<1x1024xf32>
    %23 = arith.mulf %7, %21 : vector<1x1024xf32>
    %24 = arith.subf %22, %23 : vector<1x1024xf32>
    %25 = vector.broadcast %21 : vector<1x1024xf32> to vector<8x1024xf32>
    %26 = arith.mulf %3, %25 : vector<8x1024xf32>
    %27 = vector.broadcast %24 : vector<1x1024xf32> to vector<8x1024xf32>
    %28 = arith.addf %26, %27 : vector<8x1024xf32>
    %cst_13 = arith.constant 0.000000e+00 : f32
    %29 = vector.broadcast %cst_13 : f32 to vector<8x1024xf32>
    %30 = arith.maximumf %28, %29 : vector<8x1024xf32>
    %31 = arith.truncf %30 : vector<8x1024xf32> to vector<8x1024xbf16>
    %c0_14 = arith.constant 0 : index
    %c0_15 = arith.constant 0 : index
    %32 = vector.load %arg5[%c0_14, %c0_15] : memref<10x1024xbf16, #tpu.memory_space<vmem>>, vector<10x1024xbf16>
    %cst_16 = arith.constant dense<0.000000e+00> : vector<8x10xf32>
    %33 = tpu.matmul %31, %32, %cst_16 {dimension_numbers = #tpu.dot_dimension_numbers<[1], [1], [0], [0], [0, 0, 1, 0], [], []>} : vector<8x1024xbf16>, vector<10x1024xbf16>, vector<8x10xf32> -> vector<8x10xf32>
    %c0_17 = arith.constant 0 : index
    %c0_18 = arith.constant 0 : index
    %c0_19 = arith.constant 0 : index
    %34 = vector.load %arg6[%c0_17, %c0_18, %c0_19] : memref<1x8x10xf32, #tpu.memory_space<vmem>>, vector<1x8x10xf32>
    %35 = vector.shape_cast %34 : vector<1x8x10xf32> to vector<8x10xf32>
    %36 = vector.shape_cast %33 : vector<8x10xf32> to vector<1x8x10xf32>
    tpu.vector_store %arg6[%c0_17, %c0_18, %c0_19], %36 {strides = array<i32>} : memref<1x8x10xf32, #tpu.memory_space<vmem>>, vector<1x8x10xf32>,
    return
  }
  func.func @transform_0(%arg0: i32) -> (i32, i32) {
    %c0_i32 = arith.constant 0 : i32
    %c0_i32_0 = arith.constant 0 : i32
    %c0_i32_1 = arith.constant 0 : i32
    return %c0_i32, %c0_i32_0 : i32, i32
  }
  func.func @transform_1(%arg0: i32) -> (i32, i32, i32) {
    %c0_i32 = arith.constant 0 : i32
    %c0_i32_0 = arith.constant 0 : i32
    %c0_i32_1 = arith.constant 0 : i32
    return %arg0, %c0_i32, %c0_i32_0 : i32, i32, i32
  }
  func.func @transform_2(%arg0: i32) -> (i32, i32) {
    %c0_i32 = arith.constant 0 : i32
    %c0_i32_0 = arith.constant 0 : i32
    return %c0_i32, %arg0 : i32, i32
  }
  func.func @transform_3(%arg0: i32) -> (i32, i32) {
    %c0_i32 = arith.constant 0 : i32
    %c0_i32_0 = arith.constant 0 : i32
    return %c0_i32, %arg0 : i32, i32
  }
  func.func @transform_4(%arg0: i32) -> (i32, i32) {
    %c0_i32 = arith.constant 0 : i32
    %c0_i32_0 = arith.constant 0 : i32
    return %c0_i32, %arg0 : i32, i32
  }
  func.func @transform_5(%arg0: i32) -> (i32, i32, i32) {
    %c0_i32 = arith.constant 0 : i32
    %c0_i32_0 = arith.constant 0 : i32
    %c0_i32_1 = arith.constant 0 : i32
    return %arg0, %c0_i32, %c0_i32_0 : i32, i32, i32
  }
}

module attributes {stable_mosaic.version = 11 : i64} {
  func.func @_classifier_kernel(%arg0: i32, %arg1: memref<8x3072xbf16, #tpu.memory_space<vmem>>, %arg2: memref<1x3072x1024xbf16, #tpu.memory_space<vmem>>, %arg3: memref<1x1024xf32, #tpu.memory_space<vmem>>, %arg4: memref<1x1024xf32, #tpu.memory_space<vmem>>, %arg5: memref<10x1024xbf16, #tpu.memory_space<vmem>>, %arg6: memref<1x8x10xf32, #tpu.memory_space<vmem>>) attributes {dimension_semantics = [#tpu.dimension_semantics<parallel>], iteration_bounds = array<i64: 2>, scalar_prefetch = 0 : i64, scratch_operands = 0 : i64, tpu.core_type = #tpu.core_type<tc>, window_params = [{pipeline_mode = #tpu.pipeline_mode<synchronous>, transform_indices = @transform_0, window_bounds = array<i64: 8, 3072>}, {transform_indices = @transform_1, window_bounds = array<i64: 1, 3072, 1024>}, {transform_indices = @transform_2, window_bounds = array<i64: 1, 1024>}, {transform_indices = @transform_3, window_bounds = array<i64: 1, 1024>}, {transform_indices = @transform_4, window_bounds = array<i64: 10, 1024>}, {transform_indices = @transform_5, window_bounds = array<i64: 1, 8, 10>}]} {
    %c0 = arith.constant 0 : index
    %c0_0 = arith.constant 0 : index
    %0 = vector.load %arg1[%c0, %c0_0] : memref<8x3072xbf16, #tpu.memory_space<vmem>>, vector<8x3072xbf16>
    %c0_1 = arith.constant 0 : index
    %c0_2 = arith.constant 0 : index
    %c0_3 = arith.constant 0 : index
    %1 = vector.load %arg2[%c0_1, %c0_2, %c0_3] : memref<1x3072x1024xbf16, #tpu.memory_space<vmem>>, vector<1x3072x1024xbf16>
    %2 = vector.shape_cast %1 : vector<1x3072x1024xbf16> to vector<3072x1024xbf16>
    %cst = arith.constant dense<0.000000e+00> : vector<8x1024xf32>
    %3 = tpu.matmul %0, %2, %cst {dimension_numbers = #tpu.dot_dimension_numbers<[1], [0], [0], [1], [0, 0, 1, 1], [], []>} : vector<8x3072xbf16>, vector<3072x1024xbf16>, vector<8x1024xf32> -> vector<8x1024xf32>
    %cst_4 = arith.constant dense<0.000000e+00> : vector<1024xf32>
    %4 = vector.multi_reduction <add>, %3, %cst_4 [0] : vector<8x1024xf32> to vector<1024xf32>
    %5 = vector.shape_cast %4 : vector<1024xf32> to vector<1x1024xf32>
    %cst_5 = arith.constant 8.000000e+00 : f32
    %6 = vector.broadcast %cst_5 : f32 to vector<1x1024xf32>
    %7 = arith.divf %5, %6 : vector<1x1024xf32>
    %8 = vector.broadcast %7 : vector<1x1024xf32> to vector<8x1024xf32>
    %9 = arith.subf %3, %8 : vector<8x1024xf32>
    %10 = vector.broadcast %7 : vector<1x1024xf32> to vector<8x1024xf32>
    %11 = arith.subf %3, %10 : vector<8x1024xf32>
    %12 = arith.mulf %9, %11 : vector<8x1024xf32>
    %cst_6 = arith.constant dense<0.000000e+00> : vector<1024xf32>
    %13 = vector.multi_reduction <add>, %12, %cst_6 [0] : vector<8x1024xf32> to vector<1024xf32>
    %14 = vector.shape_cast %13 : vector<1024xf32> to vector<1x1024xf32>
    %cst_7 = arith.constant 8.000000e+00 : f32
    %15 = vector.broadcast %cst_7 : f32 to vector<1x1024xf32>
    %16 = arith.divf %14, %15 : vector<1x1024xf32>
    %c0_8 = arith.constant 0 : index
    %c0_9 = arith.constant 0 : index
    %17 = vector.load %arg3[%c0_8, %c0_9] : memref<1x1024xf32, #tpu.memory_space<vmem>>, vector<1x1024xf32>
    %cst_10 = arith.constant 9.99999974E-6 : f32
    %18 = vector.broadcast %cst_10 : f32 to vector<1x1024xf32>
    %19 = arith.addf %16, %18 : vector<1x1024xf32>
    %20 = math.rsqrt %19 : vector<1x1024xf32>
    %21 = arith.mulf %17, %20 : vector<1x1024xf32>
    %c0_11 = arith.constant 0 : index
    %c0_12 = arith.constant 0 : index
    %22 = vector.load %arg4[%c0_11, %c0_12] : memref<1x1024xf32, #tpu.memory_space<vmem>>, vector<1x1024xf32>
    %23 = arith.mulf %7, %21 : vector<1x1024xf32>
    %24 = arith.subf %22, %23 : vector<1x1024xf32>
    %25 = vector.broadcast %21 : vector<1x1024xf32> to vector<8x1024xf32>
    %26 = arith.mulf %3, %25 : vector<8x1024xf32>
    %27 = vector.broadcast %24 : vector<1x1024xf32> to vector<8x1024xf32>
    %28 = arith.addf %26, %27 : vector<8x1024xf32>
    %cst_13 = arith.constant 0.000000e+00 : f32
    %29 = vector.broadcast %cst_13 : f32 to vector<8x1024xf32>
    %30 = arith.maximumf %28, %29 : vector<8x1024xf32>
    %31 = arith.truncf %30 : vector<8x1024xf32> to vector<8x1024xbf16>
    %c0_14 = arith.constant 0 : index
    %c0_15 = arith.constant 0 : index
    %32 = vector.load %arg5[%c0_14, %c0_15] : memref<10x1024xbf16, #tpu.memory_space<vmem>>, vector<10x1024xbf16>
    %cst_16 = arith.constant dense<0.000000e+00> : vector<8x10xf32>
    %33 = tpu.matmul %31, %32, %cst_16 {dimension_numbers = #tpu.dot_dimension_numbers<[1], [1], [0], [0], [0, 0, 1, 0], [], []>} : vector<8x1024xbf16>, vector<10x1024xbf16>, vector<8x10xf32> -> vector<8x10xf32>
    %c0_17 = arith.constant 0 : index
    %c0_18 = arith.constant 0 : index
    %c0_19 = arith.constant 0 : index
    %34 = vector.load %arg6[%c0_17, %c0_18, %c0_19] : memref<1x8x10xf32, #tpu.memory_space<vmem>>, vector<1x8x10xf32>
    %35 = vector.shape_cast %34 : vector<1x8x10xf32> to vector<8x10xf32>
    %36 = vector.shape_cast %33 : vector<8x10xf32> to vector<1x8x10xf32>
    tpu.vector_store %arg6[%c0_17, %c0_18, %c0_19], %36 {strides = array<i32>} : memref<1x8x10xf32, #tpu.memory_space<vmem>>, vector<1x8x10xf32>,
    return
  }
  func.func @transform_0(%arg0: i32) -> (i32, i32) {
    %c0_i32 = arith.constant 0 : i32
    %c0_i32_0 = arith.constant 0 : i32
    %c0_i32_1 = arith.constant 0 : i32
    return %c0_i32, %c0_i32_0 : i32, i32
  }
  func.func @transform_1(%arg0: i32) -> (i32, i32, i32) {
    %c0_i32 = arith.constant 0 : i32
    %c0_i32_0 = arith.constant 0 : i32
    %c0_i32_1 = arith.constant 0 : i32
    return %arg0, %c0_i32, %c0_i32_0 : i32, i32, i32
  }
  func.func @transform_2(%arg0: i32) -> (i32, i32) {
    %c0_i32 = arith.constant 0 : i32
    %c0_i32_0 = arith.constant 0 : i32
    return %c0_i32, %arg0 : i32, i32
  }
  func.func @transform_3(%arg0: i32) -> (i32, i32) {
    %c0_i32 = arith.constant 0 : i32
    %c0_i32_0 = arith.constant 0 : i32
    return %c0_i32, %arg0 : i32, i32
  }
  func.func @transform_4(%arg0: i32) -> (i32, i32) {
    %c0_i32 = arith.constant 0 : i32
    %c0_i32_0 = arith.constant 0 : i32
    return %c0_i32, %arg0 : i32, i32
  }
  func.func @transform_5(%arg0: i32) -> (i32, i32, i32) {
    %c0_i32 = arith.constant 0 : i32
    %c0_i32_0 = arith.constant 0 : i32
    %c0_i32_1 = arith.constant 0 : i32
    return %arg0, %c0_i32, %c0_i32_0 : i32, i32, i32
  }
}

</mosaic_0001>

<bundles_post_ra>
// kernel: tpu_custom_call.1
= control target key start
LH: loop header
LB: loop body
LE: loop exit
PB: predicated region body
PF: predicated region fallthrough
CT: control target
= control target key end

     0   :  { %s16780_s0 = inlined_call_operand.hbm [shape: bf16[8,3072], index: 0, kind: input, shape index: {}]   ;;  %s16781_s1 = inlined_call_operand.hbm [shape: bf16[2,3072,1024], index: 1, kind: input, shape index: {}]   ;;  %s16782_s2 = inlined_call_operand.hbm [shape: f32[1,2048], index: 2, kind: input, shape index: {}]   ;;  %s16783_s3 = inlined_call_operand.hbm [shape: f32[1,2048], index: 3, kind: input, shape index: {}]   ;;  %s16784_s4 = inlined_call_operand.hbm [shape: bf16[10,2048], index: 4, kind: input, shape index: {}]   ;;  %s16785_s5 = inlined_call_operand.hbm [shape: f32[2,8,10], index: 5, kind: output, shape index: {}]  }
   0x1   :  { %16800 = sst [smem:[#allocation18_spill]] %s16781_s1 }
   0x2   :  { %16801 = sst [smem:[#allocation19_spill]] %s16783_s3 }
   0x3   :  { %10 = vsyncpa [#allocation3], 0 }
   0x4   :  { %11 = vsyncpa [#allocation6], 0 }
   0x5   :  { %13 = vsyncpa [#allocation6 + $0x1], 0 }
   0x6   :  { %14 = vsyncpa [#allocation9], 0 }
   0x7   :  { %16 = vsyncpa [#allocation9 + $0x1], 0 }
   0x8   :  { %17 = vsyncpa [#allocation4], 0 }
   0x9   :  { %19 = vsyncpa [#allocation4 + $0x1], 0  ;;  %s14569_s18 = smov 0   ;;  %s14571_s19 = smov 0  }
   0xa   :  { %s14573_s20 = smov 0   ;;  %s14575_s21 = smov 0  }
   0xb LB: > { %16802 = sst [smem:[#allocation16_spill]] %s14523_s20  ;;  %s14590_s22 = sadd.s32 1, %s14527_s21   ;;  %s14527_s21 = sphi %s14575_s21, %s16835_s21   ;;  %s14523_s20 = sphi %s14573_s20, %s16832_s20   ;;  %s14519_s19 = sphi %s14571_s19, %s16834_s19   ;;  %s14515_s18 = sphi %s14569_s18, %s16833_s18  }
   0xc   : > { %s53_s23 = sadd.s32 1, %s14523_s20  ;;  %s50_s24 = ssub.s32 %s14527_s21, %s14590_s22 }
   0xd   : > { %p16786_p0 = scmp.ne.s32.totalorder %s14523_s20, %s14519_s19  ;;  %p51_p1 = scmp.eq.s32.totalorder %s50_s24, 0 }
   0xe   : > { %p61_p2 = scmp.eq.s32.totalorder %s14527_s21, 0  ;;  %p14225_p4 = scmp.lt.s32.totalorder %s14527_s21, 2 }
   0xf   : > { %s14601_s25 = scalar_select %p51_p1, %s14523_s20, %s53_s23  }
  0x10   : > { %p62_p5 = por %p61_p2, %p16786_p0  ;;  %s16787_s26 = sand.u32 1, %s14527_s21  }
  0x11   : > { %16803 = sst [smem:[#allocation17_spill]] %s14601_s25  ;;  %s14608_s27 = sand.u32 1, %s14523_s20  }
  0x12   : > { %s14186_s28 = smul.u32 12288, %s14608_s27  ;;  %p14611_p6 = pnand %p14225_p4, %p62_p5 }
  0x13   : > { %s14187_s30 = smul.u32 196608, %s14527_s21  ;;  %s16805_s1 = sld [smem:[#allocation18_spill]] }
  0x14   : > { %s16804_s29 = scalar_select %p14611_p6, 1, 0 }
  0x15   : > { %s209_s9 = scalar_lea.vmem [#allocation5], %s14186_s28  ;;  %s14625_s11 = scalar_lea.sflag [#allocation6], %s16787_s26 }
  0x16   : > { %s216_s10 = sshll.u32 %s209_s9, 4  ;;  %p14631_p8 = pneg %p14611_p6  ;;  %s14621_s10 = int_to_ptr.vmem [resolvable:$true] %s216_s10 }
  0x18   : > { %s16806_s13 = scalar_select %p14631_p8, 1, 0 }
  0x19   : > { %s14619_s8 = scalar_lea.hbm %s16805_s1, %s14187_s30  ;;  %s14310_s16 = scalar_lea.hbm %s16805_s1, 393216 }
  0x1a   : > { %s14305_s12 = scalar_lea.hbm %s14619_s8, 196608  ;;  %p14311_p11 = scmp.lt.u32.totalorder %s14619_s8, %s16805_s1 }
  0x1b   : > { %p14306_p7 = scmp.ne.s32.totalorder %s14619_s8, %s14305_s12  ;;  %p14312_p12 = scmp.lt.u32.totalorder %s14310_s16, %s14305_s12 }
  0x1c   : > { %p14314_p1 = scmp.lt.u32.totalorder %s14305_s12, %s14619_s8 }
  0x1d   : > { %p14308_p9 = pnand %p14631_p8, %p14306_p7  ;;  %p14313_p13 = por %p14312_p12, %p14311_p11 }
  0x1f   : > { %p14309_p10 = pneg %p14308_p9  ;;  %p14315_p2 = por %p14314_p1, %p14313_p13 }
  0x21   : > { %p14316_p4 = pnand %p14315_p2, %p14309_p10 }
  0x23   : > { %14319 = shalt.err (!%p14316_p4)
}
  0x24   : > { %s14320_s24 = scalar_lea.vmem %s14621_s10, 196608  ;;  %s14529_s28 = smov [#allocation5]  }
  0x25   : > { %p14321_p5 = scmp.ne.s32.totalorder %s14621_s10, %s14320_s24  ;;  %s14325_s30 = sshll.u32 %s14529_s28, 4  ;;  %s14326_s30 = int_to_ptr.vmem [resolvable:$false] %s14325_s30 }
  0x26   : > { %s14327_s6 = scalar_lea.vmem %s14326_s30, 393216  ;;  %p14328_p3 = scmp.lt.s32.totalorder %s14621_s10, %s14326_s30 }
  0x27   : > { %p14323_p7 = pnand %p14321_p5, %p14631_p8  ;;  %p14329_p0 = scmp.lt.s32.totalorder %s14327_s6, %s14320_s24 }
  0x29   : > { %p14324_p9 = pneg %p14323_p7  ;;  %p14330_p11 = por %p14329_p0, %p14328_p3 }
  0x2b   : > { %p14331_p12 = pnand %p14330_p11, %p14324_p9 }
  0x2d   : > { %14334 = shalt.err (!%p14331_p12)
}
  0x2e   : > { %s16788_s7 = smov 512   ;;  %s16789_s9 = smov 32  }
  0x2f   : > { %14210 = dma.hbm_to_vmem [thread:$0]  (!%p14611_p6), %s14619_s8, 196608, %s14621_s10, %s14625_s11, %s16788_s7, %s16788_s7, %s16789_s9  }
  0x30   : > { %s12417_s12 = sshll.u32 %s14608_s27, 6  ;;  %s12411_s14 = sshll.u32 %s14608_s27, 3 }
  0x31   : > { %s268_s15 = scalar_lea.vmem [#allocation10], %s12417_s12  ;;  %s13998_s17 = sshll.u32 %s14527_s21, 7 }
  0x32   : > { %s275_s16 = sshll.u32 %s268_s15, 4  ;;  %s14666_s28 = scalar_lea.hbm %s16782_s2, %s13998_s17  ;;  %s14661_s16 = int_to_ptr.vmem [resolvable:$true] %s275_s16 }
  0x33   : > { %s16807_s3 = sld [smem:[#allocation19_spill]]  ;;  %s249_s8 = scalar_lea.vmem [#allocation8], %s12411_s14 }
  0x34   : > { %s257_s10 = sshll.u32 %s249_s8, 4  ;;  %s16808_s12 = sand.u32 1, %s14527_s21   ;;  %s258_s10 = int_to_ptr.vmem [resolvable:$true] %s257_s10 }
  0x35   : > { %s14677_s15 = scalar_lea.sflag [#allocation9], %s16808_s12 }
  0x39   : > { %s14671_s26 = scalar_lea.hbm %s16807_s3, %s13998_s17  ;;  %s14340_s17 = scalar_lea.hbm %s16807_s3, 256 }
  0x3a   : > { %s14335_s7 = scalar_lea.hbm %s14671_s26, 128  ;;  %p14341_p13 = scmp.lt.u32.totalorder %s14671_s26, %s16807_s3 }
  0x3b   : > { %p14336_p0 = scmp.ne.s32.totalorder %s14671_s26, %s14335_s7  ;;  %p14342_p1 = scmp.lt.u32.totalorder %s14340_s17, %s14335_s7 }
  0x3c   : > { %p14344_p4 = scmp.lt.u32.totalorder %s14335_s7, %s14671_s26 }
  0x3d   : > { %p14338_p3 = pnand %p14336_p0, %p14631_p8  ;;  %p14343_p2 = por %p14342_p1, %p14341_p13 }
  0x3f   : > { %p14339_p10 = pneg %p14338_p3  ;;  %p14345_p5 = por %p14344_p4, %p14343_p2 }
  0x41   : > { %p14346_p7 = pnand %p14345_p5, %p14339_p10 }
  0x43   : > { %14349 = shalt.err (!%p14346_p7)
}
  0x44   : > { %s14350_s8 = scalar_lea.vmem %s258_s10, 128  ;;  %s14532_s12 = smov [#allocation8]  }
  0x45   : > { %p14351_p9 = scmp.ne.s32.totalorder %s258_s10, %s14350_s8  ;;  %s14355_s9 = sshll.u32 %s14532_s12, 4  ;;  %s14356_s9 = int_to_ptr.vmem [resolvable:$false] %s14355_s9 }
  0x46   : > { %s14357_s23 = scalar_lea.vmem %s14356_s9, 256  ;;  %p14358_p0 = scmp.lt.s32.totalorder %s258_s10, %s14356_s9 }
  0x47   : > { %p14353_p11 = pnand %p14351_p9, %p14631_p8  ;;  %p14359_p3 = scmp.lt.s32.totalorder %s14357_s23, %s14350_s8 }
  0x49   : > { %p14354_p12 = pneg %p14353_p11  ;;  %p14360_p6 = por %p14359_p3, %p14358_p0 }
  0x4b   : > { %p14361_p1 = pnand %p14360_p6, %p14354_p12 }
  0x4d   : > { %14364 = shalt.err (!%p14361_p1)
}
  0x4e   : > { %p16809_p13 = scmp.ne.s32.totalorder %s16804_s29, 0  ;;  %s14698_s7 = sadd.s32 4294967295, %s14527_s21  }
  0x4f   : > { %s12406_s9 = sadd.s32 4294967294, %s14527_s21   ;;  %p66_p6 = scmp.ne.s32.totalorder %s14519_s19, %s14515_s18 }
  0x50   : > { %14216 = dma.hbm_to_vmem [thread:$0]  (!%p16809_p13), %s14671_s26, 128, %s258_s10, %s14677_s15  }
  0x51   : > { %p16793_p10 = scmp.eq.s32.totalorder %s14698_s7, 0  ;;  %p168_p2 = scmp.eq.s32.totalorder %s14698_s7, 1 }
  0x52   : > { %p174_p4 = scmp.eq.s32.totalorder %s12406_s9, 1  ;;  %p12407_p5 = scmp.ge.s32.totalorder %s14527_s21, 1 }
  0x53   : > { %p14708_p7 = por %p16793_p10, %p66_p6  ;;  %p16811_p9 = scmp.ne.s32.totalorder %s14523_s20, %s14519_s19 }
  0x54   : > { %p14719_p12 = por %p174_p4, %p66_p6  ;;  %p181_p0 = scmp.lt.s32.totalorder %s14527_s21, 3 }
  0x55   : > { %s16810_s24 = scalar_select %p14708_p7, 1, 0 }
  0x56   : > { %p14715_p11 = por %p168_p2, %p16811_p9  ;;  %p14724_p3 = pnand %p12407_p5, %p181_p0 }
  0x57   : > { %s16813_s10 = scalar_select %p14719_p12, 1, 0 }
  0x58   : > { %s16812_s26 = scalar_select %p14715_p11, 1, 0 }
  0x59   : > { %s16814_s17 = scalar_select %p14724_p3, 1, 0 }
  0x5a   : > { %s14533_s30 = smov [#allocation2]   ;;  %s230_s8 = scalar_lea.vmem [#allocation7], %s12411_s14 }
  0x5b   : > { %s194_s6 = sshll.u32 %s14533_s30, 4  ;;  %s238_s12 = sshll.u32 %s230_s8, 4  ;;  %s14728_s6 = int_to_ptr.vmem [resolvable:$true] %s194_s6  ;;  %s239_s12 = int_to_ptr.vmem [resolvable:$true] %s238_s12 }
  0x5c   : > { %s14365_s23 = scalar_lea.hbm %s14666_s28, 128  ;;  %s14370_s3 = scalar_lea.hbm %s16782_s2, 256 }
  0x5d   : > { %p14366_p6 = scmp.ne.s32.totalorder %s14666_s28, %s14365_s23  ;;  %p14371_p5 = scmp.lt.u32.totalorder %s14666_s28, %s16782_s2 }
  0x5e   : > { %p14372_p9 = scmp.lt.u32.totalorder %s14370_s3, %s14365_s23  ;;  %p14374_p10 = scmp.lt.u32.totalorder %s14365_s23, %s14666_s28 }
  0x5f   : > { %p14368_p2 = pnand %p14366_p6, %p14631_p8 }
  0x60   : > { %p14373_p0 = por %p14372_p9, %p14371_p5 }
  0x61   : > { %p14369_p4 = pneg %p14368_p2 }
  0x62   : > { %p14375_p12 = por %p14374_p10, %p14373_p0 }
  0x64   : > { %p14376_p11 = pnand %p14375_p12, %p14369_p4 }
  0x66   : > { %14379 = shalt.err (!%p14376_p11)
}
  0x67   : > { %s14380_s27 = scalar_lea.vmem %s239_s12, 128  ;;  %s14534_s14 = smov [#allocation7]  }
  0x68   : > { %p14381_p1 = scmp.ne.s32.totalorder %s239_s12, %s14380_s27  ;;  %s14385_s30 = sshll.u32 %s14534_s14, 4  ;;  %s14386_s30 = int_to_ptr.vmem [resolvable:$false] %s14385_s30 }
  0x69   : > { %s14387_s1 = scalar_lea.vmem %s14386_s30, 256  ;;  %p14388_p7 = scmp.lt.s32.totalorder %s239_s12, %s14386_s30 }
  0x6a   : > { %p14383_p6 = pnand %p14381_p1, %p14631_p8  ;;  %p14389_p3 = scmp.lt.s32.totalorder %s14387_s1, %s14380_s27 }
  0x6c   : > { %p14384_p2 = pneg %p14383_p6  ;;  %p14390_p13 = por %p14389_p3, %p14388_p7 }
  0x6e   : > { %p14391_p5 = pnand %p14390_p13, %p14384_p2 }
  0x70   : > { %14394 = shalt.err (!%p14391_p5)
}
  0x71   : > { %p16815_p9 = scmp.ne.s32.totalorder %s16804_s29, 0  ;;  %p16816_p10 = scmp.eq.s32.totalorder %s14698_s7, 0 }
  0x72   : > { %p16817_p11 = scmp.ne.s32.totalorder %s16814_s17, 0  ;;  %s14000_s20 = sshll.u32 %s14527_s21, 9 }
  0x73   : > { %14213 = dma.hbm_to_vmem [thread:$0]  (!%p16815_p9), %s14666_s28, 128, %s239_s12, %s14625_s11  }
  0x74   : > { %p16818_p12 = pneg %p16817_p11  ;;  %s14765_s23 = scalar_lea.hbm %s16784_s4, %s14000_s20 }
  0x75   : > { %s14395_s14 = scalar_lea.hbm %s16780_s0, 1536 }
  0x76   : > { %p14757_p1 = pnand %p16818_p12, %p16816_p10  ;;  %p14396_p13 = scmp.ne.s32.totalorder %s16780_s0, %s14395_s14 }
  0x77   : > { %p14402_p0 = scmp.lt.u32.totalorder %s14395_s14, %s16780_s0 }
  0x78   : > { %p14397_p7 = pneg %p14757_p1 }
  0x7a   : > { %p14398_p3 = pnand %p14397_p7, %p14396_p13 }
  0x7c   : > { %p14399_p4 = pneg %p14398_p3 }
  0x7e   : > { %p14404_p6 = pnand %p14402_p0, %p14399_p4 }
  0x80   : > { %14407 = shalt.err (!%p14404_p6)
}
  0x81   : > { %s14408_s1 = scalar_lea.vmem %s14728_s6, 1536  ;;  %p14416_p12 = scmp.lt.s32.totalorder %s14728_s6, %s14728_s6 }
  0x82   : > { %p14409_p2 = scmp.ne.s32.totalorder %s14728_s6, %s14408_s1  ;;  %p14417_p11 = scmp.lt.s32.totalorder %s14408_s1, %s14408_s1 }
  0x84   : > { %p14411_p5 = pnand %p14409_p2, %p14397_p7  ;;  %p14418_p9 = por %p14417_p11, %p14416_p12 }
  0x86   : > { %p14412_p10 = pneg %p14411_p5 }
  0x88   : > { %p14419_p8 = pnand %p14418_p9, %p14412_p10 }
  0x8a   : > { %14422 = shalt.err (!%p14419_p8)
}
  0x8b   : > { %14206 = dma.hbm_to_vmem [thread:$0]  (!%p14757_p1), %s16780_s0, 1536, %s14728_s6, [#allocation3]  }
  0x8c   : > { %s14423_s8 = scalar_lea.hbm %s14765_s23, 1024  ;;  %p16820_p7 = scmp.ne.s32.totalorder %s16806_s13, 0 }
  0x8d   : > { %p14424_p13 = scmp.ne.s32.totalorder %s14765_s23, %s14423_s8  ;;  %s14428_s14 = scalar_lea.hbm %s16784_s4, 2048 }
  0x8e   : > { %p14429_p8 = scmp.lt.u32.totalorder %s14765_s23, %s16784_s4  ;;  %p14430_p9 = scmp.lt.u32.totalorder %s14428_s14, %s14423_s8 }
  0x8f   : > { %p14426_p3 = pnand %p14424_p13, %p16820_p7  ;;  %p14432_p0 = scmp.lt.u32.totalorder %s14423_s8, %s14765_s23 }
  0x90   : > { %p14431_p11 = por %p14430_p9, %p14429_p8 }
  0x91   : > { %p14427_p4 = pneg %p14426_p3 }
  0x92   : > { %p14433_p6 = por %p14432_p0, %p14431_p11 }
  0x94   : > { %p14434_p2 = pnand %p14433_p6, %p14427_p4 }
  0x96   : > { %14437 = shalt.err (!%p14434_p2)
}
  0x97   : > { %s14438_s6 = scalar_lea.vmem %s14661_s16, 1024  ;;  %s14535_s11 = smov [#allocation10]  }
  0x98   : > { %p14439_p1 = scmp.ne.s32.totalorder %s14661_s16, %s14438_s6  ;;  %s14443_s28 = sshll.u32 %s14535_s11, 4  ;;  %s14444_s28 = int_to_ptr.vmem [resolvable:$false] %s14443_s28 }
  0x99   : > { %s14445_s12 = scalar_lea.vmem %s14444_s28, 2048  ;;  %p14446_p12 = scmp.lt.s32.totalorder %s14661_s16, %s14444_s28 }
  0x9a   : > { %p14441_p5 = pnand %p14439_p1, %p16820_p7  ;;  %p14447_p13 = scmp.lt.s32.totalorder %s14445_s12, %s14438_s6 }
  0x9c   : > { %p14442_p10 = pneg %p14441_p5  ;;  %p14448_p3 = por %p14447_p13, %p14446_p12 }
  0x9e   : > { %p14449_p8 = pnand %p14448_p3, %p14442_p10 }
  0xa0   : > { %14452 = shalt.err (!%p14449_p8)
}
  0xa1   : > { %s14536_s1 = smov 1024   ;;  %p16821_p4 = scmp.ne.s32.totalorder %s16804_s29, 0 }
  0xa2   : > { %s16822_s20 = smov 32   ;;  %s16823_s25 = smov 512  }
  0xa3   : > { %14219 = dma.hbm_to_vmem [thread:$0]  (!%p16821_p4), %s14765_s23, 1024, %s14661_s16, %s14677_s15, %s14536_s1, %s16823_s25, %s16822_s20  }
  0xa4   : > { %p16824_p7 = scmp.ne.s32.totalorder %s16814_s17, 0 }
  0xa5   : > { %p16825_p9 = scmp.eq.s32.totalorder (!%p16824_p7), %s14698_s7, 0 }
  0xa6   : > { %287 = sbr.rel (%p16824_p7) target bundleno = 2261 (0x8d5), region = 40 }
  0xad   : > { %14498 = dma.done.wait (%p16825_p9), [#allocation3], 1536   ;;  %p16826_p11 = pmov %p16825_p9 }
  0xae   : > { %s293_s13 = sand.u32 1, %s14698_s7   ;;  %s14820_s29 = sand.u32 1, %s14519_s19  }
  0xaf   : > { %14500 = vsyncadd (%p16826_p11), [#allocation3], 4294965760  ;;  %s14188_s8 = smul.u32 12288, %s14820_s29  ;;  %s294_s9 = scalar_lea.sflag [#allocation6], %s293_s13 }
  0xb0   : > { %p16827_p0 = scmp.ne.s32.totalorder %s16810_s24, 0 }
  0xb1   : > { %s14823_s27 = scalar_lea.vmem [#allocation5], %s14188_s8 }
  0xb2   : > { %14502 = dma.done.wait (%p16827_p0), %s294_s9, 196736  }
  0xb3   : > { %14504 = vsyncadd (%p16827_p0), %s294_s9, 4294770560  ;;  %s14830_s16 = sshll.u32 %s14820_s29, 3  ;;  %s312_s17 = scalar_lea.sflag [#allocation9], %s293_s13 }
  0xb4   : > { %s306_s15 = scalar_lea.vmem [#allocation7], %s14830_s16  ;;  %s315_s23 = scalar_lea.vmem [#allocation8], %s14830_s16 }
  0xb5   : > { %14506 = dma.done.wait (%p16827_p0), %s312_s17, 1152  }
  0xb6   : > { %14508 = vsyncadd (%p16827_p0), %s312_s17, 4294966144  ;;  %v382_v0 = vld [vmem:[%s14823_s27] sm:$0xff]  ;;  %v383_v2 = vld [vmem:[%s14823_s27 + $0x8] sm:$0xff]  ;;  %s12424_s24 = sshll.u32 %s14820_s29, 6  ;;  %s13995_s3 = sshll.u32 %s14698_s7, 7  ;;  %vm12245_vm0 = vcmask 80896  }
  0xb7   : > { %v386_v1 = vld [vmem:[%s14823_s27 + $0x20] sm:$0xff]  ;;  %v387_v4 = vld [vmem:[%s14823_s27 + $0x28] sm:$0xff]  ;;  %s324_s14 = scalar_lea.vmem [#allocation10], %s12424_s24  ;;  %s365_s30 = scalar_lea.vmem [#allocation11], %s14830_s16 }
  0xb8   : > { %v12451_v3 = vcombine.high %v382_v0, %v386_v1  ;;  %v12450_v5 = vcombine.low %v382_v0, %v386_v1  ;;  %v390_v6 = vld [vmem:[%s14823_s27 + $0x40] sm:$0xff]  ;;  %v12453_v8 = vcombine.high %v383_v2, %v387_v4  ;;  %v12452_v9 = vcombine.low %v383_v2, %v387_v4  ;;  %v391_v11 = vld [vmem:[%s14823_s27 + $0x48] sm:$0xff]  ;;  %s12261_s6 = sshll.u32 %s365_s30, 4  ;;  %s16736_s12 = scalar_lea.hbm %s16785_s5, %s13995_s3  ;;  %s16738_s6 = int_to_ptr.vmem [resolvable:$true] %s12261_s6 }
  0xb9   : > { %v394_v7 = vld [vmem:[%s14823_s27 + $0x60] sm:$0xff]  ;;  %v395_v12 = vld [vmem:[%s14823_s27 + $0x68] sm:$0xff]  ;;  %s12248_s7 = scalar_lea.sflag [#allocation4], %s14820_s29  ;;  %s14453_s1 = scalar_lea.vmem %s16738_s6, 128 }
  0xba   : > { %v12459_v10 = vcombine.high %v390_v6, %v394_v7  ;;  %v398_v13 = vld [vmem:[%s14823_s27 + $0x80] sm:$0xff]  ;;  %9682 = vmatprep.subr.bf16.mxu0 %v12451_v3  ;;  %v12461_v14 = vcombine.high %v391_v11, %v395_v12  ;;  %v399_v16 = vld [vmem:[%s14823_s27 + $0x88] sm:$0xff]  ;;  %10174 = vmatprep.subr.bf16.mxu1 %v12453_v8  ;;  %v12458_v18 = vcombine.low %v390_v6, %v394_v7  ;;  %p14454_p6 = scmp.ne.s32.totalorder %s16738_s6, %s14453_s1  ;;  %p16828_p2 = scmp.ne.s32.totalorder %s16812_s26, 0 }
  0xbb   : > { %v402_v15 = vld [vmem:[%s14823_s27 + $0xa0] sm:$0xff]  ;;  %v403_v17 = vld [vmem:[%s14823_s27 + $0xa8] sm:$0xff]  ;;  %9683 = vmatpush1.bf16.msra.mxu0 %v12450_v5  ;;  %10175 = vmatpush1.bf16.msra.mxu1 %v12452_v9  ;;  %v12460_v19 = vcombine.low %v391_v11, %v395_v12  ;;  %s14538_s20 = smov [#allocation11]  }
  0xbc   : > { %9684 = vmatprep.subr.bf16.mxu0 %v12459_v10  ;;  %v12467_v20 = vcombine.high %v398_v13, %v402_v15  ;;  %10176 = vmatprep.subr.bf16.mxu1 %v12461_v14  ;;  %v12469_v21 = vcombine.high %v399_v16, %v403_v17  ;;  %v406_v22 = vld [vmem:[%s14823_s27 + $0xc0] sm:$0xff]  ;;  %v407_v24 = vld [vmem:[%s14823_s27 + $0xc8] sm:$0xff]  ;;  %v12466_v26 = vcombine.low %v398_v13, %v402_v15  ;;  %p14455_p1 = pnand %p14454_p6, %p16828_p2  ;;  %s14457_s25 = sshll.u32 %s14538_s20, 4  ;;  %s14458_s25 = int_to_ptr.vmem [resolvable:$false] %s14457_s25 }
  0xbd   : > { %v410_v23 = vld [vmem:[%s14823_s27 + $0xe0] sm:$0xff]  ;;  %v411_v25 = vld [vmem:[%s14823_s27 + $0xe8] sm:$0xff]  ;;  %v12468_v27 = vcombine.low %v399_v16, %v403_v17  ;;  %s14459_s13 = scalar_lea.vmem %s14458_s25, 256  ;;  %p14460_p10 = scmp.lt.s32.totalorder %s16738_s6, %s14458_s25 }
  0xbe   : > { %v12475_v28 = vcombine.high %v406_v22, %v410_v23  ;;  %v12477_v29 = vcombine.high %v407_v24, %v411_v25  ;;  %v414_v30 = vld [vmem:[%s14823_s27 + $0x100] sm:$0xff]  ;;  %v415_v32 = vld [vmem:[%s14823_s27 + $0x108] sm:$0xff]  ;;  %v12474_v34 = vcombine.low %v406_v22, %v410_v23  ;;  %v12476_v35 = vcombine.low %v407_v24, %v411_v25  ;;  %p14456_p5 = pneg %p14455_p1  ;;  %p14461_p12 = scmp.lt.s32.totalorder %s14459_s13, %s14453_s1 }
  0xbf   : > { %9685 = vmatpush1.bf16.msra.mxu0 %v12458_v18  ;;  %10177 = vmatpush1.bf16.msra.mxu1 %v12460_v19  ;;  %v418_v31 = vld [vmem:[%s14823_s27 + $0x120] sm:$0xff]  ;;  %v419_v33 = vld [vmem:[%s14823_s27 + $0x128] sm:$0xff] }
  0xc0   : > { %9686 = vmatprep.subr.bf16.mxu0 %v12467_v20  ;;  %10178 = vmatprep.subr.bf16.mxu1 %v12469_v21  ;;  %v12483_v36 = vcombine.high %v414_v30, %v418_v31  ;;  %v12485_v37 = vcombine.high %v415_v32, %v419_v33  ;;  %v422_v38 = vld [vmem:[%s14823_s27 + $0x140] sm:$0xff]  ;;  %v423_v40 = vld [vmem:[%s14823_s27 + $0x148] sm:$0xff]  ;;  %v12482_v42 = vcombine.low %v414_v30, %v418_v31  ;;  %p14462_p13 = por %p14461_p12, %p14460_p10 }
  0xc1   : > { %v426_v39 = vld [vmem:[%s14823_s27 + $0x160] sm:$0xff]  ;;  %v427_v41 = vld [vmem:[%s14823_s27 + $0x168] sm:$0xff]  ;;  %v12484_v43 = vcombine.low %v415_v32, %v419_v33 }
  0xc2   : > { %v12491_v44 = vcombine.high %v422_v38, %v426_v39  ;;  %v12493_v45 = vcombine.high %v423_v40, %v427_v41  ;;  %v430_v46 = vld [vmem:[%s14823_s27 + $0x180] sm:$0xff]  ;;  %v431_v48 = vld [vmem:[%s14823_s27 + $0x188] sm:$0xff]  ;;  %v12490_v50 = vcombine.low %v422_v38, %v426_v39  ;;  %v12492_v51 = vcombine.low %v423_v40, %v427_v41  ;;  %p14463_p3 = pnand %p14462_p13, %p14456_p5 }
  0xc3   : > { %9687 = vmatpush1.bf16.msra.mxu0 %v12466_v26  ;;  %10179 = vmatpush1.bf16.msra.mxu1 %v12468_v27  ;;  %v434_v47 = vld [vmem:[%s14823_s27 + $0x1a0] sm:$0xff]  ;;  %v435_v49 = vld [vmem:[%s14823_s27 + $0x1a8] sm:$0xff] }
  0xc4   : > { %9688 = vmatprep.subr.bf16.mxu0 %v12475_v28  ;;  %10180 = vmatprep.subr.bf16.mxu1 %v12477_v29  ;;  %v12499_v52 = vcombine.high %v430_v46, %v434_v47  ;;  %v14866_v53 = vld [vmem:[#allocation2] sm:$0xff]  ;;  %v12501_v54 = vcombine.high %v431_v48, %v435_v49  ;;  %v439_v58 = vld [vmem:[%s14823_s27 + $0x1c8] sm:$0xff]  ;;  %v12498_v60 = vcombine.low %v430_v46, %v434_v47 }
  0xc5   : > { %v438_v55 = vld [vmem:[%s14823_s27 + $0x1c0] sm:$0xff]  ;;  %v14872_v57 = vcombine.high %v14866_v53, %v14866_v53  ;;  %v443_v59 = vld [vmem:[%s14823_s27 + $0x1e8] sm:$0xff]  ;;  %v12500_v61 = vcombine.low %v431_v48, %v435_v49 }
  0xc6   : > { %v442_v56 = vld [vmem:[%s14823_s27 + $0x1e0] sm:$0xff]  ;;  %v12509_v63 = vcombine.high %v439_v58, %v443_v59  ;;  %v447_v2 = vld [vmem:[%s14823_s27 + $0x208] sm:$0xff]  ;;  %v12508_v5 = vcombine.low %v439_v58, %v443_v59 }
  0xc7   : > { %9689 = vmatpush1.bf16.msra.mxu0 %v12474_v34  ;;  %10181 = vmatpush1.bf16.msra.mxu1 %v12476_v35  ;;  %v12507_v62 = vcombine.high %v438_v55, %v442_v56  ;;  %v446_v0 = vld [vmem:[%s14823_s27 + $0x200] sm:$0xff]  ;;  %v451_v3 = vld [vmem:[%s14823_s27 + $0x228] sm:$0xff]  ;;  %v12506_v4 = vcombine.low %v438_v55, %v442_v56 }
  0xc8   : > { %9690 = vmatprep.subr.bf16.mxu0 %v12483_v36  ;;  %10182 = vmatprep.subr.bf16.mxu1 %v12485_v37  ;;  %v450_v1 = vld [vmem:[%s14823_s27 + $0x220] sm:$0xff]  ;;  %v12517_v7 = vcombine.high %v447_v2, %v451_v3  ;;  %v455_v10 = vld [vmem:[%s14823_s27 + $0x248] sm:$0xff]  ;;  %v12516_v13 = vcombine.low %v447_v2, %v451_v3 }
  0xc9   : > { %9714 = vmatprep.mubr.bf16.mxu0 %v14872_v57  ;;  %10206 = vmatprep.mubr.bf16.mxu1 %v14872_v57  ;;  %v12515_v6 = vcombine.high %v446_v0, %v450_v1  ;;  %v454_v8 = vld [vmem:[%s14823_s27 + $0x240] sm:$0xff]  ;;  %v459_v11 = vld [vmem:[%s14823_s27 + $0x268] sm:$0xff]  ;;  %v12514_v12 = vcombine.low %v446_v0, %v450_v1 }
  0xca   : > { %v458_v9 = vld [vmem:[%s14823_s27 + $0x260] sm:$0xff]  ;;  %v12525_v15 = vcombine.high %v455_v10, %v459_v11  ;;  %v463_v18 = vld [vmem:[%s14823_s27 + $0x288] sm:$0xff]  ;;  %v12524_v21 = vcombine.low %v455_v10, %v459_v11 }
  0xcb   : > { %9691 = vmatpush1.bf16.msra.mxu0 %v12482_v42  ;;  %10183 = vmatpush1.bf16.msra.mxu1 %v12484_v43  ;;  %v12523_v14 = vcombine.high %v454_v8, %v458_v9  ;;  %v462_v16 = vld [vmem:[%s14823_s27 + $0x280] sm:$0xff]  ;;  %v467_v19 = vld [vmem:[%s14823_s27 + $0x2a8] sm:$0xff]  ;;  %v12522_v20 = vcombine.low %v454_v8, %v458_v9 }
  0xcc   : > { %9692 = vmatprep.subr.bf16.mxu0 %v12491_v44  ;;  %10184 = vmatprep.subr.bf16.mxu1 %v12493_v45  ;;  %v466_v17 = vld [vmem:[%s14823_s27 + $0x2a0] sm:$0xff]  ;;  %v12533_v23 = vcombine.high %v463_v18, %v467_v19  ;;  %v471_v26 = vld [vmem:[%s14823_s27 + $0x2c8] sm:$0xff]  ;;  %v12532_v29 = vcombine.low %v463_v18, %v467_v19 }
  0xcd   : > { %v12531_v22 = vcombine.high %v462_v16, %v466_v17  ;;  %v470_v24 = vld [vmem:[%s14823_s27 + $0x2c0] sm:$0xff]  ;;  %v475_v27 = vld [vmem:[%s14823_s27 + $0x2e8] sm:$0xff]  ;;  %v12530_v28 = vcombine.low %v462_v16, %v466_v17 }
  0xce   : > { %v474_v25 = vld [vmem:[%s14823_s27 + $0x2e0] sm:$0xff]  ;;  %v12541_v31 = vcombine.high %v471_v26, %v475_v27  ;;  %v479_v34 = vld [vmem:[%s14823_s27 + $0x308] sm:$0xff]  ;;  %v12540_v37 = vcombine.low %v471_v26, %v475_v27 }
  0xcf   : > { %9693 = vmatpush1.bf16.msra.mxu0 %v12490_v50  ;;  %10185 = vmatpush1.bf16.msra.mxu1 %v12492_v51  ;;  %v12539_v30 = vcombine.high %v470_v24, %v474_v25  ;;  %v478_v32 = vld [vmem:[%s14823_s27 + $0x300] sm:$0xff]  ;;  %v483_v35 = vld [vmem:[%s14823_s27 + $0x328] sm:$0xff]  ;;  %v12538_v36 = vcombine.low %v470_v24, %v474_v25 }
  0xd0   : > { %9694 = vmatprep.subr.bf16.mxu0 %v12499_v52  ;;  %10186 = vmatprep.subr.bf16.mxu1 %v12501_v54  ;;  %v482_v33 = vld [vmem:[%s14823_s27 + $0x320] sm:$0xff]  ;;  %v12549_v39 = vcombine.high %v479_v34, %v483_v35  ;;  %v487_v42 = vld [vmem:[%s14823_s27 + $0x348] sm:$0xff]  ;;  %v12548_v45 = vcombine.low %v479_v34, %v483_v35 }
  0xd1   : > { %v12547_v38 = vcombine.high %v478_v32, %v482_v33  ;;  %v486_v40 = vld [vmem:[%s14823_s27 + $0x340] sm:$0xff]  ;;  %v491_v43 = vld [vmem:[%s14823_s27 + $0x368] sm:$0xff]  ;;  %v12546_v44 = vcombine.low %v478_v32, %v482_v33 }
  0xd2   : > { %v490_v41 = vld [vmem:[%s14823_s27 + $0x360] sm:$0xff]  ;;  %v12557_v47 = vcombine.high %v487_v42, %v491_v43  ;;  %v495_v50 = vld [vmem:[%s14823_s27 + $0x388] sm:$0xff]  ;;  %v12556_v54 = vcombine.low %v487_v42, %v491_v43 }
  0xd3   : > { %9695 = vmatpush1.bf16.msra.mxu0 %v12498_v60  ;;  %10187 = vmatpush1.bf16.msra.mxu1 %v12500_v61  ;;  %v12555_v46 = vcombine.high %v486_v40, %v490_v41  ;;  %v494_v48 = vld [vmem:[%s14823_s27 + $0x380] sm:$0xff]  ;;  %v499_v51 = vld [vmem:[%s14823_s27 + $0x3a8] sm:$0xff]  ;;  %v12554_v52 = vcombine.low %v486_v40, %v490_v41 }
  0xd4   : > { %9696 = vmatprep.subr.bf16.mxu0 %v12507_v62  ;;  %10188 = vmatprep.subr.bf16.mxu1 %v12509_v63  ;;  %v498_v49 = vld [vmem:[%s14823_s27 + $0x3a0] sm:$0xff]  ;;  %v12565_v56 = vcombine.high %v495_v50, %v499_v51  ;;  %v503_v60 = vld [vmem:[%s14823_s27 + $0x3c8] sm:$0xff]  ;;  %v12564_v63 = vcombine.low %v495_v50, %v499_v51 }
  0xd5   : > { %v12563_v55 = vcombine.high %v494_v48, %v498_v49  ;;  %v502_v58 = vld [vmem:[%s14823_s27 + $0x3c0] sm:$0xff]  ;;  %v507_v61 = vld [vmem:[%s14823_s27 + $0x3e8] sm:$0xff]  ;;  %v12562_v62 = vcombine.low %v494_v48, %v498_v49 }
  0xd6   : > { %v506_v59 = vld [vmem:[%s14823_s27 + $0x3e0] sm:$0xff]  ;;  %v12573_v1 = vcombine.high %v503_v60, %v507_v61 }
  0xd7   : > { %9697 = vmatpush1.bf16.msra.mxu0 %v12506_v4  ;;  %10189 = vmatpush1.bf16.msra.mxu1 %v12508_v5  ;;  %v12571_v0 = vcombine.high %v502_v58, %v506_v59  ;;  %v510_v2 = vld [vmem:[%s14823_s27 + $0x400] sm:$0xff]  ;;  %v511_v4 = vld [vmem:[%s14823_s27 + $0x408] sm:$0xff] }
  0xd8   : > { %9698 = vmatprep.subr.bf16.mxu0 %v12515_v6  ;;  %10190 = vmatprep.subr.bf16.mxu1 %v12517_v7  ;;  %v514_v3 = vld [vmem:[%s14823_s27 + $0x420] sm:$0xff]  ;;  %v515_v5 = vld [vmem:[%s14823_s27 + $0x428] sm:$0xff]  ;;  %v12570_v6 = vcombine.low %v502_v58, %v506_v59  ;;  %v12572_v7 = vcombine.low %v503_v60, %v507_v61 }
  0xd9   : > { %v12579_v8 = vcombine.high %v510_v2, %v514_v3  ;;  %v12581_v9 = vcombine.high %v511_v4, %v515_v5  ;;  %v518_v10 = vld [vmem:[%s14823_s27 + $0x440] sm:$0xff]  ;;  %v12578_v16 = vcombine.low %v510_v2, %v514_v3  ;;  %v12580_v17 = vcombine.low %v511_v4, %v515_v5 }
  0xda   : > { %v522_v11 = vld [vmem:[%s14823_s27 + $0x460] sm:$0xff] }
  0xdb   : > { %9699 = vmatpush1.bf16.msra.mxu0 %v12514_v12  ;;  %10191 = vmatpush1.bf16.msra.mxu1 %v12516_v13  ;;  %v14918_v12 = vcombine.low %v14866_v53, %v14866_v53  ;;  %v519_v13 = vld [vmem:[%s14823_s27 + $0x448] sm:$0xff]  ;;  %v12587_v18 = vcombine.high %v518_v10, %v522_v11  ;;  %v12586_v24 = vcombine.low %v518_v10, %v522_v11 }
  0xdc   : > { %9700 = vmatprep.subr.bf16.mxu0 %v12523_v14  ;;  %10192 = vmatprep.subr.bf16.mxu1 %v12525_v15  ;;  %v523_v14 = vld [vmem:[%s14823_s27 + $0x468] sm:$0xff] }
  0xdd   : > { %v14922_v15 = vld [vmem:[#allocation2 + $0x8] sm:$0xff]  ;;  %v12589_v19 = vcombine.high %v519_v13, %v523_v14  ;;  %v12588_v25 = vcombine.low %v519_v13, %v523_v14 }
  0xde   : > { %v14928_v53 = vcombine.high %v14922_v15, %v14922_v15 }
  0xdf   : > { %9701 = vmatpush1.bf16.msra.mxu0 %v12522_v20  ;;  %10193 = vmatpush1.bf16.msra.mxu1 %v12524_v21  ;;  %v526_v20 = vld [vmem:[%s14823_s27 + $0x480] sm:$0xff] }
  0xe0   : > { %9702 = vmatprep.subr.bf16.mxu0 %v12531_v22  ;;  %10194 = vmatprep.subr.bf16.mxu1 %v12533_v23  ;;  %v530_v21 = vld [vmem:[%s14823_s27 + $0x4a0] sm:$0xff]  ;;  %v527_v22 = vld [vmem:[%s14823_s27 + $0x488] sm:$0xff] }
  0xe1   : > { %v531_v23 = vld [vmem:[%s14823_s27 + $0x4a8] sm:$0xff]  ;;  %v12595_v26 = vcombine.high %v526_v20, %v530_v21  ;;  %v12594_v32 = vcombine.low %v526_v20, %v530_v21 }
  0xe2   : > { %v12597_v27 = vcombine.high %v527_v22, %v531_v23  ;;  %v12596_v33 = vcombine.low %v527_v22, %v531_v23 }
  0xe3   : > { %9703 = vmatpush1.bf16.msra.mxu0 %v12530_v28  ;;  %10195 = vmatpush1.bf16.msra.mxu1 %v12532_v29  ;;  %v534_v28 = vld [vmem:[%s14823_s27 + $0x4c0] sm:$0xff] }
  0xe4   : > { %9704 = vmatprep.subr.bf16.mxu0 %v12539_v30  ;;  %10196 = vmatprep.subr.bf16.mxu1 %v12541_v31  ;;  %v538_v29 = vld [vmem:[%s14823_s27 + $0x4e0] sm:$0xff]  ;;  %v535_v30 = vld [vmem:[%s14823_s27 + $0x4c8] sm:$0xff] }
  0xe5   : > { %v539_v31 = vld [vmem:[%s14823_s27 + $0x4e8] sm:$0xff]  ;;  %v12603_v34 = vcombine.high %v534_v28, %v538_v29  ;;  %v12602_v40 = vcombine.low %v534_v28, %v538_v29 }
  0xe6   : > { %v12605_v35 = vcombine.high %v535_v30, %v539_v31  ;;  %v12604_v41 = vcombine.low %v535_v30, %v539_v31 }
  0xe7   : > { %9705 = vmatpush1.bf16.msra.mxu0 %v12538_v36  ;;  %10197 = vmatpush1.bf16.msra.mxu1 %v12540_v37  ;;  %v542_v36 = vld [vmem:[%s14823_s27 + $0x500] sm:$0xff] }
  0xe8   : > { %9706 = vmatprep.subr.bf16.mxu0 %v12547_v38  ;;  %10198 = vmatprep.subr.bf16.mxu1 %v12549_v39  ;;  %v546_v37 = vld [vmem:[%s14823_s27 + $0x520] sm:$0xff]  ;;  %v543_v38 = vld [vmem:[%s14823_s27 + $0x508] sm:$0xff] }
  0xe9   : > { %v547_v39 = vld [vmem:[%s14823_s27 + $0x528] sm:$0xff]  ;;  %v12611_v42 = vcombine.high %v542_v36, %v546_v37  ;;  %v12610_v48 = vcombine.low %v542_v36, %v546_v37 }
  0xea   : > { %v12613_v43 = vcombine.high %v543_v38, %v547_v39  ;;  %v12612_v49 = vcombine.low %v543_v38, %v547_v39 }
  0xeb   : > { %9707 = vmatpush1.bf16.msra.mxu0 %v12546_v44  ;;  %10199 = vmatpush1.bf16.msra.mxu1 %v12548_v45  ;;  %v550_v44 = vld [vmem:[%s14823_s27 + $0x540] sm:$0xff] }
  0xec   : > { %9708 = vmatprep.subr.bf16.mxu0 %v12555_v46  ;;  %10200 = vmatprep.subr.bf16.mxu1 %v12557_v47  ;;  %v554_v45 = vld [vmem:[%s14823_s27 + $0x560] sm:$0xff]  ;;  %v551_v46 = vld [vmem:[%s14823_s27 + $0x548] sm:$0xff] }
  0xed   : > { %v555_v47 = vld [vmem:[%s14823_s27 + $0x568] sm:$0xff]  ;;  %v12619_v50 = vcombine.high %v550_v44, %v554_v45  ;;  %v12618_v58 = vcombine.low %v550_v44, %v554_v45 }
  0xee   : > { %v12621_v51 = vcombine.high %v551_v46, %v555_v47  ;;  %v12620_v59 = vcombine.low %v551_v46, %v555_v47 }
  0xef   : > { %9709 = vmatpush1.bf16.msra.mxu0 %v12554_v52  ;;  %10201 = vmatpush1.bf16.msra.mxu1 %v12556_v54  ;;  %v558_v52 = vld [vmem:[%s14823_s27 + $0x580] sm:$0xff] }
  0xf0   : > { %9710 = vmatprep.subr.bf16.mxu0 %v12563_v55  ;;  %10202 = vmatprep.subr.bf16.mxu1 %v12565_v56  ;;  %v562_v54 = vld [vmem:[%s14823_s27 + $0x5a0] sm:$0xff]  ;;  %v559_v55 = vld [vmem:[%s14823_s27 + $0x588] sm:$0xff] }
  0xf1   : > { %v563_v56 = vld [vmem:[%s14823_s27 + $0x5a8] sm:$0xff]  ;;  %v12627_v60 = vcombine.high %v558_v52, %v562_v54  ;;  %v12626_v2 = vcombine.low %v558_v52, %v562_v54 }
  0xf2   : > { %v12629_v61 = vcombine.high %v559_v55, %v563_v56  ;;  %v12628_v3 = vcombine.low %v559_v55, %v563_v56 }
  0xf3   : > { %9711 = vmatpush1.bf16.msra.mxu0 %v12562_v62  ;;  %10203 = vmatpush1.bf16.msra.mxu1 %v12564_v63  ;;  %v566_v62 = vld [vmem:[%s14823_s27 + $0x5c0] sm:$0xff] }
  0xf4   : > { %9712 = vmatprep.subr.bf16.mxu0 %v12571_v0  ;;  %10204 = vmatprep.subr.bf16.mxu1 %v12573_v1  ;;  %v570_v63 = vld [vmem:[%s14823_s27 + $0x5e0] sm:$0xff]  ;;  %v567_v0 = vld [vmem:[%s14823_s27 + $0x5c8] sm:$0xff] }
  0xf5   : > { %v571_v1 = vld [vmem:[%s14823_s27 + $0x5e8] sm:$0xff]  ;;  %v12635_v4 = vcombine.high %v566_v62, %v570_v63  ;;  %v12634_v10 = vcombine.low %v566_v62, %v570_v63 }
  0xf6   : > { %v12637_v5 = vcombine.high %v567_v0, %v571_v1  ;;  %v12636_v11 = vcombine.low %v567_v0, %v571_v1 }
  0xf7   : > { %9713 = vmatpush1.bf16.msra.mxu0 %v12570_v6  ;;  %10205 = vmatpush1.bf16.msra.mxu1 %v12572_v7  ;;  %v574_v6 = vld [vmem:[%s14823_s27 + $0x600] sm:$0xff] }
  0xf8   : > { %9723 = vmatprep.subr.bf16.mxu0 %v12579_v8  ;;  %10215 = vmatprep.subr.bf16.mxu1 %v12581_v9  ;;  %v578_v7 = vld [vmem:[%s14823_s27 + $0x620] sm:$0xff]  ;;  %v575_v8 = vld [vmem:[%s14823_s27 + $0x608] sm:$0xff] }
  0xf9   : > { %v579_v9 = vld [vmem:[%s14823_s27 + $0x628] sm:$0xff]  ;;  %v12643_v13 = vcombine.high %v574_v6, %v578_v7  ;;  %v12642_v20 = vcombine.low %v574_v6, %v578_v7 }
  0xfa   : > { %9715 = vmatmul.mubr.bf16.vlgmr.msra.gmra.mrb[0].mxu0 %v14918_v12  ;;  %10207 = vmatmul.mubr.bf16.vlgmr.msra.gmra.mrb[0].mxu1 %v14918_v12  ;;  %v12645_v14 = vcombine.high %v575_v8, %v579_v9  ;;  %v12644_v21 = vcombine.low %v575_v8, %v579_v9 }
  0xfb   : > { %9724 = vmatpush1.bf16.msra.mxu0 %v12578_v16  ;;  %10216 = vmatpush1.bf16.msra.mxu1 %v12580_v17  ;;  %v582_v16 = vld [vmem:[%s14823_s27 + $0x640] sm:$0xff] }
  0xfc   : > { %9725 = vmatprep.subr.bf16.mxu0 %v12587_v18  ;;  %10217 = vmatprep.subr.bf16.mxu1 %v12589_v19  ;;  %v586_v17 = vld [vmem:[%s14823_s27 + $0x660] sm:$0xff]  ;;  %v583_v18 = vld [vmem:[%s14823_s27 + $0x648] sm:$0xff] }
  0xfd   : > { %9755 = vmatprep.mubr.bf16.mxu0 %v14928_v53  ;;  %10247 = vmatprep.mubr.bf16.mxu1 %v14928_v53  ;;  %v587_v19 = vld [vmem:[%s14823_s27 + $0x668] sm:$0xff]  ;;  %v12651_v22 = vcombine.high %v582_v16, %v586_v17  ;;  %v12650_v28 = vcombine.low %v582_v16, %v586_v17 }
  0xfe   : > { %v12653_v23 = vcombine.high %v583_v18, %v587_v19  ;;  %v12652_v29 = vcombine.low %v583_v18, %v587_v19 }
  0xff   : > { %9726 = vmatpush1.bf16.msra.mxu0 %v12586_v24  ;;  %10218 = vmatpush1.bf16.msra.mxu1 %v12588_v25  ;;  %v590_v24 = vld [vmem:[%s14823_s27 + $0x680] sm:$0xff] }
 0x100   : > { %9727 = vmatprep.subr.bf16.mxu0 %v12595_v26  ;;  %10219 = vmatprep.subr.bf16.mxu1 %v12597_v27  ;;  %v594_v25 = vld [vmem:[%s14823_s27 + $0x6a0] sm:$0xff]  ;;  %v591_v26 = vld [vmem:[%s14823_s27 + $0x688] sm:$0xff] }
 0x101   : > { %v595_v27 = vld [vmem:[%s14823_s27 + $0x6a8] sm:$0xff]  ;;  %v12659_v30 = vcombine.high %v590_v24, %v594_v25  ;;  %v12658_v36 = vcombine.low %v590_v24, %v594_v25  ;;  %v15000_v25 = vld [vmem:[#allocation2 + $0x10] sm:$0xff] }
 0x102   : > { %v12661_v31 = vcombine.high %v591_v26, %v595_v27  ;;  %v12660_v37 = vcombine.low %v591_v26, %v595_v27  ;;  %v651_v24 = vld [vmem:[%s14823_s27 + $0x868] sm:$0xff] }
 0x103   : > { %9728 = vmatpush1.bf16.msra.mxu0 %v12594_v32  ;;  %10220 = vmatpush1.bf16.msra.mxu1 %v12596_v33  ;;  %v598_v32 = vld [vmem:[%s14823_s27 + $0x6c0] sm:$0xff] }
 0x104   : > { %9729 = vmatprep.subr.bf16.mxu0 %v12603_v34  ;;  %10221 = vmatprep.subr.bf16.mxu1 %v12605_v35  ;;  %v602_v33 = vld [vmem:[%s14823_s27 + $0x6e0] sm:$0xff]  ;;  %v599_v34 = vld [vmem:[%s14823_s27 + $0x6c8] sm:$0xff] }
 0x105   : > { %v603_v35 = vld [vmem:[%s14823_s27 + $0x6e8] sm:$0xff]  ;;  %v12667_v38 = vcombine.high %v598_v32, %v602_v33  ;;  %v12666_v44 = vcombine.low %v598_v32, %v602_v33 }
 0x106   : > { %v12669_v39 = vcombine.high %v599_v34, %v603_v35  ;;  %v12668_v45 = vcombine.low %v599_v34, %v603_v35  ;;  %v655_v32 = vld [vmem:[%s14823_s27 + $0x888] sm:$0xff] }
 0x107   : > { %9730 = vmatpush1.bf16.msra.mxu0 %v12602_v40  ;;  %10222 = vmatpush1.bf16.msra.mxu1 %v12604_v41  ;;  %v606_v40 = vld [vmem:[%s14823_s27 + $0x700] sm:$0xff]  ;;  %v659_v33 = vld [vmem:[%s14823_s27 + $0x8a8] sm:$0xff] }
 0x108   : > { %9731 = vmatprep.subr.bf16.mxu0 %v12611_v42  ;;  %10223 = vmatprep.subr.bf16.mxu1 %v12613_v43  ;;  %v610_v41 = vld [vmem:[%s14823_s27 + $0x720] sm:$0xff]  ;;  %v607_v42 = vld [vmem:[%s14823_s27 + $0x708] sm:$0xff] }
 0x109   : > { %v611_v43 = vld [vmem:[%s14823_s27 + $0x728] sm:$0xff]  ;;  %v12675_v46 = vcombine.high %v606_v40, %v610_v41  ;;  %v12674_v52 = vcombine.low %v606_v40, %v610_v41 }
 0x10a   : > { %v12677_v47 = vcombine.high %v607_v42, %v611_v43  ;;  %v12676_v54 = vcombine.low %v607_v42, %v611_v43  ;;  %v663_v40 = vld [vmem:[%s14823_s27 + $0x8c8] sm:$0xff]  ;;  %v12724_v43 = vcombine.low %v655_v32, %v659_v33 }
 0x10b   : > { %9732 = vmatpush1.bf16.msra.mxu0 %v12610_v48  ;;  %10224 = vmatpush1.bf16.msra.mxu1 %v12612_v49  ;;  %v614_v48 = vld [vmem:[%s14823_s27 + $0x740] sm:$0xff]  ;;  %v667_v41 = vld [vmem:[%s14823_s27 + $0x8e8] sm:$0xff] }
 0x10c   : > { %9733 = vmatprep.subr.bf16.mxu0 %v12619_v50  ;;  %10225 = vmatprep.subr.bf16.mxu1 %v12621_v51  ;;  %v618_v49 = vld [vmem:[%s14823_s27 + $0x760] sm:$0xff]  ;;  %v615_v50 = vld [vmem:[%s14823_s27 + $0x748] sm:$0xff] }
 0x10d   : > { %v619_v51 = vld [vmem:[%s14823_s27 + $0x768] sm:$0xff]  ;;  %v12683_v55 = vcombine.high %v614_v48, %v618_v49  ;;  %v12682_v62 = vcombine.low %v614_v48, %v618_v49 }
 0x10e   : > { %v12685_v56 = vcombine.high %v615_v50, %v619_v51  ;;  %v12684_v63 = vcombine.low %v615_v50, %v619_v51  ;;  %v671_v48 = vld [vmem:[%s14823_s27 + $0x908] sm:$0xff]  ;;  %v12732_v51 = vcombine.low %v663_v40, %v667_v41 }
 0x10f   : > { %9734 = vmatpush1.bf16.msra.mxu0 %v12618_v58  ;;  %10226 = vmatpush1.bf16.msra.mxu1 %v12620_v59  ;;  %v622_v58 = vld [vmem:[%s14823_s27 + $0x780] sm:$0xff]  ;;  %v675_v49 = vld [vmem:[%s14823_s27 + $0x928] sm:$0xff] }
 0x110   : > { %9735 = vmatprep.subr.bf16.mxu0 %v12627_v60  ;;  %10227 = vmatprep.subr.bf16.mxu1 %v12629_v61  ;;  %v626_v59 = vld [vmem:[%s14823_s27 + $0x7a0] sm:$0xff]  ;;  %v623_v60 = vld [vmem:[%s14823_s27 + $0x788] sm:$0xff] }
 0x111   : > { %v627_v61 = vld [vmem:[%s14823_s27 + $0x7a8] sm:$0xff]  ;;  %v12691_v0 = vcombine.high %v622_v58, %v626_v59  ;;  %v12690_v6 = vcombine.low %v622_v58, %v626_v59 }
 0x112   : > { %v12693_v1 = vcombine.high %v623_v60, %v627_v61  ;;  %v12692_v7 = vcombine.low %v623_v60, %v627_v61  ;;  %v679_v58 = vld [vmem:[%s14823_s27 + $0x948] sm:$0xff]  ;;  %v12740_v61 = vcombine.low %v671_v48, %v675_v49 }
 0x113   : > { %9736 = vmatpush1.bf16.msra.mxu0 %v12626_v2  ;;  %10228 = vmatpush1.bf16.msra.mxu1 %v12628_v3  ;;  %v630_v2 = vld [vmem:[%s14823_s27 + $0x7c0] sm:$0xff]  ;;  %v683_v59 = vld [vmem:[%s14823_s27 + $0x968] sm:$0xff] }
 0x114   : > { %9737 = vmatprep.subr.bf16.mxu0 %v12635_v4  ;;  %10229 = vmatprep.subr.bf16.mxu1 %v12637_v5  ;;  %v634_v3 = vld [vmem:[%s14823_s27 + $0x7e0] sm:$0xff]  ;;  %v631_v4 = vld [vmem:[%s14823_s27 + $0x7c8] sm:$0xff] }
 0x115   : > { %v635_v5 = vld [vmem:[%s14823_s27 + $0x7e8] sm:$0xff]  ;;  %v12699_v8 = vcombine.high %v630_v2, %v634_v3  ;;  %v12698_v16 = vcombine.low %v630_v2, %v634_v3 }
 0x116   : > { %v12701_v9 = vcombine.high %v631_v4, %v635_v5  ;;  %v12700_v17 = vcombine.low %v631_v4, %v635_v5  ;;  %v687_v2 = vld [vmem:[%s14823_s27 + $0x988] sm:$0xff]  ;;  %v12748_v5 = vcombine.low %v679_v58, %v683_v59 }
 0x117   : > { %9738 = vmatpush1.bf16.msra.mxu0 %v12634_v10  ;;  %10230 = vmatpush1.bf16.msra.mxu1 %v12636_v11  ;;  %v638_v10 = vld [vmem:[%s14823_s27 + $0x800] sm:$0xff]  ;;  %v691_v3 = vld [vmem:[%s14823_s27 + $0x9a8] sm:$0xff] }
 0x118   : > { %9739 = vmatprep.subr.bf16.mxu0 %v12643_v13  ;;  %10231 = vmatprep.subr.bf16.mxu1 %v12645_v14  ;;  %v642_v11 = vld [vmem:[%s14823_s27 + $0x820] sm:$0xff]  ;;  %v639_v13 = vld [vmem:[%s14823_s27 + $0x808] sm:$0xff] }
 0x119   : > { %v643_v14 = vld [vmem:[%s14823_s27 + $0x828] sm:$0xff]  ;;  %v12707_v18 = vcombine.high %v638_v10, %v642_v11  ;;  %v12706_v26 = vcombine.low %v638_v10, %v642_v11 }
 0x11a   : > { %v12709_v19 = vcombine.high %v639_v13, %v643_v14  ;;  %v12708_v27 = vcombine.low %v639_v13, %v643_v14  ;;  %v695_v10 = vld [vmem:[%s14823_s27 + $0x9c8] sm:$0xff]  ;;  %v12756_v14 = vcombine.low %v687_v2, %v691_v3 }
 0x11b   : > { %9740 = vmatpush1.bf16.msra.mxu0 %v12642_v20  ;;  %10232 = vmatpush1.bf16.msra.mxu1 %v12644_v21  ;;  %v646_v20 = vld [vmem:[%s14823_s27 + $0x840] sm:$0xff]  ;;  %v699_v11 = vld [vmem:[%s14823_s27 + $0x9e8] sm:$0xff] }
 0x11c   : > { %9741 = vmatprep.subr.bf16.mxu0 %v12651_v22  ;;  %10233 = vmatprep.subr.bf16.mxu1 %v12653_v23  ;;  %v650_v21 = vld [vmem:[%s14823_s27 + $0x860] sm:$0xff]  ;;  %v14996_v22 = vcombine.low %v14922_v15, %v14922_v15  ;;  %v647_v23 = vld [vmem:[%s14823_s27 + $0x848] sm:$0xff]  ;;  %v15006_v15 = vcombine.high %v15000_v25, %v15000_v25 }
 0x11d   : > { %v12714_v34 = vcombine.low %v646_v20, %v650_v21  ;;  %v12716_v35 = vcombine.low %v647_v23, %v651_v24 }
 0x11f   : > { %9742 = vmatpush1.bf16.msra.mxu0 %v12650_v28  ;;  %10234 = vmatpush1.bf16.msra.mxu1 %v12652_v29  ;;  %v12715_v28 = vcombine.high %v646_v20, %v650_v21  ;;  %v12717_v29 = vcombine.high %v647_v23, %v651_v24  ;;  %v703_v20 = vld [vmem:[%s14823_s27 + $0xa08] sm:$0xff]  ;;  %v12764_v24 = vcombine.low %v695_v10, %v699_v11 }
 0x120   : > { %9743 = vmatprep.subr.bf16.mxu0 %v12659_v30  ;;  %10235 = vmatprep.subr.bf16.mxu1 %v12661_v31  ;;  %v654_v30 = vld [vmem:[%s14823_s27 + $0x880] sm:$0xff]  ;;  %v707_v21 = vld [vmem:[%s14823_s27 + $0xa28] sm:$0xff] }
 0x121   : > { %v658_v31 = vld [vmem:[%s14823_s27 + $0x8a0] sm:$0xff] }
 0x122   : > { %v12722_v42 = vcombine.low %v654_v30, %v658_v31 }
 0x123   : > { %9744 = vmatpush1.bf16.msra.mxu0 %v12658_v36  ;;  %10236 = vmatpush1.bf16.msra.mxu1 %v12660_v37  ;;  %v12723_v36 = vcombine.high %v654_v30, %v658_v31  ;;  %v12725_v37 = vcombine.high %v655_v32, %v659_v33  ;;  %v711_v30 = vld [vmem:[%s14823_s27 + $0xa48] sm:$0xff]  ;;  %v12772_v33 = vcombine.low %v703_v20, %v707_v21 }
 0x124   : > { %9745 = vmatprep.subr.bf16.mxu0 %v12667_v38  ;;  %10237 = vmatprep.subr.bf16.mxu1 %v12669_v39  ;;  %v662_v38 = vld [vmem:[%s14823_s27 + $0x8c0] sm:$0xff]  ;;  %v715_v31 = vld [vmem:[%s14823_s27 + $0xa68] sm:$0xff] }
 0x125   : > { %v666_v39 = vld [vmem:[%s14823_s27 + $0x8e0] sm:$0xff] }
 0x126   : > { %v12730_v50 = vcombine.low %v662_v38, %v666_v39 }
 0x127   : > { %9746 = vmatpush1.bf16.msra.mxu0 %v12666_v44  ;;  %10238 = vmatpush1.bf16.msra.mxu1 %v12668_v45  ;;  %v12731_v44 = vcombine.high %v662_v38, %v666_v39  ;;  %v12733_v45 = vcombine.high %v663_v40, %v667_v41  ;;  %v719_v38 = vld [vmem:[%s14823_s27 + $0xa88] sm:$0xff]  ;;  %v12780_v41 = vcombine.low %v711_v30, %v715_v31 }
 0x128   : > { %9747 = vmatprep.subr.bf16.mxu0 %v12675_v46  ;;  %10239 = vmatprep.subr.bf16.mxu1 %v12677_v47  ;;  %v670_v46 = vld [vmem:[%s14823_s27 + $0x900] sm:$0xff]  ;;  %v723_v39 = vld [vmem:[%s14823_s27 + $0xaa8] sm:$0xff] }
 0x129   : > { %v674_v47 = vld [vmem:[%s14823_s27 + $0x920] sm:$0xff] }
 0x12a   : > { %v12738_v60 = vcombine.low %v670_v46, %v674_v47 }
 0x12b   : > { %9748 = vmatpush1.bf16.msra.mxu0 %v12674_v52  ;;  %10240 = vmatpush1.bf16.msra.mxu1 %v12676_v54  ;;  %v12739_v52 = vcombine.high %v670_v46, %v674_v47  ;;  %v12741_v54 = vcombine.high %v671_v48, %v675_v49  ;;  %v727_v46 = vld [vmem:[%s14823_s27 + $0xac8] sm:$0xff]  ;;  %v12788_v49 = vcombine.low %v719_v38, %v723_v39 }
 0x12c   : > { %9749 = vmatprep.subr.bf16.mxu0 %v12683_v55  ;;  %10241 = vmatprep.subr.bf16.mxu1 %v12685_v56  ;;  %v678_v55 = vld [vmem:[%s14823_s27 + $0x940] sm:$0xff]  ;;  %v731_v47 = vld [vmem:[%s14823_s27 + $0xae8] sm:$0xff] }
 0x12d   : > { %v682_v56 = vld [vmem:[%s14823_s27 + $0x960] sm:$0xff] }
 0x12e   : > { %v12746_v4 = vcombine.low %v678_v55, %v682_v56 }
 0x12f   : > { %9750 = vmatpush1.bf16.msra.mxu0 %v12682_v62  ;;  %10242 = vmatpush1.bf16.msra.mxu1 %v12684_v63  ;;  %v12747_v62 = vcombine.high %v678_v55, %v682_v56  ;;  %v12749_v63 = vcombine.high %v679_v58, %v683_v59  ;;  %v735_v55 = vld [vmem:[%s14823_s27 + $0xb08] sm:$0xff]  ;;  %v12796_v59 = vcombine.low %v727_v46, %v731_v47 }
 0x130   : > { %9751 = vmatprep.subr.bf16.mxu0 %v12691_v0  ;;  %10243 = vmatprep.subr.bf16.mxu1 %v12693_v1  ;;  %v686_v0 = vld [vmem:[%s14823_s27 + $0x980] sm:$0xff]  ;;  %v739_v56 = vld [vmem:[%s14823_s27 + $0xb28] sm:$0xff] }
 0x131   : > { %v690_v1 = vld [vmem:[%s14823_s27 + $0x9a0] sm:$0xff] }
 0x132   : > { %v12754_v13 = vcombine.low %v686_v0, %v690_v1 }
 0x133   : > { %9752 = vmatpush1.bf16.msra.mxu0 %v12690_v6  ;;  %10244 = vmatpush1.bf16.msra.mxu1 %v12692_v7  ;;  %v12755_v6 = vcombine.high %v686_v0, %v690_v1  ;;  %v12757_v7 = vcombine.high %v687_v2, %v691_v3  ;;  %v743_v0 = vld [vmem:[%s14823_s27 + $0xb48] sm:$0xff]  ;;  %v12804_v3 = vcombine.low %v735_v55, %v739_v56 }
 0x134   : > { %9753 = vmatprep.subr.bf16.mxu0 %v12699_v8  ;;  %10245 = vmatprep.subr.bf16.mxu1 %v12701_v9  ;;  %v694_v8 = vld [vmem:[%s14823_s27 + $0x9c0] sm:$0xff]  ;;  %v747_v1 = vld [vmem:[%s14823_s27 + $0xb68] sm:$0xff] }
 0x135   : > { %v698_v9 = vld [vmem:[%s14823_s27 + $0x9e0] sm:$0xff] }
 0x136   : > { %v12762_v23 = vcombine.low %v694_v8, %v698_v9 }
 0x137   : > { %9754 = vmatpush1.bf16.msra.mxu0 %v12698_v16  ;;  %10246 = vmatpush1.bf16.msra.mxu1 %v12700_v17  ;;  %v12763_v16 = vcombine.high %v694_v8, %v698_v9  ;;  %v12765_v17 = vcombine.high %v695_v10, %v699_v11  ;;  %v751_v8 = vld [vmem:[%s14823_s27 + $0xb88] sm:$0xff]  ;;  %v12812_v11 = vcombine.low %v743_v0, %v747_v1 }
 0x138   : > { %9764 = vmatprep.subr.bf16.mxu0 %v12707_v18  ;;  %10256 = vmatprep.subr.bf16.mxu1 %v12709_v19  ;;  %v702_v18 = vld [vmem:[%s14823_s27 + $0xa00] sm:$0xff]  ;;  %v755_v9 = vld [vmem:[%s14823_s27 + $0xba8] sm:$0xff] }
 0x139   : > { %v706_v19 = vld [vmem:[%s14823_s27 + $0xa20] sm:$0xff] }
 0x13a   : > { %9756 = vmatmul.mubr.bf16.vlgmr.msra.gmra.mrb[0].mxu0 %v14996_v22  ;;  %10248 = vmatmul.mubr.bf16.vlgmr.msra.gmra.mrb[0].mxu1 %v14996_v22  ;;  %v12770_v32 = vcombine.low %v702_v18, %v706_v19 }
 0x13b   : > { %9765 = vmatpush1.bf16.msra.mxu0 %v12706_v26  ;;  %10257 = vmatpush1.bf16.msra.mxu1 %v12708_v27  ;;  %v12771_v26 = vcombine.high %v702_v18, %v706_v19  ;;  %v12773_v27 = vcombine.high %v703_v20, %v707_v21  ;;  %v759_v18 = vld [vmem:[%s14823_s27 + $0xbc8] sm:$0xff]  ;;  %v12820_v21 = vcombine.low %v751_v8, %v755_v9 }
 0x13c   : > { %9766 = vmatprep.subr.bf16.mxu0 %v12715_v28  ;;  %10258 = vmatprep.subr.bf16.mxu1 %v12717_v29  ;;  %v710_v28 = vld [vmem:[%s14823_s27 + $0xa40] sm:$0xff]  ;;  %v763_v19 = vld [vmem:[%s14823_s27 + $0xbe8] sm:$0xff] }
 0x13d   : > { %9796 = vmatprep.mubr.bf16.mxu0 %v15006_v15  ;;  %10288 = vmatprep.mubr.bf16.mxu1 %v15006_v15  ;;  %v714_v29 = vld [vmem:[%s14823_s27 + $0xa60] sm:$0xff] }
 0x13e   : > { %v12778_v40 = vcombine.low %v710_v28, %v714_v29 }
 0x13f   : > { %9767 = vmatpush1.bf16.msra.mxu0 %v12714_v34  ;;  %10259 = vmatpush1.bf16.msra.mxu1 %v12716_v35  ;;  %v12779_v34 = vcombine.high %v710_v28, %v714_v29  ;;  %v12781_v35 = vcombine.high %v711_v30, %v715_v31  ;;  %v767_v28 = vld [vmem:[%s14823_s27 + $0xc08] sm:$0xff]  ;;  %v12828_v31 = vcombine.low %v759_v18, %v763_v19 }
 0x140   : > { %9768 = vmatprep.subr.bf16.mxu0 %v12723_v36  ;;  %10260 = vmatprep.subr.bf16.mxu1 %v12725_v37  ;;  %v718_v36 = vld [vmem:[%s14823_s27 + $0xa80] sm:$0xff]  ;;  %v771_v29 = vld [vmem:[%s14823_s27 + $0xc28] sm:$0xff] }
 0x141   : > { %v722_v37 = vld [vmem:[%s14823_s27 + $0xaa0] sm:$0xff] }
 0x142   : > { %v12786_v48 = vcombine.low %v718_v36, %v722_v37 }
 0x143   : > { %9769 = vmatpush1.bf16.msra.mxu0 %v12722_v42  ;;  %10261 = vmatpush1.bf16.msra.mxu1 %v12724_v43  ;;  %v12787_v42 = vcombine.high %v718_v36, %v722_v37  ;;  %v12789_v43 = vcombine.high %v719_v38, %v723_v39  ;;  %v15074_v36 = vcombine.low %v15000_v25, %v15000_v25  ;;  %v775_v37 = vld [vmem:[%s14823_s27 + $0xc48] sm:$0xff]  ;;  %v15078_v39 = vld [vmem:[#allocation2 + $0x18] sm:$0xff] }
 0x144   : > { %9770 = vmatprep.subr.bf16.mxu0 %v12731_v44  ;;  %10262 = vmatprep.subr.bf16.mxu1 %v12733_v45  ;;  %v726_v44 = vld [vmem:[%s14823_s27 + $0xac0] sm:$0xff]  ;;  %v779_v38 = vld [vmem:[%s14823_s27 + $0xc68] sm:$0xff]  ;;  %v15084_v25 = vcombine.high %v15078_v39, %v15078_v39 }
 0x145   : > { %v730_v45 = vld [vmem:[%s14823_s27 + $0xae0] sm:$0xff] }
 0x146   : > { %v12794_v58 = vcombine.low %v726_v44, %v730_v45 }
 0x147   : > { %9771 = vmatpush1.bf16.msra.mxu0 %v12730_v50  ;;  %10263 = vmatpush1.bf16.msra.mxu1 %v12732_v51  ;;  %v12795_v50 = vcombine.high %v726_v44, %v730_v45  ;;  %v12797_v51 = vcombine.high %v727_v46, %v731_v47  ;;  %v782_v44 = vld [vmem:[%s14823_s27 + $0xc80] sm:$0xff]  ;;  %v783_v46 = vld [vmem:[%s14823_s27 + $0xc88] sm:$0xff] }
 0x148   : > { %9772 = vmatprep.subr.bf16.mxu0 %v12739_v52  ;;  %10264 = vmatprep.subr.bf16.mxu1 %v12741_v54  ;;  %v734_v52 = vld [vmem:[%s14823_s27 + $0xb00] sm:$0xff]  ;;  %v787_v47 = vld [vmem:[%s14823_s27 + $0xca8] sm:$0xff] }
 0x149   : > { %v738_v54 = vld [vmem:[%s14823_s27 + $0xb20] sm:$0xff] }
 0x14a   : > { %v12802_v2 = vcombine.low %v734_v52, %v738_v54  ;;  %v786_v45 = vld [vmem:[%s14823_s27 + $0xca0] sm:$0xff] }
 0x14b   : > { %9773 = vmatpush1.bf16.msra.mxu0 %v12738_v60  ;;  %10265 = vmatpush1.bf16.msra.mxu1 %v12740_v61  ;;  %v12803_v60 = vcombine.high %v734_v52, %v738_v54  ;;  %v12805_v61 = vcombine.high %v735_v55, %v739_v56  ;;  %v790_v52 = vld [vmem:[%s14823_s27 + $0xcc0] sm:$0xff]  ;;  %v791_v55 = vld [vmem:[%s14823_s27 + $0xcc8] sm:$0xff] }
 0x14c   : > { %9774 = vmatprep.subr.bf16.mxu0 %v12747_v62  ;;  %10266 = vmatprep.subr.bf16.mxu1 %v12749_v63  ;;  %v742_v62 = vld [vmem:[%s14823_s27 + $0xb40] sm:$0xff]  ;;  %v795_v56 = vld [vmem:[%s14823_s27 + $0xce8] sm:$0xff] }
 0x14d   : > { %v746_v63 = vld [vmem:[%s14823_s27 + $0xb60] sm:$0xff] }
 0x14e   : > { %v12810_v10 = vcombine.low %v742_v62, %v746_v63  ;;  %v794_v54 = vld [vmem:[%s14823_s27 + $0xce0] sm:$0xff] }
 0x14f   : > { %9775 = vmatpush1.bf16.msra.mxu0 %v12746_v4  ;;  %10267 = vmatpush1.bf16.msra.mxu1 %v12748_v5  ;;  %v12811_v4 = vcombine.high %v742_v62, %v746_v63  ;;  %v12813_v5 = vcombine.high %v743_v0, %v747_v1  ;;  %v798_v62 = vld [vmem:[%s14823_s27 + $0xd00] sm:$0xff]  ;;  %v799_v0 = vld [vmem:[%s14823_s27 + $0xd08] sm:$0xff] }
 0x150   : > { %9776 = vmatprep.subr.bf16.mxu0 %v12755_v6  ;;  %10268 = vmatprep.subr.bf16.mxu1 %v12757_v7  ;;  %v750_v6 = vld [vmem:[%s14823_s27 + $0xb80] sm:$0xff]  ;;  %v803_v1 = vld [vmem:[%s14823_s27 + $0xd28] sm:$0xff] }
 0x151   : > { %v754_v7 = vld [vmem:[%s14823_s27 + $0xba0] sm:$0xff] }
 0x152   : > { %v12818_v20 = vcombine.low %v750_v6, %v754_v7  ;;  %v802_v63 = vld [vmem:[%s14823_s27 + $0xd20] sm:$0xff] }
 0x153   : > { %9777 = vmatpush1.bf16.msra.mxu0 %v12754_v13  ;;  %10269 = vmatpush1.bf16.msra.mxu1 %v12756_v14  ;;  %v12819_v13 = vcombine.high %v750_v6, %v754_v7  ;;  %v12821_v14 = vcombine.high %v751_v8, %v755_v9  ;;  %v806_v6 = vld [vmem:[%s14823_s27 + $0xd40] sm:$0xff]  ;;  %v807_v8 = vld [vmem:[%s14823_s27 + $0xd48] sm:$0xff] }
 0x154   : > { %9778 = vmatprep.subr.bf16.mxu0 %v12763_v16  ;;  %10270 = vmatprep.subr.bf16.mxu1 %v12765_v17  ;;  %v758_v16 = vld [vmem:[%s14823_s27 + $0xbc0] sm:$0xff]  ;;  %v811_v9 = vld [vmem:[%s14823_s27 + $0xd68] sm:$0xff] }
 0x155   : > { %v762_v17 = vld [vmem:[%s14823_s27 + $0xbe0] sm:$0xff] }
 0x156   : > { %v12826_v30 = vcombine.low %v758_v16, %v762_v17  ;;  %v810_v7 = vld [vmem:[%s14823_s27 + $0xd60] sm:$0xff] }
 0x157   : > { %9779 = vmatpush1.bf16.msra.mxu0 %v12762_v23  ;;  %10271 = vmatpush1.bf16.msra.mxu1 %v12764_v24  ;;  %v12827_v23 = vcombine.high %v758_v16, %v762_v17  ;;  %v12829_v24 = vcombine.high %v759_v18, %v763_v19  ;;  %v814_v16 = vld [vmem:[%s14823_s27 + $0xd80] sm:$0xff]  ;;  %v815_v18 = vld [vmem:[%s14823_s27 + $0xd88] sm:$0xff] }
 0x158   : > { %9780 = vmatprep.subr.bf16.mxu0 %v12771_v26  ;;  %10272 = vmatprep.subr.bf16.mxu1 %v12773_v27  ;;  %v766_v26 = vld [vmem:[%s14823_s27 + $0xc00] sm:$0xff]  ;;  %v819_v19 = vld [vmem:[%s14823_s27 + $0xda8] sm:$0xff] }
 0x159   : > { %v770_v27 = vld [vmem:[%s14823_s27 + $0xc20] sm:$0xff] }
 0x15a   : > { %v818_v17 = vld [vmem:[%s14823_s27 + $0xda0] sm:$0xff] }
 0x15b   : > { %9781 = vmatpush1.bf16.msra.mxu0 %v12770_v32  ;;  %10273 = vmatpush1.bf16.msra.mxu1 %v12772_v33  ;;  %v12835_v32 = vcombine.high %v766_v26, %v770_v27  ;;  %v12837_v33 = vcombine.high %v767_v28, %v771_v29 }
 0x15c   : > { %9782 = vmatprep.subr.bf16.mxu0 %v12779_v34  ;;  %10274 = vmatprep.subr.bf16.mxu1 %v12781_v35  ;;  %v774_v34 = vld [vmem:[%s14823_s27 + $0xc40] sm:$0xff] }
 0x15d   : > { %v778_v35 = vld [vmem:[%s14823_s27 + $0xc60] sm:$0xff] }
 0x15f   : > { %9783 = vmatpush1.bf16.msra.mxu0 %v12778_v40  ;;  %10275 = vmatpush1.bf16.msra.mxu1 %v12780_v41  ;;  %v12834_v40 = vcombine.low %v766_v26, %v770_v27  ;;  %v12836_v41 = vcombine.low %v767_v28, %v771_v29  ;;  %v822_v26 = vld [vmem:[%s14823_s27 + $0xdc0] sm:$0xff]  ;;  %v823_v28 = vld [vmem:[%s14823_s27 + $0xdc8] sm:$0xff] }
 0x160   : > { %9784 = vmatprep.subr.bf16.mxu0 %v12787_v42  ;;  %10276 = vmatprep.subr.bf16.mxu1 %v12789_v43  ;;  %v12843_v42 = vcombine.high %v774_v34, %v778_v35  ;;  %v12845_v43 = vcombine.high %v775_v37, %v779_v38  ;;  %v826_v27 = vld [vmem:[%s14823_s27 + $0xde0] sm:$0xff]  ;;  %v827_v29 = vld [vmem:[%s14823_s27 + $0xde8] sm:$0xff] }
 0x163   : > { %9785 = vmatpush1.bf16.msra.mxu0 %v12786_v48  ;;  %10277 = vmatpush1.bf16.msra.mxu1 %v12788_v49  ;;  %v12842_v48 = vcombine.low %v774_v34, %v778_v35  ;;  %v12844_v49 = vcombine.low %v775_v37, %v779_v38  ;;  %v830_v34 = vld [vmem:[%s14823_s27 + $0xe00] sm:$0xff]  ;;  %v831_v37 = vld [vmem:[%s14823_s27 + $0xe08] sm:$0xff] }
 0x164   : > { %9786 = vmatprep.subr.bf16.mxu0 %v12795_v50  ;;  %10278 = vmatprep.subr.bf16.mxu1 %v12797_v51  ;;  %v12851_v50 = vcombine.high %v782_v44, %v786_v45  ;;  %v12853_v51 = vcombine.high %v783_v46, %v787_v47  ;;  %v834_v35 = vld [vmem:[%s14823_s27 + $0xe20] sm:$0xff]  ;;  %v835_v38 = vld [vmem:[%s14823_s27 + $0xe28] sm:$0xff] }
 0x167   : > { %9787 = vmatpush1.bf16.msra.mxu0 %v12794_v58  ;;  %10279 = vmatpush1.bf16.msra.mxu1 %v12796_v59  ;;  %v12850_v58 = vcombine.low %v782_v44, %v786_v45  ;;  %v12852_v59 = vcombine.low %v783_v46, %v787_v47  ;;  %v838_v44 = vld [vmem:[%s14823_s27 + $0xe40] sm:$0xff]  ;;  %v839_v46 = vld [vmem:[%s14823_s27 + $0xe48] sm:$0xff] }
 0x168   : > { %9788 = vmatprep.subr.bf16.mxu0 %v12803_v60  ;;  %10280 = vmatprep.subr.bf16.mxu1 %v12805_v61  ;;  %v12859_v60 = vcombine.high %v790_v52, %v794_v54  ;;  %v12861_v61 = vcombine.high %v791_v55, %v795_v56  ;;  %v842_v45 = vld [vmem:[%s14823_s27 + $0xe60] sm:$0xff]  ;;  %v843_v47 = vld [vmem:[%s14823_s27 + $0xe68] sm:$0xff] }
 0x16b   : > { %9789 = vmatpush1.bf16.msra.mxu0 %v12802_v2  ;;  %10281 = vmatpush1.bf16.msra.mxu1 %v12804_v3  ;;  %v12858_v2 = vcombine.low %v790_v52, %v794_v54  ;;  %v12860_v3 = vcombine.low %v791_v55, %v795_v56  ;;  %v846_v52 = vld [vmem:[%s14823_s27 + $0xe80] sm:$0xff]  ;;  %v847_v55 = vld [vmem:[%s14823_s27 + $0xe88] sm:$0xff] }
 0x16c   : > { %9790 = vmatprep.subr.bf16.mxu0 %v12811_v4  ;;  %10282 = vmatprep.subr.bf16.mxu1 %v12813_v5  ;;  %v12867_v4 = vcombine.high %v798_v62, %v802_v63  ;;  %v12869_v5 = vcombine.high %v799_v0, %v803_v1  ;;  %v850_v54 = vld [vmem:[%s14823_s27 + $0xea0] sm:$0xff]  ;;  %v851_v56 = vld [vmem:[%s14823_s27 + $0xea8] sm:$0xff] }
 0x16f   : > { %9791 = vmatpush1.bf16.msra.mxu0 %v12810_v10  ;;  %10283 = vmatpush1.bf16.msra.mxu1 %v12812_v11  ;;  %v12866_v10 = vcombine.low %v798_v62, %v802_v63  ;;  %v12868_v11 = vcombine.low %v799_v0, %v803_v1  ;;  %v854_v62 = vld [vmem:[%s14823_s27 + $0xec0] sm:$0xff]  ;;  %v855_v0 = vld [vmem:[%s14823_s27 + $0xec8] sm:$0xff] }
 0x170   : > { %9792 = vmatprep.subr.bf16.mxu0 %v12819_v13  ;;  %10284 = vmatprep.subr.bf16.mxu1 %v12821_v14  ;;  %v12875_v13 = vcombine.high %v806_v6, %v810_v7  ;;  %v12877_v14 = vcombine.high %v807_v8, %v811_v9  ;;  %v858_v63 = vld [vmem:[%s14823_s27 + $0xee0] sm:$0xff]  ;;  %v859_v1 = vld [vmem:[%s14823_s27 + $0xee8] sm:$0xff] }
 0x173   : > { %9793 = vmatpush1.bf16.msra.mxu0 %v12818_v20  ;;  %10285 = vmatpush1.bf16.msra.mxu1 %v12820_v21  ;;  %v12874_v20 = vcombine.low %v806_v6, %v810_v7  ;;  %v12876_v21 = vcombine.low %v807_v8, %v811_v9  ;;  %v862_v6 = vld [vmem:[%s14823_s27 + $0xf00] sm:$0xff]  ;;  %v863_v8 = vld [vmem:[%s14823_s27 + $0xf08] sm:$0xff] }
 0x174   : > { %9794 = vmatprep.subr.bf16.mxu0 %v12827_v23  ;;  %10286 = vmatprep.subr.bf16.mxu1 %v12829_v24  ;;  %v12883_v23 = vcombine.high %v814_v16, %v818_v17  ;;  %v12885_v24 = vcombine.high %v815_v18, %v819_v19  ;;  %v866_v7 = vld [vmem:[%s14823_s27 + $0xf20] sm:$0xff]  ;;  %v867_v9 = vld [vmem:[%s14823_s27 + $0xf28] sm:$0xff] }
 0x177   : > { %9795 = vmatpush1.bf16.msra.mxu0 %v12826_v30  ;;  %10287 = vmatpush1.bf16.msra.mxu1 %v12828_v31  ;;  %v12882_v30 = vcombine.low %v814_v16, %v818_v17  ;;  %v12884_v31 = vcombine.low %v815_v18, %v819_v19  ;;  %v870_v16 = vld [vmem:[%s14823_s27 + $0xf40] sm:$0xff]  ;;  %v871_v18 = vld [vmem:[%s14823_s27 + $0xf48] sm:$0xff] }
 0x178   : > { %9805 = vmatprep.subr.bf16.mxu0 %v12835_v32  ;;  %10297 = vmatprep.subr.bf16.mxu1 %v12837_v33  ;;  %v12891_v32 = vcombine.high %v822_v26, %v826_v27  ;;  %v12893_v33 = vcombine.high %v823_v28, %v827_v29  ;;  %v874_v17 = vld [vmem:[%s14823_s27 + $0xf60] sm:$0xff]  ;;  %v875_v19 = vld [vmem:[%s14823_s27 + $0xf68] sm:$0xff] }
 0x17a   : > { %9797 = vmatmul.mubr.bf16.vlgmr.msra.gmra.mrb[0].mxu0 %v15074_v36  ;;  %10289 = vmatmul.mubr.bf16.vlgmr.msra.gmra.mrb[0].mxu1 %v15074_v36 }
 0x17b   : > { %9806 = vmatpush1.bf16.msra.mxu0 %v12834_v40  ;;  %10298 = vmatpush1.bf16.msra.mxu1 %v12836_v41  ;;  %v12890_v40 = vcombine.low %v822_v26, %v826_v27  ;;  %v12892_v41 = vcombine.low %v823_v28, %v827_v29  ;;  %v878_v26 = vld [vmem:[%s14823_s27 + $0xf80] sm:$0xff]  ;;  %v879_v28 = vld [vmem:[%s14823_s27 + $0xf88] sm:$0xff] }
 0x17c   : > { %9807 = vmatprep.subr.bf16.mxu0 %v12843_v42  ;;  %10299 = vmatprep.subr.bf16.mxu1 %v12845_v43  ;;  %v12899_v42 = vcombine.high %v830_v34, %v834_v35  ;;  %v12901_v43 = vcombine.high %v831_v37, %v835_v38  ;;  %v882_v27 = vld [vmem:[%s14823_s27 + $0xfa0] sm:$0xff]  ;;  %v883_v29 = vld [vmem:[%s14823_s27 + $0xfa8] sm:$0xff] }
 0x17d   : > { %9837 = vmatprep.mubr.bf16.mxu0 %v15084_v25  ;;  %10329 = vmatprep.mubr.bf16.mxu1 %v15084_v25 }
 0x17f   : > { %9808 = vmatpush1.bf16.msra.mxu0 %v12842_v48  ;;  %10300 = vmatpush1.bf16.msra.mxu1 %v12844_v49  ;;  %v12898_v48 = vcombine.low %v830_v34, %v834_v35  ;;  %v12900_v49 = vcombine.low %v831_v37, %v835_v38  ;;  %v886_v34 = vld [vmem:[%s14823_s27 + $0xfc0] sm:$0xff]  ;;  %v887_v37 = vld [vmem:[%s14823_s27 + $0xfc8] sm:$0xff] }
 0x180   : > { %9809 = vmatprep.subr.bf16.mxu0 %v12851_v50  ;;  %10301 = vmatprep.subr.bf16.mxu1 %v12853_v51  ;;  %v12907_v50 = vcombine.high %v838_v44, %v842_v45  ;;  %v12909_v51 = vcombine.high %v839_v46, %v843_v47  ;;  %v890_v35 = vld [vmem:[%s14823_s27 + $0xfe0] sm:$0xff]  ;;  %v891_v38 = vld [vmem:[%s14823_s27 + $0xfe8] sm:$0xff] }
 0x183   : > { %9810 = vmatpush1.bf16.msra.mxu0 %v12850_v58  ;;  %10302 = vmatpush1.bf16.msra.mxu1 %v12852_v59  ;;  %v12906_v58 = vcombine.low %v838_v44, %v842_v45  ;;  %v12908_v59 = vcombine.low %v839_v46, %v843_v47  ;;  %v894_v44 = vld [vmem:[%s14823_s27 + $0x1000] sm:$0xff]  ;;  %v895_v46 = vld [vmem:[%s14823_s27 + $0x1008] sm:$0xff] }
 0x184   : > { %9811 = vmatprep.subr.bf16.mxu0 %v12859_v60  ;;  %10303 = vmatprep.subr.bf16.mxu1 %v12861_v61  ;;  %v12915_v60 = vcombine.high %v846_v52, %v850_v54  ;;  %v12917_v61 = vcombine.high %v847_v55, %v851_v56  ;;  %v898_v45 = vld [vmem:[%s14823_s27 + $0x1020] sm:$0xff]  ;;  %v899_v47 = vld [vmem:[%s14823_s27 + $0x1028] sm:$0xff] }
 0x187   : > { %9812 = vmatpush1.bf16.msra.mxu0 %v12858_v2  ;;  %10304 = vmatpush1.bf16.msra.mxu1 %v12860_v3  ;;  %v12914_v2 = vcombine.low %v846_v52, %v850_v54  ;;  %v12916_v3 = vcombine.low %v847_v55, %v851_v56  ;;  %v902_v52 = vld [vmem:[%s14823_s27 + $0x1040] sm:$0xff]  ;;  %v15152_v55 = vcombine.low %v15078_v39, %v15078_v39  ;;  %v903_v56 = vld [vmem:[%s14823_s27 + $0x1048] sm:$0xff] }
 0x188   : > { %9813 = vmatprep.subr.bf16.mxu0 %v12867_v4  ;;  %10305 = vmatprep.subr.bf16.mxu1 %v12869_v5  ;;  %v12923_v4 = vcombine.high %v854_v62, %v858_v63  ;;  %v12925_v5 = vcombine.high %v855_v0, %v859_v1  ;;  %v906_v54 = vld [vmem:[%s14823_s27 + $0x1060] sm:$0xff] }
 0x18b   : > { %9814 = vmatpush1.bf16.msra.mxu0 %v12866_v10  ;;  %10306 = vmatpush1.bf16.msra.mxu1 %v12868_v11  ;;  %v12922_v10 = vcombine.low %v854_v62, %v858_v63  ;;  %v12924_v11 = vcombine.low %v855_v0, %v859_v1  ;;  %v12971_v62 = vcombine.high %v902_v52, %v906_v54  ;;  %v910_v0 = vld [vmem:[%s14823_s27 + $0x1080] sm:$0xff] }
 0x18c   : > { %9815 = vmatprep.subr.bf16.mxu0 %v12875_v13  ;;  %10307 = vmatprep.subr.bf16.mxu1 %v12877_v14  ;;  %v12931_v13 = vcombine.high %v862_v6, %v866_v7  ;;  %v12933_v14 = vcombine.high %v863_v8, %v867_v9  ;;  %v914_v1 = vld [vmem:[%s14823_s27 + $0x10a0] sm:$0xff] }
 0x18f   : > { %9816 = vmatpush1.bf16.msra.mxu0 %v12874_v20  ;;  %10308 = vmatpush1.bf16.msra.mxu1 %v12876_v21  ;;  %v12930_v20 = vcombine.low %v862_v6, %v866_v7  ;;  %v12932_v21 = vcombine.low %v863_v8, %v867_v9  ;;  %v12979_v6 = vcombine.high %v910_v0, %v914_v1  ;;  %v918_v8 = vld [vmem:[%s14823_s27 + $0x10c0] sm:$0xff] }
 0x190   : > { %9817 = vmatprep.subr.bf16.mxu0 %v12883_v23  ;;  %10309 = vmatprep.subr.bf16.mxu1 %v12885_v24  ;;  %v12939_v23 = vcombine.high %v870_v16, %v874_v17  ;;  %v12941_v24 = vcombine.high %v871_v18, %v875_v19  ;;  %v922_v9 = vld [vmem:[%s14823_s27 + $0x10e0] sm:$0xff] }
 0x193   : > { %9818 = vmatpush1.bf16.msra.mxu0 %v12882_v30  ;;  %10310 = vmatpush1.bf16.msra.mxu1 %v12884_v31  ;;  %v12938_v30 = vcombine.low %v870_v16, %v874_v17  ;;  %v12940_v31 = vcombine.low %v871_v18, %v875_v19  ;;  %v12987_v16 = vcombine.high %v918_v8, %v922_v9  ;;  %v926_v18 = vld [vmem:[%s14823_s27 + $0x1100] sm:$0xff] }
 0x194   : > { %9819 = vmatprep.subr.bf16.mxu0 %v12891_v32  ;;  %10311 = vmatprep.subr.bf16.mxu1 %v12893_v33  ;;  %v12947_v32 = vcombine.high %v878_v26, %v882_v27  ;;  %v12949_v33 = vcombine.high %v879_v28, %v883_v29  ;;  %v930_v19 = vld [vmem:[%s14823_s27 + $0x1120] sm:$0xff] }
 0x197   : > { %9820 = vmatpush1.bf16.msra.mxu0 %v12890_v40  ;;  %10312 = vmatpush1.bf16.msra.mxu1 %v12892_v41  ;;  %v12946_v40 = vcombine.low %v878_v26, %v882_v27  ;;  %v12948_v41 = vcombine.low %v879_v28, %v883_v29  ;;  %v12995_v26 = vcombine.high %v926_v18, %v930_v19  ;;  %v934_v28 = vld [vmem:[%s14823_s27 + $0x1140] sm:$0xff] }
 0x198   : > { %9821 = vmatprep.subr.bf16.mxu0 %v12899_v42  ;;  %10313 = vmatprep.subr.bf16.mxu1 %v12901_v43  ;;  %v12955_v42 = vcombine.high %v886_v34, %v890_v35  ;;  %v12957_v43 = vcombine.high %v887_v37, %v891_v38  ;;  %v938_v29 = vld [vmem:[%s14823_s27 + $0x1160] sm:$0xff] }
 0x19b   : > { %9822 = vmatpush1.bf16.msra.mxu0 %v12898_v48  ;;  %10314 = vmatpush1.bf16.msra.mxu1 %v12900_v49  ;;  %v12954_v48 = vcombine.low %v886_v34, %v890_v35  ;;  %v12956_v49 = vcombine.low %v887_v37, %v891_v38  ;;  %v13003_v34 = vcombine.high %v934_v28, %v938_v29  ;;  %v942_v37 = vld [vmem:[%s14823_s27 + $0x1180] sm:$0xff] }
 0x19c   : > { %9823 = vmatprep.subr.bf16.mxu0 %v12907_v50  ;;  %10315 = vmatprep.subr.bf16.mxu1 %v12909_v51  ;;  %v12963_v50 = vcombine.high %v894_v44, %v898_v45  ;;  %v12965_v51 = vcombine.high %v895_v46, %v899_v47  ;;  %v946_v38 = vld [vmem:[%s14823_s27 + $0x11a0] sm:$0xff] }
 0x19f   : > { %9824 = vmatpush1.bf16.msra.mxu0 %v12906_v58  ;;  %10316 = vmatpush1.bf16.msra.mxu1 %v12908_v59  ;;  %v907_v58 = vld [vmem:[%s14823_s27 + $0x1068] sm:$0xff]  ;;  %v15156_v59 = vld [vmem:[#allocation2 + $0x20] sm:$0xff] }
 0x1a0   : > { %9825 = vmatprep.subr.bf16.mxu0 %v12915_v60  ;;  %10317 = vmatprep.subr.bf16.mxu1 %v12917_v61  ;;  %v12962_v60 = vcombine.low %v894_v44, %v898_v45  ;;  %v12964_v61 = vcombine.low %v895_v46, %v899_v47  ;;  %v12973_v63 = vcombine.high %v903_v56, %v907_v58  ;;  %v950_v46 = vld [vmem:[%s14823_s27 + $0x11c0] sm:$0xff] }
 0x1a1   : > { %v15162_v39 = vcombine.high %v15156_v59, %v15156_v59  ;;  %v13011_v44 = vcombine.high %v942_v37, %v946_v38  ;;  %v954_v47 = vld [vmem:[%s14823_s27 + $0x11e0] sm:$0xff] }
 0x1a3   : > { %9826 = vmatpush1.bf16.msra.mxu0 %v12914_v2  ;;  %10318 = vmatpush1.bf16.msra.mxu1 %v12916_v3  ;;  %v911_v2 = vld [vmem:[%s14823_s27 + $0x1088] sm:$0xff] }
 0x1a4   : > { %9827 = vmatprep.subr.bf16.mxu0 %v12923_v4  ;;  %10319 = vmatprep.subr.bf16.mxu1 %v12925_v5  ;;  %v915_v3 = vld [vmem:[%s14823_s27 + $0x10a8] sm:$0xff]  ;;  %v12970_v4 = vcombine.low %v902_v52, %v906_v54  ;;  %v12972_v5 = vcombine.low %v903_v56, %v907_v58  ;;  %v13019_v52 = vcombine.high %v950_v46, %v954_v47  ;;  %v958_v56 = vld [vmem:[%s14823_s27 + $0x1200] sm:$0xff] }
 0x1a5   : > { %v12981_v7 = vcombine.high %v911_v2, %v915_v3  ;;  %v962_v58 = vld [vmem:[%s14823_s27 + $0x1220] sm:$0xff] }
 0x1a7   : > { %9828 = vmatpush1.bf16.msra.mxu0 %v12922_v10  ;;  %10320 = vmatpush1.bf16.msra.mxu1 %v12924_v11  ;;  %v919_v10 = vld [vmem:[%s14823_s27 + $0x10c8] sm:$0xff] }
 0x1a8   : > { %9829 = vmatprep.subr.bf16.mxu0 %v12931_v13  ;;  %10321 = vmatprep.subr.bf16.mxu1 %v12933_v14  ;;  %v923_v11 = vld [vmem:[%s14823_s27 + $0x10e8] sm:$0xff]  ;;  %v12978_v13 = vcombine.low %v910_v0, %v914_v1  ;;  %v12980_v14 = vcombine.low %v911_v2, %v915_v3  ;;  %v13027_v0 = vcombine.high %v958_v56, %v962_v58  ;;  %v966_v2 = vld [vmem:[%s14823_s27 + $0x1240] sm:$0xff] }
 0x1a9   : > { %v12989_v17 = vcombine.high %v919_v10, %v923_v11  ;;  %v970_v3 = vld [vmem:[%s14823_s27 + $0x1260] sm:$0xff] }
 0x1ab   : > { %9830 = vmatpush1.bf16.msra.mxu0 %v12930_v20  ;;  %10322 = vmatpush1.bf16.msra.mxu1 %v12932_v21  ;;  %v927_v20 = vld [vmem:[%s14823_s27 + $0x1108] sm:$0xff] }
 0x1ac   : > { %9831 = vmatprep.subr.bf16.mxu0 %v12939_v23  ;;  %10323 = vmatprep.subr.bf16.mxu1 %v12941_v24  ;;  %v931_v21 = vld [vmem:[%s14823_s27 + $0x1128] sm:$0xff]  ;;  %v12986_v23 = vcombine.low %v918_v8, %v922_v9  ;;  %v12988_v24 = vcombine.low %v919_v10, %v923_v11  ;;  %v13035_v8 = vcombine.high %v966_v2, %v970_v3  ;;  %v974_v10 = vld [vmem:[%s14823_s27 + $0x1280] sm:$0xff] }
 0x1ad   : > { %v12997_v27 = vcombine.high %v927_v20, %v931_v21  ;;  %v978_v11 = vld [vmem:[%s14823_s27 + $0x12a0] sm:$0xff] }
 0x1af   : > { %9832 = vmatpush1.bf16.msra.mxu0 %v12938_v30  ;;  %10324 = vmatpush1.bf16.msra.mxu1 %v12940_v31  ;;  %v935_v30 = vld [vmem:[%s14823_s27 + $0x1148] sm:$0xff] }
 0x1b0   : > { %9833 = vmatprep.subr.bf16.mxu0 %v12947_v32  ;;  %10325 = vmatprep.subr.bf16.mxu1 %v12949_v33  ;;  %v939_v31 = vld [vmem:[%s14823_s27 + $0x1168] sm:$0xff]  ;;  %v12994_v32 = vcombine.low %v926_v18, %v930_v19  ;;  %v12996_v33 = vcombine.low %v927_v20, %v931_v21  ;;  %v13043_v18 = vcombine.high %v974_v10, %v978_v11  ;;  %v982_v20 = vld [vmem:[%s14823_s27 + $0x12c0] sm:$0xff] }
 0x1b1   : > { %v13005_v35 = vcombine.high %v935_v30, %v939_v31  ;;  %v986_v21 = vld [vmem:[%s14823_s27 + $0x12e0] sm:$0xff] }
 0x1b3   : > { %9834 = vmatpush1.bf16.msra.mxu0 %v12946_v40  ;;  %10326 = vmatpush1.bf16.msra.mxu1 %v12948_v41  ;;  %v943_v40 = vld [vmem:[%s14823_s27 + $0x1188] sm:$0xff] }
 0x1b4   : > { %9835 = vmatprep.subr.bf16.mxu0 %v12955_v42  ;;  %10327 = vmatprep.subr.bf16.mxu1 %v12957_v43  ;;  %v947_v41 = vld [vmem:[%s14823_s27 + $0x11a8] sm:$0xff]  ;;  %v13002_v42 = vcombine.low %v934_v28, %v938_v29  ;;  %v13004_v43 = vcombine.low %v935_v30, %v939_v31  ;;  %v13051_v28 = vcombine.high %v982_v20, %v986_v21  ;;  %v990_v30 = vld [vmem:[%s14823_s27 + $0x1300] sm:$0xff] }
 0x1b5   : > { %v13013_v45 = vcombine.high %v943_v40, %v947_v41  ;;  %v994_v31 = vld [vmem:[%s14823_s27 + $0x1320] sm:$0xff] }
 0x1b7   : > { %9836 = vmatpush1.bf16.msra.mxu0 %v12954_v48  ;;  %10328 = vmatpush1.bf16.msra.mxu1 %v12956_v49  ;;  %v951_v48 = vld [vmem:[%s14823_s27 + $0x11c8] sm:$0xff] }
 0x1b8   : > { %9846 = vmatprep.subr.bf16.mxu0 %v12963_v50  ;;  %10338 = vmatprep.subr.bf16.mxu1 %v12965_v51  ;;  %v955_v49 = vld [vmem:[%s14823_s27 + $0x11e8] sm:$0xff]  ;;  %v13010_v50 = vcombine.low %v942_v37, %v946_v38  ;;  %v13012_v51 = vcombine.low %v943_v40, %v947_v41  ;;  %v13059_v37 = vcombine.high %v990_v30, %v994_v31  ;;  %v998_v40 = vld [vmem:[%s14823_s27 + $0x1340] sm:$0xff] }
 0x1b9   : > { %v13021_v54 = vcombine.high %v951_v48, %v955_v49  ;;  %v1002_v41 = vld [vmem:[%s14823_s27 + $0x1360] sm:$0xff] }
 0x1ba   : > { %9838 = vmatmul.mubr.bf16.vlgmr.msra.gmra.mrb[0].mxu0 %v15152_v55  ;;  %10330 = vmatmul.mubr.bf16.vlgmr.msra.gmra.mrb[0].mxu1 %v15152_v55 }
 0x1bb   : > { %9847 = vmatpush1.bf16.msra.mxu0 %v12962_v60  ;;  %10339 = vmatpush1.bf16.msra.mxu1 %v12964_v61  ;;  %v959_v60 = vld [vmem:[%s14823_s27 + $0x1208] sm:$0xff] }
 0x1bc   : > { %9848 = vmatprep.subr.bf16.mxu0 %v12971_v62  ;;  %10340 = vmatprep.subr.bf16.mxu1 %v12973_v63  ;;  %v963_v61 = vld [vmem:[%s14823_s27 + $0x1228] sm:$0xff]  ;;  %v13018_v62 = vcombine.low %v950_v46, %v954_v47  ;;  %v13020_v63 = vcombine.low %v951_v48, %v955_v49  ;;  %v13067_v46 = vcombine.high %v998_v40, %v1002_v41  ;;  %v1006_v48 = vld [vmem:[%s14823_s27 + $0x1380] sm:$0xff] }
 0x1bd   : > { %9878 = vmatprep.mubr.bf16.mxu0 %v15162_v39  ;;  %10370 = vmatprep.mubr.bf16.mxu1 %v15162_v39  ;;  %v13029_v1 = vcombine.high %v959_v60, %v963_v61  ;;  %v1010_v49 = vld [vmem:[%s14823_s27 + $0x13a0] sm:$0xff] }
 0x1bf   : > { %9849 = vmatpush1.bf16.msra.mxu0 %v12970_v4  ;;  %10341 = vmatpush1.bf16.msra.mxu1 %v12972_v5  ;;  %v967_v4 = vld [vmem:[%s14823_s27 + $0x1248] sm:$0xff] }
 0x1c0   : > { %9850 = vmatprep.subr.bf16.mxu0 %v12979_v6  ;;  %10342 = vmatprep.subr.bf16.mxu1 %v12981_v7  ;;  %v971_v5 = vld [vmem:[%s14823_s27 + $0x1268] sm:$0xff]  ;;  %v13026_v6 = vcombine.low %v958_v56, %v962_v58  ;;  %v13028_v7 = vcombine.low %v959_v60, %v963_v61  ;;  %v13075_v56 = vcombine.high %v1006_v48, %v1010_v49  ;;  %v1014_v60 = vld [vmem:[%s14823_s27 + $0x13c0] sm:$0xff] }
 0x1c1   : > { %v13037_v9 = vcombine.high %v967_v4, %v971_v5  ;;  %v1018_v61 = vld [vmem:[%s14823_s27 + $0x13e0] sm:$0xff] }
 0x1c3   : > { %9851 = vmatpush1.bf16.msra.mxu0 %v12978_v13  ;;  %10343 = vmatpush1.bf16.msra.mxu1 %v12980_v14  ;;  %v975_v13 = vld [vmem:[%s14823_s27 + $0x1288] sm:$0xff] }
 0x1c4   : > { %9852 = vmatprep.subr.bf16.mxu0 %v12987_v16  ;;  %10344 = vmatprep.subr.bf16.mxu1 %v12989_v17  ;;  %v979_v14 = vld [vmem:[%s14823_s27 + $0x12a8] sm:$0xff]  ;;  %v13034_v16 = vcombine.low %v966_v2, %v970_v3  ;;  %v13036_v17 = vcombine.low %v967_v4, %v971_v5  ;;  %v13083_v2 = vcombine.high %v1014_v60, %v1018_v61  ;;  %v1022_v4 = vld [vmem:[%s14823_s27 + $0x1400] sm:$0xff] }
 0x1c5   : > { %v13045_v19 = vcombine.high %v975_v13, %v979_v14  ;;  %v1026_v5 = vld [vmem:[%s14823_s27 + $0x1420] sm:$0xff] }
 0x1c7   : > { %9853 = vmatpush1.bf16.msra.mxu0 %v12986_v23  ;;  %10345 = vmatpush1.bf16.msra.mxu1 %v12988_v24  ;;  %v983_v23 = vld [vmem:[%s14823_s27 + $0x12c8] sm:$0xff] }
 0x1c8   : > { %9854 = vmatprep.subr.bf16.mxu0 %v12995_v26  ;;  %10346 = vmatprep.subr.bf16.mxu1 %v12997_v27  ;;  %v987_v24 = vld [vmem:[%s14823_s27 + $0x12e8] sm:$0xff]  ;;  %v13042_v26 = vcombine.low %v974_v10, %v978_v11  ;;  %v13044_v27 = vcombine.low %v975_v13, %v979_v14  ;;  %v13091_v10 = vcombine.high %v1022_v4, %v1026_v5  ;;  %v1030_v13 = vld [vmem:[%s14823_s27 + $0x1440] sm:$0xff] }
 0x1c9   : > { %v13053_v29 = vcombine.high %v983_v23, %v987_v24  ;;  %v1034_v14 = vld [vmem:[%s14823_s27 + $0x1460] sm:$0xff] }
 0x1cb   : > { %9855 = vmatpush1.bf16.msra.mxu0 %v12994_v32  ;;  %10347 = vmatpush1.bf16.msra.mxu1 %v12996_v33  ;;  %v991_v32 = vld [vmem:[%s14823_s27 + $0x1308] sm:$0xff] }
 0x1cc   : > { %9856 = vmatprep.subr.bf16.mxu0 %v13003_v34  ;;  %10348 = vmatprep.subr.bf16.mxu1 %v13005_v35  ;;  %v995_v33 = vld [vmem:[%s14823_s27 + $0x1328] sm:$0xff]  ;;  %v13050_v34 = vcombine.low %v982_v20, %v986_v21  ;;  %v13052_v35 = vcombine.low %v983_v23, %v987_v24  ;;  %v13090_v20 = vcombine.low %v1022_v4, %v1026_v5 }
 0x1cd   : > { %v13061_v38 = vcombine.high %v991_v32, %v995_v33  ;;  %v13099_v23 = vcombine.high %v1030_v13, %v1034_v14 }
 0x1cf   : > { %9857 = vmatpush1.bf16.msra.mxu0 %v13002_v42  ;;  %10349 = vmatpush1.bf16.msra.mxu1 %v13004_v43  ;;  %v999_v42 = vld [vmem:[%s14823_s27 + $0x1348] sm:$0xff] }
 0x1d0   : > { %9858 = vmatprep.subr.bf16.mxu0 %v13011_v44  ;;  %10350 = vmatprep.subr.bf16.mxu1 %v13013_v45  ;;  %v1003_v43 = vld [vmem:[%s14823_s27 + $0x1368] sm:$0xff]  ;;  %v13058_v44 = vcombine.low %v990_v30, %v994_v31  ;;  %v13060_v45 = vcombine.low %v991_v32, %v995_v33  ;;  %v13098_v30 = vcombine.low %v1030_v13, %v1034_v14 }
 0x1d1   : > { %v13069_v47 = vcombine.high %v999_v42, %v1003_v43 }
 0x1d3   : > { %9859 = vmatpush1.bf16.msra.mxu0 %v13010_v50  ;;  %10351 = vmatpush1.bf16.msra.mxu1 %v13012_v51  ;;  %v1007_v50 = vld [vmem:[%s14823_s27 + $0x1388] sm:$0xff] }
 0x1d4   : > { %9860 = vmatprep.subr.bf16.mxu0 %v13019_v52  ;;  %10352 = vmatprep.subr.bf16.mxu1 %v13021_v54  ;;  %v1011_v51 = vld [vmem:[%s14823_s27 + $0x13a8] sm:$0xff]  ;;  %v13066_v52 = vcombine.low %v998_v40, %v1002_v41  ;;  %v13068_v54 = vcombine.low %v999_v42, %v1003_v43 }
 0x1d5   : > { %v13077_v58 = vcombine.high %v1007_v50, %v1011_v51 }
 0x1d7   : > { %9861 = vmatpush1.bf16.msra.mxu0 %v13018_v62  ;;  %10353 = vmatpush1.bf16.msra.mxu1 %v13020_v63  ;;  %v1015_v62 = vld [vmem:[%s14823_s27 + $0x13c8] sm:$0xff] }
 0x1d8   : > { %9862 = vmatprep.subr.bf16.mxu0 %v13027_v0  ;;  %10354 = vmatprep.subr.bf16.mxu1 %v13029_v1  ;;  %v1019_v63 = vld [vmem:[%s14823_s27 + $0x13e8] sm:$0xff]  ;;  %v13074_v0 = vcombine.low %v1006_v48, %v1010_v49  ;;  %v13076_v1 = vcombine.low %v1007_v50, %v1011_v51 }
 0x1d9   : > { %v13085_v3 = vcombine.high %v1015_v62, %v1019_v63 }
 0x1db   : > { %9863 = vmatpush1.bf16.msra.mxu0 %v13026_v6  ;;  %10355 = vmatpush1.bf16.msra.mxu1 %v13028_v7  ;;  %v1023_v6 = vld [vmem:[%s14823_s27 + $0x1408] sm:$0xff] }
 0x1dc   : > { %9864 = vmatprep.subr.bf16.mxu0 %v13035_v8  ;;  %10356 = vmatprep.subr.bf16.mxu1 %v13037_v9  ;;  %v1027_v7 = vld [vmem:[%s14823_s27 + $0x1428] sm:$0xff]  ;;  %v13082_v8 = vcombine.low %v1014_v60, %v1018_v61  ;;  %v13084_v9 = vcombine.low %v1015_v62, %v1019_v63 }
 0x1dd   : > { %v13093_v11 = vcombine.high %v1023_v6, %v1027_v7  ;;  %v13092_v21 = vcombine.low %v1023_v6, %v1027_v7 }
 0x1df   : > { %9865 = vmatpush1.bf16.msra.mxu0 %v13034_v16  ;;  %10357 = vmatpush1.bf16.msra.mxu1 %v13036_v17  ;;  %v15230_v16 = vcombine.low %v15156_v59, %v15156_v59  ;;  %v1031_v17 = vld [vmem:[%s14823_s27 + $0x1448] sm:$0xff] }
 0x1e0   : > { %9866 = vmatprep.subr.bf16.mxu0 %v13043_v18  ;;  %10358 = vmatprep.subr.bf16.mxu1 %v13045_v19  ;;  %v1035_v18 = vld [vmem:[%s14823_s27 + $0x1468] sm:$0xff] }
 0x1e1   : > { %v15234_v19 = vld [vmem:[#allocation2 + $0x28] sm:$0xff]  ;;  %v13101_v24 = vcombine.high %v1031_v17, %v1035_v18  ;;  %v13100_v31 = vcombine.low %v1031_v17, %v1035_v18 }
 0x1e2   : > { %v15240_v59 = vcombine.high %v15234_v19, %v15234_v19 }
 0x1e3   : > { %9867 = vmatpush1.bf16.msra.mxu0 %v13042_v26  ;;  %10359 = vmatpush1.bf16.msra.mxu1 %v13044_v27  ;;  %v1038_v26 = vld [vmem:[%s14823_s27 + $0x1480] sm:$0xff] }
 0x1e4   : > { %9868 = vmatprep.subr.bf16.mxu0 %v13051_v28  ;;  %10360 = vmatprep.subr.bf16.mxu1 %v13053_v29  ;;  %v1042_v27 = vld [vmem:[%s14823_s27 + $0x14a0] sm:$0xff]  ;;  %v1039_v28 = vld [vmem:[%s14823_s27 + $0x1488] sm:$0xff] }
 0x1e5   : > { %v1043_v29 = vld [vmem:[%s14823_s27 + $0x14a8] sm:$0xff]  ;;  %v13107_v32 = vcombine.high %v1038_v26, %v1042_v27  ;;  %v13106_v40 = vcombine.low %v1038_v26, %v1042_v27 }
 0x1e6   : > { %v13109_v33 = vcombine.high %v1039_v28, %v1043_v29  ;;  %v13108_v41 = vcombine.low %v1039_v28, %v1043_v29 }
 0x1e7   : > { %9869 = vmatpush1.bf16.msra.mxu0 %v13050_v34  ;;  %10361 = vmatpush1.bf16.msra.mxu1 %v13052_v35  ;;  %v1046_v34 = vld [vmem:[%s14823_s27 + $0x14c0] sm:$0xff] }
 0x1e8   : > { %9870 = vmatprep.subr.bf16.mxu0 %v13059_v37  ;;  %10362 = vmatprep.subr.bf16.mxu1 %v13061_v38  ;;  %v1050_v35 = vld [vmem:[%s14823_s27 + $0x14e0] sm:$0xff]  ;;  %v1047_v37 = vld [vmem:[%s14823_s27 + $0x14c8] sm:$0xff] }
 0x1e9   : > { %v1051_v38 = vld [vmem:[%s14823_s27 + $0x14e8] sm:$0xff]  ;;  %v13115_v42 = vcombine.high %v1046_v34, %v1050_v35  ;;  %v13114_v48 = vcombine.low %v1046_v34, %v1050_v35 }
 0x1ea   : > { %v13117_v43 = vcombine.high %v1047_v37, %v1051_v38  ;;  %v13116_v49 = vcombine.low %v1047_v37, %v1051_v38 }
 0x1eb   : > { %9871 = vmatpush1.bf16.msra.mxu0 %v13058_v44  ;;  %10363 = vmatpush1.bf16.msra.mxu1 %v13060_v45  ;;  %v1054_v44 = vld [vmem:[%s14823_s27 + $0x1500] sm:$0xff] }
 0x1ec   : > { %9872 = vmatprep.subr.bf16.mxu0 %v13067_v46  ;;  %10364 = vmatprep.subr.bf16.mxu1 %v13069_v47  ;;  %v1058_v45 = vld [vmem:[%s14823_s27 + $0x1520] sm:$0xff]  ;;  %v1055_v46 = vld [vmem:[%s14823_s27 + $0x1508] sm:$0xff] }
 0x1ed   : > { %v1059_v47 = vld [vmem:[%s14823_s27 + $0x1528] sm:$0xff]  ;;  %v13123_v50 = vcombine.high %v1054_v44, %v1058_v45  ;;  %v13122_v60 = vcombine.low %v1054_v44, %v1058_v45 }
 0x1ee   : > { %v13125_v51 = vcombine.high %v1055_v46, %v1059_v47  ;;  %v13124_v61 = vcombine.low %v1055_v46, %v1059_v47 }
 0x1ef   : > { %9873 = vmatpush1.bf16.msra.mxu0 %v13066_v52  ;;  %10365 = vmatpush1.bf16.msra.mxu1 %v13068_v54  ;;  %v1062_v52 = vld [vmem:[%s14823_s27 + $0x1540] sm:$0xff] }
 0x1f0   : > { %9874 = vmatprep.subr.bf16.mxu0 %v13075_v56  ;;  %10366 = vmatprep.subr.bf16.mxu1 %v13077_v58  ;;  %v1066_v54 = vld [vmem:[%s14823_s27 + $0x1560] sm:$0xff]  ;;  %v1063_v56 = vld [vmem:[%s14823_s27 + $0x1548] sm:$0xff] }
 0x1f1   : > { %v1067_v58 = vld [vmem:[%s14823_s27 + $0x1568] sm:$0xff]  ;;  %v13131_v62 = vcombine.high %v1062_v52, %v1066_v54  ;;  %v13130_v4 = vcombine.low %v1062_v52, %v1066_v54 }
 0x1f2   : > { %v13133_v63 = vcombine.high %v1063_v56, %v1067_v58  ;;  %v13132_v5 = vcombine.low %v1063_v56, %v1067_v58 }
 0x1f3   : > { %9875 = vmatpush1.bf16.msra.mxu0 %v13074_v0  ;;  %10367 = vmatpush1.bf16.msra.mxu1 %v13076_v1  ;;  %v1070_v0 = vld [vmem:[%s14823_s27 + $0x1580] sm:$0xff] }
 0x1f4   : > { %9876 = vmatprep.subr.bf16.mxu0 %v13083_v2  ;;  %10368 = vmatprep.subr.bf16.mxu1 %v13085_v3  ;;  %v1074_v1 = vld [vmem:[%s14823_s27 + $0x15a0] sm:$0xff]  ;;  %v1071_v2 = vld [vmem:[%s14823_s27 + $0x1588] sm:$0xff] }
 0x1f5   : > { %v1075_v3 = vld [vmem:[%s14823_s27 + $0x15a8] sm:$0xff]  ;;  %v13139_v6 = vcombine.high %v1070_v0, %v1074_v1  ;;  %v13138_v13 = vcombine.low %v1070_v0, %v1074_v1 }
 0x1f6   : > { %v13141_v7 = vcombine.high %v1071_v2, %v1075_v3  ;;  %v13140_v14 = vcombine.low %v1071_v2, %v1075_v3 }
 0x1f7   : > { %9877 = vmatpush1.bf16.msra.mxu0 %v13082_v8  ;;  %10369 = vmatpush1.bf16.msra.mxu1 %v13084_v9  ;;  %v1078_v8 = vld [vmem:[%s14823_s27 + $0x15c0] sm:$0xff] }
 0x1f8   : > { %9887 = vmatprep.subr.bf16.mxu0 %v13091_v10  ;;  %10379 = vmatprep.subr.bf16.mxu1 %v13093_v11  ;;  %v1082_v9 = vld [vmem:[%s14823_s27 + $0x15e0] sm:$0xff]  ;;  %v1079_v10 = vld [vmem:[%s14823_s27 + $0x15c8] sm:$0xff] }
 0x1f9   : > { %v1083_v11 = vld [vmem:[%s14823_s27 + $0x15e8] sm:$0xff]  ;;  %v13147_v17 = vcombine.high %v1078_v8, %v1082_v9  ;;  %v13146_v26 = vcombine.low %v1078_v8, %v1082_v9 }
 0x1fa   : > { %9879 = vmatmul.mubr.bf16.vlgmr.msra.gmra.mrb[0].mxu0 %v15230_v16  ;;  %10371 = vmatmul.mubr.bf16.vlgmr.msra.gmra.mrb[0].mxu1 %v15230_v16  ;;  %v13149_v18 = vcombine.high %v1079_v10, %v1083_v11  ;;  %v13148_v27 = vcombine.low %v1079_v10, %v1083_v11 }
 0x1fb   : > { %9888 = vmatpush1.bf16.msra.mxu0 %v13090_v20  ;;  %10380 = vmatpush1.bf16.msra.mxu1 %v13092_v21  ;;  %v1086_v20 = vld [vmem:[%s14823_s27 + $0x1600] sm:$0xff] }
 0x1fc   : > { %9889 = vmatprep.subr.bf16.mxu0 %v13099_v23  ;;  %10381 = vmatprep.subr.bf16.mxu1 %v13101_v24  ;;  %v1090_v21 = vld [vmem:[%s14823_s27 + $0x1620] sm:$0xff]  ;;  %v1087_v23 = vld [vmem:[%s14823_s27 + $0x1608] sm:$0xff] }
 0x1fd   : > { %9919 = vmatprep.mubr.bf16.mxu0 %v15240_v59  ;;  %10411 = vmatprep.mubr.bf16.mxu1 %v15240_v59  ;;  %v1091_v24 = vld [vmem:[%s14823_s27 + $0x1628] sm:$0xff]  ;;  %v13155_v28 = vcombine.high %v1086_v20, %v1090_v21  ;;  %v13154_v34 = vcombine.low %v1086_v20, %v1090_v21 }
 0x1fe   : > { %v13157_v29 = vcombine.high %v1087_v23, %v1091_v24  ;;  %v13156_v35 = vcombine.low %v1087_v23, %v1091_v24 }
 0x1ff   : > { %9890 = vmatpush1.bf16.msra.mxu0 %v13098_v30  ;;  %10382 = vmatpush1.bf16.msra.mxu1 %v13100_v31  ;;  %v1094_v30 = vld [vmem:[%s14823_s27 + $0x1640] sm:$0xff] }
 0x200   : > { %9891 = vmatprep.subr.bf16.mxu0 %v13107_v32  ;;  %10383 = vmatprep.subr.bf16.mxu1 %v13109_v33  ;;  %v1098_v31 = vld [vmem:[%s14823_s27 + $0x1660] sm:$0xff]  ;;  %v1095_v32 = vld [vmem:[%s14823_s27 + $0x1648] sm:$0xff] }
 0x201   : > { %v1099_v33 = vld [vmem:[%s14823_s27 + $0x1668] sm:$0xff]  ;;  %v13163_v37 = vcombine.high %v1094_v30, %v1098_v31  ;;  %v13162_v44 = vcombine.low %v1094_v30, %v1098_v31 }
 0x202   : > { %v13165_v38 = vcombine.high %v1095_v32, %v1099_v33  ;;  %v13164_v45 = vcombine.low %v1095_v32, %v1099_v33 }
 0x203   : > { %9892 = vmatpush1.bf16.msra.mxu0 %v13106_v40  ;;  %10384 = vmatpush1.bf16.msra.mxu1 %v13108_v41  ;;  %v1102_v40 = vld [vmem:[%s14823_s27 + $0x1680] sm:$0xff] }
 0x204   : > { %9893 = vmatprep.subr.bf16.mxu0 %v13115_v42  ;;  %10385 = vmatprep.subr.bf16.mxu1 %v13117_v43  ;;  %v1106_v41 = vld [vmem:[%s14823_s27 + $0x16a0] sm:$0xff]  ;;  %v1103_v42 = vld [vmem:[%s14823_s27 + $0x1688] sm:$0xff] }
 0x205   : > { %v1107_v43 = vld [vmem:[%s14823_s27 + $0x16a8] sm:$0xff]  ;;  %v13171_v46 = vcombine.high %v1102_v40, %v1106_v41  ;;  %v13170_v52 = vcombine.low %v1102_v40, %v1106_v41 }
 0x206   : > { %v13173_v47 = vcombine.high %v1103_v42, %v1107_v43  ;;  %v13172_v54 = vcombine.low %v1103_v42, %v1107_v43 }
 0x207   : > { %9894 = vmatpush1.bf16.msra.mxu0 %v13114_v48  ;;  %10386 = vmatpush1.bf16.msra.mxu1 %v13116_v49  ;;  %v1110_v48 = vld [vmem:[%s14823_s27 + $0x16c0] sm:$0xff] }
 0x208   : > { %9895 = vmatprep.subr.bf16.mxu0 %v13123_v50  ;;  %10387 = vmatprep.subr.bf16.mxu1 %v13125_v51  ;;  %v1114_v49 = vld [vmem:[%s14823_s27 + $0x16e0] sm:$0xff]  ;;  %v1111_v50 = vld [vmem:[%s14823_s27 + $0x16c8] sm:$0xff] }
 0x209   : > { %v1115_v51 = vld [vmem:[%s14823_s27 + $0x16e8] sm:$0xff]  ;;  %v13179_v56 = vcombine.high %v1110_v48, %v1114_v49  ;;  %v13178_v0 = vcombine.low %v1110_v48, %v1114_v49  ;;  %v15312_v49 = vld [vmem:[#allocation2 + $0x30] sm:$0xff] }
 0x20a   : > { %v13181_v58 = vcombine.high %v1111_v50, %v1115_v51  ;;  %v13180_v1 = vcombine.low %v1111_v50, %v1115_v51  ;;  %v1163_v48 = vld [vmem:[%s14823_s27 + $0x1868] sm:$0xff] }
 0x20b   : > { %9896 = vmatpush1.bf16.msra.mxu0 %v13122_v60  ;;  %10388 = vmatpush1.bf16.msra.mxu1 %v13124_v61  ;;  %v1118_v60 = vld [vmem:[%s14823_s27 + $0x1700] sm:$0xff] }
 0x20c   : > { %9897 = vmatprep.subr.bf16.mxu0 %v13131_v62  ;;  %10389 = vmatprep.subr.bf16.mxu1 %v13133_v63  ;;  %v1122_v61 = vld [vmem:[%s14823_s27 + $0x1720] sm:$0xff]  ;;  %v1119_v62 = vld [vmem:[%s14823_s27 + $0x1708] sm:$0xff] }
 0x20d   : > { %v1123_v63 = vld [vmem:[%s14823_s27 + $0x1728] sm:$0xff]  ;;  %v13187_v2 = vcombine.high %v1118_v60, %v1122_v61  ;;  %v13186_v8 = vcombine.low %v1118_v60, %v1122_v61 }
 0x20e   : > { %v13189_v3 = vcombine.high %v1119_v62, %v1123_v63  ;;  %v13188_v9 = vcombine.low %v1119_v62, %v1123_v63  ;;  %v1167_v60 = vld [vmem:[%s14823_s27 + $0x1888] sm:$0xff] }
 0x20f   : > { %9898 = vmatpush1.bf16.msra.mxu0 %v13130_v4  ;;  %10390 = vmatpush1.bf16.msra.mxu1 %v13132_v5  ;;  %v1126_v4 = vld [vmem:[%s14823_s27 + $0x1740] sm:$0xff]  ;;  %v1171_v61 = vld [vmem:[%s14823_s27 + $0x18a8] sm:$0xff] }
 0x210   : > { %9899 = vmatprep.subr.bf16.mxu0 %v13139_v6  ;;  %10391 = vmatprep.subr.bf16.mxu1 %v13141_v7  ;;  %v1130_v5 = vld [vmem:[%s14823_s27 + $0x1760] sm:$0xff]  ;;  %v1127_v6 = vld [vmem:[%s14823_s27 + $0x1748] sm:$0xff] }
 0x211   : > { %v1131_v7 = vld [vmem:[%s14823_s27 + $0x1768] sm:$0xff]  ;;  %v13195_v10 = vcombine.high %v1126_v4, %v1130_v5  ;;  %v13194_v20 = vcombine.low %v1126_v4, %v1130_v5 }
 0x212   : > { %v13197_v11 = vcombine.high %v1127_v6, %v1131_v7  ;;  %v13196_v21 = vcombine.low %v1127_v6, %v1131_v7  ;;  %v1175_v4 = vld [vmem:[%s14823_s27 + $0x18c8] sm:$0xff]  ;;  %v13236_v7 = vcombine.low %v1167_v60, %v1171_v61 }
 0x213   : > { %9900 = vmatpush1.bf16.msra.mxu0 %v13138_v13  ;;  %10392 = vmatpush1.bf16.msra.mxu1 %v13140_v14  ;;  %v1134_v13 = vld [vmem:[%s14823_s27 + $0x1780] sm:$0xff]  ;;  %v1179_v5 = vld [vmem:[%s14823_s27 + $0x18e8] sm:$0xff] }
 0x214   : > { %9901 = vmatprep.subr.bf16.mxu0 %v13147_v17  ;;  %10393 = vmatprep.subr.bf16.mxu1 %v13149_v18  ;;  %v1138_v14 = vld [vmem:[%s14823_s27 + $0x17a0] sm:$0xff]  ;;  %v1135_v17 = vld [vmem:[%s14823_s27 + $0x1788] sm:$0xff] }
 0x215   : > { %v1139_v18 = vld [vmem:[%s14823_s27 + $0x17a8] sm:$0xff]  ;;  %v13203_v23 = vcombine.high %v1134_v13, %v1138_v14  ;;  %v13202_v30 = vcombine.low %v1134_v13, %v1138_v14 }
 0x216   : > { %v13205_v24 = vcombine.high %v1135_v17, %v1139_v18  ;;  %v13204_v31 = vcombine.low %v1135_v17, %v1139_v18  ;;  %v1183_v13 = vld [vmem:[%s14823_s27 + $0x1908] sm:$0xff]  ;;  %v13244_v18 = vcombine.low %v1175_v4, %v1179_v5 }
 0x217   : > { %9902 = vmatpush1.bf16.msra.mxu0 %v13146_v26  ;;  %10394 = vmatpush1.bf16.msra.mxu1 %v13148_v27  ;;  %v1142_v26 = vld [vmem:[%s14823_s27 + $0x17c0] sm:$0xff]  ;;  %v1187_v14 = vld [vmem:[%s14823_s27 + $0x1928] sm:$0xff] }
 0x218   : > { %9903 = vmatprep.subr.bf16.mxu0 %v13155_v28  ;;  %10395 = vmatprep.subr.bf16.mxu1 %v13157_v29  ;;  %v1146_v27 = vld [vmem:[%s14823_s27 + $0x17e0] sm:$0xff]  ;;  %v1143_v28 = vld [vmem:[%s14823_s27 + $0x17c8] sm:$0xff] }
 0x219   : > { %v1147_v29 = vld [vmem:[%s14823_s27 + $0x17e8] sm:$0xff]  ;;  %v13211_v32 = vcombine.high %v1142_v26, %v1146_v27  ;;  %v13210_v40 = vcombine.low %v1142_v26, %v1146_v27 }
 0x21a   : > { %v13213_v33 = vcombine.high %v1143_v28, %v1147_v29  ;;  %v13212_v41 = vcombine.low %v1143_v28, %v1147_v29  ;;  %v1191_v26 = vld [vmem:[%s14823_s27 + $0x1948] sm:$0xff]  ;;  %v13252_v29 = vcombine.low %v1183_v13, %v1187_v14 }
 0x21b   : > { %9904 = vmatpush1.bf16.msra.mxu0 %v13154_v34  ;;  %10396 = vmatpush1.bf16.msra.mxu1 %v13156_v35  ;;  %v1150_v34 = vld [vmem:[%s14823_s27 + $0x1800] sm:$0xff]  ;;  %v1195_v27 = vld [vmem:[%s14823_s27 + $0x1968] sm:$0xff] }
 0x21c   : > { %9905 = vmatprep.subr.bf16.mxu0 %v13163_v37  ;;  %10397 = vmatprep.subr.bf16.mxu1 %v13165_v38  ;;  %v1154_v35 = vld [vmem:[%s14823_s27 + $0x1820] sm:$0xff]  ;;  %v1151_v37 = vld [vmem:[%s14823_s27 + $0x1808] sm:$0xff] }
 0x21d   : > { %v1155_v38 = vld [vmem:[%s14823_s27 + $0x1828] sm:$0xff]  ;;  %v13219_v42 = vcombine.high %v1150_v34, %v1154_v35  ;;  %v13218_v50 = vcombine.low %v1150_v34, %v1154_v35 }
 0x21e   : > { %v13221_v43 = vcombine.high %v1151_v37, %v1155_v38  ;;  %v13220_v51 = vcombine.low %v1151_v37, %v1155_v38  ;;  %v1199_v34 = vld [vmem:[%s14823_s27 + $0x1988] sm:$0xff]  ;;  %v13260_v38 = vcombine.low %v1191_v26, %v1195_v27 }
 0x21f   : > { %9906 = vmatpush1.bf16.msra.mxu0 %v13162_v44  ;;  %10398 = vmatpush1.bf16.msra.mxu1 %v13164_v45  ;;  %v1158_v44 = vld [vmem:[%s14823_s27 + $0x1840] sm:$0xff]  ;;  %v1203_v35 = vld [vmem:[%s14823_s27 + $0x19a8] sm:$0xff] }
 0x220   : > { %9907 = vmatprep.subr.bf16.mxu0 %v13171_v46  ;;  %10399 = vmatprep.subr.bf16.mxu1 %v13173_v47  ;;  %v1162_v45 = vld [vmem:[%s14823_s27 + $0x1860] sm:$0xff]  ;;  %v15308_v46 = vcombine.low %v15234_v19, %v15234_v19  ;;  %v1159_v47 = vld [vmem:[%s14823_s27 + $0x1848] sm:$0xff]  ;;  %v15318_v19 = vcombine.high %v15312_v49, %v15312_v49 }
 0x221   : > { %v13226_v62 = vcombine.low %v1158_v44, %v1162_v45  ;;  %v13228_v63 = vcombine.low %v1159_v47, %v1163_v48 }
 0x223   : > { %9908 = vmatpush1.bf16.msra.mxu0 %v13170_v52  ;;  %10400 = vmatpush1.bf16.msra.mxu1 %v13172_v54  ;;  %v13227_v52 = vcombine.high %v1158_v44, %v1162_v45  ;;  %v13229_v54 = vcombine.high %v1159_v47, %v1163_v48  ;;  %v1207_v44 = vld [vmem:[%s14823_s27 + $0x19c8] sm:$0xff]  ;;  %v13268_v48 = vcombine.low %v1199_v34, %v1203_v35 }
 0x224   : > { %9909 = vmatprep.subr.bf16.mxu0 %v13179_v56  ;;  %10401 = vmatprep.subr.bf16.mxu1 %v13181_v58  ;;  %v1166_v56 = vld [vmem:[%s14823_s27 + $0x1880] sm:$0xff]  ;;  %v1211_v45 = vld [vmem:[%s14823_s27 + $0x19e8] sm:$0xff] }
 0x225   : > { %v1170_v58 = vld [vmem:[%s14823_s27 + $0x18a0] sm:$0xff] }
 0x226   : > { %v13234_v6 = vcombine.low %v1166_v56, %v1170_v58 }
 0x227   : > { %9910 = vmatpush1.bf16.msra.mxu0 %v13178_v0  ;;  %10402 = vmatpush1.bf16.msra.mxu1 %v13180_v1  ;;  %v13235_v0 = vcombine.high %v1166_v56, %v1170_v58  ;;  %v13237_v1 = vcombine.high %v1167_v60, %v1171_v61  ;;  %v1215_v56 = vld [vmem:[%s14823_s27 + $0x1a08] sm:$0xff]  ;;  %v13276_v61 = vcombine.low %v1207_v44, %v1211_v45 }
 0x228   : > { %9911 = vmatprep.subr.bf16.mxu0 %v13187_v2  ;;  %10403 = vmatprep.subr.bf16.mxu1 %v13189_v3  ;;  %v1174_v2 = vld [vmem:[%s14823_s27 + $0x18c0] sm:$0xff]  ;;  %v1219_v58 = vld [vmem:[%s14823_s27 + $0x1a28] sm:$0xff] }
 0x229   : > { %v1178_v3 = vld [vmem:[%s14823_s27 + $0x18e0] sm:$0xff] }
 0x22a   : > { %v13242_v17 = vcombine.low %v1174_v2, %v1178_v3 }
 0x22b   : > { %9912 = vmatpush1.bf16.msra.mxu0 %v13186_v8  ;;  %10404 = vmatpush1.bf16.msra.mxu1 %v13188_v9  ;;  %v13243_v8 = vcombine.high %v1174_v2, %v1178_v3  ;;  %v13245_v9 = vcombine.high %v1175_v4, %v1179_v5  ;;  %v1223_v2 = vld [vmem:[%s14823_s27 + $0x1a48] sm:$0xff]  ;;  %v13284_v5 = vcombine.low %v1215_v56, %v1219_v58 }
 0x22c   : > { %9913 = vmatprep.subr.bf16.mxu0 %v13195_v10  ;;  %10405 = vmatprep.subr.bf16.mxu1 %v13197_v11  ;;  %v1182_v10 = vld [vmem:[%s14823_s27 + $0x1900] sm:$0xff]  ;;  %v1227_v3 = vld [vmem:[%s14823_s27 + $0x1a68] sm:$0xff] }
 0x22d   : > { %v1186_v11 = vld [vmem:[%s14823_s27 + $0x1920] sm:$0xff] }
 0x22e   : > { %v13250_v28 = vcombine.low %v1182_v10, %v1186_v11 }
 0x22f   : > { %9914 = vmatpush1.bf16.msra.mxu0 %v13194_v20  ;;  %10406 = vmatpush1.bf16.msra.mxu1 %v13196_v21  ;;  %v13251_v20 = vcombine.high %v1182_v10, %v1186_v11  ;;  %v13253_v21 = vcombine.high %v1183_v13, %v1187_v14  ;;  %v1231_v10 = vld [vmem:[%s14823_s27 + $0x1a88] sm:$0xff]  ;;  %v13292_v14 = vcombine.low %v1223_v2, %v1227_v3 }
 0x230   : > { %9915 = vmatprep.subr.bf16.mxu0 %v13203_v23  ;;  %10407 = vmatprep.subr.bf16.mxu1 %v13205_v24  ;;  %v1190_v23 = vld [vmem:[%s14823_s27 + $0x1940] sm:$0xff]  ;;  %v1235_v11 = vld [vmem:[%s14823_s27 + $0x1aa8] sm:$0xff] }
 0x231   : > { %v1194_v24 = vld [vmem:[%s14823_s27 + $0x1960] sm:$0xff] }
 0x232   : > { %v13258_v37 = vcombine.low %v1190_v23, %v1194_v24 }
 0x233   : > { %9916 = vmatpush1.bf16.msra.mxu0 %v13202_v30  ;;  %10408 = vmatpush1.bf16.msra.mxu1 %v13204_v31  ;;  %v13259_v30 = vcombine.high %v1190_v23, %v1194_v24  ;;  %v13261_v31 = vcombine.high %v1191_v26, %v1195_v27  ;;  %v1239_v23 = vld [vmem:[%s14823_s27 + $0x1ac8] sm:$0xff]  ;;  %v13300_v27 = vcombine.low %v1231_v10, %v1235_v11 }
 0x234   : > { %9917 = vmatprep.subr.bf16.mxu0 %v13211_v32  ;;  %10409 = vmatprep.subr.bf16.mxu1 %v13213_v33  ;;  %v1198_v32 = vld [vmem:[%s14823_s27 + $0x1980] sm:$0xff]  ;;  %v1243_v24 = vld [vmem:[%s14823_s27 + $0x1ae8] sm:$0xff] }
 0x235   : > { %v1202_v33 = vld [vmem:[%s14823_s27 + $0x19a0] sm:$0xff] }
 0x236   : > { %v13266_v47 = vcombine.low %v1198_v32, %v1202_v33 }
 0x237   : > { %9918 = vmatpush1.bf16.msra.mxu0 %v13210_v40  ;;  %10410 = vmatpush1.bf16.msra.mxu1 %v13212_v41  ;;  %v13267_v40 = vcombine.high %v1198_v32, %v1202_v33  ;;  %v13269_v41 = vcombine.high %v1199_v34, %v1203_v35  ;;  %v1247_v32 = vld [vmem:[%s14823_s27 + $0x1b08] sm:$0xff]  ;;  %v13308_v35 = vcombine.low %v1239_v23, %v1243_v24 }
 0x238   : > { %9928 = vmatprep.subr.bf16.mxu0 %v13219_v42  ;;  %10420 = vmatprep.subr.bf16.mxu1 %v13221_v43  ;;  %v1206_v42 = vld [vmem:[%s14823_s27 + $0x19c0] sm:$0xff]  ;;  %v1251_v33 = vld [vmem:[%s14823_s27 + $0x1b28] sm:$0xff] }
 0x239   : > { %v1210_v43 = vld [vmem:[%s14823_s27 + $0x19e0] sm:$0xff] }
 0x23a   : > { %9920 = vmatmul.mubr.bf16.vlgmr.msra.gmra.mrb[0].mxu0 %v15308_v46  ;;  %10412 = vmatmul.mubr.bf16.vlgmr.msra.gmra.mrb[0].mxu1 %v15308_v46  ;;  %v13274_v60 = vcombine.low %v1206_v42, %v1210_v43 }
 0x23b   : > { %9929 = vmatpush1.bf16.msra.mxu0 %v13218_v50  ;;  %10421 = vmatpush1.bf16.msra.mxu1 %v13220_v51  ;;  %v13275_v50 = vcombine.high %v1206_v42, %v1210_v43  ;;  %v13277_v51 = vcombine.high %v1207_v44, %v1211_v45  ;;  %v1255_v42 = vld [vmem:[%s14823_s27 + $0x1b48] sm:$0xff]  ;;  %v13316_v45 = vcombine.low %v1247_v32, %v1251_v33 }
 0x23c   : > { %9930 = vmatprep.subr.bf16.mxu0 %v13227_v52  ;;  %10422 = vmatprep.subr.bf16.mxu1 %v13229_v54  ;;  %v1214_v52 = vld [vmem:[%s14823_s27 + $0x1a00] sm:$0xff]  ;;  %v1259_v43 = vld [vmem:[%s14823_s27 + $0x1b68] sm:$0xff] }
 0x23d   : > { %9960 = vmatprep.mubr.bf16.mxu0 %v15318_v19  ;;  %10452 = vmatprep.mubr.bf16.mxu1 %v15318_v19  ;;  %v1218_v54 = vld [vmem:[%s14823_s27 + $0x1a20] sm:$0xff] }
 0x23e   : > { %v13282_v4 = vcombine.low %v1214_v52, %v1218_v54 }
 0x23f   : > { %9931 = vmatpush1.bf16.msra.mxu0 %v13226_v62  ;;  %10423 = vmatpush1.bf16.msra.mxu1 %v13228_v63  ;;  %v13283_v62 = vcombine.high %v1214_v52, %v1218_v54  ;;  %v13285_v63 = vcombine.high %v1215_v56, %v1219_v58  ;;  %v1263_v52 = vld [vmem:[%s14823_s27 + $0x1b88] sm:$0xff]  ;;  %v13324_v58 = vcombine.low %v1255_v42, %v1259_v43 }
 0x240   : > { %9932 = vmatprep.subr.bf16.mxu0 %v13235_v0  ;;  %10424 = vmatprep.subr.bf16.mxu1 %v13237_v1  ;;  %v1222_v0 = vld [vmem:[%s14823_s27 + $0x1a40] sm:$0xff]  ;;  %v1267_v54 = vld [vmem:[%s14823_s27 + $0x1ba8] sm:$0xff] }
 0x241   : > { %v1226_v1 = vld [vmem:[%s14823_s27 + $0x1a60] sm:$0xff] }
 0x242   : > { %v13290_v13 = vcombine.low %v1222_v0, %v1226_v1 }
 0x243   : > { %9933 = vmatpush1.bf16.msra.mxu0 %v13234_v6  ;;  %10425 = vmatpush1.bf16.msra.mxu1 %v13236_v7  ;;  %v13291_v6 = vcombine.high %v1222_v0, %v1226_v1  ;;  %v13293_v7 = vcombine.high %v1223_v2, %v1227_v3  ;;  %v1271_v0 = vld [vmem:[%s14823_s27 + $0x1bc8] sm:$0xff]  ;;  %v13332_v3 = vcombine.low %v1263_v52, %v1267_v54 }
 0x244   : > { %9934 = vmatprep.subr.bf16.mxu0 %v13243_v8  ;;  %10426 = vmatprep.subr.bf16.mxu1 %v13245_v9  ;;  %v1230_v8 = vld [vmem:[%s14823_s27 + $0x1a80] sm:$0xff]  ;;  %v1275_v1 = vld [vmem:[%s14823_s27 + $0x1be8] sm:$0xff] }
 0x245   : > { %v1234_v9 = vld [vmem:[%s14823_s27 + $0x1aa0] sm:$0xff] }
 0x246   : > { %v13298_v26 = vcombine.low %v1230_v8, %v1234_v9 }
 0x247   : > { %9935 = vmatpush1.bf16.msra.mxu0 %v13242_v17  ;;  %10427 = vmatpush1.bf16.msra.mxu1 %v13244_v18  ;;  %v13299_v17 = vcombine.high %v1230_v8, %v1234_v9  ;;  %v13301_v18 = vcombine.high %v1231_v10, %v1235_v11  ;;  %v1279_v8 = vld [vmem:[%s14823_s27 + $0x1c08] sm:$0xff]  ;;  %v13340_v11 = vcombine.low %v1271_v0, %v1275_v1 }
 0x248   : > { %9936 = vmatprep.subr.bf16.mxu0 %v13251_v20  ;;  %10428 = vmatprep.subr.bf16.mxu1 %v13253_v21  ;;  %v1238_v20 = vld [vmem:[%s14823_s27 + $0x1ac0] sm:$0xff]  ;;  %v1283_v9 = vld [vmem:[%s14823_s27 + $0x1c28] sm:$0xff] }
 0x249   : > { %v1242_v21 = vld [vmem:[%s14823_s27 + $0x1ae0] sm:$0xff] }
 0x24a   : > { %v13306_v34 = vcombine.low %v1238_v20, %v1242_v21 }
 0x24b   : > { %9937 = vmatpush1.bf16.msra.mxu0 %v13250_v28  ;;  %10429 = vmatpush1.bf16.msra.mxu1 %v13252_v29  ;;  %v13307_v28 = vcombine.high %v1238_v20, %v1242_v21  ;;  %v13309_v29 = vcombine.high %v1239_v23, %v1243_v24  ;;  %v15386_v20 = vcombine.low %v15312_v49, %v15312_v49  ;;  %v1287_v21 = vld [vmem:[%s14823_s27 + $0x1c48] sm:$0xff]  ;;  %v15390_v24 = vld [vmem:[#allocation2 + $0x38] sm:$0xff] }
 0x24c   : > { %9938 = vmatprep.subr.bf16.mxu0 %v13259_v30  ;;  %10430 = vmatprep.subr.bf16.mxu1 %v13261_v31  ;;  %v1246_v30 = vld [vmem:[%s14823_s27 + $0x1b00] sm:$0xff]  ;;  %v1291_v23 = vld [vmem:[%s14823_s27 + $0x1c68] sm:$0xff]  ;;  %v15396_v49 = vcombine.high %v15390_v24, %v15390_v24 }
 0x24d   : > { %v1250_v31 = vld [vmem:[%s14823_s27 + $0x1b20] sm:$0xff] }
 0x24e   : > { %v13314_v44 = vcombine.low %v1246_v30, %v1250_v31 }
 0x24f   : > { %9939 = vmatpush1.bf16.msra.mxu0 %v13258_v37  ;;  %10431 = vmatpush1.bf16.msra.mxu1 %v13260_v38  ;;  %v13315_v37 = vcombine.high %v1246_v30, %v1250_v31  ;;  %v13317_v38 = vcombine.high %v1247_v32, %v1251_v33  ;;  %v1294_v30 = vld [vmem:[%s14823_s27 + $0x1c80] sm:$0xff]  ;;  %v1295_v32 = vld [vmem:[%s14823_s27 + $0x1c88] sm:$0xff] }
 0x250   : > { %9940 = vmatprep.subr.bf16.mxu0 %v13267_v40  ;;  %10432 = vmatprep.subr.bf16.mxu1 %v13269_v41  ;;  %v1254_v40 = vld [vmem:[%s14823_s27 + $0x1b40] sm:$0xff]  ;;  %v1299_v33 = vld [vmem:[%s14823_s27 + $0x1ca8] sm:$0xff] }
 0x251   : > { %v1258_v41 = vld [vmem:[%s14823_s27 + $0x1b60] sm:$0xff] }
 0x252   : > { %v13322_v56 = vcombine.low %v1254_v40, %v1258_v41  ;;  %v1298_v31 = vld [vmem:[%s14823_s27 + $0x1ca0] sm:$0xff] }
 0x253   : > { %9941 = vmatpush1.bf16.msra.mxu0 %v13266_v47  ;;  %10433 = vmatpush1.bf16.msra.mxu1 %v13268_v48  ;;  %v13323_v47 = vcombine.high %v1254_v40, %v1258_v41  ;;  %v13325_v48 = vcombine.high %v1255_v42, %v1259_v43  ;;  %v1302_v40 = vld [vmem:[%s14823_s27 + $0x1cc0] sm:$0xff]  ;;  %v1303_v42 = vld [vmem:[%s14823_s27 + $0x1cc8] sm:$0xff] }
 0x254   : > { %9942 = vmatprep.subr.bf16.mxu0 %v13275_v50  ;;  %10434 = vmatprep.subr.bf16.mxu1 %v13277_v51  ;;  %v1262_v50 = vld [vmem:[%s14823_s27 + $0x1b80] sm:$0xff]  ;;  %v1307_v43 = vld [vmem:[%s14823_s27 + $0x1ce8] sm:$0xff] }
 0x255   : > { %v1266_v51 = vld [vmem:[%s14823_s27 + $0x1ba0] sm:$0xff] }
 0x256   : > { %v13330_v2 = vcombine.low %v1262_v50, %v1266_v51  ;;  %v1306_v41 = vld [vmem:[%s14823_s27 + $0x1ce0] sm:$0xff] }
 0x257   : > { %9943 = vmatpush1.bf16.msra.mxu0 %v13274_v60  ;;  %10435 = vmatpush1.bf16.msra.mxu1 %v13276_v61  ;;  %v13331_v60 = vcombine.high %v1262_v50, %v1266_v51  ;;  %v13333_v61 = vcombine.high %v1263_v52, %v1267_v54  ;;  %v1310_v50 = vld [vmem:[%s14823_s27 + $0x1d00] sm:$0xff]  ;;  %v1311_v52 = vld [vmem:[%s14823_s27 + $0x1d08] sm:$0xff] }
 0x258   : > { %9944 = vmatprep.subr.bf16.mxu0 %v13283_v62  ;;  %10436 = vmatprep.subr.bf16.mxu1 %v13285_v63  ;;  %v1270_v62 = vld [vmem:[%s14823_s27 + $0x1bc0] sm:$0xff]  ;;  %v1315_v54 = vld [vmem:[%s14823_s27 + $0x1d28] sm:$0xff] }
 0x259   : > { %v1274_v63 = vld [vmem:[%s14823_s27 + $0x1be0] sm:$0xff] }
 0x25a   : > { %v13338_v10 = vcombine.low %v1270_v62, %v1274_v63  ;;  %v1314_v51 = vld [vmem:[%s14823_s27 + $0x1d20] sm:$0xff] }
 0x25b   : > { %9945 = vmatpush1.bf16.msra.mxu0 %v13282_v4  ;;  %10437 = vmatpush1.bf16.msra.mxu1 %v13284_v5  ;;  %v13339_v4 = vcombine.high %v1270_v62, %v1274_v63  ;;  %v13341_v5 = vcombine.high %v1271_v0, %v1275_v1  ;;  %v1318_v62 = vld [vmem:[%s14823_s27 + $0x1d40] sm:$0xff]  ;;  %v1319_v0 = vld [vmem:[%s14823_s27 + $0x1d48] sm:$0xff] }
 0x25c   : > { %9946 = vmatprep.subr.bf16.mxu0 %v13291_v6  ;;  %10438 = vmatprep.subr.bf16.mxu1 %v13293_v7  ;;  %v1278_v6 = vld [vmem:[%s14823_s27 + $0x1c00] sm:$0xff]  ;;  %v1323_v1 = vld [vmem:[%s14823_s27 + $0x1d68] sm:$0xff] }
 0x25d   : > { %v1282_v7 = vld [vmem:[%s14823_s27 + $0x1c20] sm:$0xff] }
 0x25e   : > { %v1322_v63 = vld [vmem:[%s14823_s27 + $0x1d60] sm:$0xff] }
 0x25f   : > { %9947 = vmatpush1.bf16.msra.mxu0 %v13290_v13  ;;  %10439 = vmatpush1.bf16.msra.mxu1 %v13292_v14  ;;  %v13347_v13 = vcombine.high %v1278_v6, %v1282_v7  ;;  %v13349_v14 = vcombine.high %v1279_v8, %v1283_v9 }
 0x260   : > { %9948 = vmatprep.subr.bf16.mxu0 %v13299_v17  ;;  %10440 = vmatprep.subr.bf16.mxu1 %v13301_v18  ;;  %v1286_v17 = vld [vmem:[%s14823_s27 + $0x1c40] sm:$0xff] }
 0x261   : > { %v1290_v18 = vld [vmem:[%s14823_s27 + $0x1c60] sm:$0xff] }
 0x263   : > { %9949 = vmatpush1.bf16.msra.mxu0 %v13298_v26  ;;  %10441 = vmatpush1.bf16.msra.mxu1 %v13300_v27  ;;  %v13346_v26 = vcombine.low %v1278_v6, %v1282_v7  ;;  %v13348_v27 = vcombine.low %v1279_v8, %v1283_v9  ;;  %v1326_v6 = vld [vmem:[%s14823_s27 + $0x1d80] sm:$0xff]  ;;  %v1327_v8 = vld [vmem:[%s14823_s27 + $0x1d88] sm:$0xff] }
 0x264   : > { %9950 = vmatprep.subr.bf16.mxu0 %v13307_v28  ;;  %10442 = vmatprep.subr.bf16.mxu1 %v13309_v29  ;;  %v13355_v28 = vcombine.high %v1286_v17, %v1290_v18  ;;  %v13357_v29 = vcombine.high %v1287_v21, %v1291_v23  ;;  %v1330_v7 = vld [vmem:[%s14823_s27 + $0x1da0] sm:$0xff]  ;;  %v1331_v9 = vld [vmem:[%s14823_s27 + $0x1da8] sm:$0xff] }
 0x267   : > { %9951 = vmatpush1.bf16.msra.mxu0 %v13306_v34  ;;  %10443 = vmatpush1.bf16.msra.mxu1 %v13308_v35  ;;  %v13354_v34 = vcombine.low %v1286_v17, %v1290_v18  ;;  %v13356_v35 = vcombine.low %v1287_v21, %v1291_v23  ;;  %v1334_v17 = vld [vmem:[%s14823_s27 + $0x1dc0] sm:$0xff]  ;;  %v1335_v21 = vld [vmem:[%s14823_s27 + $0x1dc8] sm:$0xff] }
 0x268   : > { %9952 = vmatprep.subr.bf16.mxu0 %v13315_v37  ;;  %10444 = vmatprep.subr.bf16.mxu1 %v13317_v38  ;;  %v13363_v37 = vcombine.high %v1294_v30, %v1298_v31  ;;  %v13365_v38 = vcombine.high %v1295_v32, %v1299_v33  ;;  %v1338_v18 = vld [vmem:[%s14823_s27 + $0x1de0] sm:$0xff]  ;;  %v1339_v23 = vld [vmem:[%s14823_s27 + $0x1de8] sm:$0xff] }
 0x26b   : > { %9953 = vmatpush1.bf16.msra.mxu0 %v13314_v44  ;;  %10445 = vmatpush1.bf16.msra.mxu1 %v13316_v45  ;;  %v13362_v44 = vcombine.low %v1294_v30, %v1298_v31  ;;  %v13364_v45 = vcombine.low %v1295_v32, %v1299_v33  ;;  %v1342_v30 = vld [vmem:[%s14823_s27 + $0x1e00] sm:$0xff]  ;;  %v1343_v32 = vld [vmem:[%s14823_s27 + $0x1e08] sm:$0xff] }
 0x26c   : > { %9954 = vmatprep.subr.bf16.mxu0 %v13323_v47  ;;  %10446 = vmatprep.subr.bf16.mxu1 %v13325_v48  ;;  %v13371_v47 = vcombine.high %v1302_v40, %v1306_v41  ;;  %v13373_v48 = vcombine.high %v1303_v42, %v1307_v43  ;;  %v1346_v31 = vld [vmem:[%s14823_s27 + $0x1e20] sm:$0xff]  ;;  %v1347_v33 = vld [vmem:[%s14823_s27 + $0x1e28] sm:$0xff] }
 0x26f   : > { %9955 = vmatpush1.bf16.msra.mxu0 %v13322_v56  ;;  %10447 = vmatpush1.bf16.msra.mxu1 %v13324_v58  ;;  %v13370_v56 = vcombine.low %v1302_v40, %v1306_v41  ;;  %v13372_v58 = vcombine.low %v1303_v42, %v1307_v43  ;;  %v1350_v40 = vld [vmem:[%s14823_s27 + $0x1e40] sm:$0xff]  ;;  %v1351_v42 = vld [vmem:[%s14823_s27 + $0x1e48] sm:$0xff] }
 0x270   : > { %9956 = vmatprep.subr.bf16.mxu0 %v13331_v60  ;;  %10448 = vmatprep.subr.bf16.mxu1 %v13333_v61  ;;  %v13379_v60 = vcombine.high %v1310_v50, %v1314_v51  ;;  %v13381_v61 = vcombine.high %v1311_v52, %v1315_v54  ;;  %v1354_v41 = vld [vmem:[%s14823_s27 + $0x1e60] sm:$0xff]  ;;  %v1355_v43 = vld [vmem:[%s14823_s27 + $0x1e68] sm:$0xff] }
 0x273   : > { %9957 = vmatpush1.bf16.msra.mxu0 %v13330_v2  ;;  %10449 = vmatpush1.bf16.msra.mxu1 %v13332_v3  ;;  %v13378_v2 = vcombine.low %v1310_v50, %v1314_v51  ;;  %v13380_v3 = vcombine.low %v1311_v52, %v1315_v54  ;;  %v1358_v50 = vld [vmem:[%s14823_s27 + $0x1e80] sm:$0xff]  ;;  %v1359_v52 = vld [vmem:[%s14823_s27 + $0x1e88] sm:$0xff] }
 0x274   : > { %9958 = vmatprep.subr.bf16.mxu0 %v13339_v4  ;;  %10450 = vmatprep.subr.bf16.mxu1 %v13341_v5  ;;  %v13387_v4 = vcombine.high %v1318_v62, %v1322_v63  ;;  %v13389_v5 = vcombine.high %v1319_v0, %v1323_v1  ;;  %v1362_v51 = vld [vmem:[%s14823_s27 + $0x1ea0] sm:$0xff]  ;;  %v1363_v54 = vld [vmem:[%s14823_s27 + $0x1ea8] sm:$0xff] }
 0x277   : > { %9959 = vmatpush1.bf16.msra.mxu0 %v13338_v10  ;;  %10451 = vmatpush1.bf16.msra.mxu1 %v13340_v11  ;;  %v13386_v10 = vcombine.low %v1318_v62, %v1322_v63  ;;  %v13388_v11 = vcombine.low %v1319_v0, %v1323_v1  ;;  %v1366_v62 = vld [vmem:[%s14823_s27 + $0x1ec0] sm:$0xff]  ;;  %v1367_v0 = vld [vmem:[%s14823_s27 + $0x1ec8] sm:$0xff] }
 0x278   : > { %9969 = vmatprep.subr.bf16.mxu0 %v13347_v13  ;;  %10461 = vmatprep.subr.bf16.mxu1 %v13349_v14  ;;  %v13395_v13 = vcombine.high %v1326_v6, %v1330_v7  ;;  %v13397_v14 = vcombine.high %v1327_v8, %v1331_v9  ;;  %v1370_v63 = vld [vmem:[%s14823_s27 + $0x1ee0] sm:$0xff]  ;;  %v1371_v1 = vld [vmem:[%s14823_s27 + $0x1ee8] sm:$0xff] }
 0x27a   : > { %9961 = vmatmul.mubr.bf16.vlgmr.msra.gmra.mrb[0].mxu0 %v15386_v20  ;;  %10453 = vmatmul.mubr.bf16.vlgmr.msra.gmra.mrb[0].mxu1 %v15386_v20 }
 0x27b   : > { %9970 = vmatpush1.bf16.msra.mxu0 %v13346_v26  ;;  %10462 = vmatpush1.bf16.msra.mxu1 %v13348_v27  ;;  %v13394_v26 = vcombine.low %v1326_v6, %v1330_v7  ;;  %v13396_v27 = vcombine.low %v1327_v8, %v1331_v9  ;;  %v1374_v6 = vld [vmem:[%s14823_s27 + $0x1f00] sm:$0xff]  ;;  %v1375_v8 = vld [vmem:[%s14823_s27 + $0x1f08] sm:$0xff] }
 0x27c   : > { %9971 = vmatprep.subr.bf16.mxu0 %v13355_v28  ;;  %10463 = vmatprep.subr.bf16.mxu1 %v13357_v29  ;;  %v13403_v28 = vcombine.high %v1334_v17, %v1338_v18  ;;  %v13405_v29 = vcombine.high %v1335_v21, %v1339_v23  ;;  %v1378_v7 = vld [vmem:[%s14823_s27 + $0x1f20] sm:$0xff]  ;;  %v1379_v9 = vld [vmem:[%s14823_s27 + $0x1f28] sm:$0xff] }
 0x27d   : > { %10001 = vmatprep.mubr.bf16.mxu0 %v15396_v49  ;;  %10493 = vmatprep.mubr.bf16.mxu1 %v15396_v49 }
 0x27f   : > { %9972 = vmatpush1.bf16.msra.mxu0 %v13354_v34  ;;  %10464 = vmatpush1.bf16.msra.mxu1 %v13356_v35  ;;  %v13402_v34 = vcombine.low %v1334_v17, %v1338_v18  ;;  %v13404_v35 = vcombine.low %v1335_v21, %v1339_v23  ;;  %v1382_v17 = vld [vmem:[%s14823_s27 + $0x1f40] sm:$0xff]  ;;  %v1383_v21 = vld [vmem:[%s14823_s27 + $0x1f48] sm:$0xff] }
 0x280   : > { %9973 = vmatprep.subr.bf16.mxu0 %v13363_v37  ;;  %10465 = vmatprep.subr.bf16.mxu1 %v13365_v38  ;;  %v13411_v37 = vcombine.high %v1342_v30, %v1346_v31  ;;  %v13413_v38 = vcombine.high %v1343_v32, %v1347_v33  ;;  %v1386_v18 = vld [vmem:[%s14823_s27 + $0x1f60] sm:$0xff]  ;;  %v1387_v23 = vld [vmem:[%s14823_s27 + $0x1f68] sm:$0xff] }
 0x283   : > { %9974 = vmatpush1.bf16.msra.mxu0 %v13362_v44  ;;  %10466 = vmatpush1.bf16.msra.mxu1 %v13364_v45  ;;  %v13410_v44 = vcombine.low %v1342_v30, %v1346_v31  ;;  %v13412_v45 = vcombine.low %v1343_v32, %v1347_v33  ;;  %v1390_v30 = vld [vmem:[%s14823_s27 + $0x1f80] sm:$0xff]  ;;  %v1391_v32 = vld [vmem:[%s14823_s27 + $0x1f88] sm:$0xff] }
 0x284   : > { %9975 = vmatprep.subr.bf16.mxu0 %v13371_v47  ;;  %10467 = vmatprep.subr.bf16.mxu1 %v13373_v48  ;;  %v13419_v47 = vcombine.high %v1350_v40, %v1354_v41  ;;  %v13421_v48 = vcombine.high %v1351_v42, %v1355_v43  ;;  %v1394_v31 = vld [vmem:[%s14823_s27 + $0x1fa0] sm:$0xff]  ;;  %v1395_v33 = vld [vmem:[%s14823_s27 + $0x1fa8] sm:$0xff] }
 0x287   : > { %9976 = vmatpush1.bf16.msra.mxu0 %v13370_v56  ;;  %10468 = vmatpush1.bf16.msra.mxu1 %v13372_v58  ;;  %v13418_v56 = vcombine.low %v1350_v40, %v1354_v41  ;;  %v13420_v58 = vcombine.low %v1351_v42, %v1355_v43  ;;  %v1398_v40 = vld [vmem:[%s14823_s27 + $0x1fc0] sm:$0xff]  ;;  %v1399_v42 = vld [vmem:[%s14823_s27 + $0x1fc8] sm:$0xff] }
 0x288   : > { %9977 = vmatprep.subr.bf16.mxu0 %v13379_v60  ;;  %10469 = vmatprep.subr.bf16.mxu1 %v13381_v61  ;;  %v13427_v60 = vcombine.high %v1358_v50, %v1362_v51  ;;  %v13429_v61 = vcombine.high %v1359_v52, %v1363_v54  ;;  %v1402_v41 = vld [vmem:[%s14823_s27 + $0x1fe0] sm:$0xff]  ;;  %v1403_v43 = vld [vmem:[%s14823_s27 + $0x1fe8] sm:$0xff] }
 0x28b   : > { %9978 = vmatpush1.bf16.msra.mxu0 %v13378_v2  ;;  %10470 = vmatpush1.bf16.msra.mxu1 %v13380_v3  ;;  %v13426_v2 = vcombine.low %v1358_v50, %v1362_v51  ;;  %v13428_v3 = vcombine.low %v1359_v52, %v1363_v54  ;;  %v1406_v50 = vld [vmem:[%s14823_s27 + $0x2000] sm:$0xff]  ;;  %v1407_v52 = vld [vmem:[%s14823_s27 + $0x2008] sm:$0xff] }
 0x28c   : > { %9979 = vmatprep.subr.bf16.mxu0 %v13387_v4  ;;  %10471 = vmatprep.subr.bf16.mxu1 %v13389_v5  ;;  %v13435_v4 = vcombine.high %v1366_v62, %v1370_v63  ;;  %v13437_v5 = vcombine.high %v1367_v0, %v1371_v1  ;;  %v1410_v51 = vld [vmem:[%s14823_s27 + $0x2020] sm:$0xff]  ;;  %v1411_v54 = vld [vmem:[%s14823_s27 + $0x2028] sm:$0xff] }
 0x28f   : > { %9980 = vmatpush1.bf16.msra.mxu0 %v13386_v10  ;;  %10472 = vmatpush1.bf16.msra.mxu1 %v13388_v11  ;;  %v13434_v10 = vcombine.low %v1366_v62, %v1370_v63  ;;  %v13436_v11 = vcombine.low %v1367_v0, %v1371_v1  ;;  %v1414_v62 = vld [vmem:[%s14823_s27 + $0x2040] sm:$0xff]  ;;  %v15464_v0 = vcombine.low %v15390_v24, %v15390_v24  ;;  %v1415_v1 = vld [vmem:[%s14823_s27 + $0x2048] sm:$0xff] }
 0x290   : > { %9981 = vmatprep.subr.bf16.mxu0 %v13395_v13  ;;  %10473 = vmatprep.subr.bf16.mxu1 %v13397_v14  ;;  %v13443_v13 = vcombine.high %v1374_v6, %v1378_v7  ;;  %v13445_v14 = vcombine.high %v1375_v8, %v1379_v9  ;;  %v1418_v63 = vld [vmem:[%s14823_s27 + $0x2060] sm:$0xff] }
 0x293   : > { %9982 = vmatpush1.bf16.msra.mxu0 %v13394_v26  ;;  %10474 = vmatpush1.bf16.msra.mxu1 %v13396_v27  ;;  %v13442_v26 = vcombine.low %v1374_v6, %v1378_v7  ;;  %v13444_v27 = vcombine.low %v1375_v8, %v1379_v9  ;;  %v13483_v6 = vcombine.high %v1414_v62, %v1418_v63  ;;  %v1422_v8 = vld [vmem:[%s14823_s27 + $0x2080] sm:$0xff] }
 0x294   : > { %9983 = vmatprep.subr.bf16.mxu0 %v13403_v28  ;;  %10475 = vmatprep.subr.bf16.mxu1 %v13405_v29  ;;  %v13451_v28 = vcombine.high %v1382_v17, %v1386_v18  ;;  %v13453_v29 = vcombine.high %v1383_v21, %v1387_v23  ;;  %v1426_v9 = vld [vmem:[%s14823_s27 + $0x20a0] sm:$0xff] }
 0x297   : > { %9984 = vmatpush1.bf16.msra.mxu0 %v13402_v34  ;;  %10476 = vmatpush1.bf16.msra.mxu1 %v13404_v35  ;;  %v13450_v34 = vcombine.low %v1382_v17, %v1386_v18  ;;  %v13452_v35 = vcombine.low %v1383_v21, %v1387_v23  ;;  %v13491_v17 = vcombine.high %v1422_v8, %v1426_v9  ;;  %v1430_v21 = vld [vmem:[%s14823_s27 + $0x20c0] sm:$0xff] }
 0x298   : > { %9985 = vmatprep.subr.bf16.mxu0 %v13411_v37  ;;  %10477 = vmatprep.subr.bf16.mxu1 %v13413_v38  ;;  %v13459_v37 = vcombine.high %v1390_v30, %v1394_v31  ;;  %v13461_v38 = vcombine.high %v1391_v32, %v1395_v33  ;;  %v1434_v23 = vld [vmem:[%s14823_s27 + $0x20e0] sm:$0xff] }
 0x29b   : > { %9986 = vmatpush1.bf16.msra.mxu0 %v13410_v44  ;;  %10478 = vmatpush1.bf16.msra.mxu1 %v13412_v45  ;;  %v13458_v44 = vcombine.low %v1390_v30, %v1394_v31  ;;  %v13460_v45 = vcombine.low %v1391_v32, %v1395_v33  ;;  %v13499_v30 = vcombine.high %v1430_v21, %v1434_v23  ;;  %v1438_v32 = vld [vmem:[%s14823_s27 + $0x2100] sm:$0xff] }
 0x29c   : > { %9987 = vmatprep.subr.bf16.mxu0 %v13419_v47  ;;  %10479 = vmatprep.subr.bf16.mxu1 %v13421_v48  ;;  %v13467_v47 = vcombine.high %v1398_v40, %v1402_v41  ;;  %v13469_v48 = vcombine.high %v1399_v42, %v1403_v43  ;;  %v1442_v33 = vld [vmem:[%s14823_s27 + $0x2120] sm:$0xff] }
 0x29f   : > { %9988 = vmatpush1.bf16.msra.mxu0 %v13418_v56  ;;  %10480 = vmatpush1.bf16.msra.mxu1 %v13420_v58  ;;  %v13466_v56 = vcombine.low %v1398_v40, %v1402_v41  ;;  %v13468_v58 = vcombine.low %v1399_v42, %v1403_v43  ;;  %v13507_v40 = vcombine.high %v1438_v32, %v1442_v33  ;;  %v1446_v42 = vld [vmem:[%s14823_s27 + $0x2140] sm:$0xff] }
 0x2a0   : > { %9989 = vmatprep.subr.bf16.mxu0 %v13427_v60  ;;  %10481 = vmatprep.subr.bf16.mxu1 %v13429_v61  ;;  %v13475_v60 = vcombine.high %v1406_v50, %v1410_v51  ;;  %v13477_v61 = vcombine.high %v1407_v52, %v1411_v54  ;;  %v1450_v43 = vld [vmem:[%s14823_s27 + $0x2160] sm:$0xff] }
 0x2a3   : > { %9990 = vmatpush1.bf16.msra.mxu0 %v13426_v2  ;;  %10482 = vmatpush1.bf16.msra.mxu1 %v13428_v3  ;;  %v1419_v2 = vld [vmem:[%s14823_s27 + $0x2068] sm:$0xff]  ;;  %v15468_v3 = vld [vmem:[#allocation2 + $0x40] sm:$0xff] }
 0x2a4   : > { %9991 = vmatprep.subr.bf16.mxu0 %v13435_v4  ;;  %10483 = vmatprep.subr.bf16.mxu1 %v13437_v5  ;;  %v13474_v4 = vcombine.low %v1406_v50, %v1410_v51  ;;  %v13476_v5 = vcombine.low %v1407_v52, %v1411_v54  ;;  %v13485_v7 = vcombine.high %v1415_v1, %v1419_v2  ;;  %v1454_v52 = vld [vmem:[%s14823_s27 + $0x2180] sm:$0xff] }
 0x2a5   : > { %v15474_v24 = vcombine.high %v15468_v3, %v15468_v3  ;;  %v13515_v50 = vcombine.high %v1446_v42, %v1450_v43  ;;  %v1458_v54 = vld [vmem:[%s14823_s27 + $0x21a0] sm:$0xff] }
 0x2a7   : > { %9992 = vmatpush1.bf16.msra.mxu0 %v13434_v10  ;;  %10484 = vmatpush1.bf16.msra.mxu1 %v13436_v11  ;;  %v1423_v10 = vld [vmem:[%s14823_s27 + $0x2088] sm:$0xff] }
 0x2a8   : > { %9993 = vmatprep.subr.bf16.mxu0 %v13443_v13  ;;  %10485 = vmatprep.subr.bf16.mxu1 %v13445_v14  ;;  %v1427_v11 = vld [vmem:[%s14823_s27 + $0x20a8] sm:$0xff]  ;;  %v13482_v13 = vcombine.low %v1414_v62, %v1418_v63  ;;  %v13484_v14 = vcombine.low %v1415_v1, %v1419_v2  ;;  %v13523_v62 = vcombine.high %v1454_v52, %v1458_v54  ;;  %v1462_v1 = vld [vmem:[%s14823_s27 + $0x21c0] sm:$0xff] }
 0x2a9   : > { %v13493_v18 = vcombine.high %v1423_v10, %v1427_v11  ;;  %v1466_v2 = vld [vmem:[%s14823_s27 + $0x21e0] sm:$0xff] }
 0x2ab   : > { %9994 = vmatpush1.bf16.msra.mxu0 %v13442_v26  ;;  %10486 = vmatpush1.bf16.msra.mxu1 %v13444_v27  ;;  %v1431_v26 = vld [vmem:[%s14823_s27 + $0x20c8] sm:$0xff] }
 0x2ac   : > { %9995 = vmatprep.subr.bf16.mxu0 %v13451_v28  ;;  %10487 = vmatprep.subr.bf16.mxu1 %v13453_v29  ;;  %v1435_v27 = vld [vmem:[%s14823_s27 + $0x20e8] sm:$0xff]  ;;  %v13490_v28 = vcombine.low %v1422_v8, %v1426_v9  ;;  %v13492_v29 = vcombine.low %v1423_v10, %v1427_v11  ;;  %v13531_v8 = vcombine.high %v1462_v1, %v1466_v2  ;;  %v1470_v10 = vld [vmem:[%s14823_s27 + $0x2200] sm:$0xff] }
 0x2ad   : > { %v13501_v31 = vcombine.high %v1431_v26, %v1435_v27  ;;  %v1474_v11 = vld [vmem:[%s14823_s27 + $0x2220] sm:$0xff] }
 0x2af   : > { %9996 = vmatpush1.bf16.msra.mxu0 %v13450_v34  ;;  %10488 = vmatpush1.bf16.msra.mxu1 %v13452_v35  ;;  %v1439_v34 = vld [vmem:[%s14823_s27 + $0x2108] sm:$0xff] }
 0x2b0   : > { %9997 = vmatprep.subr.bf16.mxu0 %v13459_v37  ;;  %10489 = vmatprep.subr.bf16.mxu1 %v13461_v38  ;;  %v1443_v35 = vld [vmem:[%s14823_s27 + $0x2128] sm:$0xff]  ;;  %v13498_v37 = vcombine.low %v1430_v21, %v1434_v23  ;;  %v13500_v38 = vcombine.low %v1431_v26, %v1435_v27  ;;  %v13539_v21 = vcombine.high %v1470_v10, %v1474_v11  ;;  %v1478_v26 = vld [vmem:[%s14823_s27 + $0x2240] sm:$0xff] }
 0x2b1   : > { %v13509_v41 = vcombine.high %v1439_v34, %v1443_v35  ;;  %v1482_v27 = vld [vmem:[%s14823_s27 + $0x2260] sm:$0xff] }
 0x2b3   : > { %9998 = vmatpush1.bf16.msra.mxu0 %v13458_v44  ;;  %10490 = vmatpush1.bf16.msra.mxu1 %v13460_v45  ;;  %v1447_v44 = vld [vmem:[%s14823_s27 + $0x2148] sm:$0xff] }
 0x2b4   : > { %9999 = vmatprep.subr.bf16.mxu0 %v13467_v47  ;;  %10491 = vmatprep.subr.bf16.mxu1 %v13469_v48  ;;  %v1451_v45 = vld [vmem:[%s14823_s27 + $0x2168] sm:$0xff]  ;;  %v13506_v47 = vcombine.low %v1438_v32, %v1442_v33  ;;  %v13508_v48 = vcombine.low %v1439_v34, %v1443_v35  ;;  %v13547_v32 = vcombine.high %v1478_v26, %v1482_v27  ;;  %v1486_v34 = vld [vmem:[%s14823_s27 + $0x2280] sm:$0xff] }
 0x2b5   : > { %v13517_v51 = vcombine.high %v1447_v44, %v1451_v45  ;;  %v1490_v35 = vld [vmem:[%s14823_s27 + $0x22a0] sm:$0xff] }
 0x2b7   : > { %10000 = vmatpush1.bf16.msra.mxu0 %v13466_v56  ;;  %10492 = vmatpush1.bf16.msra.mxu1 %v13468_v58  ;;  %v1455_v56 = vld [vmem:[%s14823_s27 + $0x2188] sm:$0xff] }
 0x2b8   : > { %10010 = vmatprep.subr.bf16.mxu0 %v13475_v60  ;;  %10502 = vmatprep.subr.bf16.mxu1 %v13477_v61  ;;  %v1459_v58 = vld [vmem:[%s14823_s27 + $0x21a8] sm:$0xff]  ;;  %v13514_v60 = vcombine.low %v1446_v42, %v1450_v43  ;;  %v13516_v61 = vcombine.low %v1447_v44, %v1451_v45  ;;  %v13555_v42 = vcombine.high %v1486_v34, %v1490_v35  ;;  %v1494_v44 = vld [vmem:[%s14823_s27 + $0x22c0] sm:$0xff] }
 0x2b9   : > { %v13525_v63 = vcombine.high %v1455_v56, %v1459_v58  ;;  %v1498_v45 = vld [vmem:[%s14823_s27 + $0x22e0] sm:$0xff] }
 0x2ba   : > { %10002 = vmatmul.mubr.bf16.vlgmr.msra.gmra.mrb[0].mxu0 %v15464_v0  ;;  %10494 = vmatmul.mubr.bf16.vlgmr.msra.gmra.mrb[0].mxu1 %v15464_v0 }
 0x2bb   : > { %10011 = vmatpush1.bf16.msra.mxu0 %v13474_v4  ;;  %10503 = vmatpush1.bf16.msra.mxu1 %v13476_v5  ;;  %v1463_v4 = vld [vmem:[%s14823_s27 + $0x21c8] sm:$0xff] }
 0x2bc   : > { %10012 = vmatprep.subr.bf16.mxu0 %v13483_v6  ;;  %10504 = vmatprep.subr.bf16.mxu1 %v13485_v7  ;;  %v1467_v5 = vld [vmem:[%s14823_s27 + $0x21e8] sm:$0xff]  ;;  %v13522_v6 = vcombine.low %v1454_v52, %v1458_v54  ;;  %v13524_v7 = vcombine.low %v1455_v56, %v1459_v58  ;;  %v13563_v52 = vcombine.high %v1494_v44, %v1498_v45  ;;  %v1502_v56 = vld [vmem:[%s14823_s27 + $0x2300] sm:$0xff] }
 0x2bd   : > { %10042 = vmatprep.mubr.bf16.mxu0 %v15474_v24  ;;  %10534 = vmatprep.mubr.bf16.mxu1 %v15474_v24  ;;  %v13533_v9 = vcombine.high %v1463_v4, %v1467_v5  ;;  %v1506_v58 = vld [vmem:[%s14823_s27 + $0x2320] sm:$0xff] }
 0x2bf   : > { %10013 = vmatpush1.bf16.msra.mxu0 %v13482_v13  ;;  %10505 = vmatpush1.bf16.msra.mxu1 %v13484_v14  ;;  %v1471_v13 = vld [vmem:[%s14823_s27 + $0x2208] sm:$0xff] }
 0x2c0   : > { %10014 = vmatprep.subr.bf16.mxu0 %v13491_v17  ;;  %10506 = vmatprep.subr.bf16.mxu1 %v13493_v18  ;;  %v1475_v14 = vld [vmem:[%s14823_s27 + $0x2228] sm:$0xff]  ;;  %v13530_v17 = vcombine.low %v1462_v1, %v1466_v2  ;;  %v13532_v18 = vcombine.low %v1463_v4, %v1467_v5  ;;  %v13571_v1 = vcombine.high %v1502_v56, %v1506_v58  ;;  %v1510_v4 = vld [vmem:[%s14823_s27 + $0x2340] sm:$0xff] }
 0x2c1   : > { %v13541_v23 = vcombine.high %v1471_v13, %v1475_v14  ;;  %v1514_v5 = vld [vmem:[%s14823_s27 + $0x2360] sm:$0xff] }
 0x2c3   : > { %10015 = vmatpush1.bf16.msra.mxu0 %v13490_v28  ;;  %10507 = vmatpush1.bf16.msra.mxu1 %v13492_v29  ;;  %v1479_v28 = vld [vmem:[%s14823_s27 + $0x2248] sm:$0xff] }
 0x2c4   : > { %10016 = vmatprep.subr.bf16.mxu0 %v13499_v30  ;;  %10508 = vmatprep.subr.bf16.mxu1 %v13501_v31  ;;  %v1483_v29 = vld [vmem:[%s14823_s27 + $0x2268] sm:$0xff]  ;;  %v13538_v30 = vcombine.low %v1470_v10, %v1474_v11  ;;  %v13540_v31 = vcombine.low %v1471_v13, %v1475_v14  ;;  %v13579_v10 = vcombine.high %v1510_v4, %v1514_v5  ;;  %v1518_v13 = vld [vmem:[%s14823_s27 + $0x2380] sm:$0xff] }
 0x2c5   : > { %v13549_v33 = vcombine.high %v1479_v28, %v1483_v29  ;;  %v1522_v14 = vld [vmem:[%s14823_s27 + $0x23a0] sm:$0xff] }
 0x2c7   : > { %10017 = vmatpush1.bf16.msra.mxu0 %v13498_v37  ;;  %10509 = vmatpush1.bf16.msra.mxu1 %v13500_v38  ;;  %v1487_v37 = vld [vmem:[%s14823_s27 + $0x2288] sm:$0xff] }
 0x2c8   : > { %10018 = vmatprep.subr.bf16.mxu0 %v13507_v40  ;;  %10510 = vmatprep.subr.bf16.mxu1 %v13509_v41  ;;  %v1491_v38 = vld [vmem:[%s14823_s27 + $0x22a8] sm:$0xff]  ;;  %v13546_v40 = vcombine.low %v1478_v26, %v1482_v27  ;;  %v13548_v41 = vcombine.low %v1479_v28, %v1483_v29  ;;  %v13587_v26 = vcombine.high %v1518_v13, %v1522_v14  ;;  %v1526_v28 = vld [vmem:[%s14823_s27 + $0x23c0] sm:$0xff] }
 0x2c9   : > { %v13557_v43 = vcombine.high %v1487_v37, %v1491_v38  ;;  %v1530_v29 = vld [vmem:[%s14823_s27 + $0x23e0] sm:$0xff] }
 0x2cb   : > { %10019 = vmatpush1.bf16.msra.mxu0 %v13506_v47  ;;  %10511 = vmatpush1.bf16.msra.mxu1 %v13508_v48  ;;  %v1495_v47 = vld [vmem:[%s14823_s27 + $0x22c8] sm:$0xff] }
 0x2cc   : > { %10020 = vmatprep.subr.bf16.mxu0 %v13515_v50  ;;  %10512 = vmatprep.subr.bf16.mxu1 %v13517_v51  ;;  %v1499_v48 = vld [vmem:[%s14823_s27 + $0x22e8] sm:$0xff]  ;;  %v13554_v50 = vcombine.low %v1486_v34, %v1490_v35  ;;  %v13556_v51 = vcombine.low %v1487_v37, %v1491_v38  ;;  %v13595_v34 = vcombine.high %v1526_v28, %v1530_v29  ;;  %v1534_v37 = vld [vmem:[%s14823_s27 + $0x2400] sm:$0xff] }
 0x2cd   : > { %v13565_v54 = vcombine.high %v1495_v47, %v1499_v48  ;;  %v1538_v38 = vld [vmem:[%s14823_s27 + $0x2420] sm:$0xff] }
 0x2cf   : > { %10021 = vmatpush1.bf16.msra.mxu0 %v13514_v60  ;;  %10513 = vmatpush1.bf16.msra.mxu1 %v13516_v61  ;;  %v1503_v60 = vld [vmem:[%s14823_s27 + $0x2308] sm:$0xff] }
 0x2d0   : > { %10022 = vmatprep.subr.bf16.mxu0 %v13523_v62  ;;  %10514 = vmatprep.subr.bf16.mxu1 %v13525_v63  ;;  %v1507_v61 = vld [vmem:[%s14823_s27 + $0x2328] sm:$0xff]  ;;  %v13562_v62 = vcombine.low %v1494_v44, %v1498_v45  ;;  %v13564_v63 = vcombine.low %v1495_v47, %v1499_v48  ;;  %v13603_v44 = vcombine.high %v1534_v37, %v1538_v38  ;;  %v1542_v47 = vld [vmem:[%s14823_s27 + $0x2440] sm:$0xff] }
 0x2d1   : > { %v13573_v2 = vcombine.high %v1503_v60, %v1507_v61  ;;  %v1546_v48 = vld [vmem:[%s14823_s27 + $0x2460] sm:$0xff] }
 0x2d3   : > { %10023 = vmatpush1.bf16.msra.mxu0 %v13522_v6  ;;  %10515 = vmatpush1.bf16.msra.mxu1 %v13524_v7  ;;  %v1511_v6 = vld [vmem:[%s14823_s27 + $0x2348] sm:$0xff] }
 0x2d4   : > { %10024 = vmatprep.subr.bf16.mxu0 %v13531_v8  ;;  %10516 = vmatprep.subr.bf16.mxu1 %v13533_v9  ;;  %v1515_v7 = vld [vmem:[%s14823_s27 + $0x2368] sm:$0xff]  ;;  %v13570_v8 = vcombine.low %v1502_v56, %v1506_v58  ;;  %v13572_v9 = vcombine.low %v1503_v60, %v1507_v61  ;;  %v13602_v56 = vcombine.low %v1534_v37, %v1538_v38 }
 0x2d5   : > { %v13581_v11 = vcombine.high %v1511_v6, %v1515_v7  ;;  %v13611_v60 = vcombine.high %v1542_v47, %v1546_v48 }
 0x2d7   : > { %10025 = vmatpush1.bf16.msra.mxu0 %v13530_v17  ;;  %10517 = vmatpush1.bf16.msra.mxu1 %v13532_v18  ;;  %v1519_v17 = vld [vmem:[%s14823_s27 + $0x2388] sm:$0xff] }
 0x2d8   : > { %10026 = vmatprep.subr.bf16.mxu0 %v13539_v21  ;;  %10518 = vmatprep.subr.bf16.mxu1 %v13541_v23  ;;  %v1523_v18 = vld [vmem:[%s14823_s27 + $0x23a8] sm:$0xff]  ;;  %v13578_v21 = vcombine.low %v1510_v4, %v1514_v5  ;;  %v13580_v23 = vcombine.low %v1511_v6, %v1515_v7  ;;  %v13610_v4 = vcombine.low %v1542_v47, %v1546_v48 }
 0x2d9   : > { %v13589_v27 = vcombine.high %v1519_v17, %v1523_v18 }
 0x2db   : > { %10027 = vmatpush1.bf16.msra.mxu0 %v13538_v30  ;;  %10519 = vmatpush1.bf16.msra.mxu1 %v13540_v31  ;;  %v1527_v30 = vld [vmem:[%s14823_s27 + $0x23c8] sm:$0xff] }
 0x2dc   : > { %10028 = vmatprep.subr.bf16.mxu0 %v13547_v32  ;;  %10520 = vmatprep.subr.bf16.mxu1 %v13549_v33  ;;  %v1531_v31 = vld [vmem:[%s14823_s27 + $0x23e8] sm:$0xff]  ;;  %v13586_v32 = vcombine.low %v1518_v13, %v1522_v14  ;;  %v13588_v33 = vcombine.low %v1519_v17, %v1523_v18 }
 0x2dd   : > { %v13597_v35 = vcombine.high %v1527_v30, %v1531_v31 }
 0x2df   : > { %10029 = vmatpush1.bf16.msra.mxu0 %v13546_v40  ;;  %10521 = vmatpush1.bf16.msra.mxu1 %v13548_v41  ;;  %v1535_v40 = vld [vmem:[%s14823_s27 + $0x2408] sm:$0xff] }
 0x2e0   : > { %10030 = vmatprep.subr.bf16.mxu0 %v13555_v42  ;;  %10522 = vmatprep.subr.bf16.mxu1 %v13557_v43  ;;  %v1539_v41 = vld [vmem:[%s14823_s27 + $0x2428] sm:$0xff]  ;;  %v13594_v42 = vcombine.low %v1526_v28, %v1530_v29  ;;  %v13596_v43 = vcombine.low %v1527_v30, %v1531_v31 }
 0x2e1   : > { %v13605_v45 = vcombine.high %v1535_v40, %v1539_v41  ;;  %v13604_v58 = vcombine.low %v1535_v40, %v1539_v41 }
 0x2e3   : > { %10031 = vmatpush1.bf16.msra.mxu0 %v13554_v50  ;;  %10523 = vmatpush1.bf16.msra.mxu1 %v13556_v51  ;;  %v15542_v50 = vcombine.low %v15468_v3, %v15468_v3  ;;  %v1543_v51 = vld [vmem:[%s14823_s27 + $0x2448] sm:$0xff] }
 0x2e4   : > { %10032 = vmatprep.subr.bf16.mxu0 %v13563_v52  ;;  %10524 = vmatprep.subr.bf16.mxu1 %v13565_v54  ;;  %v1547_v52 = vld [vmem:[%s14823_s27 + $0x2468] sm:$0xff] }
 0x2e5   : > { %v15546_v54 = vld [vmem:[#allocation2 + $0x48] sm:$0xff]  ;;  %v13613_v61 = vcombine.high %v1543_v51, %v1547_v52  ;;  %v13612_v5 = vcombine.low %v1543_v51, %v1547_v52 }
 0x2e6   : > { %v15552_v3 = vcombine.high %v15546_v54, %v15546_v54 }
 0x2e7   : > { %10033 = vmatpush1.bf16.msra.mxu0 %v13562_v62  ;;  %10525 = vmatpush1.bf16.msra.mxu1 %v13564_v63  ;;  %v1550_v62 = vld [vmem:[%s14823_s27 + $0x2480] sm:$0xff] }
 0x2e8   : > { %10034 = vmatprep.subr.bf16.mxu0 %v13571_v1  ;;  %10526 = vmatprep.subr.bf16.mxu1 %v13573_v2  ;;  %v1554_v63 = vld [vmem:[%s14823_s27 + $0x24a0] sm:$0xff]  ;;  %v1551_v1 = vld [vmem:[%s14823_s27 + $0x2488] sm:$0xff] }
 0x2e9   : > { %v1555_v2 = vld [vmem:[%s14823_s27 + $0x24a8] sm:$0xff]  ;;  %v13619_v6 = vcombine.high %v1550_v62, %v1554_v63  ;;  %v13618_v13 = vcombine.low %v1550_v62, %v1554_v63 }
 0x2ea   : > { %v13621_v7 = vcombine.high %v1551_v1, %v1555_v2  ;;  %v13620_v14 = vcombine.low %v1551_v1, %v1555_v2 }
 0x2eb   : > { %10035 = vmatpush1.bf16.msra.mxu0 %v13570_v8  ;;  %10527 = vmatpush1.bf16.msra.mxu1 %v13572_v9  ;;  %v1558_v8 = vld [vmem:[%s14823_s27 + $0x24c0] sm:$0xff] }
 0x2ec   : > { %10036 = vmatprep.subr.bf16.mxu0 %v13579_v10  ;;  %10528 = vmatprep.subr.bf16.mxu1 %v13581_v11  ;;  %v1562_v9 = vld [vmem:[%s14823_s27 + $0x24e0] sm:$0xff]  ;;  %v1559_v10 = vld [vmem:[%s14823_s27 + $0x24c8] sm:$0xff] }
 0x2ed   : > { %v1563_v11 = vld [vmem:[%s14823_s27 + $0x24e8] sm:$0xff]  ;;  %v13627_v17 = vcombine.high %v1558_v8, %v1562_v9  ;;  %v13626_v28 = vcombine.low %v1558_v8, %v1562_v9 }
 0x2ee   : > { %v13629_v18 = vcombine.high %v1559_v10, %v1563_v11  ;;  %v13628_v29 = vcombine.low %v1559_v10, %v1563_v11 }
 0x2ef   : > { %10037 = vmatpush1.bf16.msra.mxu0 %v13578_v21  ;;  %10529 = vmatpush1.bf16.msra.mxu1 %v13580_v23  ;;  %v1566_v21 = vld [vmem:[%s14823_s27 + $0x2500] sm:$0xff] }
 0x2f0   : > { %10038 = vmatprep.subr.bf16.mxu0 %v13587_v26  ;;  %10530 = vmatprep.subr.bf16.mxu1 %v13589_v27  ;;  %v1570_v23 = vld [vmem:[%s14823_s27 + $0x2520] sm:$0xff]  ;;  %v1567_v26 = vld [vmem:[%s14823_s27 + $0x2508] sm:$0xff] }
 0x2f1   : > { %v1571_v27 = vld [vmem:[%s14823_s27 + $0x2528] sm:$0xff]  ;;  %v13635_v30 = vcombine.high %v1566_v21, %v1570_v23  ;;  %v13634_v37 = vcombine.low %v1566_v21, %v1570_v23 }
 0x2f2   : > { %v13637_v31 = vcombine.high %v1567_v26, %v1571_v27  ;;  %v13636_v38 = vcombine.low %v1567_v26, %v1571_v27 }
 0x2f3   : > { %10039 = vmatpush1.bf16.msra.mxu0 %v13586_v32  ;;  %10531 = vmatpush1.bf16.msra.mxu1 %v13588_v33  ;;  %v1574_v32 = vld [vmem:[%s14823_s27 + $0x2540] sm:$0xff] }
 0x2f4   : > { %10040 = vmatprep.subr.bf16.mxu0 %v13595_v34  ;;  %10532 = vmatprep.subr.bf16.mxu1 %v13597_v35  ;;  %v1578_v33 = vld [vmem:[%s14823_s27 + $0x2560] sm:$0xff]  ;;  %v1575_v34 = vld [vmem:[%s14823_s27 + $0x2548] sm:$0xff] }
 0x2f5   : > { %v1579_v35 = vld [vmem:[%s14823_s27 + $0x2568] sm:$0xff]  ;;  %v13643_v40 = vcombine.high %v1574_v32, %v1578_v33  ;;  %v13642_v47 = vcombine.low %v1574_v32, %v1578_v33 }
 0x2f6   : > { %v13645_v41 = vcombine.high %v1575_v34, %v1579_v35  ;;  %v13644_v48 = vcombine.low %v1575_v34, %v1579_v35 }
 0x2f7   : > { %10041 = vmatpush1.bf16.msra.mxu0 %v13594_v42  ;;  %10533 = vmatpush1.bf16.msra.mxu1 %v13596_v43  ;;  %v1582_v42 = vld [vmem:[%s14823_s27 + $0x2580] sm:$0xff] }
 0x2f8   : > { %10051 = vmatprep.subr.bf16.mxu0 %v13603_v44  ;;  %10543 = vmatprep.subr.bf16.mxu1 %v13605_v45  ;;  %v1586_v43 = vld [vmem:[%s14823_s27 + $0x25a0] sm:$0xff]  ;;  %v1583_v44 = vld [vmem:[%s14823_s27 + $0x2588] sm:$0xff] }
 0x2f9   : > { %v1587_v45 = vld [vmem:[%s14823_s27 + $0x25a8] sm:$0xff]  ;;  %v13651_v51 = vcombine.high %v1582_v42, %v1586_v43  ;;  %v13650_v62 = vcombine.low %v1582_v42, %v1586_v43 }
 0x2fa   : > { %10043 = vmatmul.mubr.bf16.vlgmr.msra.gmra.mrb[0].mxu0 %v15542_v50  ;;  %10535 = vmatmul.mubr.bf16.vlgmr.msra.gmra.mrb[0].mxu1 %v15542_v50  ;;  %v13653_v52 = vcombine.high %v1583_v44, %v1587_v45  ;;  %v13652_v63 = vcombine.low %v1583_v44, %v1587_v45 }
 0x2fb   : > { %10052 = vmatpush1.bf16.msra.mxu0 %v13602_v56  ;;  %10544 = vmatpush1.bf16.msra.mxu1 %v13604_v58  ;;  %v1590_v56 = vld [vmem:[%s14823_s27 + $0x25c0] sm:$0xff] }
 0x2fc   : > { %10053 = vmatprep.subr.bf16.mxu0 %v13611_v60  ;;  %10545 = vmatprep.subr.bf16.mxu1 %v13613_v61  ;;  %v1594_v58 = vld [vmem:[%s14823_s27 + $0x25e0] sm:$0xff]  ;;  %v1591_v60 = vld [vmem:[%s14823_s27 + $0x25c8] sm:$0xff] }
 0x2fd   : > { %10083 = vmatprep.mubr.bf16.mxu0 %v15552_v3  ;;  %10575 = vmatprep.mubr.bf16.mxu1 %v15552_v3  ;;  %v1595_v61 = vld [vmem:[%s14823_s27 + $0x25e8] sm:$0xff]  ;;  %v13659_v1 = vcombine.high %v1590_v56, %v1594_v58  ;;  %v13658_v8 = vcombine.low %v1590_v56, %v1594_v58 }
 0x2fe   : > { %v13661_v2 = vcombine.high %v1591_v60, %v1595_v61  ;;  %v13660_v9 = vcombine.low %v1591_v60, %v1595_v61 }
 0x2ff   : > { %10054 = vmatpush1.bf16.msra.mxu0 %v13610_v4  ;;  %10546 = vmatpush1.bf16.msra.mxu1 %v13612_v5  ;;  %v1598_v4 = vld [vmem:[%s14823_s27 + $0x2600] sm:$0xff] }
 0x300   : > { %10055 = vmatprep.subr.bf16.mxu0 %v13619_v6  ;;  %10547 = vmatprep.subr.bf16.mxu1 %v13621_v7  ;;  %v1602_v5 = vld [vmem:[%s14823_s27 + $0x2620] sm:$0xff]  ;;  %v1599_v6 = vld [vmem:[%s14823_s27 + $0x2608] sm:$0xff] }
 0x301   : > { %v1603_v7 = vld [vmem:[%s14823_s27 + $0x2628] sm:$0xff]  ;;  %v13667_v10 = vcombine.high %v1598_v4, %v1602_v5  ;;  %v13666_v21 = vcombine.low %v1598_v4, %v1602_v5 }
 0x302   : > { %v13669_v11 = vcombine.high %v1599_v6, %v1603_v7  ;;  %v13668_v23 = vcombine.low %v1599_v6, %v1603_v7 }
 0x303   : > { %10056 = vmatpush1.bf16.msra.mxu0 %v13618_v13  ;;  %10548 = vmatpush1.bf16.msra.mxu1 %v13620_v14  ;;  %v1606_v13 = vld [vmem:[%s14823_s27 + $0x2640] sm:$0xff] }
 0x304   : > { %10057 = vmatprep.subr.bf16.mxu0 %v13627_v17  ;;  %10549 = vmatprep.subr.bf16.mxu1 %v13629_v18  ;;  %v1610_v14 = vld [vmem:[%s14823_s27 + $0x2660] sm:$0xff]  ;;  %v1607_v17 = vld [vmem:[%s14823_s27 + $0x2648] sm:$0xff] }
 0x305   : > { %v1611_v18 = vld [vmem:[%s14823_s27 + $0x2668] sm:$0xff]  ;;  %v13675_v26 = vcombine.high %v1606_v13, %v1610_v14  ;;  %v13674_v32 = vcombine.low %v1606_v13, %v1610_v14 }
 0x306   : > { %v13677_v27 = vcombine.high %v1607_v17, %v1611_v18  ;;  %v13676_v33 = vcombine.low %v1607_v17, %v1611_v18 }
 0x307   : > { %10058 = vmatpush1.bf16.msra.mxu0 %v13626_v28  ;;  %10550 = vmatpush1.bf16.msra.mxu1 %v13628_v29  ;;  %v1614_v28 = vld [vmem:[%s14823_s27 + $0x2680] sm:$0xff] }
 0x308   : > { %10059 = vmatprep.subr.bf16.mxu0 %v13635_v30  ;;  %10551 = vmatprep.subr.bf16.mxu1 %v13637_v31  ;;  %v1618_v29 = vld [vmem:[%s14823_s27 + $0x26a0] sm:$0xff]  ;;  %v1615_v30 = vld [vmem:[%s14823_s27 + $0x2688] sm:$0xff] }
 0x309   : > { %v1619_v31 = vld [vmem:[%s14823_s27 + $0x26a8] sm:$0xff]  ;;  %v13683_v34 = vcombine.high %v1614_v28, %v1618_v29  ;;  %v13682_v42 = vcombine.low %v1614_v28, %v1618_v29 }
 0x30a   : > { %v13685_v35 = vcombine.high %v1615_v30, %v1619_v31  ;;  %v13684_v43 = vcombine.low %v1615_v30, %v1619_v31 }
 0x30b   : > { %10060 = vmatpush1.bf16.msra.mxu0 %v13634_v37  ;;  %10552 = vmatpush1.bf16.msra.mxu1 %v13636_v38  ;;  %v1622_v37 = vld [vmem:[%s14823_s27 + $0x26c0] sm:$0xff] }
 0x30c   : > { %10061 = vmatprep.subr.bf16.mxu0 %v13643_v40  ;;  %10553 = vmatprep.subr.bf16.mxu1 %v13645_v41  ;;  %v1626_v38 = vld [vmem:[%s14823_s27 + $0x26e0] sm:$0xff]  ;;  %v1623_v40 = vld [vmem:[%s14823_s27 + $0x26c8] sm:$0xff] }
 0x30d   : > { %v1627_v41 = vld [vmem:[%s14823_s27 + $0x26e8] sm:$0xff]  ;;  %v13691_v44 = vcombine.high %v1622_v37, %v1626_v38  ;;  %v13690_v56 = vcombine.low %v1622_v37, %v1626_v38 }
 0x30e   : > { %v13693_v45 = vcombine.high %v1623_v40, %v1627_v41  ;;  %v13692_v58 = vcombine.low %v1623_v40, %v1627_v41 }
 0x30f   : > { %10062 = vmatpush1.bf16.msra.mxu0 %v13642_v47  ;;  %10554 = vmatpush1.bf16.msra.mxu1 %v13644_v48  ;;  %v1630_v47 = vld [vmem:[%s14823_s27 + $0x2700] sm:$0xff] }
 0x310   : > { %10063 = vmatprep.subr.bf16.mxu0 %v13651_v51  ;;  %10555 = vmatprep.subr.bf16.mxu1 %v13653_v52  ;;  %v1634_v48 = vld [vmem:[%s14823_s27 + $0x2720] sm:$0xff]  ;;  %v1631_v51 = vld [vmem:[%s14823_s27 + $0x2708] sm:$0xff] }
 0x311   : > { %v1635_v52 = vld [vmem:[%s14823_s27 + $0x2728] sm:$0xff]  ;;  %v13699_v60 = vcombine.high %v1630_v47, %v1634_v48  ;;  %v13698_v4 = vcombine.low %v1630_v47, %v1634_v48  ;;  %v15624_v48 = vld [vmem:[#allocation2 + $0x50] sm:$0xff] }
 0x312   : > { %v13701_v61 = vcombine.high %v1631_v51, %v1635_v52  ;;  %v13700_v5 = vcombine.low %v1631_v51, %v1635_v52  ;;  %v1675_v47 = vld [vmem:[%s14823_s27 + $0x2868] sm:$0xff] }
 0x313   : > { %10064 = vmatpush1.bf16.msra.mxu0 %v13650_v62  ;;  %10556 = vmatpush1.bf16.msra.mxu1 %v13652_v63  ;;  %v1638_v62 = vld [vmem:[%s14823_s27 + $0x2740] sm:$0xff] }
 0x314   : > { %10065 = vmatprep.subr.bf16.mxu0 %v13659_v1  ;;  %10557 = vmatprep.subr.bf16.mxu1 %v13661_v2  ;;  %v1642_v63 = vld [vmem:[%s14823_s27 + $0x2760] sm:$0xff]  ;;  %v1639_v1 = vld [vmem:[%s14823_s27 + $0x2748] sm:$0xff] }
 0x315   : > { %v1643_v2 = vld [vmem:[%s14823_s27 + $0x2768] sm:$0xff]  ;;  %v13707_v6 = vcombine.high %v1638_v62, %v1642_v63  ;;  %v13706_v13 = vcombine.low %v1638_v62, %v1642_v63 }
 0x316   : > { %v13709_v7 = vcombine.high %v1639_v1, %v1643_v2  ;;  %v13708_v14 = vcombine.low %v1639_v1, %v1643_v2  ;;  %v1679_v62 = vld [vmem:[%s14823_s27 + $0x2888] sm:$0xff] }
 0x317   : > { %10066 = vmatpush1.bf16.msra.mxu0 %v13658_v8  ;;  %10558 = vmatpush1.bf16.msra.mxu1 %v13660_v9  ;;  %v1646_v8 = vld [vmem:[%s14823_s27 + $0x2780] sm:$0xff]  ;;  %v1683_v63 = vld [vmem:[%s14823_s27 + $0x28a8] sm:$0xff] }
 0x318   : > { %10067 = vmatprep.subr.bf16.mxu0 %v13667_v10  ;;  %10559 = vmatprep.subr.bf16.mxu1 %v13669_v11  ;;  %v1650_v9 = vld [vmem:[%s14823_s27 + $0x27a0] sm:$0xff]  ;;  %v1647_v10 = vld [vmem:[%s14823_s27 + $0x2788] sm:$0xff] }
 0x319   : > { %v1651_v11 = vld [vmem:[%s14823_s27 + $0x27a8] sm:$0xff]  ;;  %v13715_v17 = vcombine.high %v1646_v8, %v1650_v9  ;;  %v13714_v28 = vcombine.low %v1646_v8, %v1650_v9 }
 0x31a   : > { %v13717_v18 = vcombine.high %v1647_v10, %v1651_v11  ;;  %v13716_v29 = vcombine.low %v1647_v10, %v1651_v11  ;;  %v1687_v8 = vld [vmem:[%s14823_s27 + $0x28c8] sm:$0xff]  ;;  %v13748_v11 = vcombine.low %v1679_v62, %v1683_v63 }
 0x31b   : > { %10068 = vmatpush1.bf16.msra.mxu0 %v13666_v21  ;;  %10560 = vmatpush1.bf16.msra.mxu1 %v13668_v23  ;;  %v1654_v21 = vld [vmem:[%s14823_s27 + $0x27c0] sm:$0xff]  ;;  %v1691_v9 = vld [vmem:[%s14823_s27 + $0x28e8] sm:$0xff] }
 0x31c   : > { %10069 = vmatprep.subr.bf16.mxu0 %v13675_v26  ;;  %10561 = vmatprep.subr.bf16.mxu1 %v13677_v27  ;;  %v1658_v23 = vld [vmem:[%s14823_s27 + $0x27e0] sm:$0xff]  ;;  %v1655_v26 = vld [vmem:[%s14823_s27 + $0x27c8] sm:$0xff] }
 0x31d   : > { %v1659_v27 = vld [vmem:[%s14823_s27 + $0x27e8] sm:$0xff]  ;;  %v13723_v30 = vcombine.high %v1654_v21, %v1658_v23  ;;  %v13722_v37 = vcombine.low %v1654_v21, %v1658_v23 }
 0x31e   : > { %v13725_v31 = vcombine.high %v1655_v26, %v1659_v27  ;;  %v13724_v38 = vcombine.low %v1655_v26, %v1659_v27  ;;  %v1695_v21 = vld [vmem:[%s14823_s27 + $0x2908] sm:$0xff]  ;;  %v13756_v27 = vcombine.low %v1687_v8, %v1691_v9 }
 0x31f   : > { %10070 = vmatpush1.bf16.msra.mxu0 %v13674_v32  ;;  %10562 = vmatpush1.bf16.msra.mxu1 %v13676_v33  ;;  %v1662_v32 = vld [vmem:[%s14823_s27 + $0x2800] sm:$0xff]  ;;  %v1699_v23 = vld [vmem:[%s14823_s27 + $0x2928] sm:$0xff] }
 0x320   : > { %10071 = vmatprep.subr.bf16.mxu0 %v13683_v34  ;;  %10563 = vmatprep.subr.bf16.mxu1 %v13685_v35  ;;  %v1666_v33 = vld [vmem:[%s14823_s27 + $0x2820] sm:$0xff]  ;;  %v1663_v34 = vld [vmem:[%s14823_s27 + $0x2808] sm:$0xff] }
 0x321   : > { %v1667_v35 = vld [vmem:[%s14823_s27 + $0x2828] sm:$0xff]  ;;  %v13731_v40 = vcombine.high %v1662_v32, %v1666_v33  ;;  %v13730_v51 = vcombine.low %v1662_v32, %v1666_v33 }
 0x322   : > { %v13733_v41 = vcombine.high %v1663_v34, %v1667_v35  ;;  %v13732_v52 = vcombine.low %v1663_v34, %v1667_v35  ;;  %v1703_v32 = vld [vmem:[%s14823_s27 + $0x2948] sm:$0xff]  ;;  %v13764_v35 = vcombine.low %v1695_v21, %v1699_v23 }
 0x323   : > { %10072 = vmatpush1.bf16.msra.mxu0 %v13682_v42  ;;  %10564 = vmatpush1.bf16.msra.mxu1 %v13684_v43  ;;  %v1670_v42 = vld [vmem:[%s14823_s27 + $0x2840] sm:$0xff]  ;;  %v1707_v33 = vld [vmem:[%s14823_s27 + $0x2968] sm:$0xff] }
 0x324   : > { %10073 = vmatprep.subr.bf16.mxu0 %v13691_v44  ;;  %10565 = vmatprep.subr.bf16.mxu1 %v13693_v45  ;;  %v1674_v43 = vld [vmem:[%s14823_s27 + $0x2860] sm:$0xff]  ;;  %v15620_v44 = vcombine.low %v15546_v54, %v15546_v54  ;;  %v1671_v45 = vld [vmem:[%s14823_s27 + $0x2848] sm:$0xff]  ;;  %v15630_v54 = vcombine.high %v15624_v48, %v15624_v48 }
 0x325   : > { %v13738_v1 = vcombine.low %v1670_v42, %v1674_v43  ;;  %v13740_v2 = vcombine.low %v1671_v45, %v1675_v47 }
 0x327   : > { %10074 = vmatpush1.bf16.msra.mxu0 %v13690_v56  ;;  %10566 = vmatpush1.bf16.msra.mxu1 %v13692_v58  ;;  %v13739_v56 = vcombine.high %v1670_v42, %v1674_v43  ;;  %v13741_v58 = vcombine.high %v1671_v45, %v1675_v47  ;;  %v1711_v42 = vld [vmem:[%s14823_s27 + $0x2988] sm:$0xff]  ;;  %v13772_v47 = vcombine.low %v1703_v32, %v1707_v33 }
 0x328   : > { %10075 = vmatprep.subr.bf16.mxu0 %v13699_v60  ;;  %10567 = vmatprep.subr.bf16.mxu1 %v13701_v61  ;;  %v1678_v60 = vld [vmem:[%s14823_s27 + $0x2880] sm:$0xff]  ;;  %v1715_v43 = vld [vmem:[%s14823_s27 + $0x29a8] sm:$0xff] }
 0x329   : > { %v1682_v61 = vld [vmem:[%s14823_s27 + $0x28a0] sm:$0xff] }
 0x32a   : > { %v13746_v10 = vcombine.low %v1678_v60, %v1682_v61 }
 0x32b   : > { %10076 = vmatpush1.bf16.msra.mxu0 %v13698_v4  ;;  %10568 = vmatpush1.bf16.msra.mxu1 %v13700_v5  ;;  %v13747_v4 = vcombine.high %v1678_v60, %v1682_v61  ;;  %v13749_v5 = vcombine.high %v1679_v62, %v1683_v63  ;;  %v1719_v60 = vld [vmem:[%s14823_s27 + $0x29c8] sm:$0xff]  ;;  %v13780_v63 = vcombine.low %v1711_v42, %v1715_v43 }
 0x32c   : > { %10077 = vmatprep.subr.bf16.mxu0 %v13707_v6  ;;  %10569 = vmatprep.subr.bf16.mxu1 %v13709_v7  ;;  %v1686_v6 = vld [vmem:[%s14823_s27 + $0x28c0] sm:$0xff]  ;;  %v1723_v61 = vld [vmem:[%s14823_s27 + $0x29e8] sm:$0xff] }
 0x32d   : > { %v1690_v7 = vld [vmem:[%s14823_s27 + $0x28e0] sm:$0xff] }
 0x32e   : > { %v13754_v26 = vcombine.low %v1686_v6, %v1690_v7 }
 0x32f   : > { %10078 = vmatpush1.bf16.msra.mxu0 %v13706_v13  ;;  %10570 = vmatpush1.bf16.msra.mxu1 %v13708_v14  ;;  %v13755_v13 = vcombine.high %v1686_v6, %v1690_v7  ;;  %v13757_v14 = vcombine.high %v1687_v8, %v1691_v9  ;;  %v1727_v6 = vld [vmem:[%s14823_s27 + $0x2a08] sm:$0xff]  ;;  %v13788_v9 = vcombine.low %v1719_v60, %v1723_v61 }
 0x330   : > { %10079 = vmatprep.subr.bf16.mxu0 %v13715_v17  ;;  %10571 = vmatprep.subr.bf16.mxu1 %v13717_v18  ;;  %v1694_v17 = vld [vmem:[%s14823_s27 + $0x2900] sm:$0xff]  ;;  %v1731_v7 = vld [vmem:[%s14823_s27 + $0x2a28] sm:$0xff] }
 0x331   : > { %v1698_v18 = vld [vmem:[%s14823_s27 + $0x2920] sm:$0xff] }
 0x332   : > { %v13762_v34 = vcombine.low %v1694_v17, %v1698_v18 }
 0x333   : > { %10080 = vmatpush1.bf16.msra.mxu0 %v13714_v28  ;;  %10572 = vmatpush1.bf16.msra.mxu1 %v13716_v29  ;;  %v13763_v28 = vcombine.high %v1694_v17, %v1698_v18  ;;  %v13765_v29 = vcombine.high %v1695_v21, %v1699_v23  ;;  %v1735_v17 = vld [vmem:[%s14823_s27 + $0x2a48] sm:$0xff]  ;;  %v13796_v23 = vcombine.low %v1727_v6, %v1731_v7 }
 0x334   : > { %10081 = vmatprep.subr.bf16.mxu0 %v13723_v30  ;;  %10573 = vmatprep.subr.bf16.mxu1 %v13725_v31  ;;  %v1702_v30 = vld [vmem:[%s14823_s27 + $0x2940] sm:$0xff]  ;;  %v1739_v18 = vld [vmem:[%s14823_s27 + $0x2a68] sm:$0xff] }
 0x335   : > { %v1706_v31 = vld [vmem:[%s14823_s27 + $0x2960] sm:$0xff] }
 0x336   : > { %v13770_v45 = vcombine.low %v1702_v30, %v1706_v31 }
 0x337   : > { %10082 = vmatpush1.bf16.msra.mxu0 %v13722_v37  ;;  %10574 = vmatpush1.bf16.msra.mxu1 %v13724_v38  ;;  %v13771_v37 = vcombine.high %v1702_v30, %v1706_v31  ;;  %v13773_v38 = vcombine.high %v1703_v32, %v1707_v33  ;;  %v1743_v30 = vld [vmem:[%s14823_s27 + $0x2a88] sm:$0xff]  ;;  %v13804_v33 = vcombine.low %v1735_v17, %v1739_v18 }
 0x338   : > { %10092 = vmatprep.subr.bf16.mxu0 %v13731_v40  ;;  %10584 = vmatprep.subr.bf16.mxu1 %v13733_v41  ;;  %v1710_v40 = vld [vmem:[%s14823_s27 + $0x2980] sm:$0xff]  ;;  %v1747_v31 = vld [vmem:[%s14823_s27 + $0x2aa8] sm:$0xff] }
 0x339   : > { %v1714_v41 = vld [vmem:[%s14823_s27 + $0x29a0] sm:$0xff] }
 0x33a   : > { %10084 = vmatmul.mubr.bf16.vlgmr.msra.gmra.mrb[0].mxu0 %v15620_v44  ;;  %10576 = vmatmul.mubr.bf16.vlgmr.msra.gmra.mrb[0].mxu1 %v15620_v44  ;;  %v13778_v62 = vcombine.low %v1710_v40, %v1714_v41 }
 0x33b   : > { %10093 = vmatpush1.bf16.msra.mxu0 %v13730_v51  ;;  %10585 = vmatpush1.bf16.msra.mxu1 %v13732_v52  ;;  %v13779_v51 = vcombine.high %v1710_v40, %v1714_v41  ;;  %v13781_v52 = vcombine.high %v1711_v42, %v1715_v43  ;;  %v1751_v40 = vld [vmem:[%s14823_s27 + $0x2ac8] sm:$0xff]  ;;  %v13812_v43 = vcombine.low %v1743_v30, %v1747_v31 }
 0x33c   : > { %10094 = vmatprep.subr.bf16.mxu0 %v13739_v56  ;;  %10586 = vmatprep.subr.bf16.mxu1 %v13741_v58  ;;  %v1718_v56 = vld [vmem:[%s14823_s27 + $0x29c0] sm:$0xff]  ;;  %v1755_v41 = vld [vmem:[%s14823_s27 + $0x2ae8] sm:$0xff] }
 0x33d   : > { %10124 = vmatprep.mubr.bf16.mxu0 %v15630_v54  ;;  %10616 = vmatprep.mubr.bf16.mxu1 %v15630_v54  ;;  %v1722_v58 = vld [vmem:[%s14823_s27 + $0x29e0] sm:$0xff] }
 0x33e   : > { %v13786_v8 = vcombine.low %v1718_v56, %v1722_v58 }
 0x33f   : > { %10095 = vmatpush1.bf16.msra.mxu0 %v13738_v1  ;;  %10587 = vmatpush1.bf16.msra.mxu1 %v13740_v2  ;;  %v13787_v1 = vcombine.high %v1718_v56, %v1722_v58  ;;  %v13789_v2 = vcombine.high %v1719_v60, %v1723_v61  ;;  %v1759_v56 = vld [vmem:[%s14823_s27 + $0x2b08] sm:$0xff]  ;;  %v13820_v61 = vcombine.low %v1751_v40, %v1755_v41 }
 0x340   : > { %10096 = vmatprep.subr.bf16.mxu0 %v13747_v4  ;;  %10588 = vmatprep.subr.bf16.mxu1 %v13749_v5  ;;  %v1726_v4 = vld [vmem:[%s14823_s27 + $0x2a00] sm:$0xff]  ;;  %v1763_v58 = vld [vmem:[%s14823_s27 + $0x2b28] sm:$0xff] }
 0x341   : > { %v1730_v5 = vld [vmem:[%s14823_s27 + $0x2a20] sm:$0xff] }
 0x342   : > { %v13794_v21 = vcombine.low %v1726_v4, %v1730_v5 }
 0x343   : > { %10097 = vmatpush1.bf16.msra.mxu0 %v13746_v10  ;;  %10589 = vmatpush1.bf16.msra.mxu1 %v13748_v11  ;;  %v13795_v10 = vcombine.high %v1726_v4, %v1730_v5  ;;  %v13797_v11 = vcombine.high %v1727_v6, %v1731_v7  ;;  %v1767_v4 = vld [vmem:[%s14823_s27 + $0x2b48] sm:$0xff]  ;;  %v13828_v7 = vcombine.low %v1759_v56, %v1763_v58 }
 0x344   : > { %10098 = vmatprep.subr.bf16.mxu0 %v13755_v13  ;;  %10590 = vmatprep.subr.bf16.mxu1 %v13757_v14  ;;  %v1734_v13 = vld [vmem:[%s14823_s27 + $0x2a40] sm:$0xff]  ;;  %v1771_v5 = vld [vmem:[%s14823_s27 + $0x2b68] sm:$0xff] }
 0x345   : > { %v1738_v14 = vld [vmem:[%s14823_s27 + $0x2a60] sm:$0xff] }
 0x346   : > { %v13802_v32 = vcombine.low %v1734_v13, %v1738_v14 }
 0x347   : > { %10099 = vmatpush1.bf16.msra.mxu0 %v13754_v26  ;;  %10591 = vmatpush1.bf16.msra.mxu1 %v13756_v27  ;;  %v13803_v26 = vcombine.high %v1734_v13, %v1738_v14  ;;  %v13805_v27 = vcombine.high %v1735_v17, %v1739_v18  ;;  %v1775_v13 = vld [vmem:[%s14823_s27 + $0x2b88] sm:$0xff]  ;;  %v13836_v18 = vcombine.low %v1767_v4, %v1771_v5 }
 0x348   : > { %10100 = vmatprep.subr.bf16.mxu0 %v13763_v28  ;;  %10592 = vmatprep.subr.bf16.mxu1 %v13765_v29  ;;  %v1742_v28 = vld [vmem:[%s14823_s27 + $0x2a80] sm:$0xff]  ;;  %v1779_v14 = vld [vmem:[%s14823_s27 + $0x2ba8] sm:$0xff] }
 0x349   : > { %v1746_v29 = vld [vmem:[%s14823_s27 + $0x2aa0] sm:$0xff] }
 0x34a   : > { %v13810_v42 = vcombine.low %v1742_v28, %v1746_v29 }
 0x34b   : > { %10101 = vmatpush1.bf16.msra.mxu0 %v13762_v34  ;;  %10593 = vmatpush1.bf16.msra.mxu1 %v13764_v35  ;;  %v13811_v34 = vcombine.high %v1742_v28, %v1746_v29  ;;  %v13813_v35 = vcombine.high %v1743_v30, %v1747_v31  ;;  %v1783_v28 = vld [vmem:[%s14823_s27 + $0x2bc8] sm:$0xff]  ;;  %v13844_v31 = vcombine.low %v1775_v13, %v1779_v14 }
 0x34c   : > { %10102 = vmatprep.subr.bf16.mxu0 %v13771_v37  ;;  %10594 = vmatprep.subr.bf16.mxu1 %v13773_v38  ;;  %v1750_v37 = vld [vmem:[%s14823_s27 + $0x2ac0] sm:$0xff]  ;;  %v1787_v29 = vld [vmem:[%s14823_s27 + $0x2be8] sm:$0xff] }
 0x34d   : > { %v1754_v38 = vld [vmem:[%s14823_s27 + $0x2ae0] sm:$0xff] }
 0x34e   : > { %v13818_v60 = vcombine.low %v1750_v37, %v1754_v38 }
 0x34f   : > { %10103 = vmatpush1.bf16.msra.mxu0 %v13770_v45  ;;  %10595 = vmatpush1.bf16.msra.mxu1 %v13772_v47  ;;  %v13819_v45 = vcombine.high %v1750_v37, %v1754_v38  ;;  %v13821_v47 = vcombine.high %v1751_v40, %v1755_v41  ;;  %v1791_v37 = vld [vmem:[%s14823_s27 + $0x2c08] sm:$0xff]  ;;  %v13852_v41 = vcombine.low %v1783_v28, %v1787_v29 }
 0x350   : > { %10104 = vmatprep.subr.bf16.mxu0 %v13779_v51  ;;  %10596 = vmatprep.subr.bf16.mxu1 %v13781_v52  ;;  %v1758_v51 = vld [vmem:[%s14823_s27 + $0x2b00] sm:$0xff]  ;;  %v1795_v38 = vld [vmem:[%s14823_s27 + $0x2c28] sm:$0xff] }
 0x351   : > { %v1762_v52 = vld [vmem:[%s14823_s27 + $0x2b20] sm:$0xff] }
 0x352   : > { %v13826_v6 = vcombine.low %v1758_v51, %v1762_v52 }
 0x353   : > { %10105 = vmatpush1.bf16.msra.mxu0 %v13778_v62  ;;  %10597 = vmatpush1.bf16.msra.mxu1 %v13780_v63  ;;  %v13827_v62 = vcombine.high %v1758_v51, %v1762_v52  ;;  %v13829_v63 = vcombine.high %v1759_v56, %v1763_v58  ;;  %v15698_v51 = vcombine.low %v15624_v48, %v15624_v48  ;;  %v1799_v52 = vld [vmem:[%s14823_s27 + $0x2c48] sm:$0xff]  ;;  %v15702_v58 = vld [vmem:[#allocation2 + $0x58] sm:$0xff] }
 0x354   : > { %10106 = vmatprep.subr.bf16.mxu0 %v13787_v1  ;;  %10598 = vmatprep.subr.bf16.mxu1 %v13789_v2  ;;  %v1766_v1 = vld [vmem:[%s14823_s27 + $0x2b40] sm:$0xff]  ;;  %v1803_v56 = vld [vmem:[%s14823_s27 + $0x2c68] sm:$0xff]  ;;  %v15708_v48 = vcombine.high %v15702_v58, %v15702_v58 }
 0x355   : > { %v1770_v2 = vld [vmem:[%s14823_s27 + $0x2b60] sm:$0xff] }
 0x356   : > { %v13834_v17 = vcombine.low %v1766_v1, %v1770_v2 }
 0x357   : > { %10107 = vmatpush1.bf16.msra.mxu0 %v13786_v8  ;;  %10599 = vmatpush1.bf16.msra.mxu1 %v13788_v9  ;;  %v13835_v8 = vcombine.high %v1766_v1, %v1770_v2  ;;  %v13837_v9 = vcombine.high %v1767_v4, %v1771_v5  ;;  %v1806_v1 = vld [vmem:[%s14823_s27 + $0x2c80] sm:$0xff]  ;;  %v1807_v4 = vld [vmem:[%s14823_s27 + $0x2c88] sm:$0xff] }
 0x358   : > { %10108 = vmatprep.subr.bf16.mxu0 %v13795_v10  ;;  %10600 = vmatprep.subr.bf16.mxu1 %v13797_v11  ;;  %v1774_v10 = vld [vmem:[%s14823_s27 + $0x2b80] sm:$0xff]  ;;  %v1811_v5 = vld [vmem:[%s14823_s27 + $0x2ca8] sm:$0xff] }
 0x359   : > { %v1778_v11 = vld [vmem:[%s14823_s27 + $0x2ba0] sm:$0xff] }
 0x35a   : > { %v13842_v30 = vcombine.low %v1774_v10, %v1778_v11  ;;  %v1810_v2 = vld [vmem:[%s14823_s27 + $0x2ca0] sm:$0xff] }
 0x35b   : > { %10109 = vmatpush1.bf16.msra.mxu0 %v13794_v21  ;;  %10601 = vmatpush1.bf16.msra.mxu1 %v13796_v23  ;;  %v13843_v21 = vcombine.high %v1774_v10, %v1778_v11  ;;  %v13845_v23 = vcombine.high %v1775_v13, %v1779_v14  ;;  %v1814_v10 = vld [vmem:[%s14823_s27 + $0x2cc0] sm:$0xff]  ;;  %v1815_v13 = vld [vmem:[%s14823_s27 + $0x2cc8] sm:$0xff] }
 0x35c   : > { %10110 = vmatprep.subr.bf16.mxu0 %v13803_v26  ;;  %10602 = vmatprep.subr.bf16.mxu1 %v13805_v27  ;;  %v1782_v26 = vld [vmem:[%s14823_s27 + $0x2bc0] sm:$0xff]  ;;  %v1819_v14 = vld [vmem:[%s14823_s27 + $0x2ce8] sm:$0xff] }
 0x35d   : > { %v1786_v27 = vld [vmem:[%s14823_s27 + $0x2be0] sm:$0xff] }
 0x35e   : > { %v13850_v40 = vcombine.low %v1782_v26, %v1786_v27  ;;  %v1818_v11 = vld [vmem:[%s14823_s27 + $0x2ce0] sm:$0xff] }
 0x35f   : > { %10111 = vmatpush1.bf16.msra.mxu0 %v13802_v32  ;;  %10603 = vmatpush1.bf16.msra.mxu1 %v13804_v33  ;;  %v13851_v32 = vcombine.high %v1782_v26, %v1786_v27  ;;  %v13853_v33 = vcombine.high %v1783_v28, %v1787_v29  ;;  %v1822_v26 = vld [vmem:[%s14823_s27 + $0x2d00] sm:$0xff]  ;;  %v1823_v28 = vld [vmem:[%s14823_s27 + $0x2d08] sm:$0xff] }
 0x360   : > { %10112 = vmatprep.subr.bf16.mxu0 %v13811_v34  ;;  %10604 = vmatprep.subr.bf16.mxu1 %v13813_v35  ;;  %v1790_v34 = vld [vmem:[%s14823_s27 + $0x2c00] sm:$0xff]  ;;  %v1827_v29 = vld [vmem:[%s14823_s27 + $0x2d28] sm:$0xff] }
 0x361   : > { %v1794_v35 = vld [vmem:[%s14823_s27 + $0x2c20] sm:$0xff] }
 0x362   : > { %v1826_v27 = vld [vmem:[%s14823_s27 + $0x2d20] sm:$0xff] }
 0x363   : > { %10113 = vmatpush1.bf16.msra.mxu0 %v13810_v42  ;;  %10605 = vmatpush1.bf16.msra.mxu1 %v13812_v43  ;;  %v13859_v42 = vcombine.high %v1790_v34, %v1794_v35  ;;  %v13861_v43 = vcombine.high %v1791_v37, %v1795_v38 }
 0x364   : > { %10114 = vmatprep.subr.bf16.mxu0 %v13819_v45  ;;  %10606 = vmatprep.subr.bf16.mxu1 %v13821_v47  ;;  %v1798_v45 = vld [vmem:[%s14823_s27 + $0x2c40] sm:$0xff] }
 0x365   : > { %v1802_v47 = vld [vmem:[%s14823_s27 + $0x2c60] sm:$0xff] }
 0x367   : > { %10115 = vmatpush1.bf16.msra.mxu0 %v13818_v60  ;;  %10607 = vmatpush1.bf16.msra.mxu1 %v13820_v61  ;;  %v13858_v60 = vcombine.low %v1790_v34, %v1794_v35  ;;  %v13860_v61 = vcombine.low %v1791_v37, %v1795_v38  ;;  %v1830_v34 = vld [vmem:[%s14823_s27 + $0x2d40] sm:$0xff]  ;;  %v1831_v37 = vld [vmem:[%s14823_s27 + $0x2d48] sm:$0xff] }
 0x368   : > { %10116 = vmatprep.subr.bf16.mxu0 %v13827_v62  ;;  %10608 = vmatprep.subr.bf16.mxu1 %v13829_v63  ;;  %v13867_v62 = vcombine.high %v1798_v45, %v1802_v47  ;;  %v13869_v63 = vcombine.high %v1799_v52, %v1803_v56  ;;  %v1834_v35 = vld [vmem:[%s14823_s27 + $0x2d60] sm:$0xff]  ;;  %v1835_v38 = vld [vmem:[%s14823_s27 + $0x2d68] sm:$0xff] }
 0x36b   : > { %10117 = vmatpush1.bf16.msra.mxu0 %v13826_v6  ;;  %10609 = vmatpush1.bf16.msra.mxu1 %v13828_v7  ;;  %v13866_v6 = vcombine.low %v1798_v45, %v1802_v47  ;;  %v13868_v7 = vcombine.low %v1799_v52, %v1803_v56  ;;  %v1838_v45 = vld [vmem:[%s14823_s27 + $0x2d80] sm:$0xff]  ;;  %v1839_v52 = vld [vmem:[%s14823_s27 + $0x2d88] sm:$0xff] }
 0x36c   : > { %10118 = vmatprep.subr.bf16.mxu0 %v13835_v8  ;;  %10610 = vmatprep.subr.bf16.mxu1 %v13837_v9  ;;  %v13875_v8 = vcombine.high %v1806_v1, %v1810_v2  ;;  %v13877_v9 = vcombine.high %v1807_v4, %v1811_v5  ;;  %v1842_v47 = vld [vmem:[%s14823_s27 + $0x2da0] sm:$0xff]  ;;  %v1843_v56 = vld [vmem:[%s14823_s27 + $0x2da8] sm:$0xff] }
 0x36f   : > { %10119 = vmatpush1.bf16.msra.mxu0 %v13834_v17  ;;  %10611 = vmatpush1.bf16.msra.mxu1 %v13836_v18  ;;  %v13874_v17 = vcombine.low %v1806_v1, %v1810_v2  ;;  %v13876_v18 = vcombine.low %v1807_v4, %v1811_v5  ;;  %v1846_v1 = vld [vmem:[%s14823_s27 + $0x2dc0] sm:$0xff]  ;;  %v1847_v4 = vld [vmem:[%s14823_s27 + $0x2dc8] sm:$0xff] }
 0x370   : > { %10120 = vmatprep.subr.bf16.mxu0 %v13843_v21  ;;  %10612 = vmatprep.subr.bf16.mxu1 %v13845_v23  ;;  %v13883_v21 = vcombine.high %v1814_v10, %v1818_v11  ;;  %v13885_v23 = vcombine.high %v1815_v13, %v1819_v14  ;;  %v1850_v2 = vld [vmem:[%s14823_s27 + $0x2de0] sm:$0xff]  ;;  %v1851_v5 = vld [vmem:[%s14823_s27 + $0x2de8] sm:$0xff] }
 0x373   : > { %10121 = vmatpush1.bf16.msra.mxu0 %v13842_v30  ;;  %10613 = vmatpush1.bf16.msra.mxu1 %v13844_v31  ;;  %v13882_v30 = vcombine.low %v1814_v10, %v1818_v11  ;;  %v13884_v31 = vcombine.low %v1815_v13, %v1819_v14  ;;  %v1854_v10 = vld [vmem:[%s14823_s27 + $0x2e00] sm:$0xff]  ;;  %v1855_v13 = vld [vmem:[%s14823_s27 + $0x2e08] sm:$0xff] }
 0x374   : > { %10122 = vmatprep.subr.bf16.mxu0 %v13851_v32  ;;  %10614 = vmatprep.subr.bf16.mxu1 %v13853_v33  ;;  %v13891_v32 = vcombine.high %v1822_v26, %v1826_v27  ;;  %v13893_v33 = vcombine.high %v1823_v28, %v1827_v29  ;;  %v1858_v11 = vld [vmem:[%s14823_s27 + $0x2e20] sm:$0xff]  ;;  %v1859_v14 = vld [vmem:[%s14823_s27 + $0x2e28] sm:$0xff] }
 0x377   : > { %10123 = vmatpush1.bf16.msra.mxu0 %v13850_v40  ;;  %10615 = vmatpush1.bf16.msra.mxu1 %v13852_v41  ;;  %v13890_v40 = vcombine.low %v1822_v26, %v1826_v27  ;;  %v13892_v41 = vcombine.low %v1823_v28, %v1827_v29  ;;  %v1862_v26 = vld [vmem:[%s14823_s27 + $0x2e40] sm:$0xff]  ;;  %v1863_v28 = vld [vmem:[%s14823_s27 + $0x2e48] sm:$0xff] }
 0x378   : > { %10133 = vmatprep.subr.bf16.mxu0 %v13859_v42  ;;  %10625 = vmatprep.subr.bf16.mxu1 %v13861_v43  ;;  %v13899_v42 = vcombine.high %v1830_v34, %v1834_v35  ;;  %v13901_v43 = vcombine.high %v1831_v37, %v1835_v38  ;;  %v1866_v27 = vld [vmem:[%s14823_s27 + $0x2e60] sm:$0xff]  ;;  %v1867_v29 = vld [vmem:[%s14823_s27 + $0x2e68] sm:$0xff] }
 0x37a   : > { %10125 = vmatmul.mubr.bf16.vlgmr.msra.gmra.mrb[0].mxu0 %v15698_v51  ;;  %10617 = vmatmul.mubr.bf16.vlgmr.msra.gmra.mrb[0].mxu1 %v15698_v51 }
 0x37b   : > { %10134 = vmatpush1.bf16.msra.mxu0 %v13858_v60  ;;  %10626 = vmatpush1.bf16.msra.mxu1 %v13860_v61  ;;  %v13898_v60 = vcombine.low %v1830_v34, %v1834_v35  ;;  %v13900_v61 = vcombine.low %v1831_v37, %v1835_v38  ;;  %v1870_v34 = vld [vmem:[%s14823_s27 + $0x2e80] sm:$0xff]  ;;  %v1871_v37 = vld [vmem:[%s14823_s27 + $0x2e88] sm:$0xff] }
 0x37c   : > { %10135 = vmatprep.subr.bf16.mxu0 %v13867_v62  ;;  %10627 = vmatprep.subr.bf16.mxu1 %v13869_v63  ;;  %v13907_v62 = vcombine.high %v1838_v45, %v1842_v47  ;;  %v13909_v63 = vcombine.high %v1839_v52, %v1843_v56  ;;  %v1874_v35 = vld [vmem:[%s14823_s27 + $0x2ea0] sm:$0xff]  ;;  %v1875_v38 = vld [vmem:[%s14823_s27 + $0x2ea8] sm:$0xff] }
 0x37d   : > { %10165 = vmatprep.mubr.bf16.mxu0 %v15708_v48  ;;  %10657 = vmatprep.mubr.bf16.mxu1 %v15708_v48 }
 0x37f   : > { %10136 = vmatpush1.bf16.msra.mxu0 %v13866_v6  ;;  %10628 = vmatpush1.bf16.msra.mxu1 %v13868_v7  ;;  %v13906_v6 = vcombine.low %v1838_v45, %v1842_v47  ;;  %v13908_v7 = vcombine.low %v1839_v52, %v1843_v56  ;;  %v1878_v45 = vld [vmem:[%s14823_s27 + $0x2ec0] sm:$0xff]  ;;  %v1879_v52 = vld [vmem:[%s14823_s27 + $0x2ec8] sm:$0xff] }
 0x380   : > { %10137 = vmatprep.subr.bf16.mxu0 %v13875_v8  ;;  %10629 = vmatprep.subr.bf16.mxu1 %v13877_v9  ;;  %v13915_v8 = vcombine.high %v1846_v1, %v1850_v2  ;;  %v13917_v9 = vcombine.high %v1847_v4, %v1851_v5  ;;  %v1882_v47 = vld [vmem:[%s14823_s27 + $0x2ee0] sm:$0xff]  ;;  %v1883_v56 = vld [vmem:[%s14823_s27 + $0x2ee8] sm:$0xff] }
 0x383   : > { %10138 = vmatpush1.bf16.msra.mxu0 %v13874_v17  ;;  %10630 = vmatpush1.bf16.msra.mxu1 %v13876_v18  ;;  %v13914_v17 = vcombine.low %v1846_v1, %v1850_v2  ;;  %v13916_v18 = vcombine.low %v1847_v4, %v1851_v5  ;;  %v1886_v1 = vld [vmem:[%s14823_s27 + $0x2f00] sm:$0xff]  ;;  %v1887_v4 = vld [vmem:[%s14823_s27 + $0x2f08] sm:$0xff] }
 0x384   : > { %10139 = vmatprep.subr.bf16.mxu0 %v13883_v21  ;;  %10631 = vmatprep.subr.bf16.mxu1 %v13885_v23  ;;  %v13923_v21 = vcombine.high %v1854_v10, %v1858_v11  ;;  %v13925_v23 = vcombine.high %v1855_v13, %v1859_v14  ;;  %v1890_v2 = vld [vmem:[%s14823_s27 + $0x2f20] sm:$0xff]  ;;  %v1891_v5 = vld [vmem:[%s14823_s27 + $0x2f28] sm:$0xff] }
 0x387   : > { %10140 = vmatpush1.bf16.msra.mxu0 %v13882_v30  ;;  %10632 = vmatpush1.bf16.msra.mxu1 %v13884_v31  ;;  %v13922_v30 = vcombine.low %v1854_v10, %v1858_v11  ;;  %v13924_v31 = vcombine.low %v1855_v13, %v1859_v14  ;;  %v1894_v10 = vld [vmem:[%s14823_s27 + $0x2f40] sm:$0xff]  ;;  %v1895_v13 = vld [vmem:[%s14823_s27 + $0x2f48] sm:$0xff] }
 0x388   : > { %10141 = vmatprep.subr.bf16.mxu0 %v13891_v32  ;;  %10633 = vmatprep.subr.bf16.mxu1 %v13893_v33  ;;  %v13931_v32 = vcombine.high %v1862_v26, %v1866_v27  ;;  %v13933_v33 = vcombine.high %v1863_v28, %v1867_v29  ;;  %v1898_v11 = vld [vmem:[%s14823_s27 + $0x2f60] sm:$0xff]  ;;  %v1899_v14 = vld [vmem:[%s14823_s27 + $0x2f68] sm:$0xff] }
 0x38b   : > { %10142 = vmatpush1.bf16.msra.mxu0 %v13890_v40  ;;  %10634 = vmatpush1.bf16.msra.mxu1 %v13892_v41  ;;  %v13930_v40 = vcombine.low %v1862_v26, %v1866_v27  ;;  %v13932_v41 = vcombine.low %v1863_v28, %v1867_v29  ;;  %v1902_v26 = vld [vmem:[%s14823_s27 + $0x2f80] sm:$0xff]  ;;  %v1903_v28 = vld [vmem:[%s14823_s27 + $0x2f88] sm:$0xff] }
 0x38c   : > { %10143 = vmatprep.subr.bf16.mxu0 %v13899_v42  ;;  %10635 = vmatprep.subr.bf16.mxu1 %v13901_v43  ;;  %v13939_v42 = vcombine.high %v1870_v34, %v1874_v35  ;;  %v13941_v43 = vcombine.high %v1871_v37, %v1875_v38  ;;  %v1906_v27 = vld [vmem:[%s14823_s27 + $0x2fa0] sm:$0xff]  ;;  %v1907_v29 = vld [vmem:[%s14823_s27 + $0x2fa8] sm:$0xff] }
 0x38f   : > { %10144 = vmatpush1.bf16.msra.mxu0 %v13898_v60  ;;  %10636 = vmatpush1.bf16.msra.mxu1 %v13900_v61  ;;  %v13938_v60 = vcombine.low %v1870_v34, %v1874_v35  ;;  %v13940_v61 = vcombine.low %v1871_v37, %v1875_v38  ;;  %v1910_v34 = vld [vmem:[%s14823_s27 + $0x2fc0] sm:$0xff]  ;;  %v1911_v37 = vld [vmem:[%s14823_s27 + $0x2fc8] sm:$0xff] }
 0x390   : > { %10145 = vmatprep.subr.bf16.mxu0 %v13907_v62  ;;  %10637 = vmatprep.subr.bf16.mxu1 %v13909_v63  ;;  %v13947_v62 = vcombine.high %v1878_v45, %v1882_v47  ;;  %v13949_v63 = vcombine.high %v1879_v52, %v1883_v56  ;;  %v1914_v35 = vld [vmem:[%s14823_s27 + $0x2fe0] sm:$0xff]  ;;  %v1915_v38 = vld [vmem:[%s14823_s27 + $0x2fe8] sm:$0xff] }
 0x393   : > { %10146 = vmatpush1.bf16.msra.mxu0 %v13906_v6  ;;  %10638 = vmatpush1.bf16.msra.mxu1 %v13908_v7  ;;  %v13946_v6 = vcombine.low %v1878_v45, %v1882_v47  ;;  %v13948_v7 = vcombine.low %v1879_v52, %v1883_v56  ;;  %v384_v45 = vld [vmem:[%s14823_s27 + $0x10] sm:$0xff]  ;;  %v385_v52 = vld [vmem:[%s14823_s27 + $0x18] sm:$0xff] }
 0x394   : > { %10147 = vmatprep.subr.bf16.mxu0 %v13915_v8  ;;  %10639 = vmatprep.subr.bf16.mxu1 %v13917_v9  ;;  %v13955_v8 = vcombine.high %v1886_v1, %v1890_v2  ;;  %v13957_v9 = vcombine.high %v1887_v4, %v1891_v5  ;;  %v388_v47 = vld [vmem:[%s14823_s27 + $0x30] sm:$0xff]  ;;  %v389_v56 = vld [vmem:[%s14823_s27 + $0x38] sm:$0xff] }
 0x397   : > { %10148 = vmatpush1.bf16.msra.mxu0 %v13914_v17  ;;  %10640 = vmatpush1.bf16.msra.mxu1 %v13916_v18  ;;  %v13954_v17 = vcombine.low %v1886_v1, %v1890_v2  ;;  %v13956_v18 = vcombine.low %v1887_v4, %v1891_v5  ;;  %v392_v1 = vld [vmem:[%s14823_s27 + $0x50] sm:$0xff]  ;;  %v15776_v4 = vcombine.low %v15702_v58, %v15702_v58  ;;  %v393_v5 = vld [vmem:[%s14823_s27 + $0x58] sm:$0xff] }
 0x398   : > { %10149 = vmatprep.subr.bf16.mxu0 %v13923_v21  ;;  %10641 = vmatprep.subr.bf16.mxu1 %v13925_v23  ;;  %v13963_v21 = vcombine.high %v1894_v10, %v1898_v11  ;;  %v13965_v23 = vcombine.high %v1895_v13, %v1899_v14  ;;  %v396_v2 = vld [vmem:[%s14823_s27 + $0x70] sm:$0xff]  ;;  %v401_v58 = vld [vmem:[%s14823_s27 + $0x98] sm:$0xff] }
 0x39b   : > { %10150 = vmatpush1.bf16.msra.mxu0 %v13922_v30  ;;  %10642 = vmatpush1.bf16.msra.mxu1 %v13924_v31  ;;  %v13962_v30 = vcombine.low %v1894_v10, %v1898_v11  ;;  %v13964_v31 = vcombine.low %v1895_v13, %v1899_v14  ;;  %v400_v11 = vld [vmem:[%s14823_s27 + $0x90] sm:$0xff]  ;;  %v405_v14 = vld [vmem:[%s14823_s27 + $0xb8] sm:$0xff] }
 0x39c   : > { %10151 = vmatprep.subr.bf16.mxu0 %v13931_v32  ;;  %10643 = vmatprep.subr.bf16.mxu1 %v13933_v33  ;;  %v13971_v32 = vcombine.high %v1902_v26, %v1906_v27  ;;  %v13973_v33 = vcombine.high %v1903_v28, %v1907_v29  ;;  %v404_v13 = vld [vmem:[%s14823_s27 + $0xb0] sm:$0xff] }
 0x39f   : > { %10152 = vmatpush1.bf16.msra.mxu0 %v13930_v40  ;;  %10644 = vmatpush1.bf16.msra.mxu1 %v13932_v41  ;;  %v13970_v40 = vcombine.low %v1902_v26, %v1906_v27  ;;  %v13972_v41 = vcombine.low %v1903_v28, %v1907_v29  ;;  %v408_v26 = vld [vmem:[%s14823_s27 + $0xd0] sm:$0xff]  ;;  %v409_v28 = vld [vmem:[%s14823_s27 + $0xd8] sm:$0xff] }
 0x3a0   : > { %10153 = vmatprep.subr.bf16.mxu0 %v13939_v42  ;;  %10645 = vmatprep.subr.bf16.mxu1 %v13941_v43  ;;  %v13979_v42 = vcombine.high %v1910_v34, %v1914_v35  ;;  %v13981_v43 = vcombine.high %v1911_v37, %v1915_v38  ;;  %v412_v27 = vld [vmem:[%s14823_s27 + $0xf0] sm:$0xff]  ;;  %v413_v29 = vld [vmem:[%s14823_s27 + $0xf8] sm:$0xff] }
 0x3a3   : > { %10154 = vmatpush1.bf16.msra.mxu0 %v13938_v60  ;;  %10646 = vmatpush1.bf16.msra.mxu1 %v13940_v61  ;;  %v13978_v60 = vcombine.low %v1910_v34, %v1914_v35  ;;  %v13980_v61 = vcombine.low %v1911_v37, %v1915_v38  ;;  %v416_v34 = vld [vmem:[%s14823_s27 + $0x110] sm:$0xff]  ;;  %v417_v37 = vld [vmem:[%s14823_s27 + $0x118] sm:$0xff] }
 0x3a4   : > { %10155 = vmatprep.subr.bf16.mxu0 %v13947_v62  ;;  %10647 = vmatprep.subr.bf16.mxu1 %v13949_v63  ;;  %v12455_v62 = vcombine.high %v384_v45, %v388_v47  ;;  %v12457_v63 = vcombine.high %v385_v52, %v389_v56  ;;  %v420_v35 = vld [vmem:[%s14823_s27 + $0x130] sm:$0xff]  ;;  %v421_v38 = vld [vmem:[%s14823_s27 + $0x138] sm:$0xff] }
 0x3a7   : > { %10156 = vmatpush1.bf16.msra.mxu0 %v13946_v6  ;;  %10648 = vmatpush1.bf16.msra.mxu1 %v13948_v7  ;;  %v397_v6 = vld [vmem:[%s14823_s27 + $0x78] sm:$0xff]  ;;  %v12454_v7 = vcombine.low %v384_v45, %v388_v47  ;;  %v428_v45 = vld [vmem:[%s14823_s27 + $0x170] sm:$0xff] }
 0x3a8   : > { %10157 = vmatprep.subr.bf16.mxu0 %v13955_v8  ;;  %10649 = vmatprep.subr.bf16.mxu1 %v13957_v9  ;;  %v12456_v8 = vcombine.low %v385_v52, %v389_v56  ;;  %v12463_v9 = vcombine.high %v392_v1, %v396_v2  ;;  %v12465_v10 = vcombine.high %v393_v5, %v397_v6  ;;  %v425_v47 = vld [vmem:[%s14823_s27 + $0x158] sm:$0xff] }
 0x3a9   : > { %v429_v52 = vld [vmem:[%s14823_s27 + $0x178] sm:$0xff]  ;;  %v12486_v56 = vcombine.low %v416_v34, %v420_v35 }
 0x3ab   : > { %10158 = vmatpush1.bf16.msra.mxu0 %v13954_v17  ;;  %10650 = vmatpush1.bf16.msra.mxu1 %v13956_v18  ;;  %v12462_v17 = vcombine.low %v392_v1, %v396_v2  ;;  %v12464_v18 = vcombine.low %v393_v5, %v397_v6  ;;  %v436_v1 = vld [vmem:[%s14823_s27 + $0x1b0] sm:$0xff]  ;;  %v433_v2 = vld [vmem:[%s14823_s27 + $0x198] sm:$0xff] }
 0x3ac   : > { %10159 = vmatprep.subr.bf16.mxu0 %v13963_v21  ;;  %10651 = vmatprep.subr.bf16.mxu1 %v13965_v23  ;;  %v12471_v21 = vcombine.high %v400_v11, %v404_v13  ;;  %v12473_v23 = vcombine.high %v401_v58, %v405_v14  ;;  %v437_v5 = vld [vmem:[%s14823_s27 + $0x1b8] sm:$0xff] }
 0x3af   : > { %10160 = vmatpush1.bf16.msra.mxu0 %v13962_v30  ;;  %10652 = vmatpush1.bf16.msra.mxu1 %v13964_v31  ;;  %v12470_v30 = vcombine.low %v400_v11, %v404_v13  ;;  %v12472_v31 = vcombine.low %v401_v58, %v405_v14  ;;  %v444_v11 = vld [vmem:[%s14823_s27 + $0x1f0] sm:$0xff]  ;;  %v441_v13 = vld [vmem:[%s14823_s27 + $0x1d8] sm:$0xff] }
 0x3b0   : > { %10161 = vmatprep.subr.bf16.mxu0 %v13971_v32  ;;  %10653 = vmatprep.subr.bf16.mxu1 %v13973_v33  ;;  %v12479_v32 = vcombine.high %v408_v26, %v412_v27  ;;  %v12481_v33 = vcombine.high %v409_v28, %v413_v29  ;;  %v445_v58 = vld [vmem:[%s14823_s27 + $0x1f8] sm:$0xff] }
 0x3b3   : > { %10162 = vmatpush1.bf16.msra.mxu0 %v13970_v40  ;;  %10654 = vmatpush1.bf16.msra.mxu1 %v13972_v41  ;;  %v12478_v40 = vcombine.low %v408_v26, %v412_v27  ;;  %v12487_v41 = vcombine.high %v416_v34, %v420_v35  ;;  %v452_v26 = vld [vmem:[%s14823_s27 + $0x230] sm:$0xff]  ;;  %v449_v27 = vld [vmem:[%s14823_s27 + $0x218] sm:$0xff] }
 0x3b4   : > { %10163 = vmatprep.subr.bf16.mxu0 %v13979_v42  ;;  %10655 = vmatprep.subr.bf16.mxu1 %v13981_v43  ;;  %v12489_v42 = vcombine.high %v417_v37, %v421_v38  ;;  %v424_v43 = vld [vmem:[%s14823_s27 + $0x150] sm:$0xff]  ;;  %v457_v35 = vld [vmem:[%s14823_s27 + $0x258] sm:$0xff] }
 0x3b5   : > { %v12494_v6 = vcombine.low %v424_v43, %v428_v45  ;;  %v460_v34 = vld [vmem:[%s14823_s27 + $0x270] sm:$0xff] }
 0x3b7   : > { %10164 = vmatpush1.bf16.msra.mxu0 %v13978_v60  ;;  %10656 = vmatpush1.bf16.msra.mxu1 %v13980_v61  ;;  %v12488_v60 = vcombine.low %v417_v37, %v421_v38  ;;  %v12495_v61 = vcombine.high %v424_v43, %v428_v45  ;;  %v461_v37 = vld [vmem:[%s14823_s27 + $0x278] sm:$0xff]  ;;  %v468_v43 = vld [vmem:[%s14823_s27 + $0x2b0] sm:$0xff] }
 0x3b8   : > { %10666 = vmatprep.subr.bf16.mxu0 %v12455_v62  ;;  %11158 = vmatprep.subr.bf16.mxu1 %v12457_v63  ;;  %v12497_v62 = vcombine.high %v425_v47, %v429_v52  ;;  %v432_v63 = vld [vmem:[%s14823_s27 + $0x190] sm:$0xff]  ;;  %v465_v45 = vld [vmem:[%s14823_s27 + $0x298] sm:$0xff] }
 0x3b9   : > { %v12502_v14 = vcombine.low %v432_v63, %v436_v1 }
 0x3ba   : > { %10166 = vmatmul.mubr.bf16.vlgmr.msra.gmra.mrb[0].mxu0 %v15776_v4  ;;  %10658 = vmatmul.mubr.bf16.vlgmr.msra.gmra.mrb[0].mxu1 %v15776_v4 }
 0x3bb   : > { %10667 = vmatpush1.bf16.msra.mxu0 %v12454_v7  ;;  %11159 = vmatpush1.bf16.msra.mxu1 %v12456_v8  ;;  %v12496_v7 = vcombine.low %v425_v47, %v429_v52  ;;  %v12503_v8 = vcombine.high %v432_v63, %v436_v1  ;;  %v469_v47 = vld [vmem:[%s14823_s27 + $0x2b8] sm:$0xff]  ;;  %v476_v63 = vld [vmem:[%s14823_s27 + $0x2f0] sm:$0xff] }
 0x3bc   : > { %10668 = vmatprep.subr.bf16.mxu0 %v12463_v9  ;;  %11160 = vmatprep.subr.bf16.mxu1 %v12465_v10  ;;  %v12505_v9 = vcombine.high %v433_v2, %v437_v5  ;;  %v440_v10 = vld [vmem:[%s14823_s27 + $0x1d0] sm:$0xff]  ;;  %v473_v1 = vld [vmem:[%s14823_s27 + $0x2d8] sm:$0xff] }
 0x3bd   : > { %10698 = vmatprep.mubr.bf16.mxu0 %v14872_v57  ;;  %11190 = vmatprep.mubr.bf16.mxu1 %v14872_v57  ;;  %v12480_v57 = vcombine.low %v409_v28, %v413_v29  ;;  %v453_v28 = vld [vmem:[%s14823_s27 + $0x238] sm:$0xff]  ;;  %v12510_v29 = vcombine.low %v440_v10, %v444_v11 }
 0x3bf   : > { %10669 = vmatpush1.bf16.msra.mxu0 %v12462_v17  ;;  %11161 = vmatpush1.bf16.msra.mxu1 %v12464_v18  ;;  %v12504_v17 = vcombine.low %v433_v2, %v437_v5  ;;  %v12511_v18 = vcombine.high %v440_v10, %v444_v11  ;;  %v477_v2 = vld [vmem:[%s14823_s27 + $0x2f8] sm:$0xff]  ;;  %v484_v10 = vld [vmem:[%s14823_s27 + $0x330] sm:$0xff] }
 0x3c0   : > { %10670 = vmatprep.subr.bf16.mxu0 %v12471_v21  ;;  %11162 = vmatprep.subr.bf16.mxu1 %v12473_v23  ;;  %v12513_v21 = vcombine.high %v441_v13, %v445_v58  ;;  %v448_v23 = vld [vmem:[%s14823_s27 + $0x210] sm:$0xff]  ;;  %v481_v11 = vld [vmem:[%s14823_s27 + $0x318] sm:$0xff] }
 0x3c1   : > { %v12518_v38 = vcombine.low %v448_v23, %v452_v26 }
 0x3c3   : > { %10671 = vmatpush1.bf16.msra.mxu0 %v12470_v30  ;;  %11163 = vmatpush1.bf16.msra.mxu1 %v12472_v31  ;;  %v12512_v30 = vcombine.low %v441_v13, %v445_v58  ;;  %v12519_v31 = vcombine.high %v448_v23, %v452_v26  ;;  %v485_v13 = vld [vmem:[%s14823_s27 + $0x338] sm:$0xff]  ;;  %v492_v23 = vld [vmem:[%s14823_s27 + $0x370] sm:$0xff] }
 0x3c4   : > { %10672 = vmatprep.subr.bf16.mxu0 %v12479_v32  ;;  %11164 = vmatprep.subr.bf16.mxu1 %v12481_v33  ;;  %v12521_v32 = vcombine.high %v449_v27, %v453_v28  ;;  %v456_v33 = vld [vmem:[%s14823_s27 + $0x250] sm:$0xff]  ;;  %v489_v26 = vld [vmem:[%s14823_s27 + $0x358] sm:$0xff] }
 0x3c5   : > { %v12526_v52 = vcombine.low %v456_v33, %v460_v34 }
 0x3c7   : > { %10673 = vmatpush1.bf16.msra.mxu0 %v12478_v40  ;;  %11165 = vmatpush1.bf16.msra.mxu1 %v12480_v57  ;;  %v12520_v40 = vcombine.low %v449_v27, %v453_v28  ;;  %v12527_v57 = vcombine.high %v456_v33, %v460_v34  ;;  %v493_v27 = vld [vmem:[%s14823_s27 + $0x378] sm:$0xff]  ;;  %v500_v33 = vld [vmem:[%s14823_s27 + $0x3b0] sm:$0xff] }
 0x3c8   : > { %10674 = vmatprep.subr.bf16.mxu0 %v12487_v41  ;;  %11166 = vmatprep.subr.bf16.mxu1 %v12489_v42  ;;  %v12529_v41 = vcombine.high %v457_v35, %v461_v37  ;;  %v464_v42 = vld [vmem:[%s14823_s27 + $0x290] sm:$0xff]  ;;  %v497_v34 = vld [vmem:[%s14823_s27 + $0x398] sm:$0xff] }
 0x3c9   : > { %v12534_v5 = vcombine.low %v464_v42, %v468_v43 }
 0x3cb   : > { %10675 = vmatpush1.bf16.msra.mxu0 %v12486_v56  ;;  %11167 = vmatpush1.bf16.msra.mxu1 %v12488_v60  ;;  %v12528_v56 = vcombine.low %v457_v35, %v461_v37  ;;  %v12535_v60 = vcombine.high %v464_v42, %v468_v43  ;;  %v501_v35 = vld [vmem:[%s14823_s27 + $0x3b8] sm:$0xff]  ;;  %v508_v42 = vld [vmem:[%s14823_s27 + $0x3f0] sm:$0xff] }
 0x3cc   : > { %10676 = vmatprep.subr.bf16.mxu0 %v12495_v61  ;;  %11168 = vmatprep.subr.bf16.mxu1 %v12497_v62  ;;  %v12537_v61 = vcombine.high %v465_v45, %v469_v47  ;;  %v472_v62 = vld [vmem:[%s14823_s27 + $0x2d0] sm:$0xff]  ;;  %v505_v43 = vld [vmem:[%s14823_s27 + $0x3d8] sm:$0xff] }
 0x3cd   : > { %v12542_v58 = vcombine.low %v472_v62, %v476_v63 }
 0x3cf   : > { %10677 = vmatpush1.bf16.msra.mxu0 %v12494_v6  ;;  %11169 = vmatpush1.bf16.msra.mxu1 %v12496_v7  ;;  %v12536_v6 = vcombine.low %v465_v45, %v469_v47  ;;  %v12543_v7 = vcombine.high %v472_v62, %v476_v63  ;;  %v509_v45 = vld [vmem:[%s14823_s27 + $0x3f8] sm:$0xff]  ;;  %v516_v62 = vld [vmem:[%s14823_s27 + $0x430] sm:$0xff] }
 0x3d0   : > { %10678 = vmatprep.subr.bf16.mxu0 %v12503_v8  ;;  %11170 = vmatprep.subr.bf16.mxu1 %v12505_v9  ;;  %v12545_v8 = vcombine.high %v473_v1, %v477_v2  ;;  %v480_v9 = vld [vmem:[%s14823_s27 + $0x310] sm:$0xff]  ;;  %v513_v63 = vld [vmem:[%s14823_s27 + $0x418] sm:$0xff] }
 0x3d1   : > { %v12550_v28 = vcombine.low %v480_v9, %v484_v10 }
 0x3d3   : > { %10679 = vmatpush1.bf16.msra.mxu0 %v12502_v14  ;;  %11171 = vmatpush1.bf16.msra.mxu1 %v12504_v17  ;;  %v12544_v14 = vcombine.low %v473_v1, %v477_v2  ;;  %v12551_v17 = vcombine.high %v480_v9, %v484_v10  ;;  %v517_v1 = vld [vmem:[%s14823_s27 + $0x438] sm:$0xff]  ;;  %v524_v9 = vld [vmem:[%s14823_s27 + $0x470] sm:$0xff] }
 0x3d4   : > { %10680 = vmatprep.subr.bf16.mxu0 %v12511_v18  ;;  %11172 = vmatprep.subr.bf16.mxu1 %v12513_v21  ;;  %v12553_v18 = vcombine.high %v481_v11, %v485_v13  ;;  %v488_v21 = vld [vmem:[%s14823_s27 + $0x350] sm:$0xff]  ;;  %v521_v10 = vld [vmem:[%s14823_s27 + $0x458] sm:$0xff] }
 0x3d5   : > { %v12558_v37 = vcombine.low %v488_v21, %v492_v23 }
 0x3d7   : > { %10681 = vmatpush1.bf16.msra.mxu0 %v12510_v29  ;;  %11173 = vmatpush1.bf16.msra.mxu1 %v12512_v30  ;;  %v12552_v29 = vcombine.low %v481_v11, %v485_v13  ;;  %v12559_v30 = vcombine.high %v488_v21, %v492_v23  ;;  %v525_v11 = vld [vmem:[%s14823_s27 + $0x478] sm:$0xff]  ;;  %v532_v21 = vld [vmem:[%s14823_s27 + $0x4b0] sm:$0xff] }
 0x3d8   : > { %10682 = vmatprep.subr.bf16.mxu0 %v12519_v31  ;;  %11174 = vmatprep.subr.bf16.mxu1 %v12521_v32  ;;  %v12561_v31 = vcombine.high %v489_v26, %v493_v27  ;;  %v496_v32 = vld [vmem:[%s14823_s27 + $0x390] sm:$0xff]  ;;  %v529_v23 = vld [vmem:[%s14823_s27 + $0x498] sm:$0xff] }
 0x3d9   : > { %v12566_v47 = vcombine.low %v496_v32, %v500_v33 }
 0x3db   : > { %10683 = vmatpush1.bf16.msra.mxu0 %v12518_v38  ;;  %11175 = vmatpush1.bf16.msra.mxu1 %v12520_v40  ;;  %v12560_v38 = vcombine.low %v489_v26, %v493_v27  ;;  %v12567_v40 = vcombine.high %v496_v32, %v500_v33  ;;  %v533_v26 = vld [vmem:[%s14823_s27 + $0x4b8] sm:$0xff]  ;;  %v540_v32 = vld [vmem:[%s14823_s27 + $0x4f0] sm:$0xff] }
 0x3dc   : > { %10684 = vmatprep.subr.bf16.mxu0 %v12527_v57  ;;  %11176 = vmatprep.subr.bf16.mxu1 %v12529_v41  ;;  %v12569_v57 = vcombine.high %v497_v34, %v501_v35  ;;  %v504_v41 = vld [vmem:[%s14823_s27 + $0x3d0] sm:$0xff]  ;;  %v537_v33 = vld [vmem:[%s14823_s27 + $0x4d8] sm:$0xff] }
 0x3dd   : > { %v12574_v2 = vcombine.low %v504_v41, %v508_v42 }
 0x3df   : > { %10685 = vmatpush1.bf16.msra.mxu0 %v12526_v52  ;;  %11177 = vmatpush1.bf16.msra.mxu1 %v12528_v56  ;;  %v12568_v52 = vcombine.low %v497_v34, %v501_v35  ;;  %v12575_v56 = vcombine.high %v504_v41, %v508_v42  ;;  %v541_v34 = vld [vmem:[%s14823_s27 + $0x4f8] sm:$0xff]  ;;  %v12600_v35 = vcombine.low %v529_v23, %v533_v26 }
 0x3e0   : > { %10686 = vmatprep.subr.bf16.mxu0 %v12535_v60  ;;  %11178 = vmatprep.subr.bf16.mxu1 %v12537_v61  ;;  %v12577_v60 = vcombine.high %v505_v43, %v509_v45  ;;  %v512_v61 = vld [vmem:[%s14823_s27 + $0x410] sm:$0xff]  ;;  %v545_v41 = vld [vmem:[%s14823_s27 + $0x518] sm:$0xff] }
 0x3e1   : > { %v12582_v13 = vcombine.low %v512_v61, %v516_v62  ;;  %v549_v42 = vld [vmem:[%s14823_s27 + $0x538] sm:$0xff] }
 0x3e3   : > { %10687 = vmatpush1.bf16.msra.mxu0 %v12534_v5  ;;  %11179 = vmatpush1.bf16.msra.mxu1 %v12536_v6  ;;  %v12576_v5 = vcombine.low %v505_v43, %v509_v45  ;;  %v12583_v6 = vcombine.high %v512_v61, %v516_v62  ;;  %v557_v61 = vld [vmem:[%s14823_s27 + $0x578] sm:$0xff] }
 0x3e4   : > { %10688 = vmatprep.subr.bf16.mxu0 %v12543_v7  ;;  %11180 = vmatprep.subr.bf16.mxu1 %v12545_v8  ;;  %v12585_v7 = vcombine.high %v513_v63, %v517_v1  ;;  %v520_v8 = vld [vmem:[%s14823_s27 + $0x450] sm:$0xff] }
 0x3e5   : > { %v12590_v27 = vcombine.low %v520_v8, %v524_v9 }
 0x3e7   : > { %10689 = vmatpush1.bf16.msra.mxu0 %v12542_v58  ;;  %11181 = vmatpush1.bf16.msra.mxu1 %v12544_v14  ;;  %v12584_v58 = vcombine.low %v513_v63, %v517_v1  ;;  %v12591_v14 = vcombine.high %v520_v8, %v524_v9  ;;  %v12616_v63 = vcombine.low %v545_v41, %v549_v42  ;;  %v565_v8 = vld [vmem:[%s14823_s27 + $0x5b8] sm:$0xff] }
 0x3e8   : > { %10690 = vmatprep.subr.bf16.mxu0 %v12551_v17  ;;  %11182 = vmatprep.subr.bf16.mxu1 %v12553_v18  ;;  %v12593_v17 = vcombine.high %v521_v10, %v525_v11  ;;  %v528_v18 = vld [vmem:[%s14823_s27 + $0x490] sm:$0xff] }
 0x3eb   : > { %10691 = vmatpush1.bf16.msra.mxu0 %v12550_v28  ;;  %11183 = vmatpush1.bf16.msra.mxu1 %v12552_v29  ;;  %v12592_v28 = vcombine.low %v521_v10, %v525_v11  ;;  %v12599_v29 = vcombine.high %v528_v18, %v532_v21 }
 0x3ec   : > { %10692 = vmatprep.subr.bf16.mxu0 %v12559_v30  ;;  %11184 = vmatprep.subr.bf16.mxu1 %v12561_v31  ;;  %v12601_v30 = vcombine.high %v529_v23, %v533_v26  ;;  %v536_v31 = vld [vmem:[%s14823_s27 + $0x4d0] sm:$0xff] }
 0x3ed   : > { %v12606_v43 = vcombine.low %v536_v31, %v540_v32 }
 0x3ef   : > { %10693 = vmatpush1.bf16.msra.mxu0 %v12558_v37  ;;  %11185 = vmatpush1.bf16.msra.mxu1 %v12560_v38  ;;  %v12607_v37 = vcombine.high %v536_v31, %v540_v32  ;;  %v12609_v38 = vcombine.high %v537_v33, %v541_v34  ;;  %v581_v31 = vld [vmem:[%s14823_s27 + $0x638] sm:$0xff] }
 0x3f0   : > { %10694 = vmatprep.subr.bf16.mxu0 %v12567_v40  ;;  %11186 = vmatprep.subr.bf16.mxu1 %v12569_v57  ;;  %v544_v40 = vld [vmem:[%s14823_s27 + $0x510] sm:$0xff] }
 0x3f1   : > { %v548_v57 = vld [vmem:[%s14823_s27 + $0x530] sm:$0xff] }
 0x3f2   : > { %v12615_v45 = vcombine.high %v544_v40, %v548_v57  ;;  %v12614_v62 = vcombine.low %v544_v40, %v548_v57  ;;  %v589_v40 = vld [vmem:[%s14823_s27 + $0x678] sm:$0xff] }
 0x3f3   : > { %10695 = vmatpush1.bf16.msra.mxu0 %v12566_v47  ;;  %11187 = vmatpush1.bf16.msra.mxu1 %v12568_v52  ;;  %v12617_v47 = vcombine.high %v545_v41, %v549_v42  ;;  %v552_v52 = vld [vmem:[%s14823_s27 + $0x550] sm:$0xff] }
 0x3f4   : > { %10696 = vmatprep.subr.bf16.mxu0 %v12575_v56  ;;  %11188 = vmatprep.subr.bf16.mxu1 %v12577_v60  ;;  %v556_v56 = vld [vmem:[%s14823_s27 + $0x570] sm:$0xff]  ;;  %v553_v60 = vld [vmem:[%s14823_s27 + $0x558] sm:$0xff] }
 0x3f5   : > { %v12623_v1 = vcombine.high %v552_v52, %v556_v56  ;;  %v12622_v9 = vcombine.low %v552_v52, %v556_v56  ;;  %v12624_v10 = vcombine.low %v553_v60, %v557_v61  ;;  %v597_v52 = vld [vmem:[%s14823_s27 + $0x6b8] sm:$0xff] }
 0x3f7   : > { %10697 = vmatpush1.bf16.msra.mxu0 %v12574_v2  ;;  %11189 = vmatpush1.bf16.msra.mxu1 %v12576_v5  ;;  %v12625_v2 = vcombine.high %v553_v60, %v557_v61  ;;  %v560_v5 = vld [vmem:[%s14823_s27 + $0x590] sm:$0xff] }
 0x3f8   : > { %10707 = vmatprep.subr.bf16.mxu0 %v12583_v6  ;;  %11199 = vmatprep.subr.bf16.mxu1 %v12585_v7  ;;  %v564_v6 = vld [vmem:[%s14823_s27 + $0x5b0] sm:$0xff]  ;;  %v561_v7 = vld [vmem:[%s14823_s27 + $0x598] sm:$0xff] }
 0x3f9   : > { %v12631_v11 = vcombine.high %v560_v5, %v564_v6  ;;  %v12632_v23 = vcombine.low %v561_v7, %v565_v8 }
 0x3fa   : > { %10699 = vmatmul.mubr.bf16.vlgmr.msra.gmra.mrb[4].mxu0 %v14918_v12  ;;  %11191 = vmatmul.mubr.bf16.vlgmr.msra.gmra.mrb[4].mxu1 %v14918_v12  ;;  %v12598_v12 = vcombine.low %v528_v18, %v532_v21  ;;  %v573_v18 = vld [vmem:[%s14823_s27 + $0x5f8] sm:$0xff]  ;;  %v12630_v21 = vcombine.low %v560_v5, %v564_v6 }
 0x3fb   : > { %10708 = vmatpush1.bf16.msra.mxu0 %v12582_v13  ;;  %11200 = vmatpush1.bf16.msra.mxu1 %v12584_v58  ;;  %v12633_v13 = vcombine.high %v561_v7, %v565_v8  ;;  %v568_v58 = vld [vmem:[%s14823_s27 + $0x5d0] sm:$0xff]  ;;  %v605_v5 = vld [vmem:[%s14823_s27 + $0x6f8] sm:$0xff] }
 0x3fc   : > { %10709 = vmatprep.subr.bf16.mxu0 %v12591_v14  ;;  %11201 = vmatprep.subr.bf16.mxu1 %v12593_v17  ;;  %v572_v14 = vld [vmem:[%s14823_s27 + $0x5f0] sm:$0xff]  ;;  %v569_v17 = vld [vmem:[%s14823_s27 + $0x5d8] sm:$0xff] }
 0x3fd   : > { %10739 = vmatprep.mubr.bf16.mxu0 %v14928_v53  ;;  %11231 = vmatprep.mubr.bf16.mxu1 %v14928_v53  ;;  %v12608_v53 = vcombine.low %v537_v33, %v541_v34  ;;  %v12639_v26 = vcombine.high %v568_v58, %v572_v14  ;;  %v12638_v32 = vcombine.low %v568_v58, %v572_v14  ;;  %v613_v58 = vld [vmem:[%s14823_s27 + $0x738] sm:$0xff] }
 0x3fe   : > { %v12640_v33 = vcombine.low %v569_v17, %v573_v18 }
 0x3ff   : > { %10710 = vmatpush1.bf16.msra.mxu0 %v12590_v27  ;;  %11202 = vmatpush1.bf16.msra.mxu1 %v12592_v28  ;;  %v12641_v27 = vcombine.high %v569_v17, %v573_v18  ;;  %v576_v28 = vld [vmem:[%s14823_s27 + $0x610] sm:$0xff] }
 0x400   : > { %10711 = vmatprep.subr.bf16.mxu0 %v12599_v29  ;;  %11203 = vmatprep.subr.bf16.mxu1 %v12601_v30  ;;  %v580_v29 = vld [vmem:[%s14823_s27 + $0x630] sm:$0xff]  ;;  %v577_v30 = vld [vmem:[%s14823_s27 + $0x618] sm:$0xff] }
 0x401   : > { %v12647_v34 = vcombine.high %v576_v28, %v580_v29  ;;  %v12646_v57 = vcombine.low %v576_v28, %v580_v29  ;;  %v12648_v41 = vcombine.low %v577_v30, %v581_v31  ;;  %v621_v28 = vld [vmem:[%s14823_s27 + $0x778] sm:$0xff] }
 0x403   : > { %10712 = vmatpush1.bf16.msra.mxu0 %v12598_v12  ;;  %11204 = vmatpush1.bf16.msra.mxu1 %v12600_v35  ;;  %v12649_v12 = vcombine.high %v577_v30, %v581_v31  ;;  %v584_v35 = vld [vmem:[%s14823_s27 + $0x650] sm:$0xff] }
 0x404   : > { %10713 = vmatprep.subr.bf16.mxu0 %v12607_v37  ;;  %11205 = vmatprep.subr.bf16.mxu1 %v12609_v38  ;;  %v588_v37 = vld [vmem:[%s14823_s27 + $0x670] sm:$0xff]  ;;  %v585_v38 = vld [vmem:[%s14823_s27 + $0x658] sm:$0xff] }
 0x405   : > { %v12655_v42 = vcombine.high %v584_v35, %v588_v37  ;;  %v12654_v56 = vcombine.low %v584_v35, %v588_v37  ;;  %v12656_v60 = vcombine.low %v585_v38, %v589_v40  ;;  %v629_v35 = vld [vmem:[%s14823_s27 + $0x7b8] sm:$0xff] }
 0x407   : > { %10714 = vmatpush1.bf16.msra.mxu0 %v12606_v43  ;;  %11206 = vmatpush1.bf16.msra.mxu1 %v12608_v53  ;;  %v12657_v43 = vcombine.high %v585_v38, %v589_v40  ;;  %v592_v53 = vld [vmem:[%s14823_s27 + $0x690] sm:$0xff] }
 0x408   : > { %10715 = vmatprep.subr.bf16.mxu0 %v12615_v45  ;;  %11207 = vmatprep.subr.bf16.mxu1 %v12617_v47  ;;  %v596_v45 = vld [vmem:[%s14823_s27 + $0x6b0] sm:$0xff]  ;;  %v593_v47 = vld [vmem:[%s14823_s27 + $0x698] sm:$0xff] }
 0x409   : > { %v12663_v61 = vcombine.high %v592_v53, %v596_v45  ;;  %v12662_v6 = vcombine.low %v592_v53, %v596_v45  ;;  %v12664_v7 = vcombine.low %v593_v47, %v597_v52  ;;  %v637_v53 = vld [vmem:[%s14823_s27 + $0x7f8] sm:$0xff] }
 0x40b   : > { %10716 = vmatpush1.bf16.msra.mxu0 %v12614_v62  ;;  %11208 = vmatpush1.bf16.msra.mxu1 %v12616_v63  ;;  %v12665_v62 = vcombine.high %v593_v47, %v597_v52  ;;  %v600_v63 = vld [vmem:[%s14823_s27 + $0x6d0] sm:$0xff] }
 0x40c   : > { %10717 = vmatprep.subr.bf16.mxu0 %v12623_v1  ;;  %11209 = vmatprep.subr.bf16.mxu1 %v12625_v2  ;;  %v604_v1 = vld [vmem:[%s14823_s27 + $0x6f0] sm:$0xff]  ;;  %v601_v2 = vld [vmem:[%s14823_s27 + $0x6d8] sm:$0xff] }
 0x40d   : > { %v12671_v8 = vcombine.high %v600_v63, %v604_v1  ;;  %v12670_v14 = vcombine.low %v600_v63, %v604_v1  ;;  %v12672_v17 = vcombine.low %v601_v2, %v605_v5  ;;  %v645_v63 = vld [vmem:[%s14823_s27 + $0x838] sm:$0xff] }
 0x40f   : > { %10718 = vmatpush1.bf16.msra.mxu0 %v12622_v9  ;;  %11210 = vmatpush1.bf16.msra.mxu1 %v12624_v10  ;;  %v12673_v9 = vcombine.high %v601_v2, %v605_v5  ;;  %v608_v10 = vld [vmem:[%s14823_s27 + $0x710] sm:$0xff] }
 0x410   : > { %10719 = vmatprep.subr.bf16.mxu0 %v12631_v11  ;;  %11211 = vmatprep.subr.bf16.mxu1 %v12633_v13  ;;  %v612_v11 = vld [vmem:[%s14823_s27 + $0x730] sm:$0xff]  ;;  %v609_v13 = vld [vmem:[%s14823_s27 + $0x718] sm:$0xff] }
 0x411   : > { %v12679_v18 = vcombine.high %v608_v10, %v612_v11  ;;  %v12678_v29 = vcombine.low %v608_v10, %v612_v11  ;;  %v12680_v30 = vcombine.low %v609_v13, %v613_v58  ;;  %v653_v10 = vld [vmem:[%s14823_s27 + $0x878] sm:$0xff] }
 0x413   : > { %10720 = vmatpush1.bf16.msra.mxu0 %v12630_v21  ;;  %11212 = vmatpush1.bf16.msra.mxu1 %v12632_v23  ;;  %v12681_v21 = vcombine.high %v609_v13, %v613_v58  ;;  %v616_v23 = vld [vmem:[%s14823_s27 + $0x750] sm:$0xff] }
 0x414   : > { %10721 = vmatprep.subr.bf16.mxu0 %v12639_v26  ;;  %11213 = vmatprep.subr.bf16.mxu1 %v12641_v27  ;;  %v620_v26 = vld [vmem:[%s14823_s27 + $0x770] sm:$0xff]  ;;  %v617_v27 = vld [vmem:[%s14823_s27 + $0x758] sm:$0xff] }
 0x415   : > { %v12687_v31 = vcombine.high %v616_v23, %v620_v26  ;;  %v12686_v37 = vcombine.low %v616_v23, %v620_v26  ;;  %v12688_v38 = vcombine.low %v617_v27, %v621_v28  ;;  %v661_v23 = vld [vmem:[%s14823_s27 + $0x8b8] sm:$0xff] }
 0x417   : > { %10722 = vmatpush1.bf16.msra.mxu0 %v12638_v32  ;;  %11214 = vmatpush1.bf16.msra.mxu1 %v12640_v33  ;;  %v12689_v32 = vcombine.high %v617_v27, %v621_v28  ;;  %v624_v33 = vld [vmem:[%s14823_s27 + $0x790] sm:$0xff] }
 0x418   : > { %10723 = vmatprep.subr.bf16.mxu0 %v12647_v34  ;;  %11215 = vmatprep.subr.bf16.mxu1 %v12649_v12  ;;  %v628_v34 = vld [vmem:[%s14823_s27 + $0x7b0] sm:$0xff]  ;;  %v625_v12 = vld [vmem:[%s14823_s27 + $0x798] sm:$0xff] }
 0x419   : > { %v12695_v40 = vcombine.high %v624_v33, %v628_v34  ;;  %v12694_v45 = vcombine.low %v624_v33, %v628_v34  ;;  %v12696_v47 = vcombine.low %v625_v12, %v629_v35  ;;  %v669_v33 = vld [vmem:[%s14823_s27 + $0x8f8] sm:$0xff] }
 0x41b   : > { %10724 = vmatpush1.bf16.msra.mxu0 %v12646_v57  ;;  %11216 = vmatpush1.bf16.msra.mxu1 %v12648_v41  ;;  %v12697_v57 = vcombine.high %v625_v12, %v629_v35  ;;  %v632_v41 = vld [vmem:[%s14823_s27 + $0x7d0] sm:$0xff] }
 0x41c   : > { %10725 = vmatprep.subr.bf16.mxu0 %v12655_v42  ;;  %11217 = vmatprep.subr.bf16.mxu1 %v12657_v43  ;;  %v636_v42 = vld [vmem:[%s14823_s27 + $0x7f0] sm:$0xff]  ;;  %v633_v43 = vld [vmem:[%s14823_s27 + $0x7d8] sm:$0xff] }
 0x41d   : > { %v12703_v52 = vcombine.high %v632_v41, %v636_v42  ;;  %v12702_v1 = vcombine.low %v632_v41, %v636_v42  ;;  %v12704_v2 = vcombine.low %v633_v43, %v637_v53 }
 0x41f   : > { %10726 = vmatpush1.bf16.msra.mxu0 %v12654_v56  ;;  %11218 = vmatpush1.bf16.msra.mxu1 %v12656_v60  ;;  %v12705_v56 = vcombine.high %v633_v43, %v637_v53  ;;  %v640_v60 = vld [vmem:[%s14823_s27 + $0x810] sm:$0xff] }
 0x420   : > { %10727 = vmatprep.subr.bf16.mxu0 %v12663_v61  ;;  %11219 = vmatprep.subr.bf16.mxu1 %v12665_v62  ;;  %v644_v61 = vld [vmem:[%s14823_s27 + $0x830] sm:$0xff]  ;;  %v641_v62 = vld [vmem:[%s14823_s27 + $0x818] sm:$0xff] }
 0x421   : > { %v12711_v5 = vcombine.high %v640_v60, %v644_v61  ;;  %v12710_v11 = vcombine.low %v640_v60, %v644_v61  ;;  %v12712_v13 = vcombine.low %v641_v62, %v645_v63  ;;  %v680_v53 = vld [vmem:[%s14823_s27 + $0x950] sm:$0xff] }
 0x423   : > { %10728 = vmatpush1.bf16.msra.mxu0 %v12662_v6  ;;  %11220 = vmatpush1.bf16.msra.mxu1 %v12664_v7  ;;  %v12713_v6 = vcombine.high %v641_v62, %v645_v63  ;;  %v648_v7 = vld [vmem:[%s14823_s27 + $0x850] sm:$0xff] }
 0x424   : > { %10729 = vmatprep.subr.bf16.mxu0 %v12671_v8  ;;  %11221 = vmatprep.subr.bf16.mxu1 %v12673_v9  ;;  %v652_v8 = vld [vmem:[%s14823_s27 + $0x870] sm:$0xff]  ;;  %v649_v9 = vld [vmem:[%s14823_s27 + $0x858] sm:$0xff] }
 0x425   : > { %v12719_v58 = vcombine.high %v648_v7, %v652_v8  ;;  %v12718_v26 = vcombine.low %v648_v7, %v652_v8  ;;  %v12720_v27 = vcombine.low %v649_v9, %v653_v10  ;;  %v688_v63 = vld [vmem:[%s14823_s27 + $0x990] sm:$0xff] }
 0x427   : > { %10730 = vmatpush1.bf16.msra.mxu0 %v12670_v14  ;;  %11222 = vmatpush1.bf16.msra.mxu1 %v12672_v17  ;;  %v12721_v14 = vcombine.high %v649_v9, %v653_v10  ;;  %v656_v17 = vld [vmem:[%s14823_s27 + $0x890] sm:$0xff] }
 0x428   : > { %10731 = vmatprep.subr.bf16.mxu0 %v12679_v18  ;;  %11223 = vmatprep.subr.bf16.mxu1 %v12681_v21  ;;  %v660_v18 = vld [vmem:[%s14823_s27 + $0x8b0] sm:$0xff]  ;;  %v657_v21 = vld [vmem:[%s14823_s27 + $0x898] sm:$0xff] }
 0x429   : > { %v12727_v28 = vcombine.high %v656_v17, %v660_v18  ;;  %v12728_v34 = vcombine.low %v657_v21, %v661_v23  ;;  %v696_v10 = vld [vmem:[%s14823_s27 + $0x9d0] sm:$0xff] }
 0x42b   : > { %10732 = vmatpush1.bf16.msra.mxu0 %v12678_v29  ;;  %11224 = vmatpush1.bf16.msra.mxu1 %v12680_v30  ;;  %v12729_v29 = vcombine.high %v657_v21, %v661_v23  ;;  %v664_v30 = vld [vmem:[%s14823_s27 + $0x8d0] sm:$0xff] }
 0x42c   : > { %10733 = vmatprep.subr.bf16.mxu0 %v12687_v31  ;;  %11225 = vmatprep.subr.bf16.mxu1 %v12689_v32  ;;  %v668_v31 = vld [vmem:[%s14823_s27 + $0x8f0] sm:$0xff]  ;;  %v665_v32 = vld [vmem:[%s14823_s27 + $0x8d8] sm:$0xff] }
 0x42d   : > { %v12735_v12 = vcombine.high %v664_v30, %v668_v31  ;;  %v12737_v35 = vcombine.high %v665_v32, %v669_v33  ;;  %v12734_v41 = vcombine.low %v664_v30, %v668_v31  ;;  %v704_v23 = vld [vmem:[%s14823_s27 + $0xa10] sm:$0xff] }
 0x42f   : > { %10734 = vmatpush1.bf16.msra.mxu0 %v12686_v37  ;;  %11226 = vmatpush1.bf16.msra.mxu1 %v12688_v38  ;;  %v672_v37 = vld [vmem:[%s14823_s27 + $0x910] sm:$0xff] }
 0x430   : > { %10735 = vmatprep.subr.bf16.mxu0 %v12695_v40  ;;  %11227 = vmatprep.subr.bf16.mxu1 %v12697_v57  ;;  %v676_v38 = vld [vmem:[%s14823_s27 + $0x930] sm:$0xff]  ;;  %v673_v40 = vld [vmem:[%s14823_s27 + $0x918] sm:$0xff] }
 0x431   : > { %v677_v57 = vld [vmem:[%s14823_s27 + $0x938] sm:$0xff]  ;;  %v12743_v42 = vcombine.high %v672_v37, %v676_v38 }
 0x432   : > { %v12745_v43 = vcombine.high %v673_v40, %v677_v57  ;;  %v12744_v60 = vcombine.low %v673_v40, %v677_v57  ;;  %v720_v57 = vld [vmem:[%s14823_s27 + $0xa90] sm:$0xff] }
 0x433   : > { %10736 = vmatpush1.bf16.msra.mxu0 %v12694_v45  ;;  %11228 = vmatpush1.bf16.msra.mxu1 %v12696_v47  ;;  %v684_v45 = vld [vmem:[%s14823_s27 + $0x970] sm:$0xff]  ;;  %v681_v47 = vld [vmem:[%s14823_s27 + $0x958] sm:$0xff] }
 0x434   : > { %10737 = vmatprep.subr.bf16.mxu0 %v12703_v52  ;;  %11229 = vmatprep.subr.bf16.mxu1 %v12705_v56  ;;  %v685_v52 = vld [vmem:[%s14823_s27 + $0x978] sm:$0xff]  ;;  %v12742_v56 = vcombine.low %v672_v37, %v676_v38  ;;  %v12751_v61 = vcombine.high %v680_v53, %v684_v45 }
 0x435   : > { %v12753_v62 = vcombine.high %v681_v47, %v685_v52  ;;  %v12752_v7 = vcombine.low %v681_v47, %v685_v52  ;;  %v728_v52 = vld [vmem:[%s14823_s27 + $0xad0] sm:$0xff] }
 0x437   : > { %10738 = vmatpush1.bf16.msra.mxu0 %v12702_v1  ;;  %11230 = vmatpush1.bf16.msra.mxu1 %v12704_v2  ;;  %v692_v1 = vld [vmem:[%s14823_s27 + $0x9b0] sm:$0xff]  ;;  %v689_v2 = vld [vmem:[%s14823_s27 + $0x998] sm:$0xff] }
 0x438   : > { %10748 = vmatprep.subr.bf16.mxu0 %v12711_v5  ;;  %11240 = vmatprep.subr.bf16.mxu1 %v12713_v6  ;;  %v693_v5 = vld [vmem:[%s14823_s27 + $0x9b8] sm:$0xff]  ;;  %v12750_v6 = vcombine.low %v680_v53, %v684_v45  ;;  %v12759_v8 = vcombine.high %v688_v63, %v692_v1 }
 0x439   : > { %v12761_v9 = vcombine.high %v689_v2, %v693_v5 }
 0x43a   : > { %10740 = vmatmul.mubr.bf16.vlgmr.msra.gmra.mrb[4].mxu0 %v14996_v22  ;;  %11232 = vmatmul.mubr.bf16.vlgmr.msra.gmra.mrb[4].mxu1 %v14996_v22  ;;  %v12726_v22 = vcombine.low %v656_v17, %v660_v18  ;;  %v12760_v17 = vcombine.low %v689_v2, %v693_v5  ;;  %v736_v5 = vld [vmem:[%s14823_s27 + $0xb10] sm:$0xff] }
 0x43b   : > { %10749 = vmatpush1.bf16.msra.mxu0 %v12710_v11  ;;  %11241 = vmatpush1.bf16.msra.mxu1 %v12712_v13  ;;  %v700_v11 = vld [vmem:[%s14823_s27 + $0x9f0] sm:$0xff]  ;;  %v697_v13 = vld [vmem:[%s14823_s27 + $0x9d8] sm:$0xff] }
 0x43c   : > { %10750 = vmatprep.subr.bf16.mxu0 %v12719_v58  ;;  %11242 = vmatprep.subr.bf16.mxu1 %v12721_v14  ;;  %v701_v58 = vld [vmem:[%s14823_s27 + $0x9f8] sm:$0xff]  ;;  %v12758_v14 = vcombine.low %v688_v63, %v692_v1  ;;  %v12767_v18 = vcombine.high %v696_v10, %v700_v11 }
 0x43d   : > { %10780 = vmatprep.mubr.bf16.mxu0 %v15006_v15  ;;  %11272 = vmatprep.mubr.bf16.mxu1 %v15006_v15  ;;  %v12736_v15 = vcombine.low %v665_v32, %v669_v33  ;;  %v12769_v21 = vcombine.high %v697_v13, %v701_v58  ;;  %v12768_v30 = vcombine.low %v697_v13, %v701_v58  ;;  %v712_v33 = vld [vmem:[%s14823_s27 + $0xa50] sm:$0xff] }
 0x43e   : > { %v744_v58 = vld [vmem:[%s14823_s27 + $0xb50] sm:$0xff] }
 0x43f   : > { %10751 = vmatpush1.bf16.msra.mxu0 %v12718_v26  ;;  %11243 = vmatpush1.bf16.msra.mxu1 %v12720_v27  ;;  %v708_v26 = vld [vmem:[%s14823_s27 + $0xa30] sm:$0xff]  ;;  %v705_v27 = vld [vmem:[%s14823_s27 + $0xa18] sm:$0xff] }
 0x440   : > { %10752 = vmatprep.subr.bf16.mxu0 %v12727_v28  ;;  %11244 = vmatprep.subr.bf16.mxu1 %v12729_v29  ;;  %v709_v28 = vld [vmem:[%s14823_s27 + $0xa38] sm:$0xff]  ;;  %v12766_v29 = vcombine.low %v696_v10, %v700_v11  ;;  %v12775_v31 = vcombine.high %v704_v23, %v708_v26 }
 0x441   : > { %v12777_v32 = vcombine.high %v705_v27, %v709_v28  ;;  %v12776_v37 = vcombine.low %v705_v27, %v709_v28  ;;  %v752_v28 = vld [vmem:[%s14823_s27 + $0xb90] sm:$0xff] }
 0x443   : > { %10753 = vmatpush1.bf16.msra.mxu0 %v12726_v22  ;;  %11245 = vmatpush1.bf16.msra.mxu1 %v12728_v34  ;;  %v716_v22 = vld [vmem:[%s14823_s27 + $0xa70] sm:$0xff]  ;;  %v713_v34 = vld [vmem:[%s14823_s27 + $0xa58] sm:$0xff] }
 0x444   : > { %10754 = vmatprep.subr.bf16.mxu0 %v12735_v12  ;;  %11246 = vmatprep.subr.bf16.mxu1 %v12737_v35  ;;  %v717_v12 = vld [vmem:[%s14823_s27 + $0xa78] sm:$0xff]  ;;  %v12774_v35 = vcombine.low %v704_v23, %v708_v26  ;;  %v12783_v38 = vcombine.high %v712_v33, %v716_v22 }
 0x445   : > { %v12785_v40 = vcombine.high %v713_v34, %v717_v12  ;;  %v12784_v53 = vcombine.low %v713_v34, %v717_v12  ;;  %v760_v12 = vld [vmem:[%s14823_s27 + $0xbd0] sm:$0xff] }
 0x447   : > { %10755 = vmatpush1.bf16.msra.mxu0 %v12734_v41  ;;  %11247 = vmatpush1.bf16.msra.mxu1 %v12736_v15  ;;  %v724_v41 = vld [vmem:[%s14823_s27 + $0xab0] sm:$0xff]  ;;  %v721_v15 = vld [vmem:[%s14823_s27 + $0xa98] sm:$0xff] }
 0x448   : > { %10756 = vmatprep.subr.bf16.mxu0 %v12743_v42  ;;  %11248 = vmatprep.subr.bf16.mxu1 %v12745_v43  ;;  %v725_v42 = vld [vmem:[%s14823_s27 + $0xab8] sm:$0xff]  ;;  %v12782_v43 = vcombine.low %v712_v33, %v716_v22  ;;  %v12791_v45 = vcombine.high %v720_v57, %v724_v41 }
 0x449   : > { %v12793_v47 = vcombine.high %v721_v15, %v725_v42  ;;  %v12792_v63 = vcombine.low %v721_v15, %v725_v42  ;;  %v768_v42 = vld [vmem:[%s14823_s27 + $0xc10] sm:$0xff] }
 0x44b   : > { %10757 = vmatpush1.bf16.msra.mxu0 %v12742_v56  ;;  %11249 = vmatpush1.bf16.msra.mxu1 %v12744_v60  ;;  %v732_v56 = vld [vmem:[%s14823_s27 + $0xaf0] sm:$0xff]  ;;  %v729_v60 = vld [vmem:[%s14823_s27 + $0xad8] sm:$0xff] }
 0x44c   : > { %10758 = vmatprep.subr.bf16.mxu0 %v12751_v61  ;;  %11250 = vmatprep.subr.bf16.mxu1 %v12753_v62  ;;  %v733_v61 = vld [vmem:[%s14823_s27 + $0xaf8] sm:$0xff]  ;;  %v12790_v62 = vcombine.low %v720_v57, %v724_v41  ;;  %v12799_v1 = vcombine.high %v728_v52, %v732_v56 }
 0x44d   : > { %v12801_v2 = vcombine.high %v729_v60, %v733_v61  ;;  %v12800_v10 = vcombine.low %v729_v60, %v733_v61  ;;  %v776_v61 = vld [vmem:[%s14823_s27 + $0xc50] sm:$0xff] }
 0x44f   : > { %10759 = vmatpush1.bf16.msra.mxu0 %v12750_v6  ;;  %11251 = vmatpush1.bf16.msra.mxu1 %v12752_v7  ;;  %v740_v6 = vld [vmem:[%s14823_s27 + $0xb30] sm:$0xff]  ;;  %v737_v7 = vld [vmem:[%s14823_s27 + $0xb18] sm:$0xff] }
 0x450   : > { %10760 = vmatprep.subr.bf16.mxu0 %v12759_v8  ;;  %11252 = vmatprep.subr.bf16.mxu1 %v12761_v9  ;;  %v741_v8 = vld [vmem:[%s14823_s27 + $0xb38] sm:$0xff]  ;;  %v12798_v9 = vcombine.low %v728_v52, %v732_v56  ;;  %v12807_v11 = vcombine.high %v736_v5, %v740_v6 }
 0x451   : > { %v12809_v13 = vcombine.high %v737_v7, %v741_v8  ;;  %v12808_v23 = vcombine.low %v737_v7, %v741_v8  ;;  %v784_v8 = vld [vmem:[%s14823_s27 + $0xc90] sm:$0xff] }
 0x453   : > { %10761 = vmatpush1.bf16.msra.mxu0 %v12758_v14  ;;  %11253 = vmatpush1.bf16.msra.mxu1 %v12760_v17  ;;  %v748_v14 = vld [vmem:[%s14823_s27 + $0xb70] sm:$0xff]  ;;  %v745_v17 = vld [vmem:[%s14823_s27 + $0xb58] sm:$0xff] }
 0x454   : > { %10762 = vmatprep.subr.bf16.mxu0 %v12767_v18  ;;  %11254 = vmatprep.subr.bf16.mxu1 %v12769_v21  ;;  %v749_v18 = vld [vmem:[%s14823_s27 + $0xb78] sm:$0xff]  ;;  %v12806_v21 = vcombine.low %v736_v5, %v740_v6  ;;  %v12815_v26 = vcombine.high %v744_v58, %v748_v14 }
 0x455   : > { %v12817_v27 = vcombine.high %v745_v17, %v749_v18  ;;  %v12816_v33 = vcombine.low %v745_v17, %v749_v18  ;;  %v792_v18 = vld [vmem:[%s14823_s27 + $0xcd0] sm:$0xff] }
 0x457   : > { %10763 = vmatpush1.bf16.msra.mxu0 %v12766_v29  ;;  %11255 = vmatpush1.bf16.msra.mxu1 %v12768_v30  ;;  %v756_v29 = vld [vmem:[%s14823_s27 + $0xbb0] sm:$0xff]  ;;  %v753_v30 = vld [vmem:[%s14823_s27 + $0xb98] sm:$0xff] }
 0x458   : > { %10764 = vmatprep.subr.bf16.mxu0 %v12775_v31  ;;  %11256 = vmatprep.subr.bf16.mxu1 %v12777_v32  ;;  %v757_v31 = vld [vmem:[%s14823_s27 + $0xbb8] sm:$0xff]  ;;  %v12814_v32 = vcombine.low %v744_v58, %v748_v14  ;;  %v12823_v22 = vcombine.high %v752_v28, %v756_v29 }
 0x459   : > { %v12825_v34 = vcombine.high %v753_v30, %v757_v31  ;;  %v12824_v57 = vcombine.low %v753_v30, %v757_v31  ;;  %v800_v30 = vld [vmem:[%s14823_s27 + $0xd10] sm:$0xff] }
 0x45a   : > { %v804_v31 = vld [vmem:[%s14823_s27 + $0xd30] sm:$0xff] }
 0x45b   : > { %10765 = vmatpush1.bf16.msra.mxu0 %v12774_v35  ;;  %11257 = vmatpush1.bf16.msra.mxu1 %v12776_v37  ;;  %v764_v35 = vld [vmem:[%s14823_s27 + $0xbf0] sm:$0xff]  ;;  %v761_v37 = vld [vmem:[%s14823_s27 + $0xbd8] sm:$0xff] }
 0x45c   : > { %10766 = vmatprep.subr.bf16.mxu0 %v12783_v38  ;;  %11258 = vmatprep.subr.bf16.mxu1 %v12785_v40  ;;  %v765_v38 = vld [vmem:[%s14823_s27 + $0xbf8] sm:$0xff]  ;;  %v12822_v40 = vcombine.low %v752_v28, %v756_v29  ;;  %v12831_v41 = vcombine.high %v760_v12, %v764_v35 }
 0x45d   : > { %v12833_v15 = vcombine.high %v761_v37, %v765_v38  ;;  %v12832_v52 = vcombine.low %v761_v37, %v765_v38  ;;  %v812_v37 = vld [vmem:[%s14823_s27 + $0xd70] sm:$0xff]  ;;  %v809_v38 = vld [vmem:[%s14823_s27 + $0xd58] sm:$0xff] }
 0x45f   : > { %10767 = vmatpush1.bf16.msra.mxu0 %v12782_v43  ;;  %11259 = vmatpush1.bf16.msra.mxu1 %v12784_v53  ;;  %v772_v43 = vld [vmem:[%s14823_s27 + $0xc30] sm:$0xff]  ;;  %v769_v53 = vld [vmem:[%s14823_s27 + $0xc18] sm:$0xff] }
 0x460   : > { %10768 = vmatprep.subr.bf16.mxu0 %v12791_v45  ;;  %11260 = vmatprep.subr.bf16.mxu1 %v12793_v47  ;;  %v773_v45 = vld [vmem:[%s14823_s27 + $0xc38] sm:$0xff]  ;;  %v12830_v47 = vcombine.low %v760_v12, %v764_v35  ;;  %v12839_v56 = vcombine.high %v768_v42, %v772_v43  ;;  %v808_v35 = vld [vmem:[%s14823_s27 + $0xd50] sm:$0xff] }
 0x461   : > { %v12841_v60 = vcombine.high %v769_v53, %v773_v45  ;;  %v12840_v5 = vcombine.low %v769_v53, %v773_v45  ;;  %v820_v53 = vld [vmem:[%s14823_s27 + $0xdb0] sm:$0xff]  ;;  %v817_v45 = vld [vmem:[%s14823_s27 + $0xd98] sm:$0xff] }
 0x463   : > { %10769 = vmatpush1.bf16.msra.mxu0 %v12790_v62  ;;  %11261 = vmatpush1.bf16.msra.mxu1 %v12792_v63  ;;  %v780_v62 = vld [vmem:[%s14823_s27 + $0xc70] sm:$0xff]  ;;  %v777_v63 = vld [vmem:[%s14823_s27 + $0xc58] sm:$0xff] }
 0x464   : > { %10770 = vmatprep.subr.bf16.mxu0 %v12799_v1  ;;  %11262 = vmatprep.subr.bf16.mxu1 %v12801_v2  ;;  %v781_v1 = vld [vmem:[%s14823_s27 + $0xc78] sm:$0xff]  ;;  %v12838_v2 = vcombine.low %v768_v42, %v772_v43  ;;  %v12847_v6 = vcombine.high %v776_v61, %v780_v62  ;;  %v816_v43 = vld [vmem:[%s14823_s27 + $0xd90] sm:$0xff] }
 0x465   : > { %v12849_v7 = vcombine.high %v777_v63, %v781_v1  ;;  %v12848_v58 = vcombine.low %v777_v63, %v781_v1  ;;  %v824_v63 = vld [vmem:[%s14823_s27 + $0xdd0] sm:$0xff] }
 0x466   : > { %v828_v1 = vld [vmem:[%s14823_s27 + $0xdf0] sm:$0xff] }
 0x467   : > { %10771 = vmatpush1.bf16.msra.mxu0 %v12798_v9  ;;  %11263 = vmatpush1.bf16.msra.mxu1 %v12800_v10  ;;  %v788_v9 = vld [vmem:[%s14823_s27 + $0xcb0] sm:$0xff]  ;;  %v785_v10 = vld [vmem:[%s14823_s27 + $0xc98] sm:$0xff] }
 0x468   : > { %10772 = vmatprep.subr.bf16.mxu0 %v12807_v11  ;;  %11264 = vmatprep.subr.bf16.mxu1 %v12809_v13  ;;  %v789_v11 = vld [vmem:[%s14823_s27 + $0xcb8] sm:$0xff]  ;;  %v12846_v13 = vcombine.low %v776_v61, %v780_v62  ;;  %v12855_v14 = vcombine.high %v784_v8, %v788_v9 }
 0x469   : > { %v12857_v17 = vcombine.high %v785_v10, %v789_v11 }
 0x46b   : > { %10773 = vmatpush1.bf16.msra.mxu0 %v12806_v21  ;;  %11265 = vmatpush1.bf16.msra.mxu1 %v12808_v23  ;;  %v796_v21 = vld [vmem:[%s14823_s27 + $0xcf0] sm:$0xff]  ;;  %v793_v23 = vld [vmem:[%s14823_s27 + $0xcd8] sm:$0xff] }
 0x46c   : > { %10774 = vmatprep.subr.bf16.mxu0 %v12815_v26  ;;  %11266 = vmatprep.subr.bf16.mxu1 %v12817_v27  ;;  %v797_v26 = vld [vmem:[%s14823_s27 + $0xcf8] sm:$0xff]  ;;  %v12856_v27 = vcombine.low %v785_v10, %v789_v11  ;;  %v12863_v28 = vcombine.high %v792_v18, %v796_v21 }
 0x46d   : > { %v12865_v29 = vcombine.high %v793_v23, %v797_v26 }
 0x46f   : > { %10775 = vmatpush1.bf16.msra.mxu0 %v12814_v32  ;;  %11267 = vmatpush1.bf16.msra.mxu1 %v12816_v33  ;;  %v801_v32 = vld [vmem:[%s14823_s27 + $0xd18] sm:$0xff] }
 0x470   : > { %10776 = vmatprep.subr.bf16.mxu0 %v12823_v22  ;;  %11268 = vmatprep.subr.bf16.mxu1 %v12825_v34  ;;  %v805_v33 = vld [vmem:[%s14823_s27 + $0xd38] sm:$0xff]  ;;  %v12862_v22 = vcombine.low %v792_v18, %v796_v21  ;;  %v12871_v34 = vcombine.high %v800_v30, %v804_v31 }
 0x471   : > { %v12873_v12 = vcombine.high %v801_v32, %v805_v33 }
 0x473   : > { %10777 = vmatpush1.bf16.msra.mxu0 %v12822_v40  ;;  %11269 = vmatpush1.bf16.msra.mxu1 %v12824_v57  ;;  %v813_v40 = vld [vmem:[%s14823_s27 + $0xd78] sm:$0xff]  ;;  %v12870_v57 = vcombine.low %v800_v30, %v804_v31  ;;  %v832_v30 = vld [vmem:[%s14823_s27 + $0xe10] sm:$0xff] }
 0x474   : > { %10778 = vmatprep.subr.bf16.mxu0 %v12831_v41  ;;  %11270 = vmatprep.subr.bf16.mxu1 %v12833_v15  ;;  %v12872_v41 = vcombine.low %v801_v32, %v805_v33  ;;  %v12879_v15 = vcombine.high %v808_v35, %v812_v37  ;;  %v12881_v42 = vcombine.high %v809_v38, %v813_v40  ;;  %v836_v31 = vld [vmem:[%s14823_s27 + $0xe30] sm:$0xff] }
 0x477   : > { %10779 = vmatpush1.bf16.msra.mxu0 %v12830_v47  ;;  %11271 = vmatpush1.bf16.msra.mxu1 %v12832_v52  ;;  %v821_v47 = vld [vmem:[%s14823_s27 + $0xdb8] sm:$0xff]  ;;  %v12878_v52 = vcombine.low %v808_v35, %v812_v37  ;;  %v12894_v35 = vcombine.low %v824_v63, %v828_v1 }
 0x478   : > { %10789 = vmatprep.subr.bf16.mxu0 %v12839_v56  ;;  %11281 = vmatprep.subr.bf16.mxu1 %v12841_v60  ;;  %v12880_v56 = vcombine.low %v809_v38, %v813_v40  ;;  %v12887_v60 = vcombine.high %v816_v43, %v820_v53  ;;  %v12889_v62 = vcombine.high %v817_v45, %v821_v47 }
 0x47a   : > { %10781 = vmatmul.mubr.bf16.vlgmr.msra.gmra.mrb[4].mxu0 %v15074_v36  ;;  %11273 = vmatmul.mubr.bf16.vlgmr.msra.gmra.mrb[4].mxu1 %v15074_v36  ;;  %v12854_v36 = vcombine.low %v784_v8, %v788_v9  ;;  %v829_v8 = vld [vmem:[%s14823_s27 + $0xdf8] sm:$0xff] }
 0x47b   : > { %10790 = vmatpush1.bf16.msra.mxu0 %v12838_v2  ;;  %11282 = vmatpush1.bf16.msra.mxu1 %v12840_v5 }
 0x47c   : > { %10791 = vmatprep.subr.bf16.mxu0 %v12847_v6  ;;  %11283 = vmatprep.subr.bf16.mxu1 %v12849_v7  ;;  %v825_v7 = vld [vmem:[%s14823_s27 + $0xdd8] sm:$0xff] }
 0x47d   : > { %10821 = vmatprep.mubr.bf16.mxu0 %v15084_v25  ;;  %11313 = vmatprep.mubr.bf16.mxu1 %v15084_v25  ;;  %v12864_v25 = vcombine.low %v793_v23, %v797_v26  ;;  %v12888_v23 = vcombine.low %v817_v45, %v821_v47  ;;  %v12895_v26 = vcombine.high %v824_v63, %v828_v1 }
 0x47e   : > { %v12896_v40 = vcombine.low %v825_v7, %v829_v8  ;;  %v12902_v63 = vcombine.low %v832_v30, %v836_v31 }
 0x47f   : > { %10792 = vmatpush1.bf16.msra.mxu0 %v12846_v13  ;;  %11284 = vmatpush1.bf16.msra.mxu1 %v12848_v58  ;;  %v12886_v58 = vcombine.low %v816_v43, %v820_v53  ;;  %v840_v43 = vld [vmem:[%s14823_s27 + $0xe50] sm:$0xff] }
 0x480   : > { %10793 = vmatprep.subr.bf16.mxu0 %v12855_v14  ;;  %11285 = vmatprep.subr.bf16.mxu1 %v12857_v17  ;;  %v844_v53 = vld [vmem:[%s14823_s27 + $0xe70] sm:$0xff] }
 0x483   : > { %10794 = vmatpush1.bf16.msra.mxu0 %v12854_v36  ;;  %11286 = vmatpush1.bf16.msra.mxu1 %v12856_v27 }
 0x484   : > { %10795 = vmatprep.subr.bf16.mxu0 %v12863_v28  ;;  %11287 = vmatprep.subr.bf16.mxu1 %v12865_v29  ;;  %v12897_v29 = vcombine.high %v825_v7, %v829_v8  ;;  %v12911_v8 = vcombine.high %v840_v43, %v844_v53 }
 0x487   : > { %10796 = vmatpush1.bf16.msra.mxu0 %v12862_v22  ;;  %11288 = vmatpush1.bf16.msra.mxu1 %v12864_v25  ;;  %v833_v22 = vld [vmem:[%s14823_s27 + $0xe18] sm:$0xff] }
 0x488   : > { %10797 = vmatprep.subr.bf16.mxu0 %v12871_v34  ;;  %11289 = vmatprep.subr.bf16.mxu1 %v12873_v12  ;;  %v837_v25 = vld [vmem:[%s14823_s27 + $0xe38] sm:$0xff] }
 0x489   : > { %v12904_v7 = vcombine.low %v833_v22, %v837_v25 }
 0x48b   : > { %10798 = vmatpush1.bf16.msra.mxu0 %v12870_v57  ;;  %11290 = vmatpush1.bf16.msra.mxu1 %v12872_v41  ;;  %v12903_v57 = vcombine.high %v832_v30, %v836_v31 }
 0x48c   : > { %10799 = vmatprep.subr.bf16.mxu0 %v12879_v15  ;;  %11291 = vmatprep.subr.bf16.mxu1 %v12881_v42  ;;  %v12905_v42 = vcombine.high %v833_v22, %v837_v25  ;;  %v856_v25 = vld [vmem:[%s14823_s27 + $0xed0] sm:$0xff] }
 0x48d   : > { %v16008_v61 = vpop.f32.mrb[0].mxu0  ;;  %v16013_v5 = vpop.f32.mrb[0].mxu1 }
 0x48e   : > { %v11650_v2 = vrot.slane %v16008_v61, 4  ;;  %v16015_v6 = vpop.f32.mrb[1].mxu0  ;;  %v11662_v9 = vrot.slane %v16013_v5, 4  ;;  %v16021_v11 = vpop.f32.mrb[1].mxu1 }
 0x48f   : > { %v11656_v10 = vrot.slane %v16015_v6, 4  ;;  %v10171_v13 = vpop.f32.mrb[2].mxu0  ;;  %10800 = vmatpush1.bf16.msra.mxu0 %v12878_v52  ;;  %v11668_v17 = vrot.slane %v16021_v11, 4  ;;  %v10663_v18 = vpop.f32.mrb[2].mxu1  ;;  %11292 = vmatpush1.bf16.msra.mxu1 %v12880_v56  ;;  %v841_v52 = vld [vmem:[%s14823_s27 + $0xe58] sm:$0xff] }
 0x490   : > { %v11651_v14 = vadd.f32 %v11650_v2, %v16008_v61  ;;  %v10172_v21 = vpop.f32.mrb[3].mxu0  ;;  %10801 = vmatprep.subr.bf16.mxu0 %v12887_v60  ;;  %v11663_v36 = vadd.f32 %v11662_v9, %v16013_v5  ;;  %v10664_v28 = vpop.f32.mrb[3].mxu1  ;;  %11293 = vmatprep.subr.bf16.mxu1 %v12889_v62  ;;  %v845_v56 = vld [vmem:[%s14823_s27 + $0xe78] sm:$0xff] }
 0x491   : > { %v11657_v27 = vadd.f32 %v11656_v10, %v16015_v6  ;;  %v11669_v33 = vadd.f32 %v11668_v17, %v16021_v11  ;;  %v12913_v13 = vcombine.high %v841_v52, %v845_v56  ;;  %v849_v21 = vld [vmem:[%s14823_s27 + $0xe98] sm:$0xff]  ;;  %v12912_v30 = vcombine.low %v841_v52, %v845_v56  ;;  %v864_v56 = vld [vmem:[%s14823_s27 + $0xf10] sm:$0xff] }
 0x492   : > { %v11652_v32 = vrot.slane %v11651_v14, 2  ;;  %v11664_v34 = vrot.slane %v11663_v36, 2 }
 0x493   : > { %v11658_v12 = vrot.slane %v11657_v27, 2  ;;  %10802 = vmatpush1.bf16.msra.mxu0 %v12886_v58  ;;  %v11670_v38 = vrot.slane %v11669_v33, 2  ;;  %11294 = vmatpush1.bf16.msra.mxu1 %v12888_v23  ;;  %v848_v58 = vld [vmem:[%s14823_s27 + $0xe90] sm:$0xff]  ;;  %v853_v23 = vld [vmem:[%s14823_s27 + $0xeb8] sm:$0xff] }
 0x494   : > { %v11653_v37 = vadd.f32 %v11652_v32, %v11651_v14  ;;  %10803 = vmatprep.subr.bf16.mxu0 %v12895_v26  ;;  %v11665_v41 = vadd.f32 %v11664_v34, %v11663_v36  ;;  %11295 = vmatprep.subr.bf16.mxu1 %v12897_v29  ;;  %v852_v14 = vld [vmem:[%s14823_s27 + $0xeb0] sm:$0xff]  ;;  %v12921_v22 = vcombine.high %v849_v21, %v853_v23 }
 0x495   : > { %v11659_v15 = vadd.f32 %v11658_v12, %v11657_v27  ;;  %v11671_v47 = vadd.f32 %v11670_v38, %v11669_v33  ;;  %v12910_v27 = vcombine.low %v840_v43, %v844_v53  ;;  %v12919_v31 = vcombine.high %v848_v58, %v852_v14  ;;  %v860_v34 = vld [vmem:[%s14823_s27 + $0xef0] sm:$0xff]  ;;  %v861_v38 = vld [vmem:[%s14823_s27 + $0xef8] sm:$0xff] }
 0x496   : > { %v11654_v45 = vrot.slane %v11653_v37, 1  ;;  %v11666_v60 = vrot.slane %v11665_v41, 1  ;;  %v12920_v43 = vcombine.low %v849_v21, %v853_v23  ;;  %v12927_v53 = vcombine.high %v856_v25, %v860_v34 }
 0x497   : > { %v11660_v62 = vrot.slane %v11659_v15, 1  ;;  %10804 = vmatpush1.bf16.msra.mxu0 %v12894_v35  ;;  %v11672_v2 = vrot.slane %v11671_v47, 1  ;;  %11296 = vmatpush1.bf16.msra.mxu1 %v12896_v40 }
 0x498   : > { %v11655_v1 = vadd.f32 %v11654_v45, %v11653_v37  ;;  %10805 = vmatprep.subr.bf16.mxu0 %v12903_v57  ;;  %v11667_v9 = vadd.f32 %v11666_v60, %v11665_v41  ;;  %11297 = vmatprep.subr.bf16.mxu1 %v12905_v42  ;;  %v857_v37 = vld [vmem:[%s14823_s27 + $0xed8] sm:$0xff]  ;;  %v12918_v41 = vcombine.low %v848_v58, %v852_v14  ;;  %v868_v60 = vld [vmem:[%s14823_s27 + $0xf30] sm:$0xff] }
 0x499   : > { %v11661_v10 = vadd.f32 %v11660_v62, %v11659_v15  ;;  %v11673_v18 = vadd.f32 %v11672_v2, %v11671_v47  ;;  %v12929_v52 = vcombine.high %v857_v37, %v861_v38  ;;  %v869_v2 = vld [vmem:[%s14823_s27 + $0xf38] sm:$0xff]  ;;  %v12928_v58 = vcombine.low %v857_v37, %v861_v38 }
 0x49a   : > { %v16038_v17 = vmul.f32 0.125, %v11655_v1  ;;  %v16042_v26 = vmul.f32 0.125, %v11667_v9  ;;  %v865_v1 = vld [vmem:[%s14823_s27 + $0xf18] sm:$0xff]  ;;  %v12926_v9 = vcombine.low %v856_v25, %v860_v34  ;;  %v12935_v14 = vcombine.high %v864_v56, %v868_v60 }
 0x49b   : > { %v16044_v36 = vmul.f32 0.125, %v11661_v10  ;;  %10806 = vmatpush1.bf16.msra.mxu0 %v12902_v63  ;;  %v16048_v29 = vmul.f32 0.125, %v11673_v18  ;;  %11298 = vmatpush1.bf16.msra.mxu1 %v12904_v7  ;;  %v12937_v23 = vcombine.high %v865_v1, %v869_v2  ;;  %v12934_v34 = vcombine.low %v864_v56, %v868_v60 }
 0x49c   : > { %v11707_v28 = vsub.f32 %v16008_v61, %v16038_v17  ;;  %10807 = vmatprep.subr.bf16.mxu0 %v12911_v8  ;;  %v11709_v32 = vsub.f32 %v16013_v5, %v16042_v26  ;;  %11299 = vmatprep.subr.bf16.mxu1 %v12913_v13  ;;  %v12936_v37 = vcombine.low %v865_v1, %v869_v2 }
 0x49d   : > { %v11708_v33 = vsub.f32 %v16015_v6, %v16044_v36  ;;  %v11710_v35 = vsub.f32 %v16021_v11, %v16048_v29 }
 0x49e   : > { %v11715_v12 = vmul.f32 %v11707_v28, %v11707_v28  ;;  %v11717_v40 = vmul.f32 %v11709_v32, %v11709_v32  ;;  %v876_v28 = vld [vmem:[%s14823_s27 + $0xf70] sm:$0xff]  ;;  %v873_v32 = vld [vmem:[%s14823_s27 + $0xf58] sm:$0xff] }
 0x49f   : > { %v11716_v57 = vmul.f32 %v11708_v33, %v11708_v33  ;;  %10808 = vmatpush1.bf16.msra.mxu0 %v12910_v27  ;;  %v11718_v42 = vmul.f32 %v11710_v35, %v11710_v35  ;;  %11300 = vmatpush1.bf16.msra.mxu1 %v12912_v30  ;;  %v872_v27 = vld [vmem:[%s14823_s27 + $0xf50] sm:$0xff]  ;;  %v877_v33 = vld [vmem:[%s14823_s27 + $0xf78] sm:$0xff] }
 0x4a0   : > { %v11723_v15 = vrot.slane %v11715_v12, 4  ;;  %10809 = vmatprep.subr.bf16.mxu0 %v12919_v31  ;;  %v11735_v45 = vrot.slane %v11717_v40, 4  ;;  %11301 = vmatprep.subr.bf16.mxu1 %v12921_v22  ;;  %v12943_v38 = vcombine.high %v872_v27, %v876_v28  ;;  %v12942_v60 = vcombine.low %v872_v27, %v876_v28 }
 0x4a1   : > { %v11729_v47 = vrot.slane %v11716_v57, 4  ;;  %v11741_v63 = vrot.slane %v11718_v42, 4  ;;  %v12944_v1 = vcombine.low %v873_v32, %v877_v33 }
 0x4a2   : > { %v11724_v62 = vadd.f32 %v11723_v15, %v11715_v12  ;;  %v11736_v7 = vadd.f32 %v11735_v45, %v11717_v40  ;;  %v880_v15 = vld [vmem:[%s14823_s27 + $0xf90] sm:$0xff]  ;;  %v881_v45 = vld [vmem:[%s14823_s27 + $0xf98] sm:$0xff] }
 0x4a3   : > { %v11730_v8 = vadd.f32 %v11729_v47, %v11716_v57  ;;  %10810 = vmatpush1.bf16.msra.mxu0 %v12918_v41  ;;  %v11742_v13 = vadd.f32 %v11741_v63, %v11718_v42  ;;  %11302 = vmatpush1.bf16.msra.mxu1 %v12920_v43  ;;  %v12945_v41 = vcombine.high %v873_v32, %v877_v33  ;;  %v884_v42 = vld [vmem:[%s14823_s27 + $0xfb0] sm:$0xff]  ;;  %v885_v47 = vld [vmem:[%s14823_s27 + $0xfb8] sm:$0xff] }
 0x4a4   : > { %v11725_v10 = vrot.slane %v11724_v62, 2  ;;  %10811 = vmatprep.subr.bf16.mxu0 %v12927_v53  ;;  %v11737_v18 = vrot.slane %v11736_v7, 2  ;;  %11303 = vmatprep.subr.bf16.mxu1 %v12929_v52  ;;  %v12951_v2 = vcombine.high %v880_v15, %v884_v42  ;;  %v12950_v28 = vcombine.low %v880_v15, %v884_v42  ;;  %v904_v42 = vld [vmem:[%s14823_s27 + $0x1050] sm:$0xff] }
 0x4a5   : > { %v11731_v21 = vrot.slane %v11730_v8, 2  ;;  %v11743_v31 = vrot.slane %v11742_v13, 2 }
 0x4a6   : > { %v11726_v30 = vadd.f32 %v11725_v10, %v11724_v62  ;;  %v11738_v22 = vadd.f32 %v11737_v18, %v11736_v7  ;;  %v888_v10 = vld [vmem:[%s14823_s27 + $0xfd0] sm:$0xff]  ;;  %v889_v18 = vld [vmem:[%s14823_s27 + $0xfd8] sm:$0xff] }
 0x4a7   : > { %v11732_v25 = vadd.f32 %v11731_v21, %v11730_v8  ;;  %10812 = vmatpush1.bf16.msra.mxu0 %v12926_v9  ;;  %v11744_v35 = vadd.f32 %v11743_v31, %v11742_v13  ;;  %11304 = vmatpush1.bf16.msra.mxu1 %v12928_v58  ;;  %v12953_v9 = vcombine.high %v881_v45, %v885_v47  ;;  %v892_v13 = vld [vmem:[%s14823_s27 + $0xff0] sm:$0xff]  ;;  %v893_v21 = vld [vmem:[%s14823_s27 + $0xff8] sm:$0xff] }
 0x4a8   : > { %v11727_v12 = vrot.slane %v11726_v30, 1  ;;  %10813 = vmatprep.subr.bf16.mxu0 %v12935_v14  ;;  %v11739_v40 = vrot.slane %v11738_v22, 1  ;;  %11305 = vmatprep.subr.bf16.mxu1 %v12937_v23  ;;  %v12959_v32 = vcombine.high %v888_v10, %v892_v13  ;;  %v12961_v33 = vcombine.high %v889_v18, %v893_v21 }
 0x4a9   : > { %v11733_v57 = vrot.slane %v11732_v25, 1  ;;  %v11745_v53 = vrot.slane %v11744_v35, 1 }
 0x4aa   : > { %v11728_v43 = vadd.f32 %v11727_v12, %v11726_v30  ;;  %v11740_v52 = vadd.f32 %v11739_v40, %v11738_v22  ;;  %v12952_v30 = vcombine.low %v881_v45, %v885_v47  ;;  %v896_v22 = vld [vmem:[%s14823_s27 + $0x1010] sm:$0xff]  ;;  %v901_v12 = vld [vmem:[%s14823_s27 + $0x1038] sm:$0xff]  ;;  %v12958_v40 = vcombine.low %v888_v10, %v892_v13 }
 0x4ab   : > { %v11734_v56 = vadd.f32 %v11733_v57, %v11732_v25  ;;  %10814 = vmatpush1.bf16.msra.mxu0 %v12934_v34  ;;  %v11746_v63 = vadd.f32 %v11745_v53, %v11744_v35  ;;  %11306 = vmatpush1.bf16.msra.mxu1 %v12936_v37  ;;  %v900_v25 = vld [vmem:[%s14823_s27 + $0x1030] sm:$0xff]  ;;  %v897_v34 = vld [vmem:[%s14823_s27 + $0x1018] sm:$0xff]  ;;  %v14537_v35 = vmov 1966171168   ;;  %v12960_v57 = vcombine.low %v889_v18, %v893_v21 }
 0x4ac   : > { %v11771_v62 = vmul.f32 0.125, %v11728_v43  ;;  %10815 = vmatprep.subr.bf16.mxu0 %v12943_v38  ;;  %v11773_v7 = vmul.f32 0.125, %v11740_v52  ;;  %11307 = vmatprep.subr.bf16.mxu1 %v12945_v41  ;;  %v11809_v37 = vunpack.c.l.s4 %v14537_v35  ;;  %v11811_v38 = vlaneseq  ;;  %v908_v43 = vld [vmem:[%s14823_s27 + $0x1070] sm:$0xff]  ;;  %v905_v53 = vld [vmem:[%s14823_s27 + $0x1058] sm:$0xff] }
 0x4ad   : > { %v11772_v8 = vmul.f32 0.125, %v11734_v56  ;;  %v11774_v14 = vmul.f32 0.125, %v11746_v63  ;;  %v12967_v41 = vcombine.high %v896_v22, %v900_v25  ;;  %v12969_v15 = vcombine.high %v897_v34, %v901_v12  ;;  %v909_v45 = vld [vmem:[%s14823_s27 + $0x1078] sm:$0xff] }
 0x4ae   : > { %v11780_v58 = vadd.f32 1e-05, %v11771_v62  ;;  %v11782_v23 = vadd.f32 1e-05, %v11773_v7  ;;  %v11810_v47 = vunpack.c.0.s8 %v11809_v37  ;;  %v16084_v52 = vshrl.u32 %v11811_v38, 7  ;;  %v928_v38 = vld [vmem:[%s14823_s27 + $0x1110] sm:$0xff] }
 0x4af   : > { %v11781_v27 = vadd.f32 1e-05, %v11772_v8  ;;  %10816 = vmatpush1.bf16.msra.mxu0 %v12942_v60  ;;  %v11783_v31 = vadd.f32 1e-05, %v11774_v14  ;;  %11308 = vmatpush1.bf16.msra.mxu1 %v12944_v1  ;;  %v12966_v56 = vcombine.low %v896_v22, %v900_v25  ;;  %v12968_v60 = vcombine.low %v897_v34, %v901_v12  ;;  %v912_v1 = vld [vmem:[%s14823_s27 + $0x1090] sm:$0xff]  ;;  %v913_v8 = vld [vmem:[%s14823_s27 + $0x1098] sm:$0xff] }
 0x4b0   : > { %14289 = vrsqrt.f32 %v11780_v58  ;;  %10817 = vmatprep.subr.bf16.mxu0 %v12951_v2  ;;  %11309 = vmatprep.subr.bf16.mxu1 %v12953_v9  ;;  %v12975_v62 = vcombine.high %v904_v42, %v908_v43  ;;  %v12977_v63 = vcombine.high %v905_v53, %v909_v45  ;;  %v916_v2 = vld [vmem:[%s14823_s27 + $0x10b0] sm:$0xff]  ;;  %v917_v9 = vld [vmem:[%s14823_s27 + $0x10b8] sm:$0xff]  ;;  %v16092_v13 = vsub.s32 %v11810_v47, %v16084_v52 }
 0x4b1   : > { %14291 = vrsqrt.f32 %v11782_v23  ;;  %v12974_v58 = vcombine.low %v904_v42, %v908_v43  ;;  %v12976_v18 = vcombine.low %v905_v53, %v909_v45  ;;  %v12983_v21 = vcombine.high %v912_v1, %v916_v2  ;;  %v936_v45 = vld [vmem:[%s14823_s27 + $0x1150] sm:$0xff] }
 0x4b2   : > { %14293 = vrsqrt.f32 %v11781_v27  ;;  %v12982_v25 = vcombine.low %v912_v1, %v916_v2  ;;  %v12984_v12 = vcombine.low %v913_v8, %v917_v9  ;;  %v940_v47 = vld [vmem:[%s14823_s27 + $0x1170] sm:$0xff] }
 0x4b3   : > { %14295 = vrsqrt.f32 %v11783_v31  ;;  %10818 = vmatpush1.bf16.msra.mxu0 %v12950_v28  ;;  %11310 = vmatpush1.bf16.msra.mxu1 %v12952_v30  ;;  %v12985_v28 = vcombine.high %v913_v8, %v917_v9  ;;  %v920_v30 = vld [vmem:[%s14823_s27 + $0x10d0] sm:$0xff]  ;;  %v13007_v1 = vcombine.high %v936_v45, %v940_v47  ;;  %v945_v9 = vld [vmem:[%s14823_s27 + $0x1198] sm:$0xff] }
 0x4b4   : > { %10819 = vmatprep.subr.bf16.mxu0 %v12959_v32  ;;  %11311 = vmatprep.subr.bf16.mxu1 %v12961_v33  ;;  %v924_v31 = vld [vmem:[%s14823_s27 + $0x10f0] sm:$0xff]  ;;  %v921_v33 = vld [vmem:[%s14823_s27 + $0x10d8] sm:$0xff] }
 0x4b5   : > { %v12991_v35 = vcombine.high %v920_v30, %v924_v31  ;;  %v948_v8 = vld [vmem:[%s14823_s27 + $0x11b0] sm:$0xff] }
 0x4b7   : > { %10820 = vmatpush1.bf16.msra.mxu0 %v12958_v40  ;;  %11312 = vmatpush1.bf16.msra.mxu1 %v12960_v57  ;;  %v929_v57 = vld [vmem:[%s14823_s27 + $0x1118] sm:$0xff] }
 0x4b8   : > { %10830 = vmatprep.subr.bf16.mxu0 %v12967_v41  ;;  %11322 = vmatprep.subr.bf16.mxu1 %v12969_v15  ;;  %v933_v41 = vld [vmem:[%s14823_s27 + $0x1138] sm:$0xff]  ;;  %v12990_v15 = vcombine.low %v920_v30, %v924_v31 }
 0x4b9   : > { %v13001_v53 = vcombine.high %v929_v57, %v933_v41  ;;  %v957_v30 = vld [vmem:[%s14823_s27 + $0x11f8] sm:$0xff] }
 0x4ba   : > { %v14290_v7 = vpop.eup %14289  ;;  %10822 = vmatmul.mubr.bf16.vlgmr.msra.gmra.mrb[4].mxu0 %v15152_v55  ;;  %11314 = vmatmul.mubr.bf16.vlgmr.msra.gmra.mrb[4].mxu1 %v15152_v55  ;;  %v925_v55 = vld [vmem:[%s14823_s27 + $0x10f8] sm:$0xff] }
 0x4bb   : > { %v14292_v10 = vpop.eup %14291  ;;  %10831 = vmatpush1.bf16.msra.mxu0 %v12966_v56  ;;  %11323 = vmatpush1.bf16.msra.mxu1 %v12968_v60  ;;  %v12993_v37 = vcombine.high %v921_v33, %v925_v55  ;;  %v12992_v42 = vcombine.low %v921_v33, %v925_v55  ;;  %v937_v56 = vld [vmem:[%s14823_s27 + $0x1158] sm:$0xff] }
 0x4bc   : > { %v14294_v14 = vpop.eup %14293  ;;  %10832 = vmatprep.subr.bf16.mxu0 %v12975_v62  ;;  %11324 = vmatprep.subr.bf16.mxu1 %v12977_v63  ;;  %v941_v60 = vld [vmem:[%s14823_s27 + $0x1178] sm:$0xff]  ;;  %v13000_v63 = vcombine.low %v929_v57, %v933_v41 }
 0x4bd   : > { %v14296_v23 = vpop.eup %14295  ;;  %v11804_v27 = vcombine.low %v14290_v7, %v14294_v14  ;;  %10862 = vmatprep.mubr.bf16.mxu0 %v15162_v39  ;;  %11354 = vmatprep.mubr.bf16.mxu1 %v15162_v39  ;;  %v932_v39 = vld [vmem:[%s14823_s27 + $0x1130] sm:$0xff]  ;;  %v13009_v2 = vcombine.high %v937_v56, %v941_v60  ;;  %v13008_v14 = vcombine.low %v937_v56, %v941_v60 }
 0x4be   : > { %v11805_v32 = vcombine.low %v14292_v10, %v14296_v23  ;;  %v12999_v43 = vcombine.high %v928_v38, %v932_v39  ;;  %v12998_v62 = vcombine.low %v928_v38, %v932_v39  ;;  %v944_v7 = vld [vmem:[%s14823_s27 + $0x1190] sm:$0xff]  ;;  %v949_v10 = vld [vmem:[%s14823_s27 + $0x11b8] sm:$0xff] }
 0x4bf   : > { %v16102_v22 = vrot.slane %v11804_v27, %v16092_v13  ;;  %10833 = vmatpush1.bf16.msra.mxu0 %v12974_v58  ;;  %11325 = vmatpush1.bf16.msra.mxu1 %v12976_v18  ;;  %v13006_v58 = vcombine.low %v936_v45, %v940_v47  ;;  %v13015_v18 = vcombine.high %v944_v7, %v948_v8  ;;  %v952_v23 = vld [vmem:[%s14823_s27 + $0x11d0] sm:$0xff] }
 0x4c0   : > { %v16105_v34 = vrot.slane %v11805_v32, %v16092_v13  ;;  %10834 = vmatprep.subr.bf16.mxu0 %v12983_v21  ;;  %11326 = vmatprep.subr.bf16.mxu1 %v12985_v28  ;;  %v13017_v21 = vcombine.high %v945_v9, %v949_v10  ;;  %v956_v27 = vld [vmem:[%s14823_s27 + $0x11f0] sm:$0xff]  ;;  %v953_v28 = vld [vmem:[%s14823_s27 + $0x11d8] sm:$0xff]  ;;  %v13014_v31 = vcombine.low %v944_v7, %v948_v8 }
 0x4c1   : > { %v13016_v32 = vcombine.low %v945_v9, %v949_v10  ;;  %v13023_v33 = vcombine.high %v952_v23, %v956_v27  ;;  %v13025_v55 = vcombine.high %v953_v28, %v957_v30  ;;  %v13022_v38 = vcombine.low %v952_v23, %v956_v27 }
 0x4c2   : > { %v11836_v40 = vcombine.low %v16102_v22, %v16105_v34  ;;  %v13024_v39 = vcombine.low %v953_v28, %v957_v30  ;;  %v11867_v22 = vsub.s32 2, %v16084_v52  ;;  %v11871_v34 = vsub.s32 3, %v16084_v52 }
 0x4c3   : > { %10835 = vmatpush1.bf16.msra.mxu0 %v12982_v25  ;;  %11327 = vmatpush1.bf16.msra.mxu1 %v12984_v12  ;;  %v960_v25 = vld [vmem:[%s14823_s27 + $0x1210] sm:$0xff] }
 0x4c4   : > { %10836 = vmatprep.subr.bf16.mxu0 %v12991_v35  ;;  %11328 = vmatprep.subr.bf16.mxu1 %v12993_v37  ;;  %v964_v12 = vld [vmem:[%s14823_s27 + $0x1230] sm:$0xff]  ;;  %v961_v35 = vld [vmem:[%s14823_s27 + $0x1218] sm:$0xff] }
 0x4c5   : > { %v965_v37 = vld [vmem:[%s14823_s27 + $0x1238] sm:$0xff]  ;;  %v13031_v57 = vcombine.high %v960_v25, %v964_v12  ;;  %v13030_v45 = vcombine.low %v960_v25, %v964_v12 }
 0x4c6   : > { %v13033_v41 = vcombine.high %v961_v35, %v965_v37  ;;  %v13032_v47 = vcombine.low %v961_v35, %v965_v37 }
 0x4c7   : > { %10837 = vmatpush1.bf16.msra.mxu0 %v12990_v15  ;;  %11329 = vmatpush1.bf16.msra.mxu1 %v12992_v42  ;;  %v968_v15 = vld [vmem:[%s14823_s27 + $0x1250] sm:$0xff] }
 0x4c8   : > { %10838 = vmatprep.subr.bf16.mxu0 %v12999_v43  ;;  %11330 = vmatprep.subr.bf16.mxu1 %v13001_v53  ;;  %v972_v42 = vld [vmem:[%s14823_s27 + $0x1270] sm:$0xff]  ;;  %v969_v43 = vld [vmem:[%s14823_s27 + $0x1258] sm:$0xff] }
 0x4c9   : > { %v973_v53 = vld [vmem:[%s14823_s27 + $0x1278] sm:$0xff]  ;;  %v13039_v56 = vcombine.high %v968_v15, %v972_v42  ;;  %v13038_v7 = vcombine.low %v968_v15, %v972_v42 }
 0x4ca   : > { %v13041_v60 = vcombine.high %v969_v43, %v973_v53  ;;  %v13040_v8 = vcombine.low %v969_v43, %v973_v53 }
 0x4cb   : > { %10839 = vmatpush1.bf16.msra.mxu0 %v12998_v62  ;;  %11331 = vmatpush1.bf16.msra.mxu1 %v13000_v63  ;;  %v976_v62 = vld [vmem:[%s14823_s27 + $0x1290] sm:$0xff] }
 0x4cc   : > { %10840 = vmatprep.subr.bf16.mxu0 %v13007_v1  ;;  %11332 = vmatprep.subr.bf16.mxu1 %v13009_v2  ;;  %v980_v63 = vld [vmem:[%s14823_s27 + $0x12b0] sm:$0xff]  ;;  %v977_v1 = vld [vmem:[%s14823_s27 + $0x1298] sm:$0xff] }
 0x4cd   : > { %v981_v2 = vld [vmem:[%s14823_s27 + $0x12b8] sm:$0xff]  ;;  %v13047_v9 = vcombine.high %v976_v62, %v980_v63  ;;  %v13046_v23 = vcombine.low %v976_v62, %v980_v63 }
 0x4ce   : > { %v13049_v10 = vcombine.high %v977_v1, %v981_v2  ;;  %v13048_v27 = vcombine.low %v977_v1, %v981_v2 }
 0x4cf   : > { %10841 = vmatpush1.bf16.msra.mxu0 %v13006_v58  ;;  %11333 = vmatpush1.bf16.msra.mxu1 %v13008_v14  ;;  %v984_v58 = vld [vmem:[%s14823_s27 + $0x12d0] sm:$0xff] }
 0x4d0   : > { %10842 = vmatprep.subr.bf16.mxu0 %v13015_v18  ;;  %11334 = vmatprep.subr.bf16.mxu1 %v13017_v21  ;;  %v988_v14 = vld [vmem:[%s14823_s27 + $0x12f0] sm:$0xff]  ;;  %v985_v18 = vld [vmem:[%s14823_s27 + $0x12d8] sm:$0xff] }
 0x4d1   : > { %v989_v21 = vld [vmem:[%s14823_s27 + $0x12f8] sm:$0xff]  ;;  %v13055_v28 = vcombine.high %v984_v58, %v988_v14  ;;  %v13054_v25 = vcombine.low %v984_v58, %v988_v14 }
 0x4d2   : > { %v13057_v30 = vcombine.high %v985_v18, %v989_v21  ;;  %v13056_v12 = vcombine.low %v985_v18, %v989_v21 }
 0x4d3   : > { %10843 = vmatpush1.bf16.msra.mxu0 %v13014_v31  ;;  %11335 = vmatpush1.bf16.msra.mxu1 %v13016_v32  ;;  %v992_v31 = vld [vmem:[%s14823_s27 + $0x1310] sm:$0xff] }
 0x4d4   : > { %10844 = vmatprep.subr.bf16.mxu0 %v13023_v33  ;;  %11336 = vmatprep.subr.bf16.mxu1 %v13025_v55  ;;  %v996_v32 = vld [vmem:[%s14823_s27 + $0x1330] sm:$0xff]  ;;  %v993_v33 = vld [vmem:[%s14823_s27 + $0x1318] sm:$0xff] }
 0x4d5   : > { %v997_v55 = vld [vmem:[%s14823_s27 + $0x1338] sm:$0xff]  ;;  %v13063_v35 = vcombine.high %v992_v31, %v996_v32  ;;  %v13062_v15 = vcombine.low %v992_v31, %v996_v32 }
 0x4d6   : > { %v13065_v37 = vcombine.high %v993_v33, %v997_v55  ;;  %v13064_v42 = vcombine.low %v993_v33, %v997_v55 }
 0x4d7   : > { %10845 = vmatpush1.bf16.msra.mxu0 %v13022_v38  ;;  %11337 = vmatpush1.bf16.msra.mxu1 %v13024_v39  ;;  %v1000_v38 = vld [vmem:[%s14823_s27 + $0x1350] sm:$0xff] }
 0x4d8   : > { %10846 = vmatprep.subr.bf16.mxu0 %v13031_v57  ;;  %11338 = vmatprep.subr.bf16.mxu1 %v13033_v41  ;;  %v1004_v39 = vld [vmem:[%s14823_s27 + $0x1370] sm:$0xff]  ;;  %v1001_v57 = vld [vmem:[%s14823_s27 + $0x1358] sm:$0xff] }
 0x4d9   : > { %v1005_v41 = vld [vmem:[%s14823_s27 + $0x1378] sm:$0xff]  ;;  %v13071_v43 = vcombine.high %v1000_v38, %v1004_v39  ;;  %v13070_v62 = vcombine.low %v1000_v38, %v1004_v39 }
 0x4da   : > { %v13073_v53 = vcombine.high %v1001_v57, %v1005_v41  ;;  %v13072_v63 = vcombine.low %v1001_v57, %v1005_v41 }
 0x4db   : > { %10847 = vmatpush1.bf16.msra.mxu0 %v13030_v45  ;;  %11339 = vmatpush1.bf16.msra.mxu1 %v13032_v47  ;;  %v1008_v45 = vld [vmem:[%s14823_s27 + $0x1390] sm:$0xff] }
 0x4dc   : > { %10848 = vmatprep.subr.bf16.mxu0 %v13039_v56  ;;  %11340 = vmatprep.subr.bf16.mxu1 %v13041_v60  ;;  %v1012_v47 = vld [vmem:[%s14823_s27 + $0x13b0] sm:$0xff]  ;;  %v1009_v56 = vld [vmem:[%s14823_s27 + $0x1398] sm:$0xff] }
 0x4dd   : > { %v1013_v60 = vld [vmem:[%s14823_s27 + $0x13b8] sm:$0xff]  ;;  %v13079_v1 = vcombine.high %v1008_v45, %v1012_v47  ;;  %v13078_v58 = vcombine.low %v1008_v45, %v1012_v47 }
 0x4de   : > { %v13081_v2 = vcombine.high %v1009_v56, %v1013_v60  ;;  %v13080_v14 = vcombine.low %v1009_v56, %v1013_v60 }
 0x4df   : > { %10849 = vmatpush1.bf16.msra.mxu0 %v13038_v7  ;;  %11341 = vmatpush1.bf16.msra.mxu1 %v13040_v8  ;;  %v1016_v7 = vld [vmem:[%s14823_s27 + $0x13d0] sm:$0xff] }
 0x4e0   : > { %10850 = vmatprep.subr.bf16.mxu0 %v13047_v9  ;;  %11342 = vmatprep.subr.bf16.mxu1 %v13049_v10  ;;  %v1020_v8 = vld [vmem:[%s14823_s27 + $0x13f0] sm:$0xff]  ;;  %v1017_v9 = vld [vmem:[%s14823_s27 + $0x13d8] sm:$0xff] }
 0x4e1   : > { %v1021_v10 = vld [vmem:[%s14823_s27 + $0x13f8] sm:$0xff]  ;;  %v13087_v18 = vcombine.high %v1016_v7, %v1020_v8  ;;  %v13086_v31 = vcombine.low %v1016_v7, %v1020_v8 }
 0x4e2   : > { %v13089_v21 = vcombine.high %v1017_v9, %v1021_v10  ;;  %v13088_v32 = vcombine.low %v1017_v9, %v1021_v10  ;;  %v1056_v10 = vld [vmem:[%s14823_s27 + $0x1510] sm:$0xff] }
 0x4e3   : > { %10851 = vmatpush1.bf16.msra.mxu0 %v13046_v23  ;;  %11343 = vmatpush1.bf16.msra.mxu1 %v13048_v27  ;;  %v1024_v23 = vld [vmem:[%s14823_s27 + $0x1410] sm:$0xff] }
 0x4e4   : > { %10852 = vmatprep.subr.bf16.mxu0 %v13055_v28  ;;  %11344 = vmatprep.subr.bf16.mxu1 %v13057_v30  ;;  %v1028_v27 = vld [vmem:[%s14823_s27 + $0x1430] sm:$0xff]  ;;  %v1025_v28 = vld [vmem:[%s14823_s27 + $0x1418] sm:$0xff] }
 0x4e5   : > { %v1029_v30 = vld [vmem:[%s14823_s27 + $0x1438] sm:$0xff]  ;;  %v13095_v33 = vcombine.high %v1024_v23, %v1028_v27  ;;  %v13094_v38 = vcombine.low %v1024_v23, %v1028_v27 }
 0x4e6   : > { %v13097_v55 = vcombine.high %v1025_v28, %v1029_v30  ;;  %v13096_v39 = vcombine.low %v1025_v28, %v1029_v30  ;;  %v1064_v28 = vld [vmem:[%s14823_s27 + $0x1550] sm:$0xff] }
 0x4e7   : > { %10853 = vmatpush1.bf16.msra.mxu0 %v13054_v25  ;;  %11345 = vmatpush1.bf16.msra.mxu1 %v13056_v12  ;;  %v1032_v25 = vld [vmem:[%s14823_s27 + $0x1450] sm:$0xff] }
 0x4e8   : > { %10854 = vmatprep.subr.bf16.mxu0 %v13063_v35  ;;  %11346 = vmatprep.subr.bf16.mxu1 %v13065_v37  ;;  %v1036_v12 = vld [vmem:[%s14823_s27 + $0x1470] sm:$0xff]  ;;  %v1033_v35 = vld [vmem:[%s14823_s27 + $0x1458] sm:$0xff] }
 0x4e9   : > { %v1037_v37 = vld [vmem:[%s14823_s27 + $0x1478] sm:$0xff]  ;;  %v13103_v57 = vcombine.high %v1032_v25, %v1036_v12  ;;  %v13102_v45 = vcombine.low %v1032_v25, %v1036_v12  ;;  %v1068_v30 = vld [vmem:[%s14823_s27 + $0x1570] sm:$0xff] }
 0x4ea   : > { %v13105_v41 = vcombine.high %v1033_v35, %v1037_v37  ;;  %v13104_v47 = vcombine.low %v1033_v35, %v1037_v37  ;;  %v13135_v25 = vcombine.high %v1064_v28, %v1068_v30  ;;  %v1072_v35 = vld [vmem:[%s14823_s27 + $0x1590] sm:$0xff] }
 0x4eb   : > { %10855 = vmatpush1.bf16.msra.mxu0 %v13062_v15  ;;  %11347 = vmatpush1.bf16.msra.mxu1 %v13064_v42  ;;  %v1040_v15 = vld [vmem:[%s14823_s27 + $0x1490] sm:$0xff] }
 0x4ec   : > { %10856 = vmatprep.subr.bf16.mxu0 %v13071_v43  ;;  %11348 = vmatprep.subr.bf16.mxu1 %v13073_v53  ;;  %v1044_v42 = vld [vmem:[%s14823_s27 + $0x14b0] sm:$0xff]  ;;  %v1041_v43 = vld [vmem:[%s14823_s27 + $0x1498] sm:$0xff] }
 0x4ed   : > { %v1045_v53 = vld [vmem:[%s14823_s27 + $0x14b8] sm:$0xff]  ;;  %v13111_v56 = vcombine.high %v1040_v15, %v1044_v42  ;;  %v1076_v37 = vld [vmem:[%s14823_s27 + $0x15b0] sm:$0xff] }
 0x4ee   : > { %v13113_v60 = vcombine.high %v1041_v43, %v1045_v53  ;;  %v13112_v7 = vcombine.low %v1041_v43, %v1045_v53  ;;  %v1080_v43 = vld [vmem:[%s14823_s27 + $0x15d0] sm:$0xff] }
 0x4ef   : > { %10857 = vmatpush1.bf16.msra.mxu0 %v13070_v62  ;;  %11349 = vmatpush1.bf16.msra.mxu1 %v13072_v63  ;;  %v1048_v62 = vld [vmem:[%s14823_s27 + $0x14d0] sm:$0xff] }
 0x4f0   : > { %10858 = vmatprep.subr.bf16.mxu0 %v13079_v1  ;;  %11350 = vmatprep.subr.bf16.mxu1 %v13081_v2  ;;  %v1052_v63 = vld [vmem:[%s14823_s27 + $0x14f0] sm:$0xff]  ;;  %v1049_v1 = vld [vmem:[%s14823_s27 + $0x14d8] sm:$0xff] }
 0x4f1   : > { %v1053_v2 = vld [vmem:[%s14823_s27 + $0x14f8] sm:$0xff]  ;;  %v13119_v8 = vcombine.high %v1048_v62, %v1052_v63  ;;  %v1084_v53 = vld [vmem:[%s14823_s27 + $0x15f0] sm:$0xff] }
 0x4f2   : > { %v13121_v9 = vcombine.high %v1049_v1, %v1053_v2 }
 0x4f3   : > { %10859 = vmatpush1.bf16.msra.mxu0 %v13078_v58  ;;  %11351 = vmatpush1.bf16.msra.mxu1 %v13080_v14  ;;  %v1060_v58 = vld [vmem:[%s14823_s27 + $0x1530] sm:$0xff]  ;;  %v1057_v14 = vld [vmem:[%s14823_s27 + $0x1518] sm:$0xff] }
 0x4f4   : > { %10860 = vmatprep.subr.bf16.mxu0 %v13087_v18  ;;  %11352 = vmatprep.subr.bf16.mxu1 %v13089_v21  ;;  %v1061_v18 = vld [vmem:[%s14823_s27 + $0x1538] sm:$0xff]  ;;  %v13118_v21 = vcombine.low %v1048_v62, %v1052_v63  ;;  %v13127_v23 = vcombine.high %v1056_v10, %v1060_v58  ;;  %v13151_v62 = vcombine.high %v1080_v43, %v1084_v53 }
 0x4f5   : > { %v13129_v27 = vcombine.high %v1057_v14, %v1061_v18 }
 0x4f7   : > { %10861 = vmatpush1.bf16.msra.mxu0 %v13086_v31  ;;  %11353 = vmatpush1.bf16.msra.mxu1 %v13088_v32  ;;  %v1065_v31 = vld [vmem:[%s14823_s27 + $0x1558] sm:$0xff] }
 0x4f8   : > { %10871 = vmatprep.subr.bf16.mxu0 %v13095_v33  ;;  %11363 = vmatprep.subr.bf16.mxu1 %v13097_v55  ;;  %v1069_v32 = vld [vmem:[%s14823_s27 + $0x1578] sm:$0xff]  ;;  %v13126_v33 = vcombine.low %v1056_v10, %v1060_v58  ;;  %v13128_v55 = vcombine.low %v1057_v14, %v1061_v18  ;;  %v1096_v14 = vld [vmem:[%s14823_s27 + $0x1650] sm:$0xff] }
 0x4f9   : > { %v13137_v12 = vcombine.high %v1065_v31, %v1069_v32  ;;  %v1100_v18 = vld [vmem:[%s14823_s27 + $0x1670] sm:$0xff] }
 0x4fa   : > { %10863 = vmatmul.mubr.bf16.vlgmr.msra.gmra.mrb[4].mxu0 %v15230_v16  ;;  %11355 = vmatmul.mubr.bf16.vlgmr.msra.gmra.mrb[4].mxu1 %v15230_v16  ;;  %v13110_v16 = vcombine.low %v1040_v15, %v1044_v42  ;;  %v13143_v15 = vcombine.high %v1072_v35, %v1076_v37 }
 0x4fb   : > { %10872 = vmatpush1.bf16.msra.mxu0 %v13094_v38  ;;  %11364 = vmatpush1.bf16.msra.mxu1 %v13096_v39  ;;  %v1073_v38 = vld [vmem:[%s14823_s27 + $0x1598] sm:$0xff] }
 0x4fc   : > { %10873 = vmatprep.subr.bf16.mxu0 %v13103_v57  ;;  %11365 = vmatprep.subr.bf16.mxu1 %v13105_v41  ;;  %v1077_v39 = vld [vmem:[%s14823_s27 + $0x15b8] sm:$0xff]  ;;  %v13134_v57 = vcombine.low %v1064_v28, %v1068_v30  ;;  %v13136_v41 = vcombine.low %v1065_v31, %v1069_v32  ;;  %v13167_v28 = vcombine.high %v1096_v14, %v1100_v18  ;;  %v1104_v31 = vld [vmem:[%s14823_s27 + $0x1690] sm:$0xff] }
 0x4fd   : > { %10903 = vmatprep.mubr.bf16.mxu0 %v15240_v59  ;;  %11395 = vmatprep.mubr.bf16.mxu1 %v15240_v59  ;;  %v13120_v59 = vcombine.low %v1049_v1, %v1053_v2  ;;  %v13145_v42 = vcombine.high %v1073_v38, %v1077_v39  ;;  %v1088_v1 = vld [vmem:[%s14823_s27 + $0x1610] sm:$0xff] }
 0x4fe   : > { %v1092_v2 = vld [vmem:[%s14823_s27 + $0x1630] sm:$0xff] }
 0x4ff   : > { %10874 = vmatpush1.bf16.msra.mxu0 %v13102_v45  ;;  %11366 = vmatpush1.bf16.msra.mxu1 %v13104_v47  ;;  %v1081_v45 = vld [vmem:[%s14823_s27 + $0x15d8] sm:$0xff]  ;;  %v13159_v10 = vcombine.high %v1088_v1, %v1092_v2  ;;  %v1108_v32 = vld [vmem:[%s14823_s27 + $0x16b0] sm:$0xff] }
 0x500   : > { %10875 = vmatprep.subr.bf16.mxu0 %v13111_v56  ;;  %11367 = vmatprep.subr.bf16.mxu1 %v13113_v60  ;;  %v1085_v47 = vld [vmem:[%s14823_s27 + $0x15f8] sm:$0xff]  ;;  %v13142_v56 = vcombine.low %v1072_v35, %v1076_v37  ;;  %v13144_v60 = vcombine.low %v1073_v38, %v1077_v39  ;;  %v13175_v35 = vcombine.high %v1104_v31, %v1108_v32  ;;  %v1112_v38 = vld [vmem:[%s14823_s27 + $0x16d0] sm:$0xff] }
 0x501   : > { %v13153_v63 = vcombine.high %v1081_v45, %v1085_v47  ;;  %v1116_v39 = vld [vmem:[%s14823_s27 + $0x16f0] sm:$0xff] }
 0x503   : > { %10876 = vmatpush1.bf16.msra.mxu0 %v13110_v16  ;;  %11368 = vmatpush1.bf16.msra.mxu1 %v13112_v7  ;;  %v1089_v16 = vld [vmem:[%s14823_s27 + $0x1618] sm:$0xff] }
 0x504   : > { %10877 = vmatprep.subr.bf16.mxu0 %v13119_v8  ;;  %11369 = vmatprep.subr.bf16.mxu1 %v13121_v9  ;;  %v1093_v7 = vld [vmem:[%s14823_s27 + $0x1638] sm:$0xff]  ;;  %v13150_v8 = vcombine.low %v1080_v43, %v1084_v53  ;;  %v13152_v9 = vcombine.low %v1081_v45, %v1085_v47  ;;  %v13183_v43 = vcombine.high %v1112_v38, %v1116_v39  ;;  %v1120_v45 = vld [vmem:[%s14823_s27 + $0x1710] sm:$0xff] }
 0x505   : > { %v13161_v58 = vcombine.high %v1089_v16, %v1093_v7  ;;  %v1124_v47 = vld [vmem:[%s14823_s27 + $0x1730] sm:$0xff] }
 0x507   : > { %10878 = vmatpush1.bf16.msra.mxu0 %v13118_v21  ;;  %11370 = vmatpush1.bf16.msra.mxu1 %v13120_v59  ;;  %v1097_v21 = vld [vmem:[%s14823_s27 + $0x1658] sm:$0xff] }
 0x508   : > { %10879 = vmatprep.subr.bf16.mxu0 %v13127_v23  ;;  %11371 = vmatprep.subr.bf16.mxu1 %v13129_v27  ;;  %v1101_v59 = vld [vmem:[%s14823_s27 + $0x1678] sm:$0xff]  ;;  %v13158_v23 = vcombine.low %v1088_v1, %v1092_v2  ;;  %v13160_v27 = vcombine.low %v1089_v16, %v1093_v7  ;;  %v13191_v1 = vcombine.high %v1120_v45, %v1124_v47  ;;  %v1128_v16 = vld [vmem:[%s14823_s27 + $0x1750] sm:$0xff] }
 0x509   : > { %v13169_v30 = vcombine.high %v1097_v21, %v1101_v59  ;;  %v1132_v7 = vld [vmem:[%s14823_s27 + $0x1770] sm:$0xff] }
 0x50b   : > { %10880 = vmatpush1.bf16.msra.mxu0 %v13126_v33  ;;  %11372 = vmatpush1.bf16.msra.mxu1 %v13128_v55  ;;  %v1105_v33 = vld [vmem:[%s14823_s27 + $0x1698] sm:$0xff] }
 0x50c   : > { %10881 = vmatprep.subr.bf16.mxu0 %v13135_v25  ;;  %11373 = vmatprep.subr.bf16.mxu1 %v13137_v12  ;;  %v1109_v55 = vld [vmem:[%s14823_s27 + $0x16b8] sm:$0xff]  ;;  %v13166_v25 = vcombine.low %v1096_v14, %v1100_v18  ;;  %v13168_v12 = vcombine.low %v1097_v21, %v1101_v59  ;;  %v13199_v14 = vcombine.high %v1128_v16, %v1132_v7  ;;  %v1136_v21 = vld [vmem:[%s14823_s27 + $0x1790] sm:$0xff] }
 0x50d   : > { %v13177_v37 = vcombine.high %v1105_v33, %v1109_v55  ;;  %v1140_v59 = vld [vmem:[%s14823_s27 + $0x17b0] sm:$0xff] }
 0x50f   : > { %10882 = vmatpush1.bf16.msra.mxu0 %v13134_v57  ;;  %11374 = vmatpush1.bf16.msra.mxu1 %v13136_v41  ;;  %v1113_v57 = vld [vmem:[%s14823_s27 + $0x16d8] sm:$0xff] }
 0x510   : > { %10883 = vmatprep.subr.bf16.mxu0 %v13143_v15  ;;  %11375 = vmatprep.subr.bf16.mxu1 %v13145_v42  ;;  %v1117_v41 = vld [vmem:[%s14823_s27 + $0x16f8] sm:$0xff]  ;;  %v13174_v15 = vcombine.low %v1104_v31, %v1108_v32  ;;  %v13176_v42 = vcombine.low %v1105_v33, %v1109_v55  ;;  %v13207_v31 = vcombine.high %v1136_v21, %v1140_v59  ;;  %v1144_v33 = vld [vmem:[%s14823_s27 + $0x17d0] sm:$0xff] }
 0x511   : > { %v13185_v53 = vcombine.high %v1113_v57, %v1117_v41  ;;  %v1148_v55 = vld [vmem:[%s14823_s27 + $0x17f0] sm:$0xff] }
 0x513   : > { %10884 = vmatpush1.bf16.msra.mxu0 %v13142_v56  ;;  %11376 = vmatpush1.bf16.msra.mxu1 %v13144_v60  ;;  %v1121_v56 = vld [vmem:[%s14823_s27 + $0x1718] sm:$0xff] }
 0x514   : > { %10885 = vmatprep.subr.bf16.mxu0 %v13151_v62  ;;  %11377 = vmatprep.subr.bf16.mxu1 %v13153_v63  ;;  %v1125_v60 = vld [vmem:[%s14823_s27 + $0x1738] sm:$0xff]  ;;  %v13182_v62 = vcombine.low %v1112_v38, %v1116_v39  ;;  %v13184_v63 = vcombine.low %v1113_v57, %v1117_v41  ;;  %v13215_v38 = vcombine.high %v1144_v33, %v1148_v55  ;;  %v1152_v57 = vld [vmem:[%s14823_s27 + $0x1810] sm:$0xff] }
 0x515   : > { %v13193_v2 = vcombine.high %v1121_v56, %v1125_v60  ;;  %v1156_v41 = vld [vmem:[%s14823_s27 + $0x1830] sm:$0xff] }
 0x517   : > { %10886 = vmatpush1.bf16.msra.mxu0 %v13150_v8  ;;  %11378 = vmatpush1.bf16.msra.mxu1 %v13152_v9  ;;  %v1129_v8 = vld [vmem:[%s14823_s27 + $0x1758] sm:$0xff] }
 0x518   : > { %10887 = vmatprep.subr.bf16.mxu0 %v13159_v10  ;;  %11379 = vmatprep.subr.bf16.mxu1 %v13161_v58  ;;  %v1133_v9 = vld [vmem:[%s14823_s27 + $0x1778] sm:$0xff]  ;;  %v13190_v10 = vcombine.low %v1120_v45, %v1124_v47  ;;  %v13192_v58 = vcombine.low %v1121_v56, %v1125_v60  ;;  %v13223_v45 = vcombine.high %v1152_v57, %v1156_v41  ;;  %v1160_v56 = vld [vmem:[%s14823_s27 + $0x1850] sm:$0xff] }
 0x519   : > { %v13201_v18 = vcombine.high %v1129_v8, %v1133_v9  ;;  %v1164_v60 = vld [vmem:[%s14823_s27 + $0x1870] sm:$0xff] }
 0x51b   : > { %10888 = vmatpush1.bf16.msra.mxu0 %v13158_v23  ;;  %11380 = vmatpush1.bf16.msra.mxu1 %v13160_v27  ;;  %v1137_v23 = vld [vmem:[%s14823_s27 + $0x1798] sm:$0xff] }
 0x51c   : > { %10889 = vmatprep.subr.bf16.mxu0 %v13167_v28  ;;  %11381 = vmatprep.subr.bf16.mxu1 %v13169_v30  ;;  %v1141_v27 = vld [vmem:[%s14823_s27 + $0x17b8] sm:$0xff]  ;;  %v13198_v28 = vcombine.low %v1128_v16, %v1132_v7  ;;  %v13200_v30 = vcombine.low %v1129_v8, %v1133_v9  ;;  %v13231_v16 = vcombine.high %v1160_v56, %v1164_v60  ;;  %v1168_v8 = vld [vmem:[%s14823_s27 + $0x1890] sm:$0xff] }
 0x51d   : > { %v13209_v32 = vcombine.high %v1137_v23, %v1141_v27  ;;  %v1172_v9 = vld [vmem:[%s14823_s27 + $0x18b0] sm:$0xff] }
 0x51f   : > { %10890 = vmatpush1.bf16.msra.mxu0 %v13166_v25  ;;  %11382 = vmatpush1.bf16.msra.mxu1 %v13168_v12  ;;  %v1145_v25 = vld [vmem:[%s14823_s27 + $0x17d8] sm:$0xff] }
 0x520   : > { %10891 = vmatprep.subr.bf16.mxu0 %v13175_v35  ;;  %11383 = vmatprep.subr.bf16.mxu1 %v13177_v37  ;;  %v1149_v12 = vld [vmem:[%s14823_s27 + $0x17f8] sm:$0xff]  ;;  %v13206_v35 = vcombine.low %v1136_v21, %v1140_v59  ;;  %v13208_v37 = vcombine.low %v1137_v23, %v1141_v27  ;;  %v13239_v21 = vcombine.high %v1168_v8, %v1172_v9  ;;  %v1176_v23 = vld [vmem:[%s14823_s27 + $0x18d0] sm:$0xff] }
 0x521   : > { %v13217_v39 = vcombine.high %v1145_v25, %v1149_v12  ;;  %v1180_v27 = vld [vmem:[%s14823_s27 + $0x18f0] sm:$0xff] }
 0x523   : > { %10892 = vmatpush1.bf16.msra.mxu0 %v13174_v15  ;;  %11384 = vmatpush1.bf16.msra.mxu1 %v13176_v42  ;;  %v1153_v15 = vld [vmem:[%s14823_s27 + $0x1818] sm:$0xff] }
 0x524   : > { %10893 = vmatprep.subr.bf16.mxu0 %v13183_v43  ;;  %11385 = vmatprep.subr.bf16.mxu1 %v13185_v53  ;;  %v1157_v42 = vld [vmem:[%s14823_s27 + $0x1838] sm:$0xff]  ;;  %v13214_v43 = vcombine.low %v1144_v33, %v1148_v55  ;;  %v13216_v53 = vcombine.low %v1145_v25, %v1149_v12  ;;  %v1184_v55 = vld [vmem:[%s14823_s27 + $0x1910] sm:$0xff] }
 0x525   : > { %v13225_v47 = vcombine.high %v1153_v15, %v1157_v42  ;;  %v1188_v25 = vld [vmem:[%s14823_s27 + $0x1930] sm:$0xff]  ;;  %v1185_v12 = vld [vmem:[%s14823_s27 + $0x1918] sm:$0xff] }
 0x527   : > { %10894 = vmatpush1.bf16.msra.mxu0 %v13182_v62  ;;  %11386 = vmatpush1.bf16.msra.mxu1 %v13184_v63  ;;  %v1161_v62 = vld [vmem:[%s14823_s27 + $0x1858] sm:$0xff] }
 0x528   : > { %10895 = vmatprep.subr.bf16.mxu0 %v13191_v1  ;;  %11387 = vmatprep.subr.bf16.mxu1 %v13193_v2  ;;  %v1165_v63 = vld [vmem:[%s14823_s27 + $0x1878] sm:$0xff]  ;;  %v13222_v1 = vcombine.low %v1152_v57, %v1156_v41  ;;  %v13224_v2 = vcombine.low %v1153_v15, %v1157_v42  ;;  %v1192_v57 = vld [vmem:[%s14823_s27 + $0x1950] sm:$0xff] }
 0x529   : > { %v13233_v7 = vcombine.high %v1161_v62, %v1165_v63  ;;  %v1196_v41 = vld [vmem:[%s14823_s27 + $0x1970] sm:$0xff]  ;;  %v1193_v15 = vld [vmem:[%s14823_s27 + $0x1958] sm:$0xff] }
 0x52a   : > { %v1197_v42 = vld [vmem:[%s14823_s27 + $0x1978] sm:$0xff] }
 0x52b   : > { %10896 = vmatpush1.bf16.msra.mxu0 %v13190_v10  ;;  %11388 = vmatpush1.bf16.msra.mxu1 %v13192_v58  ;;  %v1169_v10 = vld [vmem:[%s14823_s27 + $0x1898] sm:$0xff] }
 0x52c   : > { %10897 = vmatprep.subr.bf16.mxu0 %v13199_v14  ;;  %11389 = vmatprep.subr.bf16.mxu1 %v13201_v18  ;;  %v1173_v58 = vld [vmem:[%s14823_s27 + $0x18b8] sm:$0xff]  ;;  %v13230_v14 = vcombine.low %v1160_v56, %v1164_v60  ;;  %v13232_v18 = vcombine.low %v1161_v62, %v1165_v63  ;;  %v1200_v56 = vld [vmem:[%s14823_s27 + $0x1990] sm:$0xff] }
 0x52d   : > { %v13241_v59 = vcombine.high %v1169_v10, %v1173_v58  ;;  %v1204_v60 = vld [vmem:[%s14823_s27 + $0x19b0] sm:$0xff]  ;;  %v1201_v62 = vld [vmem:[%s14823_s27 + $0x1998] sm:$0xff] }
 0x52e   : > { %v1205_v63 = vld [vmem:[%s14823_s27 + $0x19b8] sm:$0xff] }
 0x52f   : > { %10898 = vmatpush1.bf16.msra.mxu0 %v13198_v28  ;;  %11390 = vmatpush1.bf16.msra.mxu1 %v13200_v30  ;;  %v1177_v28 = vld [vmem:[%s14823_s27 + $0x18d8] sm:$0xff] }
 0x530   : > { %10899 = vmatprep.subr.bf16.mxu0 %v13207_v31  ;;  %11391 = vmatprep.subr.bf16.mxu1 %v13209_v32  ;;  %v1181_v30 = vld [vmem:[%s14823_s27 + $0x18f8] sm:$0xff]  ;;  %v13240_v31 = vcombine.low %v1169_v10, %v1173_v58  ;;  %v13247_v32 = vcombine.high %v1176_v23, %v1180_v27 }
 0x531   : > { %v13249_v33 = vcombine.high %v1177_v28, %v1181_v30  ;;  %v1209_v10 = vld [vmem:[%s14823_s27 + $0x19d8] sm:$0xff] }
 0x532   : > { %v1213_v58 = vld [vmem:[%s14823_s27 + $0x19f8] sm:$0xff] }
 0x533   : > { %10900 = vmatpush1.bf16.msra.mxu0 %v13206_v35  ;;  %11392 = vmatpush1.bf16.msra.mxu1 %v13208_v37  ;;  %v1189_v35 = vld [vmem:[%s14823_s27 + $0x1938] sm:$0xff]  ;;  %v13246_v37 = vcombine.low %v1176_v23, %v1180_v27  ;;  %v1216_v23 = vld [vmem:[%s14823_s27 + $0x1a10] sm:$0xff] }
 0x534   : > { %10901 = vmatprep.subr.bf16.mxu0 %v13215_v38  ;;  %11393 = vmatprep.subr.bf16.mxu1 %v13217_v39  ;;  %v13255_v38 = vcombine.high %v1184_v55, %v1188_v25  ;;  %v13257_v39 = vcombine.high %v1185_v12, %v1189_v35  ;;  %v1220_v27 = vld [vmem:[%s14823_s27 + $0x1a30] sm:$0xff] }
 0x537   : > { %10902 = vmatpush1.bf16.msra.mxu0 %v13214_v43  ;;  %11394 = vmatpush1.bf16.msra.mxu1 %v13216_v53  ;;  %v13254_v43 = vcombine.low %v1184_v55, %v1188_v25  ;;  %v13256_v53 = vcombine.low %v1185_v12, %v1189_v35  ;;  %v1224_v55 = vld [vmem:[%s14823_s27 + $0x1a50] sm:$0xff]  ;;  %v1225_v12 = vld [vmem:[%s14823_s27 + $0x1a58] sm:$0xff] }
 0x538   : > { %10912 = vmatprep.subr.bf16.mxu0 %v13223_v45  ;;  %11404 = vmatprep.subr.bf16.mxu1 %v13225_v47  ;;  %v13263_v45 = vcombine.high %v1192_v57, %v1196_v41  ;;  %v13265_v47 = vcombine.high %v1193_v15, %v1197_v42  ;;  %v1228_v25 = vld [vmem:[%s14823_s27 + $0x1a70] sm:$0xff]  ;;  %v1229_v35 = vld [vmem:[%s14823_s27 + $0x1a78] sm:$0xff] }
 0x53a   : > { %10904 = vmatmul.mubr.bf16.vlgmr.msra.gmra.mrb[4].mxu0 %v15308_v46  ;;  %11396 = vmatmul.mubr.bf16.vlgmr.msra.gmra.mrb[4].mxu1 %v15308_v46  ;;  %v13238_v46 = vcombine.low %v1168_v8, %v1172_v9  ;;  %v1208_v8 = vld [vmem:[%s14823_s27 + $0x19d0] sm:$0xff] }
 0x53b   : > { %10913 = vmatpush1.bf16.msra.mxu0 %v13222_v1  ;;  %11405 = vmatpush1.bf16.msra.mxu1 %v13224_v2  ;;  %v13262_v1 = vcombine.low %v1192_v57, %v1196_v41  ;;  %v13264_v2 = vcombine.low %v1193_v15, %v1197_v42  ;;  %v1212_v9 = vld [vmem:[%s14823_s27 + $0x19f0] sm:$0xff]  ;;  %v1233_v15 = vld [vmem:[%s14823_s27 + $0x1a98] sm:$0xff] }
 0x53c   : > { %10914 = vmatprep.subr.bf16.mxu0 %v13231_v16  ;;  %11406 = vmatprep.subr.bf16.mxu1 %v13233_v7  ;;  %v13271_v16 = vcombine.high %v1200_v56, %v1204_v60  ;;  %v13273_v7 = vcombine.high %v1201_v62, %v1205_v63  ;;  %v1232_v57 = vld [vmem:[%s14823_s27 + $0x1a90] sm:$0xff]  ;;  %v1237_v42 = vld [vmem:[%s14823_s27 + $0x1ab8] sm:$0xff] }
 0x53d   : > { %10944 = vmatprep.mubr.bf16.mxu0 %v15318_v19  ;;  %11436 = vmatprep.mubr.bf16.mxu1 %v15318_v19  ;;  %v13248_v19 = vcombine.low %v1177_v28, %v1181_v30  ;;  %v1217_v28 = vld [vmem:[%s14823_s27 + $0x1a18] sm:$0xff]  ;;  %v1236_v41 = vld [vmem:[%s14823_s27 + $0x1ab0] sm:$0xff] }
 0x53e   : > { %v1221_v30 = vld [vmem:[%s14823_s27 + $0x1a38] sm:$0xff] }
 0x53f   : > { %10915 = vmatpush1.bf16.msra.mxu0 %v13230_v14  ;;  %11407 = vmatpush1.bf16.msra.mxu1 %v13232_v18  ;;  %v13270_v14 = vcombine.low %v1200_v56, %v1204_v60  ;;  %v13272_v18 = vcombine.low %v1201_v62, %v1205_v63  ;;  %v1240_v56 = vld [vmem:[%s14823_s27 + $0x1ad0] sm:$0xff]  ;;  %v1241_v62 = vld [vmem:[%s14823_s27 + $0x1ad8] sm:$0xff] }
 0x540   : > { %10916 = vmatprep.subr.bf16.mxu0 %v13239_v21  ;;  %11408 = vmatprep.subr.bf16.mxu1 %v13241_v59  ;;  %v13279_v21 = vcombine.high %v1208_v8, %v1212_v9  ;;  %v13281_v59 = vcombine.high %v1209_v10, %v1213_v58  ;;  %v1244_v60 = vld [vmem:[%s14823_s27 + $0x1af0] sm:$0xff]  ;;  %v1245_v63 = vld [vmem:[%s14823_s27 + $0x1af8] sm:$0xff] }
 0x543   : > { %10917 = vmatpush1.bf16.msra.mxu0 %v13238_v46  ;;  %11409 = vmatpush1.bf16.msra.mxu1 %v13240_v31  ;;  %v13278_v46 = vcombine.low %v1208_v8, %v1212_v9  ;;  %v13280_v31 = vcombine.low %v1209_v10, %v1213_v58  ;;  %v1248_v8 = vld [vmem:[%s14823_s27 + $0x1b10] sm:$0xff]  ;;  %v1249_v10 = vld [vmem:[%s14823_s27 + $0x1b18] sm:$0xff] }
 0x544   : > { %10918 = vmatprep.subr.bf16.mxu0 %v13247_v32  ;;  %11410 = vmatprep.subr.bf16.mxu1 %v13249_v33  ;;  %v13287_v32 = vcombine.high %v1216_v23, %v1220_v27  ;;  %v13289_v33 = vcombine.high %v1217_v28, %v1221_v30  ;;  %v1252_v9 = vld [vmem:[%s14823_s27 + $0x1b30] sm:$0xff]  ;;  %v1253_v58 = vld [vmem:[%s14823_s27 + $0x1b38] sm:$0xff] }
 0x547   : > { %10919 = vmatpush1.bf16.msra.mxu0 %v13246_v37  ;;  %11411 = vmatpush1.bf16.msra.mxu1 %v13248_v19  ;;  %v13286_v37 = vcombine.low %v1216_v23, %v1220_v27  ;;  %v13288_v19 = vcombine.low %v1217_v28, %v1221_v30  ;;  %v1256_v23 = vld [vmem:[%s14823_s27 + $0x1b50] sm:$0xff]  ;;  %v1257_v28 = vld [vmem:[%s14823_s27 + $0x1b58] sm:$0xff] }
 0x548   : > { %10920 = vmatprep.subr.bf16.mxu0 %v13255_v38  ;;  %11412 = vmatprep.subr.bf16.mxu1 %v13257_v39  ;;  %v13295_v38 = vcombine.high %v1224_v55, %v1228_v25  ;;  %v13297_v39 = vcombine.high %v1225_v12, %v1229_v35  ;;  %v1260_v27 = vld [vmem:[%s14823_s27 + $0x1b70] sm:$0xff]  ;;  %v1261_v30 = vld [vmem:[%s14823_s27 + $0x1b78] sm:$0xff] }
 0x54b   : > { %10921 = vmatpush1.bf16.msra.mxu0 %v13254_v43  ;;  %11413 = vmatpush1.bf16.msra.mxu1 %v13256_v53  ;;  %v13294_v43 = vcombine.low %v1224_v55, %v1228_v25  ;;  %v13296_v53 = vcombine.low %v1225_v12, %v1229_v35  ;;  %v1264_v55 = vld [vmem:[%s14823_s27 + $0x1b90] sm:$0xff]  ;;  %v1265_v12 = vld [vmem:[%s14823_s27 + $0x1b98] sm:$0xff] }
 0x54c   : > { %10922 = vmatprep.subr.bf16.mxu0 %v13263_v45  ;;  %11414 = vmatprep.subr.bf16.mxu1 %v13265_v47  ;;  %v13303_v45 = vcombine.high %v1232_v57, %v1236_v41  ;;  %v13305_v47 = vcombine.high %v1233_v15, %v1237_v42  ;;  %v1268_v25 = vld [vmem:[%s14823_s27 + $0x1bb0] sm:$0xff]  ;;  %v1269_v35 = vld [vmem:[%s14823_s27 + $0x1bb8] sm:$0xff] }
 0x54f   : > { %10923 = vmatpush1.bf16.msra.mxu0 %v13262_v1  ;;  %11415 = vmatpush1.bf16.msra.mxu1 %v13264_v2  ;;  %v13302_v1 = vcombine.low %v1232_v57, %v1236_v41  ;;  %v13304_v2 = vcombine.low %v1233_v15, %v1237_v42  ;;  %v1272_v57 = vld [vmem:[%s14823_s27 + $0x1bd0] sm:$0xff]  ;;  %v1273_v15 = vld [vmem:[%s14823_s27 + $0x1bd8] sm:$0xff] }
 0x550   : > { %10924 = vmatprep.subr.bf16.mxu0 %v13271_v16  ;;  %11416 = vmatprep.subr.bf16.mxu1 %v13273_v7  ;;  %v13311_v16 = vcombine.high %v1240_v56, %v1244_v60  ;;  %v13313_v7 = vcombine.high %v1241_v62, %v1245_v63  ;;  %v1276_v41 = vld [vmem:[%s14823_s27 + $0x1bf0] sm:$0xff]  ;;  %v1277_v42 = vld [vmem:[%s14823_s27 + $0x1bf8] sm:$0xff] }
 0x553   : > { %10925 = vmatpush1.bf16.msra.mxu0 %v13270_v14  ;;  %11417 = vmatpush1.bf16.msra.mxu1 %v13272_v18  ;;  %v13310_v14 = vcombine.low %v1240_v56, %v1244_v60  ;;  %v13312_v18 = vcombine.low %v1241_v62, %v1245_v63  ;;  %v1280_v56 = vld [vmem:[%s14823_s27 + $0x1c10] sm:$0xff]  ;;  %v1281_v62 = vld [vmem:[%s14823_s27 + $0x1c18] sm:$0xff] }
 0x554   : > { %10926 = vmatprep.subr.bf16.mxu0 %v13279_v21  ;;  %11418 = vmatprep.subr.bf16.mxu1 %v13281_v59  ;;  %v13319_v21 = vcombine.high %v1248_v8, %v1252_v9  ;;  %v13321_v59 = vcombine.high %v1249_v10, %v1253_v58  ;;  %v1284_v60 = vld [vmem:[%s14823_s27 + $0x1c30] sm:$0xff]  ;;  %v1285_v63 = vld [vmem:[%s14823_s27 + $0x1c38] sm:$0xff] }
 0x557   : > { %10927 = vmatpush1.bf16.msra.mxu0 %v13278_v46  ;;  %11419 = vmatpush1.bf16.msra.mxu1 %v13280_v31  ;;  %v13318_v46 = vcombine.low %v1248_v8, %v1252_v9  ;;  %v13320_v31 = vcombine.low %v1249_v10, %v1253_v58  ;;  %v1288_v8 = vld [vmem:[%s14823_s27 + $0x1c50] sm:$0xff]  ;;  %v1289_v10 = vld [vmem:[%s14823_s27 + $0x1c58] sm:$0xff] }
 0x558   : > { %10928 = vmatprep.subr.bf16.mxu0 %v13287_v32  ;;  %11420 = vmatprep.subr.bf16.mxu1 %v13289_v33  ;;  %v13327_v32 = vcombine.high %v1256_v23, %v1260_v27  ;;  %v13329_v33 = vcombine.high %v1257_v28, %v1261_v30  ;;  %v1292_v9 = vld [vmem:[%s14823_s27 + $0x1c70] sm:$0xff]  ;;  %v1293_v58 = vld [vmem:[%s14823_s27 + $0x1c78] sm:$0xff] }
 0x55b   : > { %10929 = vmatpush1.bf16.msra.mxu0 %v13286_v37  ;;  %11421 = vmatpush1.bf16.msra.mxu1 %v13288_v19  ;;  %v13326_v37 = vcombine.low %v1256_v23, %v1260_v27  ;;  %v13328_v19 = vcombine.low %v1257_v28, %v1261_v30  ;;  %v1296_v23 = vld [vmem:[%s14823_s27 + $0x1c90] sm:$0xff]  ;;  %v1297_v28 = vld [vmem:[%s14823_s27 + $0x1c98] sm:$0xff] }
 0x55c   : > { %10930 = vmatprep.subr.bf16.mxu0 %v13295_v38  ;;  %11422 = vmatprep.subr.bf16.mxu1 %v13297_v39  ;;  %v13335_v38 = vcombine.high %v1264_v55, %v1268_v25  ;;  %v13337_v39 = vcombine.high %v1265_v12, %v1269_v35  ;;  %v1300_v27 = vld [vmem:[%s14823_s27 + $0x1cb0] sm:$0xff]  ;;  %v1301_v30 = vld [vmem:[%s14823_s27 + $0x1cb8] sm:$0xff] }
 0x55f   : > { %10931 = vmatpush1.bf16.msra.mxu0 %v13294_v43  ;;  %11423 = vmatpush1.bf16.msra.mxu1 %v13296_v53  ;;  %v13334_v43 = vcombine.low %v1264_v55, %v1268_v25  ;;  %v13336_v53 = vcombine.low %v1265_v12, %v1269_v35  ;;  %v1304_v55 = vld [vmem:[%s14823_s27 + $0x1cd0] sm:$0xff]  ;;  %v1305_v12 = vld [vmem:[%s14823_s27 + $0x1cd8] sm:$0xff] }
 0x560   : > { %10932 = vmatprep.subr.bf16.mxu0 %v13303_v45  ;;  %11424 = vmatprep.subr.bf16.mxu1 %v13305_v47  ;;  %v13343_v45 = vcombine.high %v1272_v57, %v1276_v41  ;;  %v13345_v47 = vcombine.high %v1273_v15, %v1277_v42  ;;  %v1308_v25 = vld [vmem:[%s14823_s27 + $0x1cf0] sm:$0xff]  ;;  %v1309_v35 = vld [vmem:[%s14823_s27 + $0x1cf8] sm:$0xff] }
 0x563   : > { %10933 = vmatpush1.bf16.msra.mxu0 %v13302_v1  ;;  %11425 = vmatpush1.bf16.msra.mxu1 %v13304_v2  ;;  %v13342_v1 = vcombine.low %v1272_v57, %v1276_v41  ;;  %v13344_v2 = vcombine.low %v1273_v15, %v1277_v42  ;;  %v1316_v57 = vld [vmem:[%s14823_s27 + $0x1d30] sm:$0xff]  ;;  %v1313_v41 = vld [vmem:[%s14823_s27 + $0x1d18] sm:$0xff]  ;;  %v13374_v42 = vcombine.low %v1304_v55, %v1308_v25 }
 0x564   : > { %10934 = vmatprep.subr.bf16.mxu0 %v13311_v16  ;;  %11426 = vmatprep.subr.bf16.mxu1 %v13313_v7  ;;  %v13351_v16 = vcombine.high %v1280_v56, %v1284_v60  ;;  %v13353_v7 = vcombine.high %v1281_v62, %v1285_v63  ;;  %v1317_v15 = vld [vmem:[%s14823_s27 + $0x1d38] sm:$0xff] }
 0x567   : > { %10935 = vmatpush1.bf16.msra.mxu0 %v13310_v14  ;;  %11427 = vmatpush1.bf16.msra.mxu1 %v13312_v18  ;;  %v13350_v14 = vcombine.low %v1280_v56, %v1284_v60  ;;  %v13352_v18 = vcombine.low %v1281_v62, %v1285_v63  ;;  %v1321_v56 = vld [vmem:[%s14823_s27 + $0x1d58] sm:$0xff]  ;;  %v13384_v63 = vcombine.low %v1313_v41, %v1317_v15 }
 0x568   : > { %10936 = vmatprep.subr.bf16.mxu0 %v13319_v21  ;;  %11428 = vmatprep.subr.bf16.mxu1 %v13321_v59  ;;  %v13359_v21 = vcombine.high %v1288_v8, %v1292_v9  ;;  %v13361_v59 = vcombine.high %v1289_v10, %v1293_v58  ;;  %v1325_v60 = vld [vmem:[%s14823_s27 + $0x1d78] sm:$0xff] }
 0x56b   : > { %10937 = vmatpush1.bf16.msra.mxu0 %v13318_v46  ;;  %11429 = vmatpush1.bf16.msra.mxu1 %v13320_v31  ;;  %v13358_v46 = vcombine.low %v1288_v8, %v1292_v9  ;;  %v13360_v31 = vcombine.low %v1289_v10, %v1293_v58  ;;  %v1329_v8 = vld [vmem:[%s14823_s27 + $0x1d98] sm:$0xff]  ;;  %v13392_v58 = vcombine.low %v1321_v56, %v1325_v60 }
 0x56c   : > { %10938 = vmatprep.subr.bf16.mxu0 %v13327_v32  ;;  %11430 = vmatprep.subr.bf16.mxu1 %v13329_v33  ;;  %v13367_v32 = vcombine.high %v1296_v23, %v1300_v27  ;;  %v13369_v33 = vcombine.high %v1297_v28, %v1301_v30  ;;  %v1333_v9 = vld [vmem:[%s14823_s27 + $0x1db8] sm:$0xff] }
 0x56f   : > { %10939 = vmatpush1.bf16.msra.mxu0 %v13326_v37  ;;  %11431 = vmatpush1.bf16.msra.mxu1 %v13328_v19  ;;  %v13368_v37 = vcombine.low %v1297_v28, %v1301_v30  ;;  %v13375_v19 = vcombine.high %v1304_v55, %v1308_v25  ;;  %v13400_v30 = vcombine.low %v1329_v8, %v1333_v9  ;;  %v1345_v55 = vld [vmem:[%s14823_s27 + $0x1e18] sm:$0xff] }
 0x570   : > { %10940 = vmatprep.subr.bf16.mxu0 %v13335_v38  ;;  %11432 = vmatprep.subr.bf16.mxu1 %v13337_v39  ;;  %v13377_v38 = vcombine.high %v1305_v12, %v1309_v35  ;;  %v1312_v39 = vld [vmem:[%s14823_s27 + $0x1d10] sm:$0xff]  ;;  %v1349_v25 = vld [vmem:[%s14823_s27 + $0x1e38] sm:$0xff] }
 0x571   : > { %v13382_v62 = vcombine.low %v1312_v39, %v1316_v57 }
 0x573   : > { %10941 = vmatpush1.bf16.msra.mxu0 %v13334_v43  ;;  %11433 = vmatpush1.bf16.msra.mxu1 %v13336_v53  ;;  %v13383_v43 = vcombine.high %v1312_v39, %v1316_v57  ;;  %v13385_v53 = vcombine.high %v1313_v41, %v1317_v15  ;;  %v1353_v39 = vld [vmem:[%s14823_s27 + $0x1e58] sm:$0xff]  ;;  %v13416_v15 = vcombine.low %v1345_v55, %v1349_v25 }
 0x574   : > { %10942 = vmatprep.subr.bf16.mxu0 %v13343_v45  ;;  %11434 = vmatprep.subr.bf16.mxu1 %v13345_v47  ;;  %v1320_v45 = vld [vmem:[%s14823_s27 + $0x1d50] sm:$0xff]  ;;  %v1357_v57 = vld [vmem:[%s14823_s27 + $0x1e78] sm:$0xff] }
 0x575   : > { %v1324_v47 = vld [vmem:[%s14823_s27 + $0x1d70] sm:$0xff] }
 0x576   : > { %v13390_v10 = vcombine.low %v1320_v45, %v1324_v47 }
 0x577   : > { %10943 = vmatpush1.bf16.msra.mxu0 %v13342_v1  ;;  %11435 = vmatpush1.bf16.msra.mxu1 %v13344_v2  ;;  %v13391_v1 = vcombine.high %v1320_v45, %v1324_v47  ;;  %v13393_v2 = vcombine.high %v1321_v56, %v1325_v60  ;;  %v1361_v45 = vld [vmem:[%s14823_s27 + $0x1e98] sm:$0xff]  ;;  %v13424_v60 = vcombine.low %v1353_v39, %v1357_v57 }
 0x578   : > { %10953 = vmatprep.subr.bf16.mxu0 %v13351_v16  ;;  %11445 = vmatprep.subr.bf16.mxu1 %v13353_v7  ;;  %v1328_v16 = vld [vmem:[%s14823_s27 + $0x1d90] sm:$0xff]  ;;  %v1365_v47 = vld [vmem:[%s14823_s27 + $0x1eb8] sm:$0xff] }
 0x579   : > { %v1332_v7 = vld [vmem:[%s14823_s27 + $0x1db0] sm:$0xff] }
 0x57a   : > { %10945 = vmatmul.mubr.bf16.vlgmr.msra.gmra.mrb[4].mxu0 %v15386_v20  ;;  %11437 = vmatmul.mubr.bf16.vlgmr.msra.gmra.mrb[4].mxu1 %v15386_v20  ;;  %v13366_v20 = vcombine.low %v1296_v23, %v1300_v27  ;;  %v1337_v23 = vld [vmem:[%s14823_s27 + $0x1dd8] sm:$0xff]  ;;  %v13398_v28 = vcombine.low %v1328_v16, %v1332_v7 }
 0x57b   : > { %10954 = vmatpush1.bf16.msra.mxu0 %v13350_v14  ;;  %11446 = vmatpush1.bf16.msra.mxu1 %v13352_v18  ;;  %v13399_v14 = vcombine.high %v1328_v16, %v1332_v7  ;;  %v13401_v18 = vcombine.high %v1329_v8, %v1333_v9  ;;  %v1341_v27 = vld [vmem:[%s14823_s27 + $0x1df8] sm:$0xff]  ;;  %v13432_v9 = vcombine.low %v1361_v45, %v1365_v47 }
 0x57c   : > { %10955 = vmatprep.subr.bf16.mxu0 %v13359_v21  ;;  %11447 = vmatprep.subr.bf16.mxu1 %v13361_v59  ;;  %v1336_v21 = vld [vmem:[%s14823_s27 + $0x1dd0] sm:$0xff]  ;;  %v1369_v16 = vld [vmem:[%s14823_s27 + $0x1ed8] sm:$0xff] }
 0x57d   : > { %10985 = vmatprep.mubr.bf16.mxu0 %v15396_v49  ;;  %11477 = vmatprep.mubr.bf16.mxu1 %v15396_v49  ;;  %v13376_v49 = vcombine.low %v1305_v12, %v1309_v35  ;;  %v1340_v59 = vld [vmem:[%s14823_s27 + $0x1df0] sm:$0xff]  ;;  %v13408_v35 = vcombine.low %v1337_v23, %v1341_v27  ;;  %v1373_v7 = vld [vmem:[%s14823_s27 + $0x1ef8] sm:$0xff] }
 0x57e   : > { %v13406_v12 = vcombine.low %v1336_v21, %v1340_v59 }
 0x57f   : > { %10956 = vmatpush1.bf16.msra.mxu0 %v13358_v46  ;;  %11448 = vmatpush1.bf16.msra.mxu1 %v13360_v31  ;;  %v13407_v46 = vcombine.high %v1336_v21, %v1340_v59  ;;  %v13409_v31 = vcombine.high %v1337_v23, %v1341_v27  ;;  %v1377_v21 = vld [vmem:[%s14823_s27 + $0x1f18] sm:$0xff]  ;;  %v13440_v27 = vcombine.low %v1369_v16, %v1373_v7 }
 0x580   : > { %10957 = vmatprep.subr.bf16.mxu0 %v13367_v32  ;;  %11449 = vmatprep.subr.bf16.mxu1 %v13369_v33  ;;  %v1344_v32 = vld [vmem:[%s14823_s27 + $0x1e10] sm:$0xff]  ;;  %v1381_v59 = vld [vmem:[%s14823_s27 + $0x1f38] sm:$0xff] }
 0x581   : > { %v1348_v33 = vld [vmem:[%s14823_s27 + $0x1e30] sm:$0xff] }
 0x582   : > { %v13414_v41 = vcombine.low %v1344_v32, %v1348_v33 }
 0x583   : > { %10958 = vmatpush1.bf16.msra.mxu0 %v13366_v20  ;;  %11450 = vmatpush1.bf16.msra.mxu1 %v13368_v37  ;;  %v13415_v20 = vcombine.high %v1344_v32, %v1348_v33  ;;  %v13417_v37 = vcombine.high %v1345_v55, %v1349_v25  ;;  %v1385_v32 = vld [vmem:[%s14823_s27 + $0x1f58] sm:$0xff]  ;;  %v13448_v25 = vcombine.low %v1377_v21, %v1381_v59 }
 0x584   : > { %10959 = vmatprep.subr.bf16.mxu0 %v13375_v19  ;;  %11451 = vmatprep.subr.bf16.mxu1 %v13377_v38  ;;  %v1352_v19 = vld [vmem:[%s14823_s27 + $0x1e50] sm:$0xff]  ;;  %v1389_v33 = vld [vmem:[%s14823_s27 + $0x1f78] sm:$0xff] }
 0x585   : > { %v1356_v38 = vld [vmem:[%s14823_s27 + $0x1e70] sm:$0xff] }
 0x586   : > { %v13422_v56 = vcombine.low %v1352_v19, %v1356_v38 }
 0x587   : > { %10960 = vmatpush1.bf16.msra.mxu0 %v13374_v42  ;;  %11452 = vmatpush1.bf16.msra.mxu1 %v13376_v49  ;;  %v13423_v42 = vcombine.high %v1352_v19, %v1356_v38  ;;  %v13425_v49 = vcombine.high %v1353_v39, %v1357_v57  ;;  %v1393_v19 = vld [vmem:[%s14823_s27 + $0x1f98] sm:$0xff]  ;;  %v13456_v57 = vcombine.low %v1385_v32, %v1389_v33 }
 0x588   : > { %10961 = vmatprep.subr.bf16.mxu0 %v13383_v43  ;;  %11453 = vmatprep.subr.bf16.mxu1 %v13385_v53  ;;  %v1360_v43 = vld [vmem:[%s14823_s27 + $0x1e90] sm:$0xff]  ;;  %v1397_v38 = vld [vmem:[%s14823_s27 + $0x1fb8] sm:$0xff] }
 0x589   : > { %v1364_v53 = vld [vmem:[%s14823_s27 + $0x1eb0] sm:$0xff] }
 0x58a   : > { %v13430_v8 = vcombine.low %v1360_v43, %v1364_v53 }
 0x58b   : > { %10962 = vmatpush1.bf16.msra.mxu0 %v13382_v62  ;;  %11454 = vmatpush1.bf16.msra.mxu1 %v13384_v63  ;;  %v13431_v62 = vcombine.high %v1360_v43, %v1364_v53  ;;  %v13433_v63 = vcombine.high %v1361_v45, %v1365_v47  ;;  %v1401_v43 = vld [vmem:[%s14823_s27 + $0x1fd8] sm:$0xff]  ;;  %v13464_v47 = vcombine.low %v1393_v19, %v1397_v38 }
 0x58c   : > { %10963 = vmatprep.subr.bf16.mxu0 %v13391_v1  ;;  %11455 = vmatprep.subr.bf16.mxu1 %v13393_v2  ;;  %v1368_v1 = vld [vmem:[%s14823_s27 + $0x1ed0] sm:$0xff]  ;;  %v1405_v53 = vld [vmem:[%s14823_s27 + $0x1ff8] sm:$0xff] }
 0x58d   : > { %v1372_v2 = vld [vmem:[%s14823_s27 + $0x1ef0] sm:$0xff] }
 0x58e   : > { %v13438_v23 = vcombine.low %v1368_v1, %v1372_v2 }
 0x58f   : > { %10964 = vmatpush1.bf16.msra.mxu0 %v13390_v10  ;;  %11456 = vmatpush1.bf16.msra.mxu1 %v13392_v58  ;;  %v13439_v10 = vcombine.high %v1368_v1, %v1372_v2  ;;  %v13441_v58 = vcombine.high %v1369_v16, %v1373_v7  ;;  %v1409_v1 = vld [vmem:[%s14823_s27 + $0x2018] sm:$0xff]  ;;  %v13472_v7 = vcombine.low %v1401_v43, %v1405_v53 }
 0x590   : > { %10965 = vmatprep.subr.bf16.mxu0 %v13399_v14  ;;  %11457 = vmatprep.subr.bf16.mxu1 %v13401_v18  ;;  %v1376_v14 = vld [vmem:[%s14823_s27 + $0x1f10] sm:$0xff]  ;;  %v1413_v2 = vld [vmem:[%s14823_s27 + $0x2038] sm:$0xff] }
 0x591   : > { %v1380_v18 = vld [vmem:[%s14823_s27 + $0x1f30] sm:$0xff] }
 0x592   : > { %v13446_v55 = vcombine.low %v1376_v14, %v1380_v18 }
 0x593   : > { %10966 = vmatpush1.bf16.msra.mxu0 %v13398_v28  ;;  %11458 = vmatpush1.bf16.msra.mxu1 %v13400_v30  ;;  %v13447_v28 = vcombine.high %v1376_v14, %v1380_v18  ;;  %v13449_v30 = vcombine.high %v1377_v21, %v1381_v59  ;;  %v1417_v14 = vld [vmem:[%s14823_s27 + $0x2058] sm:$0xff]  ;;  %v13480_v59 = vcombine.low %v1409_v1, %v1413_v2 }
 0x594   : > { %10967 = vmatprep.subr.bf16.mxu0 %v13407_v46  ;;  %11459 = vmatprep.subr.bf16.mxu1 %v13409_v31  ;;  %v1384_v46 = vld [vmem:[%s14823_s27 + $0x1f50] sm:$0xff]  ;;  %v1421_v18 = vld [vmem:[%s14823_s27 + $0x2078] sm:$0xff] }
 0x595   : > { %v1388_v31 = vld [vmem:[%s14823_s27 + $0x1f70] sm:$0xff] }
 0x596   : > { %v13454_v39 = vcombine.low %v1384_v46, %v1388_v31 }
 0x597   : > { %10968 = vmatpush1.bf16.msra.mxu0 %v13406_v12  ;;  %11460 = vmatpush1.bf16.msra.mxu1 %v13408_v35  ;;  %v13455_v12 = vcombine.high %v1384_v46, %v1388_v31  ;;  %v13457_v35 = vcombine.high %v1385_v32, %v1389_v33  ;;  %v1425_v46 = vld [vmem:[%s14823_s27 + $0x2098] sm:$0xff]  ;;  %v13488_v33 = vcombine.low %v1417_v14, %v1421_v18 }
 0x598   : > { %10969 = vmatprep.subr.bf16.mxu0 %v13415_v20  ;;  %11461 = vmatprep.subr.bf16.mxu1 %v13417_v37  ;;  %v1392_v20 = vld [vmem:[%s14823_s27 + $0x1f90] sm:$0xff]  ;;  %v1429_v31 = vld [vmem:[%s14823_s27 + $0x20b8] sm:$0xff] }
 0x599   : > { %v1396_v37 = vld [vmem:[%s14823_s27 + $0x1fb0] sm:$0xff] }
 0x59a   : > { %v13462_v45 = vcombine.low %v1392_v20, %v1396_v37 }
 0x59b   : > { %10970 = vmatpush1.bf16.msra.mxu0 %v13414_v41  ;;  %11462 = vmatpush1.bf16.msra.mxu1 %v13416_v15  ;;  %v13463_v41 = vcombine.high %v1392_v20, %v1396_v37  ;;  %v13465_v15 = vcombine.high %v1393_v19, %v1397_v38  ;;  %v1433_v20 = vld [vmem:[%s14823_s27 + $0x20d8] sm:$0xff]  ;;  %v13496_v19 = vcombine.low %v1425_v46, %v1429_v31 }
 0x59c   : > { %10971 = vmatprep.subr.bf16.mxu0 %v13423_v42  ;;  %11463 = vmatprep.subr.bf16.mxu1 %v13425_v49  ;;  %v1400_v42 = vld [vmem:[%s14823_s27 + $0x1fd0] sm:$0xff]  ;;  %v1437_v37 = vld [vmem:[%s14823_s27 + $0x20f8] sm:$0xff] }
 0x59d   : > { %v1404_v49 = vld [vmem:[%s14823_s27 + $0x1ff0] sm:$0xff] }
 0x59e   : > { %v13470_v16 = vcombine.low %v1400_v42, %v1404_v49 }
 0x59f   : > { %10972 = vmatpush1.bf16.msra.mxu0 %v13422_v56  ;;  %11464 = vmatpush1.bf16.msra.mxu1 %v13424_v60  ;;  %v13471_v56 = vcombine.high %v1400_v42, %v1404_v49  ;;  %v13473_v60 = vcombine.high %v1401_v43, %v1405_v53  ;;  %v1445_v42 = vld [vmem:[%s14823_s27 + $0x2138] sm:$0xff] }
 0x5a0   : > { %10973 = vmatprep.subr.bf16.mxu0 %v13431_v62  ;;  %11465 = vmatprep.subr.bf16.mxu1 %v13433_v63  ;;  %v1408_v62 = vld [vmem:[%s14823_s27 + $0x2010] sm:$0xff] }
 0x5a1   : > { %v1412_v63 = vld [vmem:[%s14823_s27 + $0x2030] sm:$0xff] }
 0x5a2   : > { %v13478_v21 = vcombine.low %v1408_v62, %v1412_v63 }
 0x5a3   : > { %10974 = vmatpush1.bf16.msra.mxu0 %v13430_v8  ;;  %11466 = vmatpush1.bf16.msra.mxu1 %v13432_v9  ;;  %v13479_v8 = vcombine.high %v1408_v62, %v1412_v63  ;;  %v13481_v9 = vcombine.high %v1409_v1, %v1413_v2 }
 0x5a4   : > { %10975 = vmatprep.subr.bf16.mxu0 %v13439_v10  ;;  %11467 = vmatprep.subr.bf16.mxu1 %v13441_v58  ;;  %v1416_v10 = vld [vmem:[%s14823_s27 + $0x2050] sm:$0xff] }
 0x5a5   : > { %v1420_v58 = vld [vmem:[%s14823_s27 + $0x2070] sm:$0xff] }
 0x5a6   : > { %v13486_v32 = vcombine.low %v1416_v10, %v1420_v58 }
 0x5a7   : > { %10976 = vmatpush1.bf16.msra.mxu0 %v13438_v23  ;;  %11468 = vmatpush1.bf16.msra.mxu1 %v13440_v27  ;;  %v13487_v23 = vcombine.high %v1416_v10, %v1420_v58  ;;  %v13489_v27 = vcombine.high %v1417_v14, %v1421_v18 }
 0x5a8   : > { %10977 = vmatprep.subr.bf16.mxu0 %v13447_v28  ;;  %11469 = vmatprep.subr.bf16.mxu1 %v13449_v30  ;;  %v1424_v28 = vld [vmem:[%s14823_s27 + $0x2090] sm:$0xff] }
 0x5a9   : > { %v1428_v30 = vld [vmem:[%s14823_s27 + $0x20b0] sm:$0xff] }
 0x5ab   : > { %10978 = vmatpush1.bf16.msra.mxu0 %v13446_v55  ;;  %11470 = vmatpush1.bf16.msra.mxu1 %v13448_v25  ;;  %v13495_v55 = vcombine.high %v1424_v28, %v1428_v30  ;;  %v13497_v25 = vcombine.high %v1425_v46, %v1429_v31 }
 0x5ac   : > { %10979 = vmatprep.subr.bf16.mxu0 %v13455_v12  ;;  %11471 = vmatprep.subr.bf16.mxu1 %v13457_v35  ;;  %v1432_v12 = vld [vmem:[%s14823_s27 + $0x20d0] sm:$0xff] }
 0x5ad   : > { %v1436_v35 = vld [vmem:[%s14823_s27 + $0x20f0] sm:$0xff] }
 0x5ae   : > { %v13503_v38 = vcombine.high %v1432_v12, %v1436_v35  ;;  %v13502_v49 = vcombine.low %v1432_v12, %v1436_v35 }
 0x5af   : > { %10980 = vmatpush1.bf16.msra.mxu0 %v13454_v39  ;;  %11472 = vmatpush1.bf16.msra.mxu1 %v13456_v57  ;;  %v13505_v39 = vcombine.high %v1433_v20, %v1437_v37  ;;  %v1440_v57 = vld [vmem:[%s14823_s27 + $0x2110] sm:$0xff] }
 0x5b0   : > { %10981 = vmatprep.subr.bf16.mxu0 %v13463_v41  ;;  %11473 = vmatprep.subr.bf16.mxu1 %v13465_v15  ;;  %v1444_v41 = vld [vmem:[%s14823_s27 + $0x2130] sm:$0xff]  ;;  %v1441_v15 = vld [vmem:[%s14823_s27 + $0x2118] sm:$0xff] }
 0x5b1   : > { %v13511_v43 = vcombine.high %v1440_v57, %v1444_v41  ;;  %v13513_v53 = vcombine.high %v1441_v15, %v1445_v42  ;;  %v13510_v62 = vcombine.low %v1440_v57, %v1444_v41  ;;  %v13512_v63 = vcombine.low %v1441_v15, %v1445_v42 }
 0x5b3   : > { %10982 = vmatpush1.bf16.msra.mxu0 %v13462_v45  ;;  %11474 = vmatpush1.bf16.msra.mxu1 %v13464_v47  ;;  %v1448_v45 = vld [vmem:[%s14823_s27 + $0x2150] sm:$0xff] }
 0x5b4   : > { %10983 = vmatprep.subr.bf16.mxu0 %v13471_v56  ;;  %11475 = vmatprep.subr.bf16.mxu1 %v13473_v60  ;;  %v1452_v47 = vld [vmem:[%s14823_s27 + $0x2170] sm:$0xff]  ;;  %v1449_v56 = vld [vmem:[%s14823_s27 + $0x2158] sm:$0xff] }
 0x5b5   : > { %v1453_v60 = vld [vmem:[%s14823_s27 + $0x2178] sm:$0xff]  ;;  %v13519_v1 = vcombine.high %v1448_v45, %v1452_v47  ;;  %v13518_v10 = vcombine.low %v1448_v45, %v1452_v47 }
 0x5b6   : > { %v13521_v2 = vcombine.high %v1449_v56, %v1453_v60  ;;  %v13520_v58 = vcombine.low %v1449_v56, %v1453_v60 }
 0x5b7   : > { %10984 = vmatpush1.bf16.msra.mxu0 %v13470_v16  ;;  %11476 = vmatpush1.bf16.msra.mxu1 %v13472_v7  ;;  %v1456_v16 = vld [vmem:[%s14823_s27 + $0x2190] sm:$0xff] }
 0x5b8   : > { %10994 = vmatprep.subr.bf16.mxu0 %v13479_v8  ;;  %11486 = vmatprep.subr.bf16.mxu1 %v13481_v9  ;;  %v1460_v7 = vld [vmem:[%s14823_s27 + $0x21b0] sm:$0xff]  ;;  %v1457_v8 = vld [vmem:[%s14823_s27 + $0x2198] sm:$0xff] }
 0x5b9   : > { %v1461_v9 = vld [vmem:[%s14823_s27 + $0x21b8] sm:$0xff]  ;;  %v13527_v14 = vcombine.high %v1456_v16, %v1460_v7 }
 0x5ba   : > { %10986 = vmatmul.mubr.bf16.vlgmr.msra.gmra.mrb[4].mxu0 %v15464_v0  ;;  %11478 = vmatmul.mubr.bf16.vlgmr.msra.gmra.mrb[4].mxu1 %v15464_v0  ;;  %v13494_v0 = vcombine.low %v1424_v28, %v1428_v30  ;;  %v13529_v18 = vcombine.high %v1457_v8, %v1461_v9  ;;  %v13526_v28 = vcombine.low %v1456_v16, %v1460_v7 }
 0x5bb   : > { %10995 = vmatpush1.bf16.msra.mxu0 %v13478_v21  ;;  %11487 = vmatpush1.bf16.msra.mxu1 %v13480_v59  ;;  %v1464_v21 = vld [vmem:[%s14823_s27 + $0x21d0] sm:$0xff]  ;;  %v13528_v30 = vcombine.low %v1457_v8, %v1461_v9 }
 0x5bc   : > { %10996 = vmatprep.subr.bf16.mxu0 %v13487_v23  ;;  %11488 = vmatprep.subr.bf16.mxu1 %v13489_v27  ;;  %v1468_v59 = vld [vmem:[%s14823_s27 + $0x21f0] sm:$0xff]  ;;  %v1465_v23 = vld [vmem:[%s14823_s27 + $0x21d8] sm:$0xff] }
 0x5bd   : > { %11026 = vmatprep.mubr.bf16.mxu0 %v15474_v24  ;;  %11518 = vmatprep.mubr.bf16.mxu1 %v15474_v24  ;;  %v13504_v24 = vcombine.low %v1433_v20, %v1437_v37  ;;  %v1469_v27 = vld [vmem:[%s14823_s27 + $0x21f8] sm:$0xff]  ;;  %v13535_v46 = vcombine.high %v1464_v21, %v1468_v59  ;;  %v13534_v12 = vcombine.low %v1464_v21, %v1468_v59 }
 0x5be   : > { %v13537_v31 = vcombine.high %v1465_v23, %v1469_v27  ;;  %v13536_v35 = vcombine.low %v1465_v23, %v1469_v27 }
 0x5bf   : > { %10997 = vmatpush1.bf16.msra.mxu0 %v13486_v32  ;;  %11489 = vmatpush1.bf16.msra.mxu1 %v13488_v33  ;;  %v1472_v32 = vld [vmem:[%s14823_s27 + $0x2210] sm:$0xff] }
 0x5c0   : > { %10998 = vmatprep.subr.bf16.mxu0 %v13495_v55  ;;  %11490 = vmatprep.subr.bf16.mxu1 %v13497_v25  ;;  %v1476_v33 = vld [vmem:[%s14823_s27 + $0x2230] sm:$0xff]  ;;  %v1473_v55 = vld [vmem:[%s14823_s27 + $0x2218] sm:$0xff] }
 0x5c1   : > { %v1477_v25 = vld [vmem:[%s14823_s27 + $0x2238] sm:$0xff]  ;;  %v13543_v20 = vcombine.high %v1472_v32, %v1476_v33  ;;  %v13542_v57 = vcombine.low %v1472_v32, %v1476_v33 }
 0x5c2   : > { %v13545_v37 = vcombine.high %v1473_v55, %v1477_v25  ;;  %v13544_v41 = vcombine.low %v1473_v55, %v1477_v25 }
 0x5c3   : > { %10999 = vmatpush1.bf16.msra.mxu0 %v13494_v0  ;;  %11491 = vmatpush1.bf16.msra.mxu1 %v13496_v19  ;;  %v1480_v0 = vld [vmem:[%s14823_s27 + $0x2250] sm:$0xff] }
 0x5c4   : > { %11000 = vmatprep.subr.bf16.mxu0 %v13503_v38  ;;  %11492 = vmatprep.subr.bf16.mxu1 %v13505_v39  ;;  %v1484_v19 = vld [vmem:[%s14823_s27 + $0x2270] sm:$0xff]  ;;  %v1481_v38 = vld [vmem:[%s14823_s27 + $0x2258] sm:$0xff] }
 0x5c5   : > { %v1485_v39 = vld [vmem:[%s14823_s27 + $0x2278] sm:$0xff]  ;;  %v13551_v15 = vcombine.high %v1480_v0, %v1484_v19  ;;  %v13550_v45 = vcombine.low %v1480_v0, %v1484_v19 }
 0x5c6   : > { %v13553_v42 = vcombine.high %v1481_v38, %v1485_v39  ;;  %v13552_v47 = vcombine.low %v1481_v38, %v1485_v39 }
 0x5c7   : > { %11001 = vmatpush1.bf16.msra.mxu0 %v13502_v49  ;;  %11493 = vmatpush1.bf16.msra.mxu1 %v13504_v24  ;;  %v1488_v49 = vld [vmem:[%s14823_s27 + $0x2290] sm:$0xff] }
 0x5c8   : > { %11002 = vmatprep.subr.bf16.mxu0 %v13511_v43  ;;  %11494 = vmatprep.subr.bf16.mxu1 %v13513_v53  ;;  %v1492_v24 = vld [vmem:[%s14823_s27 + $0x22b0] sm:$0xff]  ;;  %v1489_v43 = vld [vmem:[%s14823_s27 + $0x2298] sm:$0xff] }
 0x5c9   : > { %v1493_v53 = vld [vmem:[%s14823_s27 + $0x22b8] sm:$0xff]  ;;  %v13559_v56 = vcombine.high %v1488_v49, %v1492_v24  ;;  %v13558_v16 = vcombine.low %v1488_v49, %v1492_v24 }
 0x5ca   : > { %v13561_v60 = vcombine.high %v1489_v43, %v1493_v53  ;;  %v13560_v7 = vcombine.low %v1489_v43, %v1493_v53 }
 0x5cb   : > { %11003 = vmatpush1.bf16.msra.mxu0 %v13510_v62  ;;  %11495 = vmatpush1.bf16.msra.mxu1 %v13512_v63  ;;  %v1496_v62 = vld [vmem:[%s14823_s27 + $0x22d0] sm:$0xff] }
 0x5cc   : > { %11004 = vmatprep.subr.bf16.mxu0 %v13519_v1  ;;  %11496 = vmatprep.subr.bf16.mxu1 %v13521_v2  ;;  %v1500_v63 = vld [vmem:[%s14823_s27 + $0x22f0] sm:$0xff]  ;;  %v1497_v1 = vld [vmem:[%s14823_s27 + $0x22d8] sm:$0xff] }
 0x5cd   : > { %v1501_v2 = vld [vmem:[%s14823_s27 + $0x22f8] sm:$0xff]  ;;  %v13567_v8 = vcombine.high %v1496_v62, %v1500_v63  ;;  %v13566_v21 = vcombine.low %v1496_v62, %v1500_v63 }
 0x5ce   : > { %v13569_v9 = vcombine.high %v1497_v1, %v1501_v2  ;;  %v13568_v59 = vcombine.low %v1497_v1, %v1501_v2 }
 0x5cf   : > { %11005 = vmatpush1.bf16.msra.mxu0 %v13518_v10  ;;  %11497 = vmatpush1.bf16.msra.mxu1 %v13520_v58  ;;  %v1504_v10 = vld [vmem:[%s14823_s27 + $0x2310] sm:$0xff] }
 0x5d0   : > { %11006 = vmatprep.subr.bf16.mxu0 %v13527_v14  ;;  %11498 = vmatprep.subr.bf16.mxu1 %v13529_v18  ;;  %v1508_v58 = vld [vmem:[%s14823_s27 + $0x2330] sm:$0xff]  ;;  %v1505_v14 = vld [vmem:[%s14823_s27 + $0x2318] sm:$0xff] }
 0x5d1   : > { %v1509_v18 = vld [vmem:[%s14823_s27 + $0x2338] sm:$0xff]  ;;  %v13575_v23 = vcombine.high %v1504_v10, %v1508_v58  ;;  %v13574_v32 = vcombine.low %v1504_v10, %v1508_v58 }
 0x5d2   : > { %v13577_v27 = vcombine.high %v1505_v14, %v1509_v18  ;;  %v13576_v33 = vcombine.low %v1505_v14, %v1509_v18 }
 0x5d3   : > { %11007 = vmatpush1.bf16.msra.mxu0 %v13526_v28  ;;  %11499 = vmatpush1.bf16.msra.mxu1 %v13528_v30  ;;  %v1512_v28 = vld [vmem:[%s14823_s27 + $0x2350] sm:$0xff] }
 0x5d4   : > { %11008 = vmatprep.subr.bf16.mxu0 %v13535_v46  ;;  %11500 = vmatprep.subr.bf16.mxu1 %v13537_v31  ;;  %v1516_v30 = vld [vmem:[%s14823_s27 + $0x2370] sm:$0xff]  ;;  %v1513_v46 = vld [vmem:[%s14823_s27 + $0x2358] sm:$0xff] }
 0x5d5   : > { %v1517_v31 = vld [vmem:[%s14823_s27 + $0x2378] sm:$0xff]  ;;  %v13583_v55 = vcombine.high %v1512_v28, %v1516_v30  ;;  %v13582_v0 = vcombine.low %v1512_v28, %v1516_v30 }
 0x5d6   : > { %v13585_v25 = vcombine.high %v1513_v46, %v1517_v31  ;;  %v13584_v19 = vcombine.low %v1513_v46, %v1517_v31 }
 0x5d7   : > { %11009 = vmatpush1.bf16.msra.mxu0 %v13534_v12  ;;  %11501 = vmatpush1.bf16.msra.mxu1 %v13536_v35  ;;  %v1520_v12 = vld [vmem:[%s14823_s27 + $0x2390] sm:$0xff] }
 0x5d8   : > { %11010 = vmatprep.subr.bf16.mxu0 %v13543_v20  ;;  %11502 = vmatprep.subr.bf16.mxu1 %v13545_v37  ;;  %v1524_v35 = vld [vmem:[%s14823_s27 + $0x23b0] sm:$0xff]  ;;  %v1521_v20 = vld [vmem:[%s14823_s27 + $0x2398] sm:$0xff] }
 0x5d9   : > { %v1525_v37 = vld [vmem:[%s14823_s27 + $0x23b8] sm:$0xff]  ;;  %v13591_v38 = vcombine.high %v1520_v12, %v1524_v35  ;;  %v13590_v49 = vcombine.low %v1520_v12, %v1524_v35 }
 0x5da   : > { %v13593_v39 = vcombine.high %v1521_v20, %v1525_v37  ;;  %v13592_v24 = vcombine.low %v1521_v20, %v1525_v37  ;;  %v1568_v37 = vld [vmem:[%s14823_s27 + $0x2510] sm:$0xff] }
 0x5db   : > { %11011 = vmatpush1.bf16.msra.mxu0 %v13542_v57  ;;  %11503 = vmatpush1.bf16.msra.mxu1 %v13544_v41  ;;  %v1528_v57 = vld [vmem:[%s14823_s27 + $0x23d0] sm:$0xff] }
 0x5dc   : > { %11012 = vmatprep.subr.bf16.mxu0 %v13551_v15  ;;  %11504 = vmatprep.subr.bf16.mxu1 %v13553_v42  ;;  %v1532_v41 = vld [vmem:[%s14823_s27 + $0x23f0] sm:$0xff]  ;;  %v1529_v15 = vld [vmem:[%s14823_s27 + $0x23d8] sm:$0xff] }
 0x5dd   : > { %v1533_v42 = vld [vmem:[%s14823_s27 + $0x23f8] sm:$0xff]  ;;  %v13599_v43 = vcombine.high %v1528_v57, %v1532_v41  ;;  %v13598_v62 = vcombine.low %v1528_v57, %v1532_v41 }
 0x5de   : > { %v13601_v53 = vcombine.high %v1529_v15, %v1533_v42  ;;  %v13600_v63 = vcombine.low %v1529_v15, %v1533_v42  ;;  %v1576_v15 = vld [vmem:[%s14823_s27 + $0x2550] sm:$0xff] }
 0x5df   : > { %11013 = vmatpush1.bf16.msra.mxu0 %v13550_v45  ;;  %11505 = vmatpush1.bf16.msra.mxu1 %v13552_v47  ;;  %v1536_v45 = vld [vmem:[%s14823_s27 + $0x2410] sm:$0xff] }
 0x5e0   : > { %11014 = vmatprep.subr.bf16.mxu0 %v13559_v56  ;;  %11506 = vmatprep.subr.bf16.mxu1 %v13561_v60  ;;  %v1540_v47 = vld [vmem:[%s14823_s27 + $0x2430] sm:$0xff]  ;;  %v1537_v56 = vld [vmem:[%s14823_s27 + $0x2418] sm:$0xff] }
 0x5e1   : > { %v1541_v60 = vld [vmem:[%s14823_s27 + $0x2438] sm:$0xff]  ;;  %v13607_v1 = vcombine.high %v1536_v45, %v1540_v47  ;;  %v13606_v10 = vcombine.low %v1536_v45, %v1540_v47  ;;  %v1580_v42 = vld [vmem:[%s14823_s27 + $0x2570] sm:$0xff] }
 0x5e2   : > { %v13609_v2 = vcombine.high %v1537_v56, %v1541_v60  ;;  %v13608_v58 = vcombine.low %v1537_v56, %v1541_v60  ;;  %v13647_v45 = vcombine.high %v1576_v15, %v1580_v42  ;;  %v1584_v56 = vld [vmem:[%s14823_s27 + $0x2590] sm:$0xff] }
 0x5e3   : > { %11015 = vmatpush1.bf16.msra.mxu0 %v13558_v16  ;;  %11507 = vmatpush1.bf16.msra.mxu1 %v13560_v7  ;;  %v1544_v16 = vld [vmem:[%s14823_s27 + $0x2450] sm:$0xff] }
 0x5e4   : > { %11016 = vmatprep.subr.bf16.mxu0 %v13567_v8  ;;  %11508 = vmatprep.subr.bf16.mxu1 %v13569_v9  ;;  %v1548_v7 = vld [vmem:[%s14823_s27 + $0x2470] sm:$0xff]  ;;  %v1545_v8 = vld [vmem:[%s14823_s27 + $0x2458] sm:$0xff] }
 0x5e5   : > { %v1549_v9 = vld [vmem:[%s14823_s27 + $0x2478] sm:$0xff]  ;;  %v13615_v14 = vcombine.high %v1544_v16, %v1548_v7  ;;  %v13614_v28 = vcombine.low %v1544_v16, %v1548_v7  ;;  %v1588_v60 = vld [vmem:[%s14823_s27 + $0x25b0] sm:$0xff] }
 0x5e6   : > { %v13617_v18 = vcombine.high %v1545_v8, %v1549_v9  ;;  %v13616_v30 = vcombine.low %v1545_v8, %v1549_v9  ;;  %v13655_v16 = vcombine.high %v1584_v56, %v1588_v60  ;;  %v1592_v8 = vld [vmem:[%s14823_s27 + $0x25d0] sm:$0xff] }
 0x5e7   : > { %11017 = vmatpush1.bf16.msra.mxu0 %v13566_v21  ;;  %11509 = vmatpush1.bf16.msra.mxu1 %v13568_v59  ;;  %v1552_v21 = vld [vmem:[%s14823_s27 + $0x2490] sm:$0xff] }
 0x5e8   : > { %11018 = vmatprep.subr.bf16.mxu0 %v13575_v23  ;;  %11510 = vmatprep.subr.bf16.mxu1 %v13577_v27  ;;  %v1556_v59 = vld [vmem:[%s14823_s27 + $0x24b0] sm:$0xff]  ;;  %v1553_v23 = vld [vmem:[%s14823_s27 + $0x2498] sm:$0xff] }
 0x5e9   : > { %v1557_v27 = vld [vmem:[%s14823_s27 + $0x24b8] sm:$0xff]  ;;  %v13623_v46 = vcombine.high %v1552_v21, %v1556_v59  ;;  %v1596_v9 = vld [vmem:[%s14823_s27 + $0x25f0] sm:$0xff] }
 0x5ea   : > { %v13625_v31 = vcombine.high %v1553_v23, %v1557_v27  ;;  %v13624_v12 = vcombine.low %v1553_v23, %v1557_v27  ;;  %v1600_v23 = vld [vmem:[%s14823_s27 + $0x2610] sm:$0xff] }
 0x5eb   : > { %11019 = vmatpush1.bf16.msra.mxu0 %v13574_v32  ;;  %11511 = vmatpush1.bf16.msra.mxu1 %v13576_v33  ;;  %v1560_v32 = vld [vmem:[%s14823_s27 + $0x24d0] sm:$0xff] }
 0x5ec   : > { %11020 = vmatprep.subr.bf16.mxu0 %v13583_v55  ;;  %11512 = vmatprep.subr.bf16.mxu1 %v13585_v25  ;;  %v1564_v33 = vld [vmem:[%s14823_s27 + $0x24f0] sm:$0xff]  ;;  %v1561_v55 = vld [vmem:[%s14823_s27 + $0x24d8] sm:$0xff] }
 0x5ed   : > { %v1565_v25 = vld [vmem:[%s14823_s27 + $0x24f8] sm:$0xff]  ;;  %v13631_v35 = vcombine.high %v1560_v32, %v1564_v33  ;;  %v1604_v27 = vld [vmem:[%s14823_s27 + $0x2630] sm:$0xff] }
 0x5ee   : > { %v13633_v20 = vcombine.high %v1561_v55, %v1565_v25 }
 0x5ef   : > { %11021 = vmatpush1.bf16.msra.mxu0 %v13582_v0  ;;  %11513 = vmatpush1.bf16.msra.mxu1 %v13584_v19  ;;  %v1572_v0 = vld [vmem:[%s14823_s27 + $0x2530] sm:$0xff]  ;;  %v1569_v19 = vld [vmem:[%s14823_s27 + $0x2518] sm:$0xff] }
 0x5f0   : > { %11022 = vmatprep.subr.bf16.mxu0 %v13591_v38  ;;  %11514 = vmatprep.subr.bf16.mxu1 %v13593_v39  ;;  %v1573_v38 = vld [vmem:[%s14823_s27 + $0x2538] sm:$0xff]  ;;  %v13630_v39 = vcombine.low %v1560_v32, %v1564_v33  ;;  %v13639_v57 = vcombine.high %v1568_v37, %v1572_v0  ;;  %v13671_v32 = vcombine.high %v1600_v23, %v1604_v27 }
 0x5f1   : > { %v13641_v41 = vcombine.high %v1569_v19, %v1573_v38 }
 0x5f3   : > { %11023 = vmatpush1.bf16.msra.mxu0 %v13590_v49  ;;  %11515 = vmatpush1.bf16.msra.mxu1 %v13592_v24  ;;  %v1577_v49 = vld [vmem:[%s14823_s27 + $0x2558] sm:$0xff] }
 0x5f4   : > { %11024 = vmatprep.subr.bf16.mxu0 %v13599_v43  ;;  %11516 = vmatprep.subr.bf16.mxu1 %v13601_v53  ;;  %v1581_v24 = vld [vmem:[%s14823_s27 + $0x2578] sm:$0xff]  ;;  %v13638_v43 = vcombine.low %v1568_v37, %v1572_v0  ;;  %v13640_v53 = vcombine.low %v1569_v19, %v1573_v38  ;;  %v1616_v19 = vld [vmem:[%s14823_s27 + $0x2690] sm:$0xff] }
 0x5f5   : > { %v13649_v47 = vcombine.high %v1577_v49, %v1581_v24  ;;  %v1620_v38 = vld [vmem:[%s14823_s27 + $0x26b0] sm:$0xff] }
 0x5f7   : > { %11025 = vmatpush1.bf16.msra.mxu0 %v13598_v62  ;;  %11517 = vmatpush1.bf16.msra.mxu1 %v13600_v63  ;;  %v1585_v62 = vld [vmem:[%s14823_s27 + $0x2598] sm:$0xff] }
 0x5f8   : > { %11035 = vmatprep.subr.bf16.mxu0 %v13607_v1  ;;  %11527 = vmatprep.subr.bf16.mxu1 %v13609_v2  ;;  %v1589_v63 = vld [vmem:[%s14823_s27 + $0x25b8] sm:$0xff]  ;;  %v13646_v1 = vcombine.low %v1576_v15, %v1580_v42  ;;  %v13648_v2 = vcombine.low %v1577_v49, %v1581_v24  ;;  %v13687_v15 = vcombine.high %v1616_v19, %v1620_v38  ;;  %v1624_v49 = vld [vmem:[%s14823_s27 + $0x26d0] sm:$0xff] }
 0x5f9   : > { %v13657_v7 = vcombine.high %v1585_v62, %v1589_v63  ;;  %v1628_v24 = vld [vmem:[%s14823_s27 + $0x26f0] sm:$0xff] }
 0x5fa   : > { %11027 = vmatmul.mubr.bf16.vlgmr.msra.gmra.mrb[4].mxu0 %v15542_v50  ;;  %11519 = vmatmul.mubr.bf16.vlgmr.msra.gmra.mrb[4].mxu1 %v15542_v50  ;;  %v13622_v50 = vcombine.low %v1552_v21, %v1556_v59  ;;  %v13663_v21 = vcombine.high %v1592_v8, %v1596_v9 }
 0x5fb   : > { %11036 = vmatpush1.bf16.msra.mxu0 %v13606_v10  ;;  %11528 = vmatpush1.bf16.msra.mxu1 %v13608_v58  ;;  %v1593_v10 = vld [vmem:[%s14823_s27 + $0x25d8] sm:$0xff] }
 0x5fc   : > { %11037 = vmatprep.subr.bf16.mxu0 %v13615_v14  ;;  %11529 = vmatprep.subr.bf16.mxu1 %v13617_v18  ;;  %v1597_v58 = vld [vmem:[%s14823_s27 + $0x25f8] sm:$0xff]  ;;  %v13654_v14 = vcombine.low %v1584_v56, %v1588_v60  ;;  %v13656_v18 = vcombine.low %v1585_v62, %v1589_v63  ;;  %v13695_v56 = vcombine.high %v1624_v49, %v1628_v24  ;;  %v1632_v62 = vld [vmem:[%s14823_s27 + $0x2710] sm:$0xff] }
 0x5fd   : > { %11067 = vmatprep.mubr.bf16.mxu0 %v15552_v3  ;;  %11559 = vmatprep.mubr.bf16.mxu1 %v15552_v3  ;;  %v13632_v3 = vcombine.low %v1561_v55, %v1565_v25  ;;  %v13665_v59 = vcombine.high %v1593_v10, %v1597_v58  ;;  %v1608_v55 = vld [vmem:[%s14823_s27 + $0x2650] sm:$0xff] }
 0x5fe   : > { %v1612_v25 = vld [vmem:[%s14823_s27 + $0x2670] sm:$0xff] }
 0x5ff   : > { %11038 = vmatpush1.bf16.msra.mxu0 %v13614_v28  ;;  %11530 = vmatpush1.bf16.msra.mxu1 %v13616_v30  ;;  %v1601_v28 = vld [vmem:[%s14823_s27 + $0x2618] sm:$0xff]  ;;  %v13679_v37 = vcombine.high %v1608_v55, %v1612_v25  ;;  %v1636_v63 = vld [vmem:[%s14823_s27 + $0x2730] sm:$0xff] }
 0x600   : > { %11039 = vmatprep.subr.bf16.mxu0 %v13623_v46  ;;  %11531 = vmatprep.subr.bf16.mxu1 %v13625_v31  ;;  %v1605_v30 = vld [vmem:[%s14823_s27 + $0x2638] sm:$0xff]  ;;  %v13662_v46 = vcombine.low %v1592_v8, %v1596_v9  ;;  %v13664_v31 = vcombine.low %v1593_v10, %v1597_v58  ;;  %v13703_v8 = vcombine.high %v1632_v62, %v1636_v63  ;;  %v1640_v10 = vld [vmem:[%s14823_s27 + $0x2750] sm:$0xff] }
 0x601   : > { %v13673_v33 = vcombine.high %v1601_v28, %v1605_v30  ;;  %v1644_v58 = vld [vmem:[%s14823_s27 + $0x2770] sm:$0xff] }
 0x603   : > { %11040 = vmatpush1.bf16.msra.mxu0 %v13622_v50  ;;  %11532 = vmatpush1.bf16.msra.mxu1 %v13624_v12  ;;  %v1609_v50 = vld [vmem:[%s14823_s27 + $0x2658] sm:$0xff] }
 0x604   : > { %11041 = vmatprep.subr.bf16.mxu0 %v13631_v35  ;;  %11533 = vmatprep.subr.bf16.mxu1 %v13633_v20  ;;  %v1613_v12 = vld [vmem:[%s14823_s27 + $0x2678] sm:$0xff]  ;;  %v13670_v35 = vcombine.low %v1600_v23, %v1604_v27  ;;  %v13672_v20 = vcombine.low %v1601_v28, %v1605_v30  ;;  %v13711_v23 = vcombine.high %v1640_v10, %v1644_v58  ;;  %v1648_v28 = vld [vmem:[%s14823_s27 + $0x2790] sm:$0xff] }
 0x605   : > { %v13681_v0 = vcombine.high %v1609_v50, %v1613_v12  ;;  %v1652_v30 = vld [vmem:[%s14823_s27 + $0x27b0] sm:$0xff] }
 0x607   : > { %11042 = vmatpush1.bf16.msra.mxu0 %v13630_v39  ;;  %11534 = vmatpush1.bf16.msra.mxu1 %v13632_v3  ;;  %v1617_v39 = vld [vmem:[%s14823_s27 + $0x2698] sm:$0xff] }
 0x608   : > { %11043 = vmatprep.subr.bf16.mxu0 %v13639_v57  ;;  %11535 = vmatprep.subr.bf16.mxu1 %v13641_v41  ;;  %v1621_v3 = vld [vmem:[%s14823_s27 + $0x26b8] sm:$0xff]  ;;  %v13678_v57 = vcombine.low %v1608_v55, %v1612_v25  ;;  %v13680_v41 = vcombine.low %v1609_v50, %v1613_v12  ;;  %v13719_v55 = vcombine.high %v1648_v28, %v1652_v30  ;;  %v1656_v50 = vld [vmem:[%s14823_s27 + $0x27d0] sm:$0xff] }
 0x609   : > { %v13689_v42 = vcombine.high %v1617_v39, %v1621_v3  ;;  %v1660_v12 = vld [vmem:[%s14823_s27 + $0x27f0] sm:$0xff] }
 0x60b   : > { %11044 = vmatpush1.bf16.msra.mxu0 %v13638_v43  ;;  %11536 = vmatpush1.bf16.msra.mxu1 %v13640_v53  ;;  %v1625_v43 = vld [vmem:[%s14823_s27 + $0x26d8] sm:$0xff] }
 0x60c   : > { %11045 = vmatprep.subr.bf16.mxu0 %v13647_v45  ;;  %11537 = vmatprep.subr.bf16.mxu1 %v13649_v47  ;;  %v1629_v53 = vld [vmem:[%s14823_s27 + $0x26f8] sm:$0xff]  ;;  %v13686_v45 = vcombine.low %v1616_v19, %v1620_v38  ;;  %v13688_v47 = vcombine.low %v1617_v39, %v1621_v3  ;;  %v13727_v19 = vcombine.high %v1656_v50, %v1660_v12  ;;  %v1664_v39 = vld [vmem:[%s14823_s27 + $0x2810] sm:$0xff] }
 0x60d   : > { %v13697_v60 = vcombine.high %v1625_v43, %v1629_v53  ;;  %v1668_v3 = vld [vmem:[%s14823_s27 + $0x2830] sm:$0xff] }
 0x60f   : > { %11046 = vmatpush1.bf16.msra.mxu0 %v13646_v1  ;;  %11538 = vmatpush1.bf16.msra.mxu1 %v13648_v2  ;;  %v1633_v1 = vld [vmem:[%s14823_s27 + $0x2718] sm:$0xff] }
 0x610   : > { %11047 = vmatprep.subr.bf16.mxu0 %v13655_v16  ;;  %11539 = vmatprep.subr.bf16.mxu1 %v13657_v7  ;;  %v1637_v2 = vld [vmem:[%s14823_s27 + $0x2738] sm:$0xff]  ;;  %v13694_v16 = vcombine.low %v1624_v49, %v1628_v24  ;;  %v13696_v7 = vcombine.low %v1625_v43, %v1629_v53  ;;  %v13735_v49 = vcombine.high %v1664_v39, %v1668_v3  ;;  %v1672_v43 = vld [vmem:[%s14823_s27 + $0x2850] sm:$0xff] }
 0x611   : > { %v13705_v9 = vcombine.high %v1633_v1, %v1637_v2  ;;  %v1676_v53 = vld [vmem:[%s14823_s27 + $0x2870] sm:$0xff] }
 0x613   : > { %11048 = vmatpush1.bf16.msra.mxu0 %v13654_v14  ;;  %11540 = vmatpush1.bf16.msra.mxu1 %v13656_v18  ;;  %v1641_v14 = vld [vmem:[%s14823_s27 + $0x2758] sm:$0xff] }
 0x614   : > { %11049 = vmatprep.subr.bf16.mxu0 %v13663_v21  ;;  %11541 = vmatprep.subr.bf16.mxu1 %v13665_v59  ;;  %v1645_v18 = vld [vmem:[%s14823_s27 + $0x2778] sm:$0xff]  ;;  %v13702_v21 = vcombine.low %v1632_v62, %v1636_v63  ;;  %v13704_v59 = vcombine.low %v1633_v1, %v1637_v2  ;;  %v13743_v62 = vcombine.high %v1672_v43, %v1676_v53  ;;  %v1680_v1 = vld [vmem:[%s14823_s27 + $0x2890] sm:$0xff] }
 0x615   : > { %v13713_v27 = vcombine.high %v1641_v14, %v1645_v18  ;;  %v1684_v2 = vld [vmem:[%s14823_s27 + $0x28b0] sm:$0xff] }
 0x617   : > { %11050 = vmatpush1.bf16.msra.mxu0 %v13662_v46  ;;  %11542 = vmatpush1.bf16.msra.mxu1 %v13664_v31  ;;  %v1649_v46 = vld [vmem:[%s14823_s27 + $0x2798] sm:$0xff] }
 0x618   : > { %11051 = vmatprep.subr.bf16.mxu0 %v13671_v32  ;;  %11543 = vmatprep.subr.bf16.mxu1 %v13673_v33  ;;  %v1653_v31 = vld [vmem:[%s14823_s27 + $0x27b8] sm:$0xff]  ;;  %v13710_v32 = vcombine.low %v1640_v10, %v1644_v58  ;;  %v13712_v33 = vcombine.low %v1641_v14, %v1645_v18  ;;  %v13751_v10 = vcombine.high %v1680_v1, %v1684_v2  ;;  %v1688_v14 = vld [vmem:[%s14823_s27 + $0x28d0] sm:$0xff] }
 0x619   : > { %v13721_v25 = vcombine.high %v1649_v46, %v1653_v31  ;;  %v1692_v18 = vld [vmem:[%s14823_s27 + $0x28f0] sm:$0xff] }
 0x61b   : > { %11052 = vmatpush1.bf16.msra.mxu0 %v13670_v35  ;;  %11544 = vmatpush1.bf16.msra.mxu1 %v13672_v20  ;;  %v1657_v35 = vld [vmem:[%s14823_s27 + $0x27d8] sm:$0xff] }
 0x61c   : > { %11053 = vmatprep.subr.bf16.mxu0 %v13679_v37  ;;  %11545 = vmatprep.subr.bf16.mxu1 %v13681_v0  ;;  %v1661_v20 = vld [vmem:[%s14823_s27 + $0x27f8] sm:$0xff]  ;;  %v13718_v37 = vcombine.low %v1648_v28, %v1652_v30  ;;  %v13720_v0 = vcombine.low %v1649_v46, %v1653_v31  ;;  %v1696_v30 = vld [vmem:[%s14823_s27 + $0x2910] sm:$0xff] }
 0x61d   : > { %v13729_v38 = vcombine.high %v1657_v35, %v1661_v20  ;;  %v1700_v46 = vld [vmem:[%s14823_s27 + $0x2930] sm:$0xff]  ;;  %v1697_v31 = vld [vmem:[%s14823_s27 + $0x2918] sm:$0xff] }
 0x61f   : > { %11054 = vmatpush1.bf16.msra.mxu0 %v13678_v57  ;;  %11546 = vmatpush1.bf16.msra.mxu1 %v13680_v41  ;;  %v1665_v57 = vld [vmem:[%s14823_s27 + $0x2818] sm:$0xff] }
 0x620   : > { %11055 = vmatprep.subr.bf16.mxu0 %v13687_v15  ;;  %11547 = vmatprep.subr.bf16.mxu1 %v13689_v42  ;;  %v1669_v41 = vld [vmem:[%s14823_s27 + $0x2838] sm:$0xff]  ;;  %v13726_v15 = vcombine.low %v1656_v50, %v1660_v12  ;;  %v13728_v42 = vcombine.low %v1657_v35, %v1661_v20  ;;  %v1704_v50 = vld [vmem:[%s14823_s27 + $0x2950] sm:$0xff] }
 0x621   : > { %v13737_v24 = vcombine.high %v1665_v57, %v1669_v41  ;;  %v1708_v12 = vld [vmem:[%s14823_s27 + $0x2970] sm:$0xff]  ;;  %v1705_v35 = vld [vmem:[%s14823_s27 + $0x2958] sm:$0xff] }
 0x622   : > { %v1709_v20 = vld [vmem:[%s14823_s27 + $0x2978] sm:$0xff] }
 0x623   : > { %11056 = vmatpush1.bf16.msra.mxu0 %v13686_v45  ;;  %11548 = vmatpush1.bf16.msra.mxu1 %v13688_v47  ;;  %v1673_v45 = vld [vmem:[%s14823_s27 + $0x2858] sm:$0xff] }
 0x624   : > { %11057 = vmatprep.subr.bf16.mxu0 %v13695_v56  ;;  %11549 = vmatprep.subr.bf16.mxu1 %v13697_v60  ;;  %v1677_v47 = vld [vmem:[%s14823_s27 + $0x2878] sm:$0xff]  ;;  %v13734_v56 = vcombine.low %v1664_v39, %v1668_v3  ;;  %v13736_v60 = vcombine.low %v1665_v57, %v1669_v41  ;;  %v1712_v39 = vld [vmem:[%s14823_s27 + $0x2990] sm:$0xff] }
 0x625   : > { %v13745_v63 = vcombine.high %v1673_v45, %v1677_v47  ;;  %v1716_v3 = vld [vmem:[%s14823_s27 + $0x29b0] sm:$0xff]  ;;  %v1713_v57 = vld [vmem:[%s14823_s27 + $0x2998] sm:$0xff] }
 0x626   : > { %v1717_v41 = vld [vmem:[%s14823_s27 + $0x29b8] sm:$0xff] }
 0x627   : > { %11058 = vmatpush1.bf16.msra.mxu0 %v13694_v16  ;;  %11550 = vmatpush1.bf16.msra.mxu1 %v13696_v7  ;;  %v1681_v16 = vld [vmem:[%s14823_s27 + $0x2898] sm:$0xff] }
 0x628   : > { %11059 = vmatprep.subr.bf16.mxu0 %v13703_v8  ;;  %11551 = vmatprep.subr.bf16.mxu1 %v13705_v9  ;;  %v1685_v7 = vld [vmem:[%s14823_s27 + $0x28b8] sm:$0xff]  ;;  %v13742_v8 = vcombine.low %v1672_v43, %v1676_v53  ;;  %v13744_v9 = vcombine.low %v1673_v45, %v1677_v47  ;;  %v1720_v43 = vld [vmem:[%s14823_s27 + $0x29d0] sm:$0xff] }
 0x629   : > { %v13753_v58 = vcombine.high %v1681_v16, %v1685_v7  ;;  %v1724_v53 = vld [vmem:[%s14823_s27 + $0x29f0] sm:$0xff]  ;;  %v1721_v45 = vld [vmem:[%s14823_s27 + $0x29d8] sm:$0xff] }
 0x62a   : > { %v1725_v47 = vld [vmem:[%s14823_s27 + $0x29f8] sm:$0xff] }
 0x62b   : > { %11060 = vmatpush1.bf16.msra.mxu0 %v13702_v21  ;;  %11552 = vmatpush1.bf16.msra.mxu1 %v13704_v59  ;;  %v1689_v21 = vld [vmem:[%s14823_s27 + $0x28d8] sm:$0xff] }
 0x62c   : > { %11061 = vmatprep.subr.bf16.mxu0 %v13711_v23  ;;  %11553 = vmatprep.subr.bf16.mxu1 %v13713_v27  ;;  %v1693_v59 = vld [vmem:[%s14823_s27 + $0x28f8] sm:$0xff]  ;;  %v13752_v23 = vcombine.low %v1681_v16, %v1685_v7  ;;  %v13759_v27 = vcombine.high %v1688_v14, %v1692_v18 }
 0x62d   : > { %v13761_v28 = vcombine.high %v1689_v21, %v1693_v59  ;;  %v1729_v16 = vld [vmem:[%s14823_s27 + $0x2a18] sm:$0xff] }
 0x62e   : > { %v1733_v7 = vld [vmem:[%s14823_s27 + $0x2a38] sm:$0xff] }
 0x62f   : > { %11062 = vmatpush1.bf16.msra.mxu0 %v13710_v32  ;;  %11554 = vmatpush1.bf16.msra.mxu1 %v13712_v33  ;;  %v1701_v32 = vld [vmem:[%s14823_s27 + $0x2938] sm:$0xff]  ;;  %v13758_v33 = vcombine.low %v1688_v14, %v1692_v18  ;;  %v1736_v14 = vld [vmem:[%s14823_s27 + $0x2a50] sm:$0xff] }
 0x630   : > { %11063 = vmatprep.subr.bf16.mxu0 %v13719_v55  ;;  %11555 = vmatprep.subr.bf16.mxu1 %v13721_v25  ;;  %v13767_v55 = vcombine.high %v1696_v30, %v1700_v46  ;;  %v13769_v25 = vcombine.high %v1697_v31, %v1701_v32  ;;  %v1740_v18 = vld [vmem:[%s14823_s27 + $0x2a70] sm:$0xff] }
 0x633   : > { %11064 = vmatpush1.bf16.msra.mxu0 %v13718_v37  ;;  %11556 = vmatpush1.bf16.msra.mxu1 %v13720_v0  ;;  %v13766_v37 = vcombine.low %v1696_v30, %v1700_v46  ;;  %v13768_v0 = vcombine.low %v1697_v31, %v1701_v32  ;;  %v1744_v30 = vld [vmem:[%s14823_s27 + $0x2a90] sm:$0xff]  ;;  %v1745_v31 = vld [vmem:[%s14823_s27 + $0x2a98] sm:$0xff] }
 0x634   : > { %11065 = vmatprep.subr.bf16.mxu0 %v13727_v19  ;;  %11557 = vmatprep.subr.bf16.mxu1 %v13729_v38  ;;  %v13775_v19 = vcombine.high %v1704_v50, %v1708_v12  ;;  %v13777_v38 = vcombine.high %v1705_v35, %v1709_v20  ;;  %v1748_v46 = vld [vmem:[%s14823_s27 + $0x2ab0] sm:$0xff]  ;;  %v1749_v32 = vld [vmem:[%s14823_s27 + $0x2ab8] sm:$0xff] }
 0x637   : > { %11066 = vmatpush1.bf16.msra.mxu0 %v13726_v15  ;;  %11558 = vmatpush1.bf16.msra.mxu1 %v13728_v42  ;;  %v13774_v15 = vcombine.low %v1704_v50, %v1708_v12  ;;  %v13776_v42 = vcombine.low %v1705_v35, %v1709_v20  ;;  %v1752_v50 = vld [vmem:[%s14823_s27 + $0x2ad0] sm:$0xff]  ;;  %v1753_v35 = vld [vmem:[%s14823_s27 + $0x2ad8] sm:$0xff] }
 0x638   : > { %11076 = vmatprep.subr.bf16.mxu0 %v13735_v49  ;;  %11568 = vmatprep.subr.bf16.mxu1 %v13737_v24  ;;  %v13783_v49 = vcombine.high %v1712_v39, %v1716_v3  ;;  %v13785_v24 = vcombine.high %v1713_v57, %v1717_v41  ;;  %v1756_v12 = vld [vmem:[%s14823_s27 + $0x2af0] sm:$0xff]  ;;  %v1757_v20 = vld [vmem:[%s14823_s27 + $0x2af8] sm:$0xff] }
 0x63a   : > { %11068 = vmatmul.mubr.bf16.vlgmr.msra.gmra.mrb[4].mxu0 %v15620_v44  ;;  %11560 = vmatmul.mubr.bf16.vlgmr.msra.gmra.mrb[4].mxu1 %v15620_v44  ;;  %v13750_v44 = vcombine.low %v1680_v1, %v1684_v2  ;;  %v1728_v1 = vld [vmem:[%s14823_s27 + $0x2a10] sm:$0xff] }
 0x63b   : > { %11077 = vmatpush1.bf16.msra.mxu0 %v13734_v56  ;;  %11569 = vmatpush1.bf16.msra.mxu1 %v13736_v60  ;;  %v13782_v56 = vcombine.low %v1712_v39, %v1716_v3  ;;  %v13784_v60 = vcombine.low %v1713_v57, %v1717_v41  ;;  %v1732_v2 = vld [vmem:[%s14823_s27 + $0x2a30] sm:$0xff]  ;;  %v1761_v57 = vld [vmem:[%s14823_s27 + $0x2b18] sm:$0xff] }
 0x63c   : > { %11078 = vmatprep.subr.bf16.mxu0 %v13743_v62  ;;  %11570 = vmatprep.subr.bf16.mxu1 %v13745_v63  ;;  %v13791_v62 = vcombine.high %v1720_v43, %v1724_v53  ;;  %v13793_v63 = vcombine.high %v1721_v45, %v1725_v47  ;;  %v1760_v39 = vld [vmem:[%s14823_s27 + $0x2b10] sm:$0xff]  ;;  %v1765_v41 = vld [vmem:[%s14823_s27 + $0x2b38] sm:$0xff] }
 0x63d   : > { %11108 = vmatprep.mubr.bf16.mxu0 %v15630_v54  ;;  %11600 = vmatprep.mubr.bf16.mxu1 %v15630_v54  ;;  %v13760_v54 = vcombine.low %v1689_v21, %v1693_v59  ;;  %v1737_v21 = vld [vmem:[%s14823_s27 + $0x2a58] sm:$0xff]  ;;  %v1764_v3 = vld [vmem:[%s14823_s27 + $0x2b30] sm:$0xff] }
 0x63e   : > { %v1741_v59 = vld [vmem:[%s14823_s27 + $0x2a78] sm:$0xff] }
 0x63f   : > { %11079 = vmatpush1.bf16.msra.mxu0 %v13742_v8  ;;  %11571 = vmatpush1.bf16.msra.mxu1 %v13744_v9  ;;  %v13790_v8 = vcombine.low %v1720_v43, %v1724_v53  ;;  %v13792_v9 = vcombine.low %v1721_v45, %v1725_v47  ;;  %v1768_v43 = vld [vmem:[%s14823_s27 + $0x2b50] sm:$0xff]  ;;  %v1769_v45 = vld [vmem:[%s14823_s27 + $0x2b58] sm:$0xff] }
 0x640   : > { %11080 = vmatprep.subr.bf16.mxu0 %v13751_v10  ;;  %11572 = vmatprep.subr.bf16.mxu1 %v13753_v58  ;;  %v13799_v10 = vcombine.high %v1728_v1, %v1732_v2  ;;  %v13801_v58 = vcombine.high %v1729_v16, %v1733_v7  ;;  %v1772_v53 = vld [vmem:[%s14823_s27 + $0x2b70] sm:$0xff]  ;;  %v1773_v47 = vld [vmem:[%s14823_s27 + $0x2b78] sm:$0xff] }
 0x643   : > { %11081 = vmatpush1.bf16.msra.mxu0 %v13750_v44  ;;  %11573 = vmatpush1.bf16.msra.mxu1 %v13752_v23  ;;  %v13798_v44 = vcombine.low %v1728_v1, %v1732_v2  ;;  %v13800_v23 = vcombine.low %v1729_v16, %v1733_v7  ;;  %v1776_v1 = vld [vmem:[%s14823_s27 + $0x2b90] sm:$0xff]  ;;  %v1777_v16 = vld [vmem:[%s14823_s27 + $0x2b98] sm:$0xff] }
 0x644   : > { %11082 = vmatprep.subr.bf16.mxu0 %v13759_v27  ;;  %11574 = vmatprep.subr.bf16.mxu1 %v13761_v28  ;;  %v13807_v27 = vcombine.high %v1736_v14, %v1740_v18  ;;  %v13809_v28 = vcombine.high %v1737_v21, %v1741_v59  ;;  %v1780_v2 = vld [vmem:[%s14823_s27 + $0x2bb0] sm:$0xff]  ;;  %v1781_v7 = vld [vmem:[%s14823_s27 + $0x2bb8] sm:$0xff] }
 0x647   : > { %11083 = vmatpush1.bf16.msra.mxu0 %v13758_v33  ;;  %11575 = vmatpush1.bf16.msra.mxu1 %v13760_v54  ;;  %v13806_v33 = vcombine.low %v1736_v14, %v1740_v18  ;;  %v13808_v54 = vcombine.low %v1737_v21, %v1741_v59  ;;  %v1784_v14 = vld [vmem:[%s14823_s27 + $0x2bd0] sm:$0xff]  ;;  %v1785_v21 = vld [vmem:[%s14823_s27 + $0x2bd8] sm:$0xff] }
 0x648   : > { %11084 = vmatprep.subr.bf16.mxu0 %v13767_v55  ;;  %11576 = vmatprep.subr.bf16.mxu1 %v13769_v25  ;;  %v13815_v55 = vcombine.high %v1744_v30, %v1748_v46  ;;  %v13817_v25 = vcombine.high %v1745_v31, %v1749_v32  ;;  %v1788_v18 = vld [vmem:[%s14823_s27 + $0x2bf0] sm:$0xff]  ;;  %v1789_v59 = vld [vmem:[%s14823_s27 + $0x2bf8] sm:$0xff] }
 0x64b   : > { %11085 = vmatpush1.bf16.msra.mxu0 %v13766_v37  ;;  %11577 = vmatpush1.bf16.msra.mxu1 %v13768_v0  ;;  %v13814_v37 = vcombine.low %v1744_v30, %v1748_v46  ;;  %v13816_v0 = vcombine.low %v1745_v31, %v1749_v32  ;;  %v1792_v30 = vld [vmem:[%s14823_s27 + $0x2c10] sm:$0xff]  ;;  %v1793_v31 = vld [vmem:[%s14823_s27 + $0x2c18] sm:$0xff] }
 0x64c   : > { %11086 = vmatprep.subr.bf16.mxu0 %v13775_v19  ;;  %11578 = vmatprep.subr.bf16.mxu1 %v13777_v38  ;;  %v13823_v19 = vcombine.high %v1752_v50, %v1756_v12  ;;  %v13825_v38 = vcombine.high %v1753_v35, %v1757_v20  ;;  %v1796_v46 = vld [vmem:[%s14823_s27 + $0x2c30] sm:$0xff]  ;;  %v1797_v32 = vld [vmem:[%s14823_s27 + $0x2c38] sm:$0xff] }
 0x64f   : > { %11087 = vmatpush1.bf16.msra.mxu0 %v13774_v15  ;;  %11579 = vmatpush1.bf16.msra.mxu1 %v13776_v42  ;;  %v13822_v15 = vcombine.low %v1752_v50, %v1756_v12  ;;  %v13824_v42 = vcombine.low %v1753_v35, %v1757_v20  ;;  %v1800_v50 = vld [vmem:[%s14823_s27 + $0x2c50] sm:$0xff]  ;;  %v1801_v35 = vld [vmem:[%s14823_s27 + $0x2c58] sm:$0xff] }
 0x650   : > { %11088 = vmatprep.subr.bf16.mxu0 %v13783_v49  ;;  %11580 = vmatprep.subr.bf16.mxu1 %v13785_v24  ;;  %v13831_v49 = vcombine.high %v1760_v39, %v1764_v3  ;;  %v13833_v24 = vcombine.high %v1761_v57, %v1765_v41  ;;  %v1804_v12 = vld [vmem:[%s14823_s27 + $0x2c70] sm:$0xff]  ;;  %v1805_v20 = vld [vmem:[%s14823_s27 + $0x2c78] sm:$0xff] }
 0x653   : > { %11089 = vmatpush1.bf16.msra.mxu0 %v13782_v56  ;;  %11581 = vmatpush1.bf16.msra.mxu1 %v13784_v60  ;;  %v13830_v56 = vcombine.low %v1760_v39, %v1764_v3  ;;  %v13832_v60 = vcombine.low %v1761_v57, %v1765_v41  ;;  %v1808_v39 = vld [vmem:[%s14823_s27 + $0x2c90] sm:$0xff]  ;;  %v1809_v57 = vld [vmem:[%s14823_s27 + $0x2c98] sm:$0xff] }
 0x654   : > { %11090 = vmatprep.subr.bf16.mxu0 %v13791_v62  ;;  %11582 = vmatprep.subr.bf16.mxu1 %v13793_v63  ;;  %v13839_v62 = vcombine.high %v1768_v43, %v1772_v53  ;;  %v13841_v63 = vcombine.high %v1769_v45, %v1773_v47  ;;  %v1812_v3 = vld [vmem:[%s14823_s27 + $0x2cb0] sm:$0xff]  ;;  %v1813_v41 = vld [vmem:[%s14823_s27 + $0x2cb8] sm:$0xff] }
 0x657   : > { %11091 = vmatpush1.bf16.msra.mxu0 %v13790_v8  ;;  %11583 = vmatpush1.bf16.msra.mxu1 %v13792_v9  ;;  %v13838_v8 = vcombine.low %v1768_v43, %v1772_v53  ;;  %v13840_v9 = vcombine.low %v1769_v45, %v1773_v47  ;;  %v1816_v43 = vld [vmem:[%s14823_s27 + $0x2cd0] sm:$0xff]  ;;  %v1817_v45 = vld [vmem:[%s14823_s27 + $0x2cd8] sm:$0xff] }
 0x658   : > { %11092 = vmatprep.subr.bf16.mxu0 %v13799_v10  ;;  %11584 = vmatprep.subr.bf16.mxu1 %v13801_v58  ;;  %v13847_v10 = vcombine.high %v1776_v1, %v1780_v2  ;;  %v13849_v58 = vcombine.high %v1777_v16, %v1781_v7  ;;  %v1820_v53 = vld [vmem:[%s14823_s27 + $0x2cf0] sm:$0xff]  ;;  %v1821_v47 = vld [vmem:[%s14823_s27 + $0x2cf8] sm:$0xff] }
 0x65b   : > { %11093 = vmatpush1.bf16.msra.mxu0 %v13798_v44  ;;  %11585 = vmatpush1.bf16.msra.mxu1 %v13800_v23  ;;  %v13846_v44 = vcombine.low %v1776_v1, %v1780_v2  ;;  %v13848_v23 = vcombine.low %v1777_v16, %v1781_v7  ;;  %v1828_v1 = vld [vmem:[%s14823_s27 + $0x2d30] sm:$0xff]  ;;  %v1825_v2 = vld [vmem:[%s14823_s27 + $0x2d18] sm:$0xff]  ;;  %v13886_v7 = vcombine.low %v1816_v43, %v1820_v53 }
 0x65c   : > { %11094 = vmatprep.subr.bf16.mxu0 %v13807_v27  ;;  %11586 = vmatprep.subr.bf16.mxu1 %v13809_v28  ;;  %v13855_v27 = vcombine.high %v1784_v14, %v1788_v18  ;;  %v13857_v28 = vcombine.high %v1785_v21, %v1789_v59  ;;  %v1829_v16 = vld [vmem:[%s14823_s27 + $0x2d38] sm:$0xff] }
 0x65f   : > { %11095 = vmatpush1.bf16.msra.mxu0 %v13806_v33  ;;  %11587 = vmatpush1.bf16.msra.mxu1 %v13808_v54  ;;  %v13854_v33 = vcombine.low %v1784_v14, %v1788_v18  ;;  %v13856_v54 = vcombine.low %v1785_v21, %v1789_v59  ;;  %v1833_v14 = vld [vmem:[%s14823_s27 + $0x2d58] sm:$0xff]  ;;  %v13896_v59 = vcombine.low %v1825_v2, %v1829_v16 }
 0x660   : > { %11096 = vmatprep.subr.bf16.mxu0 %v13815_v55  ;;  %11588 = vmatprep.subr.bf16.mxu1 %v13817_v25  ;;  %v13863_v55 = vcombine.high %v1792_v30, %v1796_v46  ;;  %v13865_v25 = vcombine.high %v1793_v31, %v1797_v32  ;;  %v1837_v18 = vld [vmem:[%s14823_s27 + $0x2d78] sm:$0xff] }
 0x663   : > { %11097 = vmatpush1.bf16.msra.mxu0 %v13814_v37  ;;  %11589 = vmatpush1.bf16.msra.mxu1 %v13816_v0  ;;  %v13862_v37 = vcombine.low %v1792_v30, %v1796_v46  ;;  %v13864_v0 = vcombine.low %v1793_v31, %v1797_v32  ;;  %v1841_v30 = vld [vmem:[%s14823_s27 + $0x2d98] sm:$0xff]  ;;  %v13904_v32 = vcombine.low %v1833_v14, %v1837_v18 }
 0x664   : > { %11098 = vmatprep.subr.bf16.mxu0 %v13823_v19  ;;  %11590 = vmatprep.subr.bf16.mxu1 %v13825_v38  ;;  %v13871_v19 = vcombine.high %v1800_v50, %v1804_v12  ;;  %v13873_v38 = vcombine.high %v1801_v35, %v1805_v20  ;;  %v1845_v46 = vld [vmem:[%s14823_s27 + $0x2db8] sm:$0xff] }
 0x667   : > { %11099 = vmatpush1.bf16.msra.mxu0 %v13822_v15  ;;  %11591 = vmatpush1.bf16.msra.mxu1 %v13824_v42  ;;  %v13870_v15 = vcombine.low %v1800_v50, %v1804_v12  ;;  %v13872_v42 = vcombine.low %v1801_v35, %v1805_v20  ;;  %v1849_v50 = vld [vmem:[%s14823_s27 + $0x2dd8] sm:$0xff]  ;;  %v13912_v20 = vcombine.low %v1841_v30, %v1845_v46 }
 0x668   : > { %11100 = vmatprep.subr.bf16.mxu0 %v13831_v49  ;;  %11592 = vmatprep.subr.bf16.mxu1 %v13833_v24  ;;  %v13879_v49 = vcombine.high %v1808_v39, %v1812_v3  ;;  %v13881_v24 = vcombine.high %v1809_v57, %v1813_v41  ;;  %v1853_v12 = vld [vmem:[%s14823_s27 + $0x2df8] sm:$0xff] }
 0x66b   : > { %11101 = vmatpush1.bf16.msra.mxu0 %v13830_v56  ;;  %11593 = vmatpush1.bf16.msra.mxu1 %v13832_v60  ;;  %v13880_v56 = vcombine.low %v1809_v57, %v1813_v41  ;;  %v13887_v60 = vcombine.high %v1816_v43, %v1820_v53  ;;  %v13920_v41 = vcombine.low %v1849_v50, %v1853_v12  ;;  %v1865_v43 = vld [vmem:[%s14823_s27 + $0x2e58] sm:$0xff] }
 0x66c   : > { %11102 = vmatprep.subr.bf16.mxu0 %v13839_v62  ;;  %11594 = vmatprep.subr.bf16.mxu1 %v13841_v63  ;;  %v13889_v62 = vcombine.high %v1817_v45, %v1821_v47  ;;  %v1824_v63 = vld [vmem:[%s14823_s27 + $0x2d10] sm:$0xff]  ;;  %v1869_v53 = vld [vmem:[%s14823_s27 + $0x2e78] sm:$0xff] }
 0x66d   : > { %v13894_v21 = vcombine.low %v1824_v63, %v1828_v1 }
 0x66f   : > { %11103 = vmatpush1.bf16.msra.mxu0 %v13838_v8  ;;  %11595 = vmatpush1.bf16.msra.mxu1 %v13840_v9  ;;  %v13895_v8 = vcombine.high %v1824_v63, %v1828_v1  ;;  %v13897_v9 = vcombine.high %v1825_v2, %v1829_v16  ;;  %v1873_v63 = vld [vmem:[%s14823_s27 + $0x2e98] sm:$0xff]  ;;  %v13936_v16 = vcombine.low %v1865_v43, %v1869_v53 }
 0x670   : > { %11104 = vmatprep.subr.bf16.mxu0 %v13847_v10  ;;  %11596 = vmatprep.subr.bf16.mxu1 %v13849_v58  ;;  %v1832_v10 = vld [vmem:[%s14823_s27 + $0x2d50] sm:$0xff]  ;;  %v1877_v1 = vld [vmem:[%s14823_s27 + $0x2eb8] sm:$0xff] }
 0x671   : > { %v1836_v58 = vld [vmem:[%s14823_s27 + $0x2d70] sm:$0xff] }
 0x672   : > { %v13902_v31 = vcombine.low %v1832_v10, %v1836_v58 }
 0x673   : > { %11105 = vmatpush1.bf16.msra.mxu0 %v13846_v44  ;;  %11597 = vmatpush1.bf16.msra.mxu1 %v13848_v23  ;;  %v13903_v44 = vcombine.high %v1832_v10, %v1836_v58  ;;  %v13905_v23 = vcombine.high %v1833_v14, %v1837_v18  ;;  %v1881_v10 = vld [vmem:[%s14823_s27 + $0x2ed8] sm:$0xff]  ;;  %v13944_v18 = vcombine.low %v1873_v63, %v1877_v1 }
 0x674   : > { %11106 = vmatprep.subr.bf16.mxu0 %v13855_v27  ;;  %11598 = vmatprep.subr.bf16.mxu1 %v13857_v28  ;;  %v1840_v27 = vld [vmem:[%s14823_s27 + $0x2d90] sm:$0xff]  ;;  %v1885_v58 = vld [vmem:[%s14823_s27 + $0x2ef8] sm:$0xff] }
 0x675   : > { %v1844_v28 = vld [vmem:[%s14823_s27 + $0x2db0] sm:$0xff] }
 0x676   : > { %v13910_v35 = vcombine.low %v1840_v27, %v1844_v28 }
 0x677   : > { %11107 = vmatpush1.bf16.msra.mxu0 %v13854_v33  ;;  %11599 = vmatpush1.bf16.msra.mxu1 %v13856_v54  ;;  %v13911_v33 = vcombine.high %v1840_v27, %v1844_v28  ;;  %v13913_v54 = vcombine.high %v1841_v30, %v1845_v46  ;;  %v1889_v27 = vld [vmem:[%s14823_s27 + $0x2f18] sm:$0xff]  ;;  %v13952_v46 = vcombine.low %v1881_v10, %v1885_v58 }
 0x678   : > { %11117 = vmatprep.subr.bf16.mxu0 %v13863_v55  ;;  %11609 = vmatprep.subr.bf16.mxu1 %v13865_v25  ;;  %v1848_v55 = vld [vmem:[%s14823_s27 + $0x2dd0] sm:$0xff]  ;;  %v1893_v28 = vld [vmem:[%s14823_s27 + $0x2f38] sm:$0xff] }
 0x679   : > { %v1852_v25 = vld [vmem:[%s14823_s27 + $0x2df0] sm:$0xff] }
 0x67a   : > { %11109 = vmatmul.mubr.bf16.vlgmr.msra.gmra.mrb[4].mxu0 %v15698_v51  ;;  %11601 = vmatmul.mubr.bf16.vlgmr.msra.gmra.mrb[4].mxu1 %v15698_v51  ;;  %v13878_v51 = vcombine.low %v1808_v39, %v1812_v3  ;;  %v1857_v39 = vld [vmem:[%s14823_s27 + $0x2e18] sm:$0xff]  ;;  %v13918_v57 = vcombine.low %v1848_v55, %v1852_v25 }
 0x67b   : > { %11118 = vmatpush1.bf16.msra.mxu0 %v13862_v37  ;;  %11610 = vmatpush1.bf16.msra.mxu1 %v13864_v0  ;;  %v13919_v37 = vcombine.high %v1848_v55, %v1852_v25  ;;  %v13921_v0 = vcombine.high %v1849_v50, %v1853_v12  ;;  %v1861_v3 = vld [vmem:[%s14823_s27 + $0x2e38] sm:$0xff]  ;;  %v13960_v12 = vcombine.low %v1889_v27, %v1893_v28 }
 0x67c   : > { %11119 = vmatprep.subr.bf16.mxu0 %v13871_v19  ;;  %11611 = vmatprep.subr.bf16.mxu1 %v13873_v38  ;;  %v1856_v19 = vld [vmem:[%s14823_s27 + $0x2e10] sm:$0xff]  ;;  %v1897_v55 = vld [vmem:[%s14823_s27 + $0x2f58] sm:$0xff] }
 0x67d   : > { %11149 = vmatprep.mubr.bf16.mxu0 %v15708_v48  ;;  %11641 = vmatprep.mubr.bf16.mxu1 %v15708_v48  ;;  %v13888_v48 = vcombine.low %v1817_v45, %v1821_v47  ;;  %v1860_v38 = vld [vmem:[%s14823_s27 + $0x2e30] sm:$0xff]  ;;  %v13928_v47 = vcombine.low %v1857_v39, %v1861_v3  ;;  %v1901_v25 = vld [vmem:[%s14823_s27 + $0x2f78] sm:$0xff] }
 0x67e   : > { %v13926_v45 = vcombine.low %v1856_v19, %v1860_v38 }
 0x67f   : > { %11120 = vmatpush1.bf16.msra.mxu0 %v13870_v15  ;;  %11612 = vmatpush1.bf16.msra.mxu1 %v13872_v42  ;;  %v13927_v15 = vcombine.high %v1856_v19, %v1860_v38  ;;  %v13929_v42 = vcombine.high %v1857_v39, %v1861_v3  ;;  %v1905_v19 = vld [vmem:[%s14823_s27 + $0x2f98] sm:$0xff]  ;;  %v13968_v3 = vcombine.low %v1897_v55, %v1901_v25 }
 0x680   : > { %11121 = vmatprep.subr.bf16.mxu0 %v13879_v49  ;;  %11613 = vmatprep.subr.bf16.mxu1 %v13881_v24  ;;  %v1864_v49 = vld [vmem:[%s14823_s27 + $0x2e50] sm:$0xff]  ;;  %v1909_v38 = vld [vmem:[%s14823_s27 + $0x2fb8] sm:$0xff] }
 0x681   : > { %v1868_v24 = vld [vmem:[%s14823_s27 + $0x2e70] sm:$0xff] }
 0x682   : > { %v13934_v2 = vcombine.low %v1864_v49, %v1868_v24 }
 0x683   : > { %11122 = vmatpush1.bf16.msra.mxu0 %v13878_v51  ;;  %11614 = vmatpush1.bf16.msra.mxu1 %v13880_v56  ;;  %v13935_v51 = vcombine.high %v1864_v49, %v1868_v24  ;;  %v13937_v56 = vcombine.high %v1865_v43, %v1869_v53  ;;  %v1913_v49 = vld [vmem:[%s14823_s27 + $0x2fd8] sm:$0xff]  ;;  %v13976_v53 = vcombine.low %v1905_v19, %v1909_v38 }
 0x684   : > { %11123 = vmatprep.subr.bf16.mxu0 %v13887_v60  ;;  %11615 = vmatprep.subr.bf16.mxu1 %v13889_v62  ;;  %v1872_v60 = vld [vmem:[%s14823_s27 + $0x2e90] sm:$0xff]  ;;  %v1917_v24 = vld [vmem:[%s14823_s27 + $0x2ff8] sm:$0xff] }
 0x685   : > { %v1876_v62 = vld [vmem:[%s14823_s27 + $0x2eb0] sm:$0xff] }
 0x686   : > { %v13942_v14 = vcombine.low %v1872_v60, %v1876_v62 }
 0x687   : > { %11124 = vmatpush1.bf16.msra.mxu0 %v13886_v7  ;;  %11616 = vmatpush1.bf16.msra.mxu1 %v13888_v48  ;;  %v13943_v7 = vcombine.high %v1872_v60, %v1876_v62  ;;  %v13945_v48 = vcombine.high %v1873_v63, %v1877_v1  ;;  %v12037_v60 = vld [vmem:[%s324_s14] sm:$0xff]  ;;  %v12039_v63 = vld [vmem:[%s324_s14 + $0x10] sm:$0xff] }
 0x688   : > { %11125 = vmatprep.subr.bf16.mxu0 %v13895_v8  ;;  %11617 = vmatprep.subr.bf16.mxu1 %v13897_v9  ;;  %v1880_v8 = vld [vmem:[%s14823_s27 + $0x2ed0] sm:$0xff]  ;;  %v12041_v62 = vld [vmem:[%s324_s14 + $0x20] sm:$0x11] }
 0x689   : > { %v1884_v9 = vld [vmem:[%s14823_s27 + $0x2ef0] sm:$0xff]  ;;  %v13986_v1 = vcombine.low %v12037_v60, %v12041_v62 }
 0x68a   : > { %v13950_v30 = vcombine.low %v1880_v8, %v1884_v9 }
 0x68b   : > { %11126 = vmatpush1.bf16.msra.mxu0 %v13894_v21  ;;  %11618 = vmatpush1.bf16.msra.mxu1 %v13896_v59  ;;  %v13951_v21 = vcombine.high %v1880_v8, %v1884_v9  ;;  %v13953_v59 = vcombine.high %v1881_v10, %v1885_v58  ;;  %v16636_v8 = vld [vmem:[%s324_s14 + $0x8] sm:$0xff]  ;;  %v16640_v10 = vld [vmem:[%s324_s14 + $0x18] sm:$0xff] }
 0x68c   : > { %11127 = vmatprep.subr.bf16.mxu0 %v13903_v44  ;;  %11619 = vmatprep.subr.bf16.mxu1 %v13905_v23  ;;  %v1888_v44 = vld [vmem:[%s14823_s27 + $0x2f10] sm:$0xff]  ;;  %v16638_v9 = vld [vmem:[%s324_s14 + $0x28] sm:$0x11] }
 0x68d   : > { %v1892_v23 = vld [vmem:[%s14823_s27 + $0x2f30] sm:$0xff]  ;;  %v13989_v58 = vcombine.high %v16636_v8, %v16638_v9 }
 0x68e   : > { %v13958_v50 = vcombine.low %v1888_v44, %v1892_v23 }
 0x68f   : > { %11128 = vmatpush1.bf16.msra.mxu0 %v13902_v31  ;;  %11620 = vmatpush1.bf16.msra.mxu1 %v13904_v32  ;;  %v13959_v31 = vcombine.high %v1888_v44, %v1892_v23  ;;  %v13961_v32 = vcombine.high %v1889_v27, %v1893_v28 }
 0x690   : > { %11129 = vmatprep.subr.bf16.mxu0 %v13911_v33  ;;  %11621 = vmatprep.subr.bf16.mxu1 %v13913_v54  ;;  %v1896_v33 = vld [vmem:[%s14823_s27 + $0x2f50] sm:$0xff] }
 0x691   : > { %v1900_v54 = vld [vmem:[%s14823_s27 + $0x2f70] sm:$0xff] }
 0x692   : > { %v13966_v39 = vcombine.low %v1896_v33, %v1900_v54 }
 0x693   : > { %11130 = vmatpush1.bf16.msra.mxu0 %v13910_v35  ;;  %11622 = vmatpush1.bf16.msra.mxu1 %v13912_v20  ;;  %v13967_v35 = vcombine.high %v1896_v33, %v1900_v54  ;;  %v13969_v20 = vcombine.high %v1897_v55, %v1901_v25 }
 0x694   : > { %11131 = vmatprep.subr.bf16.mxu0 %v13919_v37  ;;  %11623 = vmatprep.subr.bf16.mxu1 %v13921_v0  ;;  %v1904_v37 = vld [vmem:[%s14823_s27 + $0x2f90] sm:$0xff] }
 0x695   : > { %v1908_v0 = vld [vmem:[%s14823_s27 + $0x2fb0] sm:$0xff] }
 0x696   : > { %v13974_v43 = vcombine.low %v1904_v37, %v1908_v0 }
 0x697   : > { %11132 = vmatpush1.bf16.msra.mxu0 %v13918_v57  ;;  %11624 = vmatpush1.bf16.msra.mxu1 %v13920_v41  ;;  %v13975_v57 = vcombine.high %v1904_v37, %v1908_v0  ;;  %v13977_v41 = vcombine.high %v1905_v19, %v1909_v38 }
 0x698   : > { %11133 = vmatprep.subr.bf16.mxu0 %v13927_v15  ;;  %11625 = vmatprep.subr.bf16.mxu1 %v13929_v42  ;;  %v1912_v15 = vld [vmem:[%s14823_s27 + $0x2fd0] sm:$0xff] }
 0x699   : > { %v1916_v42 = vld [vmem:[%s14823_s27 + $0x2ff0] sm:$0xff] }
 0x69b   : > { %11134 = vmatpush1.bf16.msra.mxu0 %v13926_v45  ;;  %11626 = vmatpush1.bf16.msra.mxu1 %v13928_v47  ;;  %v13983_v45 = vcombine.high %v1912_v15, %v1916_v42  ;;  %v13985_v47 = vcombine.high %v1913_v49, %v1917_v24 }
 0x69c   : > { %11135 = vmatprep.subr.bf16.mxu0 %v13935_v51  ;;  %11627 = vmatprep.subr.bf16.mxu1 %v13937_v56  ;;  %v13982_v51 = vcombine.low %v1912_v15, %v1916_v42  ;;  %v13984_v56 = vcombine.low %v1913_v49, %v1917_v24 }
 0x69f   : > { %11136 = vmatpush1.bf16.msra.mxu0 %v13934_v2  ;;  %11628 = vmatpush1.bf16.msra.mxu1 %v13936_v16  ;;  %v13987_v2 = vcombine.high %v12037_v60, %v12041_v62  ;;  %v12043_v16 = vld [vmem:[%s324_s14 + $0x30] sm:$0x11] }
 0x6a0   : > { %11137 = vmatprep.subr.bf16.mxu0 %v13943_v7  ;;  %11629 = vmatprep.subr.bf16.mxu1 %v13945_v48  ;;  %v13990_v7 = vcombine.low %v12039_v63, %v12043_v16  ;;  %v13991_v48 = vcombine.high %v12039_v63, %v12043_v16 }
 0x6a3   : > { %11138 = vmatpush1.bf16.msra.mxu0 %v13942_v14  ;;  %11630 = vmatpush1.bf16.msra.mxu1 %v13944_v18  ;;  %v16646_v14 = vld [vmem:[%s324_s14 + $0x38] sm:$0x11] }
 0x6a4   : > { %11139 = vmatprep.subr.bf16.mxu0 %v13951_v21  ;;  %11631 = vmatprep.subr.bf16.mxu1 %v13953_v59  ;;  %v13992_v18 = vcombine.low %v16640_v10, %v16646_v14  ;;  %v13993_v21 = vcombine.high %v16640_v10, %v16646_v14 }
 0x6a7   : > { %11140 = vmatpush1.bf16.msra.mxu0 %v13950_v30  ;;  %11632 = vmatpush1.bf16.msra.mxu1 %v13952_v46 }
 0x6a8   : > { %11141 = vmatprep.subr.bf16.mxu0 %v13959_v31  ;;  %11633 = vmatprep.subr.bf16.mxu1 %v13961_v32 }
 0x6ab   : > { %11142 = vmatpush1.bf16.msra.mxu0 %v13958_v50  ;;  %11634 = vmatpush1.bf16.msra.mxu1 %v13960_v12 }
 0x6ac   : > { %11143 = vmatprep.subr.bf16.mxu0 %v13967_v35  ;;  %11635 = vmatprep.subr.bf16.mxu1 %v13969_v20 }
 0x6af   : > { %11144 = vmatpush1.bf16.msra.mxu0 %v13966_v39  ;;  %11636 = vmatpush1.bf16.msra.mxu1 %v13968_v3 }
 0x6b0   : > { %11145 = vmatprep.subr.bf16.mxu0 %v13975_v57  ;;  %11637 = vmatprep.subr.bf16.mxu1 %v13977_v41 }
 0x6b3   : > { %11146 = vmatpush1.bf16.msra.mxu0 %v13974_v43  ;;  %11638 = vmatpush1.bf16.msra.mxu1 %v13976_v53 }
 0x6b4   : > { %11147 = vmatprep.subr.bf16.mxu0 %v13983_v45  ;;  %11639 = vmatprep.subr.bf16.mxu1 %v13985_v47 }
 0x6b7   : > { %11148 = vmatpush1.bf16.msra.mxu0 %v13982_v51  ;;  %11640 = vmatpush1.bf16.msra.mxu1 %v13984_v56 }
 0x6b8   : > { %12085 = vmatprep.subr.bf16.mxu1 %v13987_v2  ;;  %12165 = vmatprep.subr.bf16.mxu0 %v13991_v48 }
 0x6ba   : > { %11150 = vmatmul.mubr.bf16.vlgmr.msra.gmra.mrb[4].mxu0 %v15776_v4  ;;  %11642 = vmatmul.mubr.bf16.vlgmr.msra.gmra.mrb[4].mxu1 %v15776_v4  ;;  %v13988_v4 = vcombine.low %v16636_v8, %v16638_v9 }
 0x6c0   : > { %12086 = vmatpush1.bf16.xpose.msra.mxu1 %v13986_v1  ;;  %12166 = vmatpush1.bf16.xpose.msra.mxu0 %v13990_v7 }
 0x6c1   : > { %12125 = vmatprep.subr.bf16.mxu1 %v13989_v58  ;;  %12205 = vmatprep.subr.bf16.mxu0 %v13993_v21 }
 0x78d   : > { %v16652_v59 = vpop.f32.mrb[4].mxu0  ;;  %v16655_v23 = vpop.f32.mrb[4].mxu1 }
 0x78e   : > { %v11674_v44 = vrot.slane %v16652_v59, 4  ;;  %v16657_v27 = vpop.f32.mrb[5].mxu0  ;;  %v11686_v28 = vrot.slane %v16655_v23, 4  ;;  %v16661_v46 = vpop.f32.mrb[5].mxu1 }
 0x78f   : > { %v11680_v30 = vrot.slane %v16657_v27, 4  ;;  %v11155_v31 = vpop.f32.mrb[6].mxu0  ;;  %v11692_v33 = vrot.slane %v16661_v46, 4  ;;  %v11647_v54 = vpop.f32.mrb[6].mxu1 }
 0x790   : > { %v11675_v32 = vadd.f32 %v11674_v44, %v16652_v59  ;;  %v11156_v55 = vpop.f32.mrb[7].mxu0  ;;  %v11687_v25 = vadd.f32 %v11686_v28, %v16655_v23  ;;  %v11648_v12 = vpop.f32.mrb[7].mxu1 }
 0x791   : > { %v11681_v50 = vadd.f32 %v11680_v30, %v16657_v27  ;;  %v11693_v20 = vadd.f32 %v11692_v33, %v16661_v46 }
 0x792   : > { %v11676_v35 = vrot.slane %v11675_v32, 2  ;;  %v11688_v37 = vrot.slane %v11687_v25, 2 }
 0x793   : > { %v11682_v0 = vrot.slane %v11681_v50, 2  ;;  %v11694_v38 = vrot.slane %v11693_v20, 2 }
 0x794   : > { %v11677_v19 = vadd.f32 %v11676_v35, %v11675_v32  ;;  %v11689_v39 = vadd.f32 %v11688_v37, %v11687_v25 }
 0x795   : > { %v11683_v3 = vadd.f32 %v11682_v0, %v11681_v50  ;;  %v11695_v41 = vadd.f32 %v11694_v38, %v11693_v20 }
 0x796   : > { %v11678_v57 = vrot.slane %v11677_v19, 1  ;;  %v11690_v15 = vrot.slane %v11689_v39, 1 }
 0x797   : > { %v11684_v42 = vrot.slane %v11683_v3, 1  ;;  %v11696_v24 = vrot.slane %v11695_v41, 1 }
 0x798   : > { %v11679_v49 = vadd.f32 %v11678_v57, %v11677_v19  ;;  %v11691_v43 = vadd.f32 %v11690_v15, %v11689_v39 }
 0x799   : > { %v11685_v53 = vadd.f32 %v11684_v42, %v11683_v3  ;;  %v11697_v47 = vadd.f32 %v11696_v24, %v11695_v41 }
 0x79a   : > { %v16668_v45 = vmul.f32 0.125, %v11679_v49  ;;  %v16670_v51 = vmul.f32 0.125, %v11691_v43 }
 0x79b   : > { %v16672_v56 = vmul.f32 0.125, %v11685_v53  ;;  %v16676_v62 = vmul.f32 0.125, %v11697_v47 }
 0x79c   : > { %v11711_v60 = vsub.f32 %v16652_v59, %v16668_v45  ;;  %v11713_v63 = vsub.f32 %v16655_v23, %v16670_v51 }
 0x79d   : > { %v11712_v1 = vsub.f32 %v16657_v27, %v16672_v56  ;;  %v11714_v16 = vsub.f32 %v16661_v46, %v16676_v62 }
 0x79e   : > { %v11719_v2 = vmul.f32 %v11711_v60, %v11711_v60  ;;  %v11721_v7 = vmul.f32 %v11713_v63, %v11713_v63 }
 0x79f   : > { %v11720_v48 = vmul.f32 %v11712_v1, %v11712_v1  ;;  %v11722_v21 = vmul.f32 %v11714_v16, %v11714_v16 }
 0x7a0   : > { %v11747_v58 = vrot.slane %v11719_v2, 4  ;;  %v11759_v44 = vrot.slane %v11721_v7, 4 }
 0x7a1   : > { %v11753_v28 = vrot.slane %v11720_v48, 4  ;;  %v11765_v31 = vrot.slane %v11722_v21, 4 }
 0x7a2   : > { %v11748_v30 = vadd.f32 %v11747_v58, %v11719_v2  ;;  %v11760_v32 = vadd.f32 %v11759_v44, %v11721_v7 }
 0x7a3   : > { %v11754_v33 = vadd.f32 %v11753_v28, %v11720_v48  ;;  %v11766_v55 = vadd.f32 %v11765_v31, %v11722_v21  ;;  %v11844_v31 = vrot.slane %v11836_v40, %v16092_v13 }
 0x7a4   : > { %v11749_v54 = vrot.slane %v11748_v30, 2  ;;  %v11761_v25 = vrot.slane %v11760_v32, 2 }
 0x7a5   : > { %v11755_v50 = vrot.slane %v11754_v33, 2  ;;  %v11767_v35 = vrot.slane %v11766_v55, 2 }
 0x7a6   : > { %v11750_v12 = vadd.f32 %v11749_v54, %v11748_v30  ;;  %v11762_v20 = vadd.f32 %v11761_v25, %v11760_v32  ;;  %v11875_v54 = vsub.s32 4, %v16084_v52  ;;  %v11879_v25 = vsub.s32 5, %v16084_v52 }
 0x7a7   : > { %v11756_v37 = vadd.f32 %v11755_v50, %v11754_v33  ;;  %v11768_v19 = vadd.f32 %v11767_v35, %v11766_v55  ;;  %v11779_v33 = vld [vmem:[%s306_s15] sm:$0xff]  ;;  %v11883_v50 = vsub.s32 6, %v16084_v52  ;;  %v11859_v35 = vsub.s32 0, %v16084_v52 }
 0x7a8   : > { %v11751_v0 = vrot.slane %v11750_v12, 1  ;;  %v11763_v38 = vrot.slane %v11762_v20, 1 }
 0x7a9   : > { %v11757_v39 = vrot.slane %v11756_v37, 1  ;;  %v11769_v57 = vrot.slane %v11768_v19, 1 }
 0x7aa   : > { %v11752_v3 = vadd.f32 %v11751_v0, %v11750_v12  ;;  %v11764_v41 = vadd.f32 %v11763_v38, %v11762_v20  ;;  %v11887_v12 = vsub.s32 7, %v16084_v52  ;;  %v11863_v20 = vsub.s32 1, %v16084_v52 }
 0x7ab   : > { %v11758_v15 = vadd.f32 %v11757_v39, %v11756_v37  ;;  %v11770_v49 = vadd.f32 %v11769_v57, %v11768_v19 }
 0x7ac   : > { %v11775_v42 = vmul.f32 0.125, %v11752_v3  ;;  %v11777_v24 = vmul.f32 0.125, %v11764_v41 }
 0x7ad   : > { %v11776_v43 = vmul.f32 0.125, %v11758_v15  ;;  %v11778_v47 = vmul.f32 0.125, %v11770_v49 }
 0x7ae   : > { %v11784_v53 = vadd.f32 1e-05, %v11775_v42  ;;  %v11786_v60 = vadd.f32 1e-05, %v11777_v24 }
 0x7af   : > { %v11785_v63 = vadd.f32 1e-05, %v11776_v43  ;;  %v11787_v1 = vadd.f32 1e-05, %v11778_v47 }
 0x7b0   : > { %14297 = vrsqrt.f32 %v11784_v53 }
 0x7b1   : > { %14299 = vrsqrt.f32 %v11786_v60 }
 0x7b2   : > { %14301 = vrsqrt.f32 %v11785_v63 }
 0x7b3   : > { %14303 = vrsqrt.f32 %v11787_v1 }
 0x7ba   : > { %v14298_v2 = vpop.eup %14297 }
 0x7bb   : > { %v14300_v16 = vpop.eup %14299 }
 0x7bc   : > { %v14302_v7 = vpop.eup %14301 }
 0x7bd   : > { %v14304_v48 = vpop.eup %14303  ;;  %v11806_v58 = vcombine.low %v14298_v2, %v14302_v7 }
 0x7be   : > { %v11807_v21 = vcombine.low %v14300_v16, %v14304_v48 }
 0x7bf   : > { %v11828_v44 = vrot.slane %v11806_v58, %v16092_v13  ;;  %v11855_v58 = vld [vmem:[%s315_s23] sm:$0xff] }
 0x7c0   : > { %v11835_v28 = vrot.slane %v11807_v21, %v16092_v13 }
 0x7c2   : > { %v11837_v30 = vcombine.low %v11828_v44, %v11835_v28 }
 0x7c4   : > { %v11851_v32 = vrot.slane %v11837_v30, %v16092_v13 }
 0x7c6   : > { %v11852_v55 = vcombine.low %v11844_v31, %v11851_v32 }
 0x7c8   : > { %v11854_v40 = vmul.f32 %v11852_v55, %v11779_v33 }
 0x7ca   : > { %v11876_v37 = vrot.slane %v11854_v40, %v11875_v54  ;;  %v11880_v0 = vrot.slane %v11854_v40, %v11879_v25  ;;  %v11884_v19 = vrot.slane %v11854_v40, %v11883_v50  ;;  %v11888_v38 = vrot.slane %v11854_v40, %v11887_v12 }
 0x7cb   : > { %v11860_v39 = vrot.slane %v11854_v40, %v11859_v35  ;;  %v11864_v3 = vrot.slane %v11854_v40, %v11863_v20  ;;  %v11868_v57 = vrot.slane %v11854_v40, %v11867_v22  ;;  %v11872_v41 = vrot.slane %v11854_v40, %v11871_v34 }
 0x7cc   : > { %v11901_v15 = vmul.f32 %v11876_v37, %v16668_v45  ;;  %v11902_v42 = vmul.f32 %v11880_v0, %v16672_v56  ;;  %v11903_v49 = vmul.f32 %v11884_v19, %v16670_v51  ;;  %v11904_v24 = vmul.f32 %v11888_v38, %v16676_v62 }
 0x7cd   : > { %v11971_v43 = vmul.f32 %v11888_v38, %v16661_v46  ;;  %v11897_v52 = vmul.f32 %v11860_v39, %v16038_v17  ;;  %v11898_v53 = vmul.f32 %v11864_v3, %v16044_v36  ;;  %v11899_v47 = vmul.f32 %v11868_v57, %v16042_v26 }
 0x7ce   : > { %v11915_v60 = vcombine.low %v11901_v15, %v11902_v42  ;;  %v11916_v63 = vcombine.low %v11903_v49, %v11904_v24  ;;  %v11900_v1 = vmul.f32 %v11872_v41, %v16048_v29  ;;  %v11965_v45 = vmul.f32 %v11864_v3, %v16015_v6 }
 0x7cf   : > { %v11913_v2 = vcombine.low %v11897_v52, %v11898_v53  ;;  %v11969_v51 = vmul.f32 %v11880_v0, %v16657_v27  ;;  %v11964_v56 = vmul.f32 %v11860_v39, %v16008_v61  ;;  %v11968_v46 = vmul.f32 %v11876_v37, %v16652_v59 }
 0x7d0   : > { %v11937_v17 = vrot.slane %v11915_v60, %v16092_v13  ;;  %v11944_v36 = vrot.slane %v11916_v63, %v16092_v13  ;;  %v11914_v62 = vcombine.low %v11899_v47, %v11900_v1  ;;  %v11967_v26 = vmul.f32 %v11872_v41, %v16021_v11 }
 0x7d1   : > { %v11923_v16 = vrot.slane %v11913_v2, %v16092_v13  ;;  %v11966_v29 = vmul.f32 %v11868_v57, %v16013_v5  ;;  %v11970_v6 = vmul.f32 %v11884_v19, %v16655_v23 }
 0x7d2   : > { %v11946_v7 = vcombine.low %v11937_v17, %v11944_v36  ;;  %v11930_v27 = vrot.slane %v11914_v62, %v16092_v13 }
 0x7d4   : > { %v11960_v61 = vrot.slane %v11946_v7, %v16092_v13  ;;  %v11945_v48 = vcombine.low %v11923_v16, %v11930_v27 }
 0x7d6   : > { %v11953_v59 = vrot.slane %v11945_v48, %v16092_v13 }
 0x7d8   : > { %v11961_v21 = vcombine.low %v11953_v59, %v11960_v61 }
 0x7da   : > { %v11963_v44 = vsub.f32 %v11855_v58, %v11961_v21 }
 0x7dc   : > { %v11980_v28 = vrot.slane %v11963_v44, %v11863_v20  ;;  %v11996_v11 = vrot.slane %v11963_v44, %v11879_v25  ;;  %v11976_v30 = vrot.slane %v11963_v44, %v11859_v35  ;;  %v11992_v31 = vrot.slane %v11963_v44, %v11875_v54 }
 0x7dd   : > { %v11988_v32 = vrot.slane %v11963_v44, %v11871_v34  ;;  %v12004_v5 = vrot.slane %v11963_v44, %v11887_v12  ;;  %v11984_v33 = vrot.slane %v11963_v44, %v11867_v22  ;;  %v12000_v23 = vrot.slane %v11963_v44, %v11883_v50 }
 0x7de   : > { %v12014_v55 = vadd.f32 %v11980_v28, %v11965_v45  ;;  %v12018_v40 = vadd.f32 %v11996_v11, %v11969_v51  ;;  %v12013_v37 = vadd.f32 %v11976_v30, %v11964_v56  ;;  %v12017_v0 = vadd.f32 %v11992_v31, %v11968_v46 }
 0x7df   : > { %v12016_v19 = vadd.f32 %v11988_v32, %v11967_v26  ;;  %v12020_v38 = vadd.f32 %v12004_v5, %v11971_v43  ;;  %v12015_v39 = vadd.f32 %v11984_v33, %v11966_v29  ;;  %v12019_v13 = vadd.f32 %v12000_v23, %v11970_v6 }
 0x7e0   : > { %v12022_v3 = vmax.f32 %v12014_v55, 0.0  ;;  %v12026_v57 = vmax.f32 %v12018_v40, 0.0  ;;  %v12021_v41 = vmax.f32 %v12013_v37, 0.0  ;;  %v12025_v15 = vmax.f32 %v12017_v0, 0.0 }
 0x7e1   : > { %v12024_v20 = vmax.f32 %v12016_v19, 0.0  ;;  %v12028_v25 = vmax.f32 %v12020_v38, 0.0  ;;  %v12023_v42 = vmax.f32 %v12015_v39, 0.0  ;;  %v12027_v49 = vmax.f32 %v12019_v13, 0.0 }
 0x7e2   : > { %v12030_v35 = vpack.c.bf16 %v12022_v3, %v12022_v3  ;;  %v12034_v54 = vpack.c.bf16 %v12026_v57, %v12026_v57  ;;  %v12029_v34 = vpack.c.bf16 %v12021_v41, %v12021_v41  ;;  %v12033_v12 = vpack.c.bf16 %v12025_v15, %v12025_v15 }
 0x7e3   : > { %v12032_v50 = vpack.c.bf16 %v12024_v20, %v12024_v20  ;;  %v12036_v22 = vpack.c.bf16 %v12028_v25, %v12028_v25  ;;  %v12031_v24 = vpack.c.bf16 %v12023_v42, %v12023_v42  ;;  %v12035_v43 = vpack.c.bf16 %v12027_v49, %v12027_v49 }
 0x7e4   : > { %12117 = vmatprep.mubr.bf16.mxu1 %v12030_v35  ;;  %12197 = vmatprep.mubr.bf16.mxu0 %v12034_v54 }
 0x7e5   : > { %12118 = vmatmul.mubr.bf16.vlgmr.msra.gmra.mrb[8].mxu1 %v12029_v34  ;;  %12198 = vmatmul.mubr.bf16.vlgmr.msra.gmra.mrb[8].mxu0 %v12033_v12 }
 0x7e6   : > { %12126 = vmatpush1.bf16.xpose.msra.mxu1 %v13988_v4  ;;  %12206 = vmatpush1.bf16.xpose.msra.mxu0 %v13992_v18 }
 0x7e7   : > { %12157 = vmatprep.mubr.bf16.mxu1 %v12032_v50  ;;  %12237 = vmatprep.mubr.bf16.mxu0 %v12036_v22 }
 0x7f1   : > { %12158 = vmatmul.mubr.bf16.vlgmr.msra.gmra.mrb[8].mxu1 %v12031_v24  ;;  %12238 = vmatmul.mubr.bf16.vlgmr.msra.gmra.mrb[8].mxu0 %v12035_v43 }
 0x8c4   : > { %v12159_v52 = vpop.f32.mrb[8].mxu1  ;;  %v12239_v8 = vpop.f32.mrb[8].mxu0 }
 0x8c5   : > { %v14001_v9 = vadd.f32 %v12239_v8, %v12159_v52  ;;  %v12161_v4 = vpop.f32.mrb[9].mxu1  ;;  %v12241_v10 = vpop.f32.mrb[9].mxu0 }
 0x8c6   : > { %v12162_v14 = vpop.f32.mrb[10].mxu1  ;;  %v12242_v18 = vpop.f32.mrb[10].mxu0 }
 0x8c7   : > { %v12163_v53 = vpop.f32.mrb[11].mxu1  ;;  %v12243_v47 = vpop.f32.mrb[11].mxu0  ;;  %12246 = vst.msk [vmem:[%s365_s30] sm:$0xff] %vm12245_vm0, %v14001_v9 }
 0x8c8   : > { %14466 = shalt.err (!%p14463_p3)
}
 0x8c9   : > { %s14467_s29 = scalar_lea.hbm %s16736_s12, 128  ;;  %s14471_s27 = scalar_lea.hbm %s16785_s5, 256 }
 0x8ca   : > { %p14468_p8 = scmp.ne.s32.totalorder %s16736_s12, %s14467_s29  ;;  %p14472_p9 = scmp.lt.u32.totalorder %s16736_s12, %s16785_s5 }
 0x8cb   : > { %p14473_p11 = scmp.lt.u32.totalorder %s14471_s27, %s14467_s29  ;;  %p14475_p6 = scmp.lt.u32.totalorder %s14467_s29, %s16736_s12 }
 0x8cc   : > { %p14469_p4 = pnand %p14468_p8, %p16828_p2 }
 0x8cd   : > { %p14474_p0 = por %p14473_p11, %p14472_p9 }
 0x8ce   : > { %p14470_p7 = pneg %p14469_p4 }
 0x8cf   : > { %p14476_p1 = por %p14475_p6, %p14474_p0 }
 0x8d1   : > { %p14477_p5 = pnand %p14476_p1, %p14470_p7 }
 0x8d3   : > { %14480 = shalt.err (!%p14477_p5)
}
 0x8d4   : > { %14201 = dma.vmem_to_hbm [thread:$0]  (%p16828_p2), %s16738_s6, 128, %s16736_s12, %s12248_s7  }
 0x8d5 PF: > { %s12273_s17 = sand.u32 1, %s14515_s18   ;;  %p16829_p10 = scmp.ne.s32.totalorder %s16813_s10, 0 }
 0x8d6   : > { %p16830_p12 = scmp.ge.s32.totalorder %s14527_s21, 2  ;;  %s12274_s23 = scalar_lea.sflag [#allocation4], %s12273_s17 }
 0x8d8   : > { %p14221_p13 = pnand %p16830_p12, %p16829_p10 }
 0x8da   : > { %14510 = dma.done.wait (!%p14221_p13), %s12274_s23, 128  }
 0x8db   : > { %14512 = vsyncadd (!%p14221_p13), %s12274_s23, 4294967168  ;;  %s16831_s24 = sld [smem:[#allocation16_spill]]  ;;  %s16832_s20 = sld [smem:[#allocation17_spill]] }
 0x8dc   : > { %p22_p3 = scmp.ge.s32.totalorder %s14590_s22, 4   ;;  %s16833_s18 = smov %s14519_s19 }
 0x8dd   : > { %s16835_s21 = smov %s14590_s22 }
 0x8de   :  { %24 = sbr.rel (!%p22_p3) target bundleno = 11 (0xb), region = 125 }
 0x8e1   : > { %s16834_s19 = smov %s16831_s24 }
 0x8e5   :  { %12279 = vsyncpa [#allocation3], 1 }
 0x8e6   :  { %12281 = vsyncpa [#allocation3 + $0x1], 1 }
 0x8e7   :  { %12282 = vsyncpa [#allocation6], 1 }
 0x8e8   :  { %12284 = vsyncpa [#allocation6 + $0x1], 1 }
 0x8e9   :  { %12285 = vsyncpa [#allocation9], 1 }
 0x8ea   :  { %12287 = vsyncpa [#allocation9 + $0x1], 1 }
 0x8eb   :  { %12288 = vsyncpa [#allocation4], 1 }
 0x8ec   :  { %12290 = vsyncpa [#allocation4 + $0x1], 1 }

</bundles_post_ra>
